<compile_context>
chip_gen: v6e
topology: v6e:2x2x1
jax: 0.10.0
libtpu: 0.0.40
codegen_flags: <defaults>
</compile_context>

<pallas_src>
import jax
import jax.numpy as jnp
from jax.experimental import pallas as pl
from jax.experimental.pallas import tpu as pltpu


# ----------------------------------------------------------------------------
# Kernel A: 5-layer LSTM (PyTorch gate order i, f, g, o), batch-major
# ----------------------------------------------------------------------------
def lstm_kernel(x_ref, wih_ref, whh_ref, b_ref, h0_ref, c0_ref,
                out_ref, hn_ref, cn_ref):
    # x_ref  : (B, T, H)   features zero-padded to H
    # wih_ref, whh_ref : (L, H, 4H) bf16 (pre-transposed: x @ W)
    # b_ref  : (L, 1, 4H) f32 (b_ih + b_hh)
    # h0/c0  : (L, B, H)  f32
    L = wih_ref.shape[0]
    B, T, H = out_ref.shape

    # out_ref is the working sequence buffer (layer l reads layer l-1's output
    # from it and overwrites it in place).
    out_ref[...] = x_ref[...]

    for l in range(L):                      # static unroll (L = 5)
        wih = wih_ref[l]                    # (H, 4H) bf16
        whh = whh_ref[l]                    # (H, 4H) bf16
        b = b_ref[l]                        # (1, 4H) f32

        # Hoisted input projection for the whole sequence of this layer:
        # one (B*T, H) @ (H, 4H) matmul instead of T tiny ones on the
        # serial critical path.
        seq2d = out_ref[...].reshape(B * T, H).astype(jnp.bfloat16)
        gx = (jnp.dot(seq2d, wih, preferred_element_type=jnp.float32)
              + b).reshape(B, T, 4 * H)     # (B, T, 4H) f32

        h = h0_ref[l]                       # (B, H) f32
        c = c0_ref[l]                       # (B, H) f32

        for t in range(T):                  # static unroll (T = 8)
            gates = gx[:, t, :] + jnp.dot(h.astype(jnp.bfloat16), whh,
                                          preferred_element_type=jnp.float32)
            i = jax.nn.sigmoid(gates[:, 0 * H:1 * H])
            f = jax.nn.sigmoid(gates[:, 1 * H:2 * H])
            g = jnp.tanh(gates[:, 2 * H:3 * H])
            o = jax.nn.sigmoid(gates[:, 3 * H:4 * H])
            c = f * c + i * g
            h = o * jnp.tanh(c)
            out_ref[:, t, :] = h            # becomes this layer's output seq

        hn_ref[l] = h
        cn_ref[l] = c


# ----------------------------------------------------------------------------
# Kernel B: per-batch self-attention + residual LeakyReLU + fused MLP heads
# ----------------------------------------------------------------------------
def attn_heads_kernel(x_ref, wqkv_ref, bqkv_ref, wo_ref, bo_ref,
                      w1_ref, b1_ref, w2_ref, b2_ref,
                      w3_ref, b3_ref, w4_ref, b4_ref,
                      out_ref):
    B, T, H = x_ref.shape

    x2 = x_ref[...].reshape(B * T, H)                      # (N, H) f32
    xb = x2.astype(jnp.bfloat16)

    # QKV projection (single matmul, bf16 operands, f32 accumulate)
    qkv = (jnp.dot(xb, wqkv_ref[...], preferred_element_type=jnp.float32)
           + bqkv_ref[...])                                # (N, 3H) f32
    q = qkv[:, 0 * H:1 * H].reshape(B, T, H).astype(jnp.bfloat16)
    k = qkv[:, 1 * H:2 * H].reshape(B, T, H).astype(jnp.bfloat16)
    v = qkv[:, 2 * H:3 * H].reshape(B, T, H).astype(jnp.bfloat16)

    # Per-batch (T x T) attention: no block-diagonal mask, no (N, N) scores.
    scale = jnp.float32(1.0 / (H ** 0.5))
    scores = jnp.einsum('btd,bsd->bts', q, k,
                        preferred_element_type=jnp.float32) * scale
    attn = jax.nn.softmax(scores, axis=-1)                 # f32
    ctx = jnp.einsum('bts,bsd->btd', attn.astype(jnp.bfloat16), v,
                     preferred_element_type=jnp.float32)   # (B, T, H) f32

    ctx2 = ctx.reshape(B * T, H).astype(jnp.bfloat16)
    attn_out = (jnp.dot(ctx2, wo_ref[...], preferred_element_type=jnp.float32)
                + bo_ref[...])                             # (N, H) f32

    combined = jax.nn.leaky_relu(x2 + attn_out, negative_slope=0.01)

    # Fused heads: one block-diagonal chain H -> 9H -> 6H -> 3H -> 128.
    h = combined
    for w_ref, bb_ref in ((w1_ref, b1_ref), (w2_ref, b2_ref), (w3_ref, b3_ref)):
        h = jax.nn.leaky_relu(
            jnp.dot(h.astype(jnp.bfloat16), w_ref[...],
                    preferred_element_type=jnp.float32) + bb_ref[...],
            negative_slope=0.01)
    out2 = (jnp.dot(h.astype(jnp.bfloat16), w4_ref[...],
                    preferred_element_type=jnp.float32) + b4_ref[...])

    # Lane-dense output slab (B, T, 128); wrapper slices pos / jpos / vel.
    out_ref[...] = out2.reshape(B, T, out_ref.shape[2])


# ----------------------------------------------------------------------------
# Parameter init (deterministic, synthetic)
# ----------------------------------------------------------------------------
def init_params(key, input_size, hidden_size, output_size, num_layers=5):
    H = hidden_size
    keys = iter(jax.random.split(key, 64))

    def unif(shape, fan_in):
        bound = 1.0 / (fan_in ** 0.5)
        return jax.random.uniform(next(keys), shape, jnp.float32, -bound, bound)

    # --- LSTM (pad layer-0 input weights to H columns, pre-transpose) ---
    wih, whh, bias = [], [], []
    for l in range(num_layers):
        in_l = input_size if l == 0 else H
        w_ih = unif((4 * H, in_l), H)
        w_hh = unif((4 * H, H), H)
        b_ih = unif((4 * H,), H)
        b_hh = unif((4 * H,), H)
        w_ih_pad = jnp.zeros((4 * H, H), jnp.float32).at[:, :in_l].set(w_ih)
        wih.append(w_ih_pad.T)
        whh.append(w_hh.T)
        bias.append((b_ih + b_hh)[None, :])

    params = {
        'wih': jnp.stack(wih).astype(jnp.bfloat16),   # (L, H, 4H)
        'whh': jnp.stack(whh).astype(jnp.bfloat16),   # (L, H, 4H)
        'b': jnp.stack(bias),                         # (L, 1, 4H) f32
    }

    # --- MultiheadAttention (num_heads=1) ---
    in_proj_w = unif((3 * H, H), H)
    in_proj_b = unif((3 * H,), H)
    out_proj_w = unif((H, H), H)
    out_proj_b = unif((H,), H)
    params['wqkv'] = in_proj_w.T.astype(jnp.bfloat16)   # (H, 3H)
    params['bqkv'] = in_proj_b[None, :]                 # (1, 3H) f32
    params['wo'] = out_proj_w.T.astype(jnp.bfloat16)    # (H, H)
    params['bo'] = out_proj_b[None, :]                  # (1, H) f32

    # --- heads: Linear chains H -> 3H -> 2H -> H -> out, fused block-diag ---
    def linear(din, dout):
        w = unif((dout, din), din)
        b = unif((dout,), din)
        return w.T, b                                   # (din, dout), (dout,)

    hidden_dims = [H, 3 * H, 2 * H, H]
    out_dims = [output_size, 7, 7]                      # pos, joint_pos, vel
    head_ws, head_bs = [], []
    for od in out_dims:
        dims = hidden_dims + [od]
        ws, bs = [], []
        for din, dout in zip(dims[:-1], dims[1:]):
            w, b = linear(din, dout)
            ws.append(w)
            bs.append(b)
        head_ws.append(ws)
        head_bs.append(bs)

    def block_diag(mats):
        rows = sum(m.shape[0] for m in mats)
        cols = sum(m.shape[1] for m in mats)
        out = jnp.zeros((rows, cols), jnp.float32)
        r = c = 0
        for m in mats:
            out = out.at[r:r + m.shape[0], c:c + m.shape[1]].set(m)
            r += m.shape[0]
            c += m.shape[1]
        return out

    # layer 1: shared input -> concat along output columns
    w1 = jnp.concatenate([head_ws[h][0] for h in range(3)], axis=1)   # (H, 9H)
    b1 = jnp.concatenate([head_bs[h][0] for h in range(3)], axis=0)
    # layers 2-4: block-diagonal so each head keeps its own channel slab
    w2 = block_diag([head_ws[h][1] for h in range(3)])                # (9H, 6H)
    b2 = jnp.concatenate([head_bs[h][1] for h in range(3)], axis=0)
    w3 = block_diag([head_ws[h][2] for h in range(3)])                # (6H, 3H)
    b3 = jnp.concatenate([head_bs[h][2] for h in range(3)], axis=0)
    w4 = block_diag([head_ws[h][3] for h in range(3)])                # (3H, 17)
    b4 = jnp.concatenate([head_bs[h][3] for h in range(3)], axis=0)

    out_total = sum(out_dims)
    out_pad = max(128, ((out_total + 127) // 128) * 128)              # lane-dense
    w4p = jnp.zeros((w4.shape[0], out_pad), jnp.float32).at[:, :out_total].set(w4)
    b4p = jnp.zeros((out_pad,), jnp.float32).at[:out_total].set(b4)

    params['w1'] = w1.astype(jnp.bfloat16)
    params['b1'] = b1[None, :]
    params['w2'] = w2.astype(jnp.bfloat16)
    params['b2'] = b2[None, :]
    params['w3'] = w3.astype(jnp.bfloat16)
    params['b3'] = b3[None, :]
    params['w4'] = w4p.astype(jnp.bfloat16)
    params['b4'] = b4p[None, :]
    params['head_splits'] = tuple(out_dims)
    return params


# ----------------------------------------------------------------------------
# Wrapper (= LSTMModel.forward with calc_all=True)
# ----------------------------------------------------------------------------
def lstm_model_forward(x, params, hidden=None):
    # x: (B, T, input_size) float32 (batch_first, like PyTorch)
    B, T, I = x.shape
    L, H, _ = params['wih'].shape
    out_pad = params['w4'].shape[1]
    o_sz, j_sz, v_sz = params['head_splits']

    if hidden is None:
        h0 = jnp.zeros((L, B, H), jnp.float32)
        c0 = jnp.zeros((L, B, H), jnp.float32)
    else:
        h0, c0 = hidden

    # Only glue: zero-pad features to H (no transposes anywhere).
    x_pad = jnp.zeros((B, T, H), jnp.float32).at[:, :, :I].set(x.astype(jnp.float32))

    vmem = lambda n: [pl.BlockSpec(memory_space=pltpu.MemorySpace.VMEM)
                      for _ in range(n)]

    lstm_out, hn, cn = pl.pallas_call(
        lstm_kernel,
        out_shape=(jax.ShapeDtypeStruct((B, T, H), jnp.float32),
                   jax.ShapeDtypeStruct((L, B, H), jnp.float32),
                   jax.ShapeDtypeStruct((L, B, H), jnp.float32)),
        in_specs=vmem(6),
        out_specs=tuple(vmem(3)),
    )(x_pad, params['wih'], params['whh'], params['b'], h0, c0)

    out_slab = pl.pallas_call(
        attn_heads_kernel,
        out_shape=jax.ShapeDtypeStruct((B, T, out_pad), jnp.float32),
        in_specs=vmem(13),
        out_specs=pl.BlockSpec(memory_space=pltpu.MemorySpace.VMEM),
    )(lstm_out, params['wqkv'], params['bqkv'], params['wo'], params['bo'],
      params['w1'], params['b1'], params['w2'], params['b2'],
      params['w3'], params['b3'], params['w4'], params['b4'])

    position_output = out_slab[:, :, 0:o_sz]
    joint_pos_output = out_slab[:, :, o_sz:o_sz + j_sz]
    velocity_output = out_slab[:, :, o_sz + j_sz:o_sz + j_sz + v_sz]
    return (position_output, joint_pos_output, velocity_output), (hn, cn)


if __name__ == "__main__":
    key = jax.random.PRNGKey(0)
    B, T = 2, 8
    INPUT_SIZE, HIDDEN, OUT = 17, 32, 3   # 7 joint pos + 7 joint vel + 3 pos

    pkey, xkey = jax.random.split(key)
    params = init_params(pkey, INPUT_SIZE, HIDDEN, OUT)
    x = jax.random.normal(xkey, (B, T, INPUT_SIZE), jnp.float32)

    (pos, jpos, vel), (hn, cn) = lstm_model_forward(x, params)
    jax.block_until_ready((pos, jpos, vel, hn, cn))

    assert pos.shape == (B, T, OUT)
    assert jpos.shape == (B, T, 7)
    assert vel.shape == (B, T, 7)
    assert hn.shape == (5, B, HIDDEN) and cn.shape == (5, B, HIDDEN)
    assert bool(jnp.all(jnp.isfinite(pos)))
    assert bool(jnp.all(jnp.isfinite(jpos)))
    assert bool(jnp.all(jnp.isfinite(vel)))
    print("KERNEL_OK")
</pallas_src>

<mosaic_0001>
module attributes {stable_mosaic.version = 11 : i64} {
  func.func @lstm_kernel(%arg0: memref<2x8x32xf32, #tpu.memory_space<vmem>>, %arg1: memref<5x32x128xbf16, #tpu.memory_space<vmem>>, %arg2: memref<5x32x128xbf16, #tpu.memory_space<vmem>>, %arg3: memref<5x1x128xf32, #tpu.memory_space<vmem>>, %arg4: memref<5x2x32xf32, #tpu.memory_space<vmem>>, %arg5: memref<5x2x32xf32, #tpu.memory_space<vmem>>, %arg6: memref<2x8x32xf32, #tpu.memory_space<vmem>>, %arg7: memref<5x2x32xf32, #tpu.memory_space<vmem>>, %arg8: memref<5x2x32xf32, #tpu.memory_space<vmem>>) attributes {dimension_semantics = [], scalar_prefetch = 0 : i64, scratch_operands = 0 : i64, tpu.core_type = #tpu.core_type<tc>} {
    %c0 = arith.constant 0 : index
    %c0_0 = arith.constant 0 : index
    %c0_1 = arith.constant 0 : index
    %0 = vector.load %arg0[%c0, %c0_0, %c0_1] : memref<2x8x32xf32, #tpu.memory_space<vmem>>, vector<2x8x32xf32>
    %c0_2 = arith.constant 0 : index
    %c0_3 = arith.constant 0 : index
    %c0_4 = arith.constant 0 : index
    %1 = vector.load %arg6[%c0_2, %c0_3, %c0_4] : memref<2x8x32xf32, #tpu.memory_space<vmem>>, vector<2x8x32xf32>
    tpu.vector_store %arg6[%c0_2, %c0_3, %c0_4], %0 {strides = array<i32>} : memref<2x8x32xf32, #tpu.memory_space<vmem>>, vector<2x8x32xf32>,
    %c0_5 = arith.constant 0 : index
    %c0_6 = arith.constant 0 : index
    %c0_7 = arith.constant 0 : index
    %2 = vector.load %arg1[%c0_5, %c0_6, %c0_7] : memref<5x32x128xbf16, #tpu.memory_space<vmem>>, vector<1x32x128xbf16>
    %3 = vector.shape_cast %2 : vector<1x32x128xbf16> to vector<32x128xbf16>
    %c0_8 = arith.constant 0 : index
    %c0_9 = arith.constant 0 : index
    %c0_10 = arith.constant 0 : index
    %4 = vector.load %arg2[%c0_8, %c0_9, %c0_10] : memref<5x32x128xbf16, #tpu.memory_space<vmem>>, vector<1x32x128xbf16>
    %5 = vector.shape_cast %4 : vector<1x32x128xbf16> to vector<32x128xbf16>
    %c0_11 = arith.constant 0 : index
    %c0_12 = arith.constant 0 : index
    %c0_13 = arith.constant 0 : index
    %6 = vector.load %arg3[%c0_11, %c0_12, %c0_13] : memref<5x1x128xf32, #tpu.memory_space<vmem>>, vector<1x1x128xf32>
    %7 = vector.shape_cast %6 : vector<1x1x128xf32> to vector<1x128xf32>
    %c0_14 = arith.constant 0 : index
    %c0_15 = arith.constant 0 : index
    %c0_16 = arith.constant 0 : index
    %8 = vector.load %arg6[%c0_14, %c0_15, %c0_16] : memref<2x8x32xf32, #tpu.memory_space<vmem>>, vector<2x8x32xf32>
    %9 = vector.shape_cast %8 : vector<2x8x32xf32> to vector<16x32xf32>
    %10 = arith.truncf %9 : vector<16x32xf32> to vector<16x32xbf16>
    %cst = arith.constant dense<0.000000e+00> : vector<16x128xf32>
    %11 = tpu.matmul %10, %3, %cst {dimension_numbers = #tpu.dot_dimension_numbers<[1], [0], [0], [1], [0, 0, 1, 1], [], []>} : vector<16x32xbf16>, vector<32x128xbf16>, vector<16x128xf32> -> vector<16x128xf32>
    %12 = vector.broadcast %7 : vector<1x128xf32> to vector<16x128xf32>
    %13 = arith.addf %11, %12 : vector<16x128xf32>
    %14 = vector.shape_cast %13 : vector<16x128xf32> to vector<2x8x128xf32>
    %c0_17 = arith.constant 0 : index
    %c0_18 = arith.constant 0 : index
    %c0_19 = arith.constant 0 : index
    %15 = vector.load %arg4[%c0_17, %c0_18, %c0_19] : memref<5x2x32xf32, #tpu.memory_space<vmem>>, vector<1x2x32xf32>
    %16 = vector.shape_cast %15 : vector<1x2x32xf32> to vector<2x32xf32>
    %c0_20 = arith.constant 0 : index
    %c0_21 = arith.constant 0 : index
    %c0_22 = arith.constant 0 : index
    %17 = vector.load %arg5[%c0_20, %c0_21, %c0_22] : memref<5x2x32xf32, #tpu.memory_space<vmem>>, vector<1x2x32xf32>
    %18 = vector.shape_cast %17 : vector<1x2x32xf32> to vector<2x32xf32>
    %19 = vector.extract_strided_slice %14 {offsets = [0, 0, 0], sizes = [2, 1, 128], strides = [1, 1, 1]} : vector<2x8x128xf32> to vector<2x1x128xf32>
    %20 = vector.shape_cast %19 : vector<2x1x128xf32> to vector<2x128xf32>
    %21 = arith.truncf %16 : vector<2x32xf32> to vector<2x32xbf16>
    %cst_23 = arith.constant dense<0.000000e+00> : vector<2x128xf32>
    %22 = tpu.matmul %21, %5, %cst_23 {dimension_numbers = #tpu.dot_dimension_numbers<[1], [0], [0], [1], [0, 0, 1, 1], [], []>} : vector<2x32xbf16>, vector<32x128xbf16>, vector<2x128xf32> -> vector<2x128xf32>
    %23 = arith.addf %20, %22 : vector<2x128xf32>
    %24 = vector.extract_strided_slice %23 {offsets = [0, 0], sizes = [2, 32], strides = [1, 1]} : vector<2x128xf32> to vector<2x32xf32>
    %25 = arith.negf %24 : vector<2x32xf32>
    %26 = math.exp %25 : vector<2x32xf32>
    %cst_24 = arith.constant 1.000000e+00 : f32
    %27 = vector.broadcast %cst_24 : f32 to vector<2x32xf32>
    %28 = arith.addf %27, %26 : vector<2x32xf32>
    %29 = arith.divf %27, %28 : vector<2x32xf32>
    %30 = vector.extract_strided_slice %23 {offsets = [0, 32], sizes = [2, 32], strides = [1, 1]} : vector<2x128xf32> to vector<2x32xf32>
    %31 = arith.negf %30 : vector<2x32xf32>
    %32 = math.exp %31 : vector<2x32xf32>
    %cst_25 = arith.constant 1.000000e+00 : f32
    %33 = vector.broadcast %cst_25 : f32 to vector<2x32xf32>
    %34 = arith.addf %33, %32 : vector<2x32xf32>
    %35 = arith.divf %33, %34 : vector<2x32xf32>
    %36 = vector.extract_strided_slice %23 {offsets = [0, 64], sizes = [2, 32], strides = [1, 1]} : vector<2x128xf32> to vector<2x32xf32>
    %37 = math.tanh %36 : vector<2x32xf32>
    %38 = vector.extract_strided_slice %23 {offsets = [0, 96], sizes = [2, 32], strides = [1, 1]} : vector<2x128xf32> to vector<2x32xf32>
    %39 = arith.negf %38 : vector<2x32xf32>
    %40 = math.exp %39 : vector<2x32xf32>
    %cst_26 = arith.constant 1.000000e+00 : f32
    %41 = vector.broadcast %cst_26 : f32 to vector<2x32xf32>
    %42 = arith.addf %41, %40 : vector<2x32xf32>
    %43 = arith.divf %41, %42 : vector<2x32xf32>
    %44 = arith.mulf %35, %18 : vector<2x32xf32>
    %45 = arith.mulf %29, %37 : vector<2x32xf32>
    %46 = arith.addf %44, %45 : vector<2x32xf32>
    %47 = math.tanh %46 : vector<2x32xf32>
    %48 = arith.mulf %43, %47 : vector<2x32xf32>
    %c0_27 = arith.constant 0 : index
    %c0_28 = arith.constant 0 : index
    %c0_29 = arith.constant 0 : index
    %49 = vector.load %arg6[%c0_27, %c0_28, %c0_29] : memref<2x8x32xf32, #tpu.memory_space<vmem>>, vector<2x1x32xf32>
    %50 = vector.shape_cast %49 : vector<2x1x32xf32> to vector<2x32xf32>
    %51 = vector.shape_cast %48 : vector<2x32xf32> to vector<2x1x32xf32>
    tpu.vector_store %arg6[%c0_27, %c0_28, %c0_29], %51 {strides = array<i32>} : memref<2x8x32xf32, #tpu.memory_space<vmem>>, vector<2x1x32xf32>,
    %52 = vector.extract_strided_slice %14 {offsets = [0, 1, 0], sizes = [2, 1, 128], strides = [1, 1, 1]} : vector<2x8x128xf32> to vector<2x1x128xf32>
    %53 = vector.shape_cast %52 : vector<2x1x128xf32> to vector<2x128xf32>
    %54 = arith.truncf %48 : vector<2x32xf32> to vector<2x32xbf16>
    %cst_30 = arith.constant dense<0.000000e+00> : vector<2x128xf32>
    %55 = tpu.matmul %54, %5, %cst_30 {dimension_numbers = #tpu.dot_dimension_numbers<[1], [0], [0], [1], [0, 0, 1, 1], [], []>} : vector<2x32xbf16>, vector<32x128xbf16>, vector<2x128xf32> -> vector<2x128xf32>
    %56 = arith.addf %53, %55 : vector<2x128xf32>
    %57 = vector.extract_strided_slice %56 {offsets = [0, 0], sizes = [2, 32], strides = [1, 1]} : vector<2x128xf32> to vector<2x32xf32>
    %58 = arith.negf %57 : vector<2x32xf32>
    %59 = math.exp %58 : vector<2x32xf32>
    %cst_31 = arith.constant 1.000000e+00 : f32
    %60 = vector.broadcast %cst_31 : f32 to vector<2x32xf32>
    %61 = arith.addf %60, %59 : vector<2x32xf32>
    %62 = arith.divf %60, %61 : vector<2x32xf32>
    %63 = vector.extract_strided_slice %56 {offsets = [0, 32], sizes = [2, 32], strides = [1, 1]} : vector<2x128xf32> to vector<2x32xf32>
    %64 = arith.negf %63 : vector<2x32xf32>
    %65 = math.exp %64 : vector<2x32xf32>
    %cst_32 = arith.constant 1.000000e+00 : f32
    %66 = vector.broadcast %cst_32 : f32 to vector<2x32xf32>
    %67 = arith.addf %66, %65 : vector<2x32xf32>
    %68 = arith.divf %66, %67 : vector<2x32xf32>
    %69 = vector.extract_strided_slice %56 {offsets = [0, 64], sizes = [2, 32], strides = [1, 1]} : vector<2x128xf32> to vector<2x32xf32>
    %70 = math.tanh %69 : vector<2x32xf32>
    %71 = vector.extract_strided_slice %56 {offsets = [0, 96], sizes = [2, 32], strides = [1, 1]} : vector<2x128xf32> to vector<2x32xf32>
    %72 = arith.negf %71 : vector<2x32xf32>
    %73 = math.exp %72 : vector<2x32xf32>
    %cst_33 = arith.constant 1.000000e+00 : f32
    %74 = vector.broadcast %cst_33 : f32 to vector<2x32xf32>
    %75 = arith.addf %74, %73 : vector<2x32xf32>
    %76 = arith.divf %74, %75 : vector<2x32xf32>
    %77 = arith.mulf %68, %46 : vector<2x32xf32>
    %78 = arith.mulf %62, %70 : vector<2x32xf32>
    %79 = arith.addf %77, %78 : vector<2x32xf32>
    %80 = math.tanh %79 : vector<2x32xf32>
    %81 = arith.mulf %76, %80 : vector<2x32xf32>
    %c0_34 = arith.constant 0 : index
    %c1 = arith.constant 1 : index
    %c0_35 = arith.constant 0 : index
    %82 = vector.load %arg6[%c0_34, %c1, %c0_35] : memref<2x8x32xf32, #tpu.memory_space<vmem>>, vector<2x1x32xf32>
    %83 = vector.shape_cast %82 : vector<2x1x32xf32> to vector<2x32xf32>
    %84 = vector.shape_cast %81 : vector<2x32xf32> to vector<2x1x32xf32>
    tpu.vector_store %arg6[%c0_34, %c1, %c0_35], %84 {strides = array<i32>} : memref<2x8x32xf32, #tpu.memory_space<vmem>>, vector<2x1x32xf32>,
    %85 = vector.extract_strided_slice %14 {offsets = [0, 2, 0], sizes = [2, 1, 128], strides = [1, 1, 1]} : vector<2x8x128xf32> to vector<2x1x128xf32>
    %86 = vector.shape_cast %85 : vector<2x1x128xf32> to vector<2x128xf32>
    %87 = arith.truncf %81 : vector<2x32xf32> to vector<2x32xbf16>
    %cst_36 = arith.constant dense<0.000000e+00> : vector<2x128xf32>
    %88 = tpu.matmul %87, %5, %cst_36 {dimension_numbers = #tpu.dot_dimension_numbers<[1], [0], [0], [1], [0, 0, 1, 1], [], []>} : vector<2x32xbf16>, vector<32x128xbf16>, vector<2x128xf32> -> vector<2x128xf32>
    %89 = arith.addf %86, %88 : vector<2x128xf32>
    %90 = vector.extract_strided_slice %89 {offsets = [0, 0], sizes = [2, 32], strides = [1, 1]} : vector<2x128xf32> to vector<2x32xf32>
    %91 = arith.negf %90 : vector<2x32xf32>
    %92 = math.exp %91 : vector<2x32xf32>
    %cst_37 = arith.constant 1.000000e+00 : f32
    %93 = vector.broadcast %cst_37 : f32 to vector<2x32xf32>
    %94 = arith.addf %93, %92 : vector<2x32xf32>
    %95 = arith.divf %93, %94 : vector<2x32xf32>
    %96 = vector.extract_strided_slice %89 {offsets = [0, 32], sizes = [2, 32], strides = [1, 1]} : vector<2x128xf32> to vector<2x32xf32>
    %97 = arith.negf %96 : vector<2x32xf32>
    %98 = math.exp %97 : vector<2x32xf32>
    %cst_38 = arith.constant 1.000000e+00 : f32
    %99 = vector.broadcast %cst_38 : f32 to vector<2x32xf32>
    %100 = arith.addf %99, %98 : vector<2x32xf32>
    %101 = arith.divf %99, %100 : vector<2x32xf32>
    %102 = vector.extract_strided_slice %89 {offsets = [0, 64], sizes = [2, 32], strides = [1, 1]} : vector<2x128xf32> to vector<2x32xf32>
    %103 = math.tanh %102 : vector<2x32xf32>
    %104 = vector.extract_strided_slice %89 {offsets = [0, 96], sizes = [2, 32], strides = [1, 1]} : vector<2x128xf32> to vector<2x32xf32>
    %105 = arith.negf %104 : vector<2x32xf32>
    %106 = math.exp %105 : vector<2x32xf32>
    %cst_39 = arith.constant 1.000000e+00 : f32
    %107 = vector.broadcast %cst_39 : f32 to vector<2x32xf32>
    %108 = arith.addf %107, %106 : vector<2x32xf32>
    %109 = arith.divf %107, %108 : vector<2x32xf32>
    %110 = arith.mulf %101, %79 : vector<2x32xf32>
    %111 = arith.mulf %95, %103 : vector<2x32xf32>
    %112 = arith.addf %110, %111 : vector<2x32xf32>
    %113 = math.tanh %112 : vector<2x32xf32>
    %114 = arith.mulf %109, %113 : vector<2x32xf32>
    %c0_40 = arith.constant 0 : index
    %c2 = arith.constant 2 : index
    %c0_41 = arith.constant 0 : index
    %115 = vector.load %arg6[%c0_40, %c2, %c0_41] : memref<2x8x32xf32, #tpu.memory_space<vmem>>, vector<2x1x32xf32>
    %116 = vector.shape_cast %115 : vector<2x1x32xf32> to vector<2x32xf32>
    %117 = vector.shape_cast %114 : vector<2x32xf32> to vector<2x1x32xf32>
    tpu.vector_store %arg6[%c0_40, %c2, %c0_41], %117 {strides = array<i32>} : memref<2x8x32xf32, #tpu.memory_space<vmem>>, vector<2x1x32xf32>,
    %118 = vector.extract_strided_slice %14 {offsets = [0, 3, 0], sizes = [2, 1, 128], strides = [1, 1, 1]} : vector<2x8x128xf32> to vector<2x1x128xf32>
    %119 = vector.shape_cast %118 : vector<2x1x128xf32> to vector<2x128xf32>
    %120 = arith.truncf %114 : vector<2x32xf32> to vector<2x32xbf16>
    %cst_42 = arith.constant dense<0.000000e+00> : vector<2x128xf32>
    %121 = tpu.matmul %120, %5, %cst_42 {dimension_numbers = #tpu.dot_dimension_numbers<[1], [0], [0], [1], [0, 0, 1, 1], [], []>} : vector<2x32xbf16>, vector<32x128xbf16>, vector<2x128xf32> -> vector<2x128xf32>
    %122 = arith.addf %119, %121 : vector<2x128xf32>
    %123 = vector.extract_strided_slice %122 {offsets = [0, 0], sizes = [2, 32], strides = [1, 1]} : vector<2x128xf32> to vector<2x32xf32>
    %124 = arith.negf %123 : vector<2x32xf32>
    %125 = math.exp %124 : vector<2x32xf32>
    %cst_43 = arith.constant 1.000000e+00 : f32
    %126 = vector.broadcast %cst_43 : f32 to vector<2x32xf32>
    %127 = arith.addf %126, %125 : vector<2x32xf32>
    %128 = arith.divf %126, %127 : vector<2x32xf32>
    %129 = vector.extract_strided_slice %122 {offsets = [0, 32], sizes = [2, 32], strides = [1, 1]} : vector<2x128xf32> to vector<2x32xf32>
    %130 = arith.negf %129 : vector<2x32xf32>
    %131 = math.exp %130 : vector<2x32xf32>
    %cst_44 = arith.constant 1.000000e+00 : f32
    %132 = vector.broadcast %cst_44 : f32 to vector<2x32xf32>
    %133 = arith.addf %132, %131 : vector<2x32xf32>
    %134 = arith.divf %132, %133 : vector<2x32xf32>
    %135 = vector.extract_strided_slice %122 {offsets = [0, 64], sizes = [2, 32], strides = [1, 1]} : vector<2x128xf32> to vector<2x32xf32>
    %136 = math.tanh %135 : vector<2x32xf32>
    %137 = vector.extract_strided_slice %122 {offsets = [0, 96], sizes = [2, 32], strides = [1, 1]} : vector<2x128xf32> to vector<2x32xf32>
    %138 = arith.negf %137 : vector<2x32xf32>
    %139 = math.exp %138 : vector<2x32xf32>
    %cst_45 = arith.constant 1.000000e+00 : f32
    %140 = vector.broadcast %cst_45 : f32 to vector<2x32xf32>
    %141 = arith.addf %140, %139 : vector<2x32xf32>
    %142 = arith.divf %140, %141 : vector<2x32xf32>
    %143 = arith.mulf %134, %112 : vector<2x32xf32>
    %144 = arith.mulf %128, %136 : vector<2x32xf32>
    %145 = arith.addf %143, %144 : vector<2x32xf32>
    %146 = math.tanh %145 : vector<2x32xf32>
    %147 = arith.mulf %142, %146 : vector<2x32xf32>
    %c0_46 = arith.constant 0 : index
    %c3 = arith.constant 3 : index
    %c0_47 = arith.constant 0 : index
    %148 = vector.load %arg6[%c0_46, %c3, %c0_47] : memref<2x8x32xf32, #tpu.memory_space<vmem>>, vector<2x1x32xf32>
    %149 = vector.shape_cast %148 : vector<2x1x32xf32> to vector<2x32xf32>
    %150 = vector.shape_cast %147 : vector<2x32xf32> to vector<2x1x32xf32>
    tpu.vector_store %arg6[%c0_46, %c3, %c0_47], %150 {strides = array<i32>} : memref<2x8x32xf32, #tpu.memory_space<vmem>>, vector<2x1x32xf32>,
    %151 = vector.extract_strided_slice %14 {offsets = [0, 4, 0], sizes = [2, 1, 128], strides = [1, 1, 1]} : vector<2x8x128xf32> to vector<2x1x128xf32>
    %152 = vector.shape_cast %151 : vector<2x1x128xf32> to vector<2x128xf32>
    %153 = arith.truncf %147 : vector<2x32xf32> to vector<2x32xbf16>
    %cst_48 = arith.constant dense<0.000000e+00> : vector<2x128xf32>
    %154 = tpu.matmul %153, %5, %cst_48 {dimension_numbers = #tpu.dot_dimension_numbers<[1], [0], [0], [1], [0, 0, 1, 1], [], []>} : vector<2x32xbf16>, vector<32x128xbf16>, vector<2x128xf32> -> vector<2x128xf32>
    %155 = arith.addf %152, %154 : vector<2x128xf32>
    %156 = vector.extract_strided_slice %155 {offsets = [0, 0], sizes = [2, 32], strides = [1, 1]} : vector<2x128xf32> to vector<2x32xf32>
    %157 = arith.negf %156 : vector<2x32xf32>
    %158 = math.exp %157 : vector<2x32xf32>
    %cst_49 = arith.constant 1.000000e+00 : f32
    %159 = vector.broadcast %cst_49 : f32 to vector<2x32xf32>
    %160 = arith.addf %159, %158 : vector<2x32xf32>
    %161 = arith.divf %159, %160 : vector<2x32xf32>
    %162 = vector.extract_strided_slice %155 {offsets = [0, 32], sizes = [2, 32], strides = [1, 1]} : vector<2x128xf32> to vector<2x32xf32>
    %163 = arith.negf %162 : vector<2x32xf32>
    %164 = math.exp %163 : vector<2x32xf32>
    %cst_50 = arith.constant 1.000000e+00 : f32
    %165 = vector.broadcast %cst_50 : f32 to vector<2x32xf32>
    %166 = arith.addf %165, %164 : vector<2x32xf32>
    %167 = arith.divf %165, %166 : vector<2x32xf32>
    %168 = vector.extract_strided_slice %155 {offsets = [0, 64], sizes = [2, 32], strides = [1, 1]} : vector<2x128xf32> to vector<2x32xf32>
    %169 = math.tanh %168 : vector<2x32xf32>
    %170 = vector.extract_strided_slice %155 {offsets = [0, 96], sizes = [2, 32], strides = [1, 1]} : vector<2x128xf32> to vector<2x32xf32>
    %171 = arith.negf %170 : vector<2x32xf32>
    %172 = math.exp %171 : vector<2x32xf32>
    %cst_51 = arith.constant 1.000000e+00 : f32
    %173 = vector.broadcast %cst_51 : f32 to vector<2x32xf32>
    %174 = arith.addf %173, %172 : vector<2x32xf32>
    %175 = arith.divf %173, %174 : vector<2x32xf32>
    %176 = arith.mulf %167, %145 : vector<2x32xf32>
    %177 = arith.mulf %161, %169 : vector<2x32xf32>
    %178 = arith.addf %176, %177 : vector<2x32xf32>
    %179 = math.tanh %178 : vector<2x32xf32>
    %180 = arith.mulf %175, %179 : vector<2x32xf32>
    %c0_52 = arith.constant 0 : index
    %c4 = arith.constant 4 : index
    %c0_53 = arith.constant 0 : index
    %181 = vector.load %arg6[%c0_52, %c4, %c0_53] : memref<2x8x32xf32, #tpu.memory_space<vmem>>, vector<2x1x32xf32>
    %182 = vector.shape_cast %181 : vector<2x1x32xf32> to vector<2x32xf32>
    %183 = vector.shape_cast %180 : vector<2x32xf32> to vector<2x1x32xf32>
    tpu.vector_store %arg6[%c0_52, %c4, %c0_53], %183 {strides = array<i32>} : memref<2x8x32xf32, #tpu.memory_space<vmem>>, vector<2x1x32xf32>,
    %184 = vector.extract_strided_slice %14 {offsets = [0, 5, 0], sizes = [2, 1, 128], strides = [1, 1, 1]} : vector<2x8x128xf32> to vector<2x1x128xf32>
    %185 = vector.shape_cast %184 : vector<2x1x128xf32> to vector<2x128xf32>
    %186 = arith.truncf %180 : vector<2x32xf32> to vector<2x32xbf16>
    %cst_54 = arith.constant dense<0.000000e+00> : vector<2x128xf32>
    %187 = tpu.matmul %186, %5, %cst_54 {dimension_numbers = #tpu.dot_dimension_numbers<[1], [0], [0], [1], [0, 0, 1, 1], [], []>} : vector<2x32xbf16>, vector<32x128xbf16>, vector<2x128xf32> -> vector<2x128xf32>
    %188 = arith.addf %185, %187 : vector<2x128xf32>
    %189 = vector.extract_strided_slice %188 {offsets = [0, 0], sizes = [2, 32], strides = [1, 1]} : vector<2x128xf32> to vector<2x32xf32>
    %190 = arith.negf %189 : vector<2x32xf32>
    %191 = math.exp %190 : vector<2x32xf32>
    %cst_55 = arith.constant 1.000000e+00 : f32
    %192 = vector.broadcast %cst_55 : f32 to vector<2x32xf32>
    %193 = arith.addf %192, %191 : vector<2x32xf32>
    %194 = arith.divf %192, %193 : vector<2x32xf32>
    %195 = vector.extract_strided_slice %188 {offsets = [0, 32], sizes = [2, 32], strides = [1, 1]} : vector<2x128xf32> to vector<2x32xf32>
    %196 = arith.negf %195 : vector<2x32xf32>
    %197 = math.exp %196 : vector<2x32xf32>
    %cst_56 = arith.constant 1.000000e+00 : f32
    %198 = vector.broadcast %cst_56 : f32 to vector<2x32xf32>
    %199 = arith.addf %198, %197 : vector<2x32xf32>
    %200 = arith.divf %198, %199 : vector<2x32xf32>
    %201 = vector.extract_strided_slice %188 {offsets = [0, 64], sizes = [2, 32], strides = [1, 1]} : vector<2x128xf32> to vector<2x32xf32>
    %202 = math.tanh %201 : vector<2x32xf32>
    %203 = vector.extract_strided_slice %188 {offsets = [0, 96], sizes = [2, 32], strides = [1, 1]} : vector<2x128xf32> to vector<2x32xf32>
    %204 = arith.negf %203 : vector<2x32xf32>
    %205 = math.exp %204 : vector<2x32xf32>
    %cst_57 = arith.constant 1.000000e+00 : f32
    %206 = vector.broadcast %cst_57 : f32 to vector<2x32xf32>
    %207 = arith.addf %206, %205 : vector<2x32xf32>
    %208 = arith.divf %206, %207 : vector<2x32xf32>
    %209 = arith.mulf %200, %178 : vector<2x32xf32>
    %210 = arith.mulf %194, %202 : vector<2x32xf32>
    %211 = arith.addf %209, %210 : vector<2x32xf32>
    %212 = math.tanh %211 : vector<2x32xf32>
    %213 = arith.mulf %208, %212 : vector<2x32xf32>
    %c0_58 = arith.constant 0 : index
    %c5 = arith.constant 5 : index
    %c0_59 = arith.constant 0 : index
    %214 = vector.load %arg6[%c0_58, %c5, %c0_59] : memref<2x8x32xf32, #tpu.memory_space<vmem>>, vector<2x1x32xf32>
    %215 = vector.shape_cast %214 : vector<2x1x32xf32> to vector<2x32xf32>
    %216 = vector.shape_cast %213 : vector<2x32xf32> to vector<2x1x32xf32>
    tpu.vector_store %arg6[%c0_58, %c5, %c0_59], %216 {strides = array<i32>} : memref<2x8x32xf32, #tpu.memory_space<vmem>>, vector<2x1x32xf32>,
    %217 = vector.extract_strided_slice %14 {offsets = [0, 6, 0], sizes = [2, 1, 128], strides = [1, 1, 1]} : vector<2x8x128xf32> to vector<2x1x128xf32>
    %218 = vector.shape_cast %217 : vector<2x1x128xf32> to vector<2x128xf32>
    %219 = arith.truncf %213 : vector<2x32xf32> to vector<2x32xbf16>
    %cst_60 = arith.constant dense<0.000000e+00> : vector<2x128xf32>
    %220 = tpu.matmul %219, %5, %cst_60 {dimension_numbers = #tpu.dot_dimension_numbers<[1], [0], [0], [1], [0, 0, 1, 1], [], []>} : vector<2x32xbf16>, vector<32x128xbf16>, vector<2x128xf32> -> vector<2x128xf32>
    %221 = arith.addf %218, %220 : vector<2x128xf32>
    %222 = vector.extract_strided_slice %221 {offsets = [0, 0], sizes = [2, 32], strides = [1, 1]} : vector<2x128xf32> to vector<2x32xf32>
    %223 = arith.negf %222 : vector<2x32xf32>
    %224 = math.exp %223 : vector<2x32xf32>
    %cst_61 = arith.constant 1.000000e+00 : f32
    %225 = vector.broadcast %cst_61 : f32 to vector<2x32xf32>
    %226 = arith.addf %225, %224 : vector<2x32xf32>
    %227 = arith.divf %225, %226 : vector<2x32xf32>
    %228 = vector.extract_strided_slice %221 {offsets = [0, 32], sizes = [2, 32], strides = [1, 1]} : vector<2x128xf32> to vector<2x32xf32>
    %229 = arith.negf %228 : vector<2x32xf32>
    %230 = math.exp %229 : vector<2x32xf32>
    %cst_62 = arith.constant 1.000000e+00 : f32
    %231 = vector.broadcast %cst_62 : f32 to vector<2x32xf32>
    %232 = arith.addf %231, %230 : vector<2x32xf32>
    %233 = arith.divf %231, %232 : vector<2x32xf32>
    %234 = vector.extract_strided_slice %221 {offsets = [0, 64], sizes = [2, 32], strides = [1, 1]} : vector<2x128xf32> to vector<2x32xf32>
    %235 = math.tanh %234 : vector<2x32xf32>
    %236 = vector.extract_strided_slice %221 {offsets = [0, 96], sizes = [2, 32], strides = [1, 1]} : vector<2x128xf32> to vector<2x32xf32>
    %237 = arith.negf %236 : vector<2x32xf32>
    %238 = math.exp %237 : vector<2x32xf32>
    %cst_63 = arith.constant 1.000000e+00 : f32
    %239 = vector.broadcast %cst_63 : f32 to vector<2x32xf32>
    %240 = arith.addf %239, %238 : vector<2x32xf32>
    %241 = arith.divf %239, %240 : vector<2x32xf32>
    %242 = arith.mulf %233, %211 : vector<2x32xf32>
    %243 = arith.mulf %227, %235 : vector<2x32xf32>
    %244 = arith.addf %242, %243 : vector<2x32xf32>
    %245 = math.tanh %244 : vector<2x32xf32>
    %246 = arith.mulf %241, %245 : vector<2x32xf32>
    %c0_64 = arith.constant 0 : index
    %c6 = arith.constant 6 : index
    %c0_65 = arith.constant 0 : index
    %247 = vector.load %arg6[%c0_64, %c6, %c0_65] : memref<2x8x32xf32, #tpu.memory_space<vmem>>, vector<2x1x32xf32>
    %248 = vector.shape_cast %247 : vector<2x1x32xf32> to vector<2x32xf32>
    %249 = vector.shape_cast %246 : vector<2x32xf32> to vector<2x1x32xf32>
    tpu.vector_store %arg6[%c0_64, %c6, %c0_65], %249 {strides = array<i32>} : memref<2x8x32xf32, #tpu.memory_space<vmem>>, vector<2x1x32xf32>,
    %250 = vector.extract_strided_slice %14 {offsets = [0, 7, 0], sizes = [2, 1, 128], strides = [1, 1, 1]} : vector<2x8x128xf32> to vector<2x1x128xf32>
    %251 = vector.shape_cast %250 : vector<2x1x128xf32> to vector<2x128xf32>
    %252 = arith.truncf %246 : vector<2x32xf32> to vector<2x32xbf16>
    %cst_66 = arith.constant dense<0.000000e+00> : vector<2x128xf32>
    %253 = tpu.matmul %252, %5, %cst_66 {dimension_numbers = #tpu.dot_dimension_numbers<[1], [0], [0], [1], [0, 0, 1, 1], [], []>} : vector<2x32xbf16>, vector<32x128xbf16>, vector<2x128xf32> -> vector<2x128xf32>
    %254 = arith.addf %251, %253 : vector<2x128xf32>
    %255 = vector.extract_strided_slice %254 {offsets = [0, 0], sizes = [2, 32], strides = [1, 1]} : vector<2x128xf32> to vector<2x32xf32>
    %256 = arith.negf %255 : vector<2x32xf32>
    %257 = math.exp %256 : vector<2x32xf32>
    %cst_67 = arith.constant 1.000000e+00 : f32
    %258 = vector.broadcast %cst_67 : f32 to vector<2x32xf32>
    %259 = arith.addf %258, %257 : vector<2x32xf32>
    %260 = arith.divf %258, %259 : vector<2x32xf32>
    %261 = vector.extract_strided_slice %254 {offsets = [0, 32], sizes = [2, 32], strides = [1, 1]} : vector<2x128xf32> to vector<2x32xf32>
    %262 = arith.negf %261 : vector<2x32xf32>
    %263 = math.exp %262 : vector<2x32xf32>
    %cst_68 = arith.constant 1.000000e+00 : f32
    %264 = vector.broadcast %cst_68 : f32 to vector<2x32xf32>
    %265 = arith.addf %264, %263 : vector<2x32xf32>
    %266 = arith.divf %264, %265 : vector<2x32xf32>
    %267 = vector.extract_strided_slice %254 {offsets = [0, 64], sizes = [2, 32], strides = [1, 1]} : vector<2x128xf32> to vector<2x32xf32>
    %268 = math.tanh %267 : vector<2x32xf32>
    %269 = vector.extract_strided_slice %254 {offsets = [0, 96], sizes = [2, 32], strides = [1, 1]} : vector<2x128xf32> to vector<2x32xf32>
    %270 = arith.negf %269 : vector<2x32xf32>
    %271 = math.exp %270 : vector<2x32xf32>
    %cst_69 = arith.constant 1.000000e+00 : f32
    %272 = vector.broadcast %cst_69 : f32 to vector<2x32xf32>
    %273 = arith.addf %272, %271 : vector<2x32xf32>
    %274 = arith.divf %272, %273 : vector<2x32xf32>
    %275 = arith.mulf %266, %244 : vector<2x32xf32>
    %276 = arith.mulf %260, %268 : vector<2x32xf32>
    %277 = arith.addf %275, %276 : vector<2x32xf32>
    %278 = math.tanh %277 : vector<2x32xf32>
    %279 = arith.mulf %274, %278 : vector<2x32xf32>
    %c0_70 = arith.constant 0 : index
    %c7 = arith.constant 7 : index
    %c0_71 = arith.constant 0 : index
    %280 = vector.load %arg6[%c0_70, %c7, %c0_71] : memref<2x8x32xf32, #tpu.memory_space<vmem>>, vector<2x1x32xf32>
    %281 = vector.shape_cast %280 : vector<2x1x32xf32> to vector<2x32xf32>
    %282 = vector.shape_cast %279 : vector<2x32xf32> to vector<2x1x32xf32>
    tpu.vector_store %arg6[%c0_70, %c7, %c0_71], %282 {strides = array<i32>} : memref<2x8x32xf32, #tpu.memory_space<vmem>>, vector<2x1x32xf32>,
    %c0_72 = arith.constant 0 : index
    %c0_73 = arith.constant 0 : index
    %c0_74 = arith.constant 0 : index
    %283 = vector.load %arg7[%c0_72, %c0_73, %c0_74] : memref<5x2x32xf32, #tpu.memory_space<vmem>>, vector<1x2x32xf32>
    %284 = vector.shape_cast %283 : vector<1x2x32xf32> to vector<2x32xf32>
    %285 = vector.shape_cast %279 : vector<2x32xf32> to vector<1x2x32xf32>
    tpu.vector_store %arg7[%c0_72, %c0_73, %c0_74], %285 {strides = array<i32>} : memref<5x2x32xf32, #tpu.memory_space<vmem>>, vector<1x2x32xf32>,
    %c0_75 = arith.constant 0 : index
    %c0_76 = arith.constant 0 : index
    %c0_77 = arith.constant 0 : index
    %286 = vector.load %arg8[%c0_75, %c0_76, %c0_77] : memref<5x2x32xf32, #tpu.memory_space<vmem>>, vector<1x2x32xf32>
    %287 = vector.shape_cast %286 : vector<1x2x32xf32> to vector<2x32xf32>
    %288 = vector.shape_cast %277 : vector<2x32xf32> to vector<1x2x32xf32>
    tpu.vector_store %arg8[%c0_75, %c0_76, %c0_77], %288 {strides = array<i32>} : memref<5x2x32xf32, #tpu.memory_space<vmem>>, vector<1x2x32xf32>,
    %c1_78 = arith.constant 1 : index
    %c0_79 = arith.constant 0 : index
    %c0_80 = arith.constant 0 : index
    %289 = vector.load %arg1[%c1_78, %c0_79, %c0_80] : memref<5x32x128xbf16, #tpu.memory_space<vmem>>, vector<1x32x128xbf16>
    %290 = vector.shape_cast %289 : vector<1x32x128xbf16> to vector<32x128xbf16>
    %c1_81 = arith.constant 1 : index
    %c0_82 = arith.constant 0 : index
    %c0_83 = arith.constant 0 : index
    %291 = vector.load %arg2[%c1_81, %c0_82, %c0_83] : memref<5x32x128xbf16, #tpu.memory_space<vmem>>, vector<1x32x128xbf16>
    %292 = vector.shape_cast %291 : vector<1x32x128xbf16> to vector<32x128xbf16>
    %c1_84 = arith.constant 1 : index
    %c0_85 = arith.constant 0 : index
    %c0_86 = arith.constant 0 : index
    %293 = vector.load %arg3[%c1_84, %c0_85, %c0_86] : memref<5x1x128xf32, #tpu.memory_space<vmem>>, vector<1x1x128xf32>
    %294 = vector.shape_cast %293 : vector<1x1x128xf32> to vector<1x128xf32>
    %c0_87 = arith.constant 0 : index
    %c0_88 = arith.constant 0 : index
    %c0_89 = arith.constant 0 : index
    %295 = vector.load %arg6[%c0_87, %c0_88, %c0_89] : memref<2x8x32xf32, #tpu.memory_space<vmem>>, vector<2x8x32xf32>
    %296 = vector.shape_cast %295 : vector<2x8x32xf32> to vector<16x32xf32>
    %297 = arith.truncf %296 : vector<16x32xf32> to vector<16x32xbf16>
    %cst_90 = arith.constant dense<0.000000e+00> : vector<16x128xf32>
    %298 = tpu.matmul %297, %290, %cst_90 {dimension_numbers = #tpu.dot_dimension_numbers<[1], [0], [0], [1], [0, 0, 1, 1], [], []>} : vector<16x32xbf16>, vector<32x128xbf16>, vector<16x128xf32> -> vector<16x128xf32>
    %299 = vector.broadcast %294 : vector<1x128xf32> to vector<16x128xf32>
    %300 = arith.addf %298, %299 : vector<16x128xf32>
    %301 = vector.shape_cast %300 : vector<16x128xf32> to vector<2x8x128xf32>
    %c1_91 = arith.constant 1 : index
    %c0_92 = arith.constant 0 : index
    %c0_93 = arith.constant 0 : index
    %302 = vector.load %arg4[%c1_91, %c0_92, %c0_93] : memref<5x2x32xf32, #tpu.memory_space<vmem>>, vector<1x2x32xf32>
    %303 = vector.shape_cast %302 : vector<1x2x32xf32> to vector<2x32xf32>
    %c1_94 = arith.constant 1 : index
    %c0_95 = arith.constant 0 : index
    %c0_96 = arith.constant 0 : index
    %304 = vector.load %arg5[%c1_94, %c0_95, %c0_96] : memref<5x2x32xf32, #tpu.memory_space<vmem>>, vector<1x2x32xf32>
    %305 = vector.shape_cast %304 : vector<1x2x32xf32> to vector<2x32xf32>
    %306 = vector.extract_strided_slice %301 {offsets = [0, 0, 0], sizes = [2, 1, 128], strides = [1, 1, 1]} : vector<2x8x128xf32> to vector<2x1x128xf32>
    %307 = vector.shape_cast %306 : vector<2x1x128xf32> to vector<2x128xf32>
    %308 = arith.truncf %303 : vector<2x32xf32> to vector<2x32xbf16>
    %cst_97 = arith.constant dense<0.000000e+00> : vector<2x128xf32>
    %309 = tpu.matmul %308, %292, %cst_97 {dimension_numbers = #tpu.dot_dimension_numbers<[1], [0], [0], [1], [0, 0, 1, 1], [], []>} : vector<2x32xbf16>, vector<32x128xbf16>, vector<2x128xf32> -> vector<2x128xf32>
    %310 = arith.addf %307, %309 : vector<2x128xf32>
    %311 = vector.extract_strided_slice %310 {offsets = [0, 0], sizes = [2, 32], strides = [1, 1]} : vector<2x128xf32> to vector<2x32xf32>
    %312 = arith.negf %311 : vector<2x32xf32>
    %313 = math.exp %312 : vector<2x32xf32>
    %cst_98 = arith.constant 1.000000e+00 : f32
    %314 = vector.broadcast %cst_98 : f32 to vector<2x32xf32>
    %315 = arith.addf %314, %313 : vector<2x32xf32>
    %316 = arith.divf %314, %315 : vector<2x32xf32>
    %317 = vector.extract_strided_slice %310 {offsets = [0, 32], sizes = [2, 32], strides = [1, 1]} : vector<2x128xf32> to vector<2x32xf32>
    %318 = arith.negf %317 : vector<2x32xf32>
    %319 = math.exp %318 : vector<2x32xf32>
    %cst_99 = arith.constant 1.000000e+00 : f32
    %320 = vector.broadcast %cst_99 : f32 to vector<2x32xf32>
    %321 = arith.addf %320, %319 : vector<2x32xf32>
    %322 = arith.divf %320, %321 : vector<2x32xf32>
    %323 = vector.extract_strided_slice %310 {offsets = [0, 64], sizes = [2, 32], strides = [1, 1]} : vector<2x128xf32> to vector<2x32xf32>
    %324 = math.tanh %323 : vector<2x32xf32>
    %325 = vector.extract_strided_slice %310 {offsets = [0, 96], sizes = [2, 32], strides = [1, 1]} : vector<2x128xf32> to vector<2x32xf32>
    %326 = arith.negf %325 : vector<2x32xf32>
    %327 = math.exp %326 : vector<2x32xf32>
    %cst_100 = arith.constant 1.000000e+00 : f32
    %328 = vector.broadcast %cst_100 : f32 to vector<2x32xf32>
    %329 = arith.addf %328, %327 : vector<2x32xf32>
    %330 = arith.divf %328, %329 : vector<2x32xf32>
    %331 = arith.mulf %322, %305 : vector<2x32xf32>
    %332 = arith.mulf %316, %324 : vector<2x32xf32>
    %333 = arith.addf %331, %332 : vector<2x32xf32>
    %334 = math.tanh %333 : vector<2x32xf32>
    %335 = arith.mulf %330, %334 : vector<2x32xf32>
    %c0_101 = arith.constant 0 : index
    %c0_102 = arith.constant 0 : index
    %c0_103 = arith.constant 0 : index
    %336 = vector.load %arg6[%c0_101, %c0_102, %c0_103] : memref<2x8x32xf32, #tpu.memory_space<vmem>>, vector<2x1x32xf32>
    %337 = vector.shape_cast %336 : vector<2x1x32xf32> to vector<2x32xf32>
    %338 = vector.shape_cast %335 : vector<2x32xf32> to vector<2x1x32xf32>
    tpu.vector_store %arg6[%c0_101, %c0_102, %c0_103], %338 {strides = array<i32>} : memref<2x8x32xf32, #tpu.memory_space<vmem>>, vector<2x1x32xf32>,
    %339 = vector.extract_strided_slice %301 {offsets = [0, 1, 0], sizes = [2, 1, 128], strides = [1, 1, 1]} : vector<2x8x128xf32> to vector<2x1x128xf32>
    %340 = vector.shape_cast %339 : vector<2x1x128xf32> to vector<2x128xf32>
    %341 = arith.truncf %335 : vector<2x32xf32> to vector<2x32xbf16>
    %cst_104 = arith.constant dense<0.000000e+00> : vector<2x128xf32>
    %342 = tpu.matmul %341, %292, %cst_104 {dimension_numbers = #tpu.dot_dimension_numbers<[1], [0], [0], [1], [0, 0, 1, 1], [], []>} : vector<2x32xbf16>, vector<32x128xbf16>, vector<2x128xf32> -> vector<2x128xf32>
    %343 = arith.addf %340, %342 : vector<2x128xf32>
    %344 = vector.extract_strided_slice %343 {offsets = [0, 0], sizes = [2, 32], strides = [1, 1]} : vector<2x128xf32> to vector<2x32xf32>
    %345 = arith.negf %344 : vector<2x32xf32>
    %346 = math.exp %345 : vector<2x32xf32>
    %cst_105 = arith.constant 1.000000e+00 : f32
    %347 = vector.broadcast %cst_105 : f32 to vector<2x32xf32>
    %348 = arith.addf %347, %346 : vector<2x32xf32>
    %349 = arith.divf %347, %348 : vector<2x32xf32>
    %350 = vector.extract_strided_slice %343 {offsets = [0, 32], sizes = [2, 32], strides = [1, 1]} : vector<2x128xf32> to vector<2x32xf32>
    %351 = arith.negf %350 : vector<2x32xf32>
    %352 = math.exp %351 : vector<2x32xf32>
    %cst_106 = arith.constant 1.000000e+00 : f32
    %353 = vector.broadcast %cst_106 : f32 to vector<2x32xf32>
    %354 = arith.addf %353, %352 : vector<2x32xf32>
    %355 = arith.divf %353, %354 : vector<2x32xf32>
    %356 = vector.extract_strided_slice %343 {offsets = [0, 64], sizes = [2, 32], strides = [1, 1]} : vector<2x128xf32> to vector<2x32xf32>
    %357 = math.tanh %356 : vector<2x32xf32>
    %358 = vector.extract_strided_slice %343 {offsets = [0, 96], sizes = [2, 32], strides = [1, 1]} : vector<2x128xf32> to vector<2x32xf32>
    %359 = arith.negf %358 : vector<2x32xf32>
    %360 = math.exp %359 : vector<2x32xf32>
    %cst_107 = arith.constant 1.000000e+00 : f32
    %361 = vector.broadcast %cst_107 : f32 to vector<2x32xf32>
    %362 = arith.addf %361, %360 : vector<2x32xf32>
    %363 = arith.divf %361, %362 : vector<2x32xf32>
    %364 = arith.mulf %355, %333 : vector<2x32xf32>
    %365 = arith.mulf %349, %357 : vector<2x32xf32>
    %366 = arith.addf %364, %365 : vector<2x32xf32>
    %367 = math.tanh %366 : vector<2x32xf32>
    %368 = arith.mulf %363, %367 : vector<2x32xf32>
    %c0_108 = arith.constant 0 : index
    %c1_109 = arith.constant 1 : index
    %c0_110 = arith.constant 0 : index
    %369 = vector.load %arg6[%c0_108, %c1_109, %c0_110] : memref<2x8x32xf32, #tpu.memory_space<vmem>>, vector<2x1x32xf32>
    %370 = vector.shape_cast %369 : vector<2x1x32xf32> to vector<2x32xf32>
    %371 = vector.shape_cast %368 : vector<2x32xf32> to vector<2x1x32xf32>
    tpu.vector_store %arg6[%c0_108, %c1_109, %c0_110], %371 {strides = array<i32>} : memref<2x8x32xf32, #tpu.memory_space<vmem>>, vector<2x1x32xf32>,
    %372 = vector.extract_strided_slice %301 {offsets = [0, 2, 0], sizes = [2, 1, 128], strides = [1, 1, 1]} : vector<2x8x128xf32> to vector<2x1x128xf32>
    %373 = vector.shape_cast %372 : vector<2x1x128xf32> to vector<2x128xf32>
    %374 = arith.truncf %368 : vector<2x32xf32> to vector<2x32xbf16>
    %cst_111 = arith.constant dense<0.000000e+00> : vector<2x128xf32>
    %375 = tpu.matmul %374, %292, %cst_111 {dimension_numbers = #tpu.dot_dimension_numbers<[1], [0], [0], [1], [0, 0, 1, 1], [], []>} : vector<2x32xbf16>, vector<32x128xbf16>, vector<2x128xf32> -> vector<2x128xf32>
    %376 = arith.addf %373, %375 : vector<2x128xf32>
    %377 = vector.extract_strided_slice %376 {offsets = [0, 0], sizes = [2, 32], strides = [1, 1]} : vector<2x128xf32> to vector<2x32xf32>
    %378 = arith.negf %377 : vector<2x32xf32>
    %379 = math.exp %378 : vector<2x32xf32>
    %cst_112 = arith.constant 1.000000e+00 : f32
    %380 = vector.broadcast %cst_112 : f32 to vector<2x32xf32>
    %381 = arith.addf %380, %379 : vector<2x32xf32>
    %382 = arith.divf %380, %381 : vector<2x32xf32>
    %383 = vector.extract_strided_slice %376 {offsets = [0, 32], sizes = [2, 32], strides = [1, 1]} : vector<2x128xf32> to vector<2x32xf32>
    %384 = arith.negf %383 : vector<2x32xf32>
    %385 = math.exp %384 : vector<2x32xf32>
    %cst_113 = arith.constant 1.000000e+00 : f32
    %386 = vector.broadcast %cst_113 : f32 to vector<2x32xf32>
    %387 = arith.addf %386, %385 : vector<2x32xf32>
    %388 = arith.divf %386, %387 : vector<2x32xf32>
    %389 = vector.extract_strided_slice %376 {offsets = [0, 64], sizes = [2, 32], strides = [1, 1]} : vector<2x128xf32> to vector<2x32xf32>
    %390 = math.tanh %389 : vector<2x32xf32>
    %391 = vector.extract_strided_slice %376 {offsets = [0, 96], sizes = [2, 32], strides = [1, 1]} : vector<2x128xf32> to vector<2x32xf32>
    %392 = arith.negf %391 : vector<2x32xf32>
    %393 = math.exp %392 : vector<2x32xf32>
    %cst_114 = arith.constant 1.000000e+00 : f32
    %394 = vector.broadcast %cst_114 : f32 to vector<2x32xf32>
    %395 = arith.addf %394, %393 : vector<2x32xf32>
    %396 = arith.divf %394, %395 : vector<2x32xf32>
    %397 = arith.mulf %388, %366 : vector<2x32xf32>
    %398 = arith.mulf %382, %390 : vector<2x32xf32>
    %399 = arith.addf %397, %398 : vector<2x32xf32>
    %400 = math.tanh %399 : vector<2x32xf32>
    %401 = arith.mulf %396, %400 : vector<2x32xf32>
    %c0_115 = arith.constant 0 : index
    %c2_116 = arith.constant 2 : index
    %c0_117 = arith.constant 0 : index
    %402 = vector.load %arg6[%c0_115, %c2_116, %c0_117] : memref<2x8x32xf32, #tpu.memory_space<vmem>>, vector<2x1x32xf32>
    %403 = vector.shape_cast %402 : vector<2x1x32xf32> to vector<2x32xf32>
    %404 = vector.shape_cast %401 : vector<2x32xf32> to vector<2x1x32xf32>
    tpu.vector_store %arg6[%c0_115, %c2_116, %c0_117], %404 {strides = array<i32>} : memref<2x8x32xf32, #tpu.memory_space<vmem>>, vector<2x1x32xf32>,
    %405 = vector.extract_strided_slice %301 {offsets = [0, 3, 0], sizes = [2, 1, 128], strides = [1, 1, 1]} : vector<2x8x128xf32> to vector<2x1x128xf32>
    %406 = vector.shape_cast %405 : vector<2x1x128xf32> to vector<2x128xf32>
    %407 = arith.truncf %401 : vector<2x32xf32> to vector<2x32xbf16>
    %cst_118 = arith.constant dense<0.000000e+00> : vector<2x128xf32>
    %408 = tpu.matmul %407, %292, %cst_118 {dimension_numbers = #tpu.dot_dimension_numbers<[1], [0], [0], [1], [0, 0, 1, 1], [], []>} : vector<2x32xbf16>, vector<32x128xbf16>, vector<2x128xf32> -> vector<2x128xf32>
    %409 = arith.addf %406, %408 : vector<2x128xf32>
    %410 = vector.extract_strided_slice %409 {offsets = [0, 0], sizes = [2, 32], strides = [1, 1]} : vector<2x128xf32> to vector<2x32xf32>
    %411 = arith.negf %410 : vector<2x32xf32>
    %412 = math.exp %411 : vector<2x32xf32>
    %cst_119 = arith.constant 1.000000e+00 : f32
    %413 = vector.broadcast %cst_119 : f32 to vector<2x32xf32>
    %414 = arith.addf %413, %412 : vector<2x32xf32>
    %415 = arith.divf %413, %414 : vector<2x32xf32>
    %416 = vector.extract_strided_slice %409 {offsets = [0, 32], sizes = [2, 32], strides = [1, 1]} : vector<2x128xf32> to vector<2x32xf32>
    %417 = arith.negf %416 : vector<2x32xf32>
    %418 = math.exp %417 : vector<2x32xf32>
    %cst_120 = arith.constant 1.000000e+00 : f32
    %419 = vector.broadcast %cst_120 : f32 to vector<2x32xf32>
    %420 = arith.addf %419, %418 : vector<2x32xf32>
    %421 = arith.divf %419, %420 : vector<2x32xf32>
    %422 = vector.extract_strided_slice %409 {offsets = [0, 64], sizes = [2, 32], strides = [1, 1]} : vector<2x128xf32> to vector<2x32xf32>
    %423 = math.tanh %422 : vector<2x32xf32>
    %424 = vector.extract_strided_slice %409 {offsets = [0, 96], sizes = [2, 32], strides = [1, 1]} : vector<2x128xf32> to vector<2x32xf32>
    %425 = arith.negf %424 : vector<2x32xf32>
    %426 = math.exp %425 : vector<2x32xf32>
    %cst_121 = arith.constant 1.000000e+00 : f32
    %427 = vector.broadcast %cst_121 : f32 to vector<2x32xf32>
    %428 = arith.addf %427, %426 : vector<2x32xf32>
    %429 = arith.divf %427, %428 : vector<2x32xf32>
    %430 = arith.mulf %421, %399 : vector<2x32xf32>
    %431 = arith.mulf %415, %423 : vector<2x32xf32>
    %432 = arith.addf %430, %431 : vector<2x32xf32>
    %433 = math.tanh %432 : vector<2x32xf32>
    %434 = arith.mulf %429, %433 : vector<2x32xf32>
    %c0_122 = arith.constant 0 : index
    %c3_123 = arith.constant 3 : index
    %c0_124 = arith.constant 0 : index
    %435 = vector.load %arg6[%c0_122, %c3_123, %c0_124] : memref<2x8x32xf32, #tpu.memory_space<vmem>>, vector<2x1x32xf32>
    %436 = vector.shape_cast %435 : vector<2x1x32xf32> to vector<2x32xf32>
    %437 = vector.shape_cast %434 : vector<2x32xf32> to vector<2x1x32xf32>
    tpu.vector_store %arg6[%c0_122, %c3_123, %c0_124], %437 {strides = array<i32>} : memref<2x8x32xf32, #tpu.memory_space<vmem>>, vector<2x1x32xf32>,
    %438 = vector.extract_strided_slice %301 {offsets = [0, 4, 0], sizes = [2, 1, 128], strides = [1, 1, 1]} : vector<2x8x128xf32> to vector<2x1x128xf32>
    %439 = vector.shape_cast %438 : vector<2x1x128xf32> to vector<2x128xf32>
    %440 = arith.truncf %434 : vector<2x32xf32> to vector<2x32xbf16>
    %cst_125 = arith.constant dense<0.000000e+00> : vector<2x128xf32>
    %441 = tpu.matmul %440, %292, %cst_125 {dimension_numbers = #tpu.dot_dimension_numbers<[1], [0], [0], [1], [0, 0, 1, 1], [], []>} : vector<2x32xbf16>, vector<32x128xbf16>, vector<2x128xf32> -> vector<2x128xf32>
    %442 = arith.addf %439, %441 : vector<2x128xf32>
    %443 = vector.extract_strided_slice %442 {offsets = [0, 0], sizes = [2, 32], strides = [1, 1]} : vector<2x128xf32> to vector<2x32xf32>
    %444 = arith.negf %443 : vector<2x32xf32>
    %445 = math.exp %444 : vector<2x32xf32>
    %cst_126 = arith.constant 1.000000e+00 : f32
    %446 = vector.broadcast %cst_126 : f32 to vector<2x32xf32>
    %447 = arith.addf %446, %445 : vector<2x32xf32>
    %448 = arith.divf %446, %447 : vector<2x32xf32>
    %449 = vector.extract_strided_slice %442 {offsets = [0, 32], sizes = [2, 32], strides = [1, 1]} : vector<2x128xf32> to vector<2x32xf32>
    %450 = arith.negf %449 : vector<2x32xf32>
    %451 = math.exp %450 : vector<2x32xf32>
    %cst_127 = arith.constant 1.000000e+00 : f32
    %452 = vector.broadcast %cst_127 : f32 to vector<2x32xf32>
    %453 = arith.addf %452, %451 : vector<2x32xf32>
    %454 = arith.divf %452, %453 : vector<2x32xf32>
    %455 = vector.extract_strided_slice %442 {offsets = [0, 64], sizes = [2, 32], strides = [1, 1]} : vector<2x128xf32> to vector<2x32xf32>
    %456 = math.tanh %455 : vector<2x32xf32>
    %457 = vector.extract_strided_slice %442 {offsets = [0, 96], sizes = [2, 32], strides = [1, 1]} : vector<2x128xf32> to vector<2x32xf32>
    %458 = arith.negf %457 : vector<2x32xf32>
    %459 = math.exp %458 : vector<2x32xf32>
    %cst_128 = arith.constant 1.000000e+00 : f32
    %460 = vector.broadcast %cst_128 : f32 to vector<2x32xf32>
    %461 = arith.addf %460, %459 : vector<2x32xf32>
    %462 = arith.divf %460, %461 : vector<2x32xf32>
    %463 = arith.mulf %454, %432 : vector<2x32xf32>
    %464 = arith.mulf %448, %456 : vector<2x32xf32>
    %465 = arith.addf %463, %464 : vector<2x32xf32>
    %466 = math.tanh %465 : vector<2x32xf32>
    %467 = arith.mulf %462, %466 : vector<2x32xf32>
    %c0_129 = arith.constant 0 : index
    %c4_130 = arith.constant 4 : index
    %c0_131 = arith.constant 0 : index
    %468 = vector.load %arg6[%c0_129, %c4_130, %c0_131] : memref<2x8x32xf32, #tpu.memory_space<vmem>>, vector<2x1x32xf32>
    %469 = vector.shape_cast %468 : vector<2x1x32xf32> to vector<2x32xf32>
    %470 = vector.shape_cast %467 : vector<2x32xf32> to vector<2x1x32xf32>
    tpu.vector_store %arg6[%c0_129, %c4_130, %c0_131], %470 {strides = array<i32>} : memref<2x8x32xf32, #tpu.memory_space<vmem>>, vector<2x1x32xf32>,
    %471 = vector.extract_strided_slice %301 {offsets = [0, 5, 0], sizes = [2, 1, 128], strides = [1, 1, 1]} : vector<2x8x128xf32> to vector<2x1x128xf32>
    %472 = vector.shape_cast %471 : vector<2x1x128xf32> to vector<2x128xf32>
    %473 = arith.truncf %467 : vector<2x32xf32> to vector<2x32xbf16>
    %cst_132 = arith.constant dense<0.000000e+00> : vector<2x128xf32>
    %474 = tpu.matmul %473, %292, %cst_132 {dimension_numbers = #tpu.dot_dimension_numbers<[1], [0], [0], [1], [0, 0, 1, 1], [], []>} : vector<2x32xbf16>, vector<32x128xbf16>, vector<2x128xf32> -> vector<2x128xf32>
    %475 = arith.addf %472, %474 : vector<2x128xf32>
    %476 = vector.extract_strided_slice %475 {offsets = [0, 0], sizes = [2, 32], strides = [1, 1]} : vector<2x128xf32> to vector<2x32xf32>
    %477 = arith.negf %476 : vector<2x32xf32>
    %478 = math.exp %477 : vector<2x32xf32>
    %cst_133 = arith.constant 1.000000e+00 : f32
    %479 = vector.broadcast %cst_133 : f32 to vector<2x32xf32>
    %480 = arith.addf %479, %478 : vector<2x32xf32>
    %481 = arith.divf %479, %480 : vector<2x32xf32>
    %482 = vector.extract_strided_slice %475 {offsets = [0, 32], sizes = [2, 32], strides = [1, 1]} : vector<2x128xf32> to vector<2x32xf32>
    %483 = arith.negf %482 : vector<2x32xf32>
    %484 = math.exp %483 : vector<2x32xf32>
    %cst_134 = arith.constant 1.000000e+00 : f32
    %485 = vector.broadcast %cst_134 : f32 to vector<2x32xf32>
    %486 = arith.addf %485, %484 : vector<2x32xf32>
    %487 = arith.divf %485, %486 : vector<2x32xf32>
    %488 = vector.extract_strided_slice %475 {offsets = [0, 64], sizes = [2, 32], strides = [1, 1]} : vector<2x128xf32> to vector<2x32xf32>
    %489 = math.tanh %488 : vector<2x32xf32>
    %490 = vector.extract_strided_slice %475 {offsets = [0, 96], sizes = [2, 32], strides = [1, 1]} : vector<2x128xf32> to vector<2x32xf32>
    %491 = arith.negf %490 : vector<2x32xf32>
    %492 = math.exp %491 : vector<2x32xf32>
    %cst_135 = arith.constant 1.000000e+00 : f32
    %493 = vector.broadcast %cst_135 : f32 to vector<2x32xf32>
    %494 = arith.addf %493, %492 : vector<2x32xf32>
    %495 = arith.divf %493, %494 : vector<2x32xf32>
    %496 = arith.mulf %487, %465 : vector<2x32xf32>
    %497 = arith.mulf %481, %489 : vector<2x32xf32>
    %498 = arith.addf %496, %497 : vector<2x32xf32>
    %499 = math.tanh %498 : vector<2x32xf32>
    %500 = arith.mulf %495, %499 : vector<2x32xf32>
    %c0_136 = arith.constant 0 : index
    %c5_137 = arith.constant 5 : index
    %c0_138 = arith.constant 0 : index
    %501 = vector.load %arg6[%c0_136, %c5_137, %c0_138] : memref<2x8x32xf32, #tpu.memory_space<vmem>>, vector<2x1x32xf32>
    %502 = vector.shape_cast %501 : vector<2x1x32xf32> to vector<2x32xf32>
    %503 = vector.shape_cast %500 : vector<2x32xf32> to vector<2x1x32xf32>
    tpu.vector_store %arg6[%c0_136, %c5_137, %c0_138], %503 {strides = array<i32>} : memref<2x8x32xf32, #tpu.memory_space<vmem>>, vector<2x1x32xf32>,
    %504 = vector.extract_strided_slice %301 {offsets = [0, 6, 0], sizes = [2, 1, 128], strides = [1, 1, 1]} : vector<2x8x128xf32> to vector<2x1x128xf32>
    %505 = vector.shape_cast %504 : vector<2x1x128xf32> to vector<2x128xf32>
    %506 = arith.truncf %500 : vector<2x32xf32> to vector<2x32xbf16>
    %cst_139 = arith.constant dense<0.000000e+00> : vector<2x128xf32>
    %507 = tpu.matmul %506, %292, %cst_139 {dimension_numbers = #tpu.dot_dimension_numbers<[1], [0], [0], [1], [0, 0, 1, 1], [], []>} : vector<2x32xbf16>, vector<32x128xbf16>, vector<2x128xf32> -> vector<2x128xf32>
    %508 = arith.addf %505, %507 : vector<2x128xf32>
    %509 = vector.extract_strided_slice %508 {offsets = [0, 0], sizes = [2, 32], strides = [1, 1]} : vector<2x128xf32> to vector<2x32xf32>
    %510 = arith.negf %509 : vector<2x32xf32>
    %511 = math.exp %510 : vector<2x32xf32>
    %cst_140 = arith.constant 1.000000e+00 : f32
    %512 = vector.broadcast %cst_140 : f32 to vector<2x32xf32>
    %513 = arith.addf %512, %511 : vector<2x32xf32>
    %514 = arith.divf %512, %513 : vector<2x32xf32>
    %515 = vector.extract_strided_slice %508 {offsets = [0, 32], sizes = [2, 32], strides = [1, 1]} : vector<2x128xf32> to vector<2x32xf32>
    %516 = arith.negf %515 : vector<2x32xf32>
    %517 = math.exp %516 : vector<2x32xf32>
    %cst_141 = arith.constant 1.000000e+00 : f32
    %518 = vector.broadcast %cst_141 : f32 to vector<2x32xf32>
    %519 = arith.addf %518, %517 : vector<2x32xf32>
    %520 = arith.divf %518, %519 : vector<2x32xf32>
    %521 = vector.extract_strided_slice %508 {offsets = [0, 64], sizes = [2, 32], strides = [1, 1]} : vector<2x128xf32> to vector<2x32xf32>
    %522 = math.tanh %521 : vector<2x32xf32>
    %523 = vector.extract_strided_slice %508 {offsets = [0, 96], sizes = [2, 32], strides = [1, 1]} : vector<2x128xf32> to vector<2x32xf32>
    %524 = arith.negf %523 : vector<2x32xf32>
    %525 = math.exp %524 : vector<2x32xf32>
    %cst_142 = arith.constant 1.000000e+00 : f32
    %526 = vector.broadcast %cst_142 : f32 to vector<2x32xf32>
    %527 = arith.addf %526, %525 : vector<2x32xf32>
    %528 = arith.divf %526, %527 : vector<2x32xf32>
    %529 = arith.mulf %520, %498 : vector<2x32xf32>
    %530 = arith.mulf %514, %522 : vector<2x32xf32>
    %531 = arith.addf %529, %530 : vector<2x32xf32>
    %532 = math.tanh %531 : vector<2x32xf32>
    %533 = arith.mulf %528, %532 : vector<2x32xf32>
    %c0_143 = arith.constant 0 : index
    %c6_144 = arith.constant 6 : index
    %c0_145 = arith.constant 0 : index
    %534 = vector.load %arg6[%c0_143, %c6_144, %c0_145] : memref<2x8x32xf32, #tpu.memory_space<vmem>>, vector<2x1x32xf32>
    %535 = vector.shape_cast %534 : vector<2x1x32xf32> to vector<2x32xf32>
    %536 = vector.shape_cast %533 : vector<2x32xf32> to vector<2x1x32xf32>
    tpu.vector_store %arg6[%c0_143, %c6_144, %c0_145], %536 {strides = array<i32>} : memref<2x8x32xf32, #tpu.memory_space<vmem>>, vector<2x1x32xf32>,
    %537 = vector.extract_strided_slice %301 {offsets = [0, 7, 0], sizes = [2, 1, 128], strides = [1, 1, 1]} : vector<2x8x128xf32> to vector<2x1x128xf32>
    %538 = vector.shape_cast %537 : vector<2x1x128xf32> to vector<2x128xf32>
    %539 = arith.truncf %533 : vector<2x32xf32> to vector<2x32xbf16>
    %cst_146 = arith.constant dense<0.000000e+00> : vector<2x128xf32>
    %540 = tpu.matmul %539, %292, %cst_146 {dimension_numbers = #tpu.dot_dimension_numbers<[1], [0], [0], [1], [0, 0, 1, 1], [], []>} : vector<2x32xbf16>, vector<32x128xbf16>, vector<2x128xf32> -> vector<2x128xf32>
    %541 = arith.addf %538, %540 : vector<2x128xf32>
    %542 = vector.extract_strided_slice %541 {offsets = [0, 0], sizes = [2, 32], strides = [1, 1]} : vector<2x128xf32> to vector<2x32xf32>
    %543 = arith.negf %542 : vector<2x32xf32>
    %544 = math.exp %543 : vector<2x32xf32>
    %cst_147 = arith.constant 1.000000e+00 : f32
    %545 = vector.broadcast %cst_147 : f32 to vector<2x32xf32>
    %546 = arith.addf %545, %544 : vector<2x32xf32>
    %547 = arith.divf %545, %546 : vector<2x32xf32>
    %548 = vector.extract_strided_slice %541 {offsets = [0, 32], sizes = [2, 32], strides = [1, 1]} : vector<2x128xf32> to vector<2x32xf32>
    %549 = arith.negf %548 : vector<2x32xf32>
    %550 = math.exp %549 : vector<2x32xf32>
    %cst_148 = arith.constant 1.000000e+00 : f32
    %551 = vector.broadcast %cst_148 : f32 to vector<2x32xf32>
    %552 = arith.addf %551, %550 : vector<2x32xf32>
    %553 = arith.divf %551, %552 : vector<2x32xf32>
    %554 = vector.extract_strided_slice %541 {offsets = [0, 64], sizes = [2, 32], strides = [1, 1]} : vector<2x128xf32> to vector<2x32xf32>
    %555 = math.tanh %554 : vector<2x32xf32>
    %556 = vector.extract_strided_slice %541 {offsets = [0, 96], sizes = [2, 32], strides = [1, 1]} : vector<2x128xf32> to vector<2x32xf32>
    %557 = arith.negf %556 : vector<2x32xf32>
    %558 = math.exp %557 : vector<2x32xf32>
    %cst_149 = arith.constant 1.000000e+00 : f32
    %559 = vector.broadcast %cst_149 : f32 to vector<2x32xf32>
    %560 = arith.addf %559, %558 : vector<2x32xf32>
    %561 = arith.divf %559, %560 : vector<2x32xf32>
    %562 = arith.mulf %553, %531 : vector<2x32xf32>
    %563 = arith.mulf %547, %555 : vector<2x32xf32>
    %564 = arith.addf %562, %563 : vector<2x32xf32>
    %565 = math.tanh %564 : vector<2x32xf32>
    %566 = arith.mulf %561, %565 : vector<2x32xf32>
    %c0_150 = arith.constant 0 : index
    %c7_151 = arith.constant 7 : index
    %c0_152 = arith.constant 0 : index
    %567 = vector.load %arg6[%c0_150, %c7_151, %c0_152] : memref<2x8x32xf32, #tpu.memory_space<vmem>>, vector<2x1x32xf32>
    %568 = vector.shape_cast %567 : vector<2x1x32xf32> to vector<2x32xf32>
    %569 = vector.shape_cast %566 : vector<2x32xf32> to vector<2x1x32xf32>
    tpu.vector_store %arg6[%c0_150, %c7_151, %c0_152], %569 {strides = array<i32>} : memref<2x8x32xf32, #tpu.memory_space<vmem>>, vector<2x1x32xf32>,
    %c1_153 = arith.constant 1 : index
    %c0_154 = arith.constant 0 : index
    %c0_155 = arith.constant 0 : index
    %570 = vector.load %arg7[%c1_153, %c0_154, %c0_155] : memref<5x2x32xf32, #tpu.memory_space<vmem>>, vector<1x2x32xf32>
    %571 = vector.shape_cast %570 : vector<1x2x32xf32> to vector<2x32xf32>
    %572 = vector.shape_cast %566 : vector<2x32xf32> to vector<1x2x32xf32>
    tpu.vector_store %arg7[%c1_153, %c0_154, %c0_155], %572 {strides = array<i32>} : memref<5x2x32xf32, #tpu.memory_space<vmem>>, vector<1x2x32xf32>,
    %c1_156 = arith.constant 1 : index
    %c0_157 = arith.constant 0 : index
    %c0_158 = arith.constant 0 : index
    %573 = vector.load %arg8[%c1_156, %c0_157, %c0_158] : memref<5x2x32xf32, #tpu.memory_space<vmem>>, vector<1x2x32xf32>
    %574 = vector.shape_cast %573 : vector<1x2x32xf32> to vector<2x32xf32>
    %575 = vector.shape_cast %564 : vector<2x32xf32> to vector<1x2x32xf32>
    tpu.vector_store %arg8[%c1_156, %c0_157, %c0_158], %575 {strides = array<i32>} : memref<5x2x32xf32, #tpu.memory_space<vmem>>, vector<1x2x32xf32>,
    %c2_159 = arith.constant 2 : index
    %c0_160 = arith.constant 0 : index
    %c0_161 = arith.constant 0 : index
    %576 = vector.load %arg1[%c2_159, %c0_160, %c0_161] : memref<5x32x128xbf16, #tpu.memory_space<vmem>>, vector<1x32x128xbf16>
    %577 = vector.shape_cast %576 : vector<1x32x128xbf16> to vector<32x128xbf16>
    %c2_162 = arith.constant 2 : index
    %c0_163 = arith.constant 0 : index
    %c0_164 = arith.constant 0 : index
    %578 = vector.load %arg2[%c2_162, %c0_163, %c0_164] : memref<5x32x128xbf16, #tpu.memory_space<vmem>>, vector<1x32x128xbf16>
    %579 = vector.shape_cast %578 : vector<1x32x128xbf16> to vector<32x128xbf16>
    %c2_165 = arith.constant 2 : index
    %c0_166 = arith.constant 0 : index
    %c0_167 = arith.constant 0 : index
    %580 = vector.load %arg3[%c2_165, %c0_166, %c0_167] : memref<5x1x128xf32, #tpu.memory_space<vmem>>, vector<1x1x128xf32>
    %581 = vector.shape_cast %580 : vector<1x1x128xf32> to vector<1x128xf32>
    %c0_168 = arith.constant 0 : index
    %c0_169 = arith.constant 0 : index
    %c0_170 = arith.constant 0 : index
    %582 = vector.load %arg6[%c0_168, %c0_169, %c0_170] : memref<2x8x32xf32, #tpu.memory_space<vmem>>, vector<2x8x32xf32>
    %583 = vector.shape_cast %582 : vector<2x8x32xf32> to vector<16x32xf32>
    %584 = arith.truncf %583 : vector<16x32xf32> to vector<16x32xbf16>
    %cst_171 = arith.constant dense<0.000000e+00> : vector<16x128xf32>
    %585 = tpu.matmul %584, %577, %cst_171 {dimension_numbers = #tpu.dot_dimension_numbers<[1], [0], [0], [1], [0, 0, 1, 1], [], []>} : vector<16x32xbf16>, vector<32x128xbf16>, vector<16x128xf32> -> vector<16x128xf32>
    %586 = vector.broadcast %581 : vector<1x128xf32> to vector<16x128xf32>
    %587 = arith.addf %585, %586 : vector<16x128xf32>
    %588 = vector.shape_cast %587 : vector<16x128xf32> to vector<2x8x128xf32>
    %c2_172 = arith.constant 2 : index
    %c0_173 = arith.constant 0 : index
    %c0_174 = arith.constant 0 : index
    %589 = vector.load %arg4[%c2_172, %c0_173, %c0_174] : memref<5x2x32xf32, #tpu.memory_space<vmem>>, vector<1x2x32xf32>
    %590 = vector.shape_cast %589 : vector<1x2x32xf32> to vector<2x32xf32>
    %c2_175 = arith.constant 2 : index
    %c0_176 = arith.constant 0 : index
    %c0_177 = arith.constant 0 : index
    %591 = vector.load %arg5[%c2_175, %c0_176, %c0_177] : memref<5x2x32xf32, #tpu.memory_space<vmem>>, vector<1x2x32xf32>
    %592 = vector.shape_cast %591 : vector<1x2x32xf32> to vector<2x32xf32>
    %593 = vector.extract_strided_slice %588 {offsets = [0, 0, 0], sizes = [2, 1, 128], strides = [1, 1, 1]} : vector<2x8x128xf32> to vector<2x1x128xf32>
    %594 = vector.shape_cast %593 : vector<2x1x128xf32> to vector<2x128xf32>
    %595 = arith.truncf %590 : vector<2x32xf32> to vector<2x32xbf16>
    %cst_178 = arith.constant dense<0.000000e+00> : vector<2x128xf32>
    %596 = tpu.matmul %595, %579, %cst_178 {dimension_numbers = #tpu.dot_dimension_numbers<[1], [0], [0], [1], [0, 0, 1, 1], [], []>} : vector<2x32xbf16>, vector<32x128xbf16>, vector<2x128xf32> -> vector<2x128xf32>
    %597 = arith.addf %594, %596 : vector<2x128xf32>
    %598 = vector.extract_strided_slice %597 {offsets = [0, 0], sizes = [2, 32], strides = [1, 1]} : vector<2x128xf32> to vector<2x32xf32>
    %599 = arith.negf %598 : vector<2x32xf32>
    %600 = math.exp %599 : vector<2x32xf32>
    %cst_179 = arith.constant 1.000000e+00 : f32
    %601 = vector.broadcast %cst_179 : f32 to vector<2x32xf32>
    %602 = arith.addf %601, %600 : vector<2x32xf32>
    %603 = arith.divf %601, %602 : vector<2x32xf32>
    %604 = vector.extract_strided_slice %597 {offsets = [0, 32], sizes = [2, 32], strides = [1, 1]} : vector<2x128xf32> to vector<2x32xf32>
    %605 = arith.negf %604 : vector<2x32xf32>
    %606 = math.exp %605 : vector<2x32xf32>
    %cst_180 = arith.constant 1.000000e+00 : f32
    %607 = vector.broadcast %cst_180 : f32 to vector<2x32xf32>
    %608 = arith.addf %607, %606 : vector<2x32xf32>
    %609 = arith.divf %607, %608 : vector<2x32xf32>
    %610 = vector.extract_strided_slice %597 {offsets = [0, 64], sizes = [2, 32], strides = [1, 1]} : vector<2x128xf32> to vector<2x32xf32>
    %611 = math.tanh %610 : vector<2x32xf32>
    %612 = vector.extract_strided_slice %597 {offsets = [0, 96], sizes = [2, 32], strides = [1, 1]} : vector<2x128xf32> to vector<2x32xf32>
    %613 = arith.negf %612 : vector<2x32xf32>
    %614 = math.exp %613 : vector<2x32xf32>
    %cst_181 = arith.constant 1.000000e+00 : f32
    %615 = vector.broadcast %cst_181 : f32 to vector<2x32xf32>
    %616 = arith.addf %615, %614 : vector<2x32xf32>
    %617 = arith.divf %615, %616 : vector<2x32xf32>
    %618 = arith.mulf %609, %592 : vector<2x32xf32>
    %619 = arith.mulf %603, %611 : vector<2x32xf32>
    %620 = arith.addf %618, %619 : vector<2x32xf32>
    %621 = math.tanh %620 : vector<2x32xf32>
    %622 = arith.mulf %617, %621 : vector<2x32xf32>
    %c0_182 = arith.constant 0 : index
    %c0_183 = arith.constant 0 : index
    %c0_184 = arith.constant 0 : index
    %623 = vector.load %arg6[%c0_182, %c0_183, %c0_184] : memref<2x8x32xf32, #tpu.memory_space<vmem>>, vector<2x1x32xf32>
    %624 = vector.shape_cast %623 : vector<2x1x32xf32> to vector<2x32xf32>
    %625 = vector.shape_cast %622 : vector<2x32xf32> to vector<2x1x32xf32>
    tpu.vector_store %arg6[%c0_182, %c0_183, %c0_184], %625 {strides = array<i32>} : memref<2x8x32xf32, #tpu.memory_space<vmem>>, vector<2x1x32xf32>,
    %626 = vector.extract_strided_slice %588 {offsets = [0, 1, 0], sizes = [2, 1, 128], strides = [1, 1, 1]} : vector<2x8x128xf32> to vector<2x1x128xf32>
    %627 = vector.shape_cast %626 : vector<2x1x128xf32> to vector<2x128xf32>
    %628 = arith.truncf %622 : vector<2x32xf32> to vector<2x32xbf16>
    %cst_185 = arith.constant dense<0.000000e+00> : vector<2x128xf32>
    %629 = tpu.matmul %628, %579, %cst_185 {dimension_numbers = #tpu.dot_dimension_numbers<[1], [0], [0], [1], [0, 0, 1, 1], [], []>} : vector<2x32xbf16>, vector<32x128xbf16>, vector<2x128xf32> -> vector<2x128xf32>
    %630 = arith.addf %627, %629 : vector<2x128xf32>
    %631 = vector.extract_strided_slice %630 {offsets = [0, 0], sizes = [2, 32], strides = [1, 1]} : vector<2x128xf32> to vector<2x32xf32>
    %632 = arith.negf %631 : vector<2x32xf32>
    %633 = math.exp %632 : vector<2x32xf32>
    %cst_186 = arith.constant 1.000000e+00 : f32
    %634 = vector.broadcast %cst_186 : f32 to vector<2x32xf32>
    %635 = arith.addf %634, %633 : vector<2x32xf32>
    %636 = arith.divf %634, %635 : vector<2x32xf32>
    %637 = vector.extract_strided_slice %630 {offsets = [0, 32], sizes = [2, 32], strides = [1, 1]} : vector<2x128xf32> to vector<2x32xf32>
    %638 = arith.negf %637 : vector<2x32xf32>
    %639 = math.exp %638 : vector<2x32xf32>
    %cst_187 = arith.constant 1.000000e+00 : f32
    %640 = vector.broadcast %cst_187 : f32 to vector<2x32xf32>
    %641 = arith.addf %640, %639 : vector<2x32xf32>
    %642 = arith.divf %640, %641 : vector<2x32xf32>
    %643 = vector.extract_strided_slice %630 {offsets = [0, 64], sizes = [2, 32], strides = [1, 1]} : vector<2x128xf32> to vector<2x32xf32>
    %644 = math.tanh %643 : vector<2x32xf32>
    %645 = vector.extract_strided_slice %630 {offsets = [0, 96], sizes = [2, 32], strides = [1, 1]} : vector<2x128xf32> to vector<2x32xf32>
    %646 = arith.negf %645 : vector<2x32xf32>
    %647 = math.exp %646 : vector<2x32xf32>
    %cst_188 = arith.constant 1.000000e+00 : f32
    %648 = vector.broadcast %cst_188 : f32 to vector<2x32xf32>
    %649 = arith.addf %648, %647 : vector<2x32xf32>
    %650 = arith.divf %648, %649 : vector<2x32xf32>
    %651 = arith.mulf %642, %620 : vector<2x32xf32>
    %652 = arith.mulf %636, %644 : vector<2x32xf32>
    %653 = arith.addf %651, %652 : vector<2x32xf32>
    %654 = math.tanh %653 : vector<2x32xf32>
    %655 = arith.mulf %650, %654 : vector<2x32xf32>
    %c0_189 = arith.constant 0 : index
    %c1_190 = arith.constant 1 : index
    %c0_191 = arith.constant 0 : index
    %656 = vector.load %arg6[%c0_189, %c1_190, %c0_191] : memref<2x8x32xf32, #tpu.memory_space<vmem>>, vector<2x1x32xf32>
    %657 = vector.shape_cast %656 : vector<2x1x32xf32> to vector<2x32xf32>
    %658 = vector.shape_cast %655 : vector<2x32xf32> to vector<2x1x32xf32>
    tpu.vector_store %arg6[%c0_189, %c1_190, %c0_191], %658 {strides = array<i32>} : memref<2x8x32xf32, #tpu.memory_space<vmem>>, vector<2x1x32xf32>,
    %659 = vector.extract_strided_slice %588 {offsets = [0, 2, 0], sizes = [2, 1, 128], strides = [1, 1, 1]} : vector<2x8x128xf32> to vector<2x1x128xf32>
    %660 = vector.shape_cast %659 : vector<2x1x128xf32> to vector<2x128xf32>
    %661 = arith.truncf %655 : vector<2x32xf32> to vector<2x32xbf16>
    %cst_192 = arith.constant dense<0.000000e+00> : vector<2x128xf32>
    %662 = tpu.matmul %661, %579, %cst_192 {dimension_numbers = #tpu.dot_dimension_numbers<[1], [0], [0], [1], [0, 0, 1, 1], [], []>} : vector<2x32xbf16>, vector<32x128xbf16>, vector<2x128xf32> -> vector<2x128xf32>
    %663 = arith.addf %660, %662 : vector<2x128xf32>
    %664 = vector.extract_strided_slice %663 {offsets = [0, 0], sizes = [2, 32], strides = [1, 1]} : vector<2x128xf32> to vector<2x32xf32>
    %665 = arith.negf %664 : vector<2x32xf32>
    %666 = math.exp %665 : vector<2x32xf32>
    %cst_193 = arith.constant 1.000000e+00 : f32
    %667 = vector.broadcast %cst_193 : f32 to vector<2x32xf32>
    %668 = arith.addf %667, %666 : vector<2x32xf32>
    %669 = arith.divf %667, %668 : vector<2x32xf32>
    %670 = vector.extract_strided_slice %663 {offsets = [0, 32], sizes = [2, 32], strides = [1, 1]} : vector<2x128xf32> to vector<2x32xf32>
    %671 = arith.negf %670 : vector<2x32xf32>
    %672 = math.exp %671 : vector<2x32xf32>
    %cst_194 = arith.constant 1.000000e+00 : f32
    %673 = vector.broadcast %cst_194 : f32 to vector<2x32xf32>
    %674 = arith.addf %673, %672 : vector<2x32xf32>
    %675 = arith.divf %673, %674 : vector<2x32xf32>
    %676 = vector.extract_strided_slice %663 {offsets = [0, 64], sizes = [2, 32], strides = [1, 1]} : vector<2x128xf32> to vector<2x32xf32>
    %677 = math.tanh %676 : vector<2x32xf32>
    %678 = vector.extract_strided_slice %663 {offsets = [0, 96], sizes = [2, 32], strides = [1, 1]} : vector<2x128xf32> to vector<2x32xf32>
    %679 = arith.negf %678 : vector<2x32xf32>
    %680 = math.exp %679 : vector<2x32xf32>
    %cst_195 = arith.constant 1.000000e+00 : f32
    %681 = vector.broadcast %cst_195 : f32 to vector<2x32xf32>
    %682 = arith.addf %681, %680 : vector<2x32xf32>
    %683 = arith.divf %681, %682 : vector<2x32xf32>
    %684 = arith.mulf %675, %653 : vector<2x32xf32>
    %685 = arith.mulf %669, %677 : vector<2x32xf32>
    %686 = arith.addf %684, %685 : vector<2x32xf32>
    %687 = math.tanh %686 : vector<2x32xf32>
    %688 = arith.mulf %683, %687 : vector<2x32xf32>
    %c0_196 = arith.constant 0 : index
    %c2_197 = arith.constant 2 : index
    %c0_198 = arith.constant 0 : index
    %689 = vector.load %arg6[%c0_196, %c2_197, %c0_198] : memref<2x8x32xf32, #tpu.memory_space<vmem>>, vector<2x1x32xf32>
    %690 = vector.shape_cast %689 : vector<2x1x32xf32> to vector<2x32xf32>
    %691 = vector.shape_cast %688 : vector<2x32xf32> to vector<2x1x32xf32>
    tpu.vector_store %arg6[%c0_196, %c2_197, %c0_198], %691 {strides = array<i32>} : memref<2x8x32xf32, #tpu.memory_space<vmem>>, vector<2x1x32xf32>,
    %692 = vector.extract_strided_slice %588 {offsets = [0, 3, 0], sizes = [2, 1, 128], strides = [1, 1, 1]} : vector<2x8x128xf32> to vector<2x1x128xf32>
    %693 = vector.shape_cast %692 : vector<2x1x128xf32> to vector<2x128xf32>
    %694 = arith.truncf %688 : vector<2x32xf32> to vector<2x32xbf16>
    %cst_199 = arith.constant dense<0.000000e+00> : vector<2x128xf32>
    %695 = tpu.matmul %694, %579, %cst_199 {dimension_numbers = #tpu.dot_dimension_numbers<[1], [0], [0], [1], [0, 0, 1, 1], [], []>} : vector<2x32xbf16>, vector<32x128xbf16>, vector<2x128xf32> -> vector<2x128xf32>
    %696 = arith.addf %693, %695 : vector<2x128xf32>
    %697 = vector.extract_strided_slice %696 {offsets = [0, 0], sizes = [2, 32], strides = [1, 1]} : vector<2x128xf32> to vector<2x32xf32>
    %698 = arith.negf %697 : vector<2x32xf32>
    %699 = math.exp %698 : vector<2x32xf32>
    %cst_200 = arith.constant 1.000000e+00 : f32
    %700 = vector.broadcast %cst_200 : f32 to vector<2x32xf32>
    %701 = arith.addf %700, %699 : vector<2x32xf32>
    %702 = arith.divf %700, %701 : vector<2x32xf32>
    %703 = vector.extract_strided_slice %696 {offsets = [0, 32], sizes = [2, 32], strides = [1, 1]} : vector<2x128xf32> to vector<2x32xf32>
    %704 = arith.negf %703 : vector<2x32xf32>
    %705 = math.exp %704 : vector<2x32xf32>
    %cst_201 = arith.constant 1.000000e+00 : f32
    %706 = vector.broadcast %cst_201 : f32 to vector<2x32xf32>
    %707 = arith.addf %706, %705 : vector<2x32xf32>
    %708 = arith.divf %706, %707 : vector<2x32xf32>
    %709 = vector.extract_strided_slice %696 {offsets = [0, 64], sizes = [2, 32], strides = [1, 1]} : vector<2x128xf32> to vector<2x32xf32>
    %710 = math.tanh %709 : vector<2x32xf32>
    %711 = vector.extract_strided_slice %696 {offsets = [0, 96], sizes = [2, 32], strides = [1, 1]} : vector<2x128xf32> to vector<2x32xf32>
    %712 = arith.negf %711 : vector<2x32xf32>
    %713 = math.exp %712 : vector<2x32xf32>
    %cst_202 = arith.constant 1.000000e+00 : f32
    %714 = vector.broadcast %cst_202 : f32 to vector<2x32xf32>
    %715 = arith.addf %714, %713 : vector<2x32xf32>
    %716 = arith.divf %714, %715 : vector<2x32xf32>
    %717 = arith.mulf %708, %686 : vector<2x32xf32>
    %718 = arith.mulf %702, %710 : vector<2x32xf32>
    %719 = arith.addf %717, %718 : vector<2x32xf32>
    %720 = math.tanh %719 : vector<2x32xf32>
    %721 = arith.mulf %716, %720 : vector<2x32xf32>
    %c0_203 = arith.constant 0 : index
    %c3_204 = arith.constant 3 : index
    %c0_205 = arith.constant 0 : index
    %722 = vector.load %arg6[%c0_203, %c3_204, %c0_205] : memref<2x8x32xf32, #tpu.memory_space<vmem>>, vector<2x1x32xf32>
    %723 = vector.shape_cast %722 : vector<2x1x32xf32> to vector<2x32xf32>
    %724 = vector.shape_cast %721 : vector<2x32xf32> to vector<2x1x32xf32>
    tpu.vector_store %arg6[%c0_203, %c3_204, %c0_205], %724 {strides = array<i32>} : memref<2x8x32xf32, #tpu.memory_space<vmem>>, vector<2x1x32xf32>,
    %725 = vector.extract_strided_slice %588 {offsets = [0, 4, 0], sizes = [2, 1, 128], strides = [1, 1, 1]} : vector<2x8x128xf32> to vector<2x1x128xf32>
    %726 = vector.shape_cast %725 : vector<2x1x128xf32> to vector<2x128xf32>
    %727 = arith.truncf %721 : vector<2x32xf32> to vector<2x32xbf16>
    %cst_206 = arith.constant dense<0.000000e+00> : vector<2x128xf32>
    %728 = tpu.matmul %727, %579, %cst_206 {dimension_numbers = #tpu.dot_dimension_numbers<[1], [0], [0], [1], [0, 0, 1, 1], [], []>} : vector<2x32xbf16>, vector<32x128xbf16>, vector<2x128xf32> -> vector<2x128xf32>
    %729 = arith.addf %726, %728 : vector<2x128xf32>
    %730 = vector.extract_strided_slice %729 {offsets = [0, 0], sizes = [2, 32], strides = [1, 1]} : vector<2x128xf32> to vector<2x32xf32>
    %731 = arith.negf %730 : vector<2x32xf32>
    %732 = math.exp %731 : vector<2x32xf32>
    %cst_207 = arith.constant 1.000000e+00 : f32
    %733 = vector.broadcast %cst_207 : f32 to vector<2x32xf32>
    %734 = arith.addf %733, %732 : vector<2x32xf32>
    %735 = arith.divf %733, %734 : vector<2x32xf32>
    %736 = vector.extract_strided_slice %729 {offsets = [0, 32], sizes = [2, 32], strides = [1, 1]} : vector<2x128xf32> to vector<2x32xf32>
    %737 = arith.negf %736 : vector<2x32xf32>
    %738 = math.exp %737 : vector<2x32xf32>
    %cst_208 = arith.constant 1.000000e+00 : f32
    %739 = vector.broadcast %cst_208 : f32 to vector<2x32xf32>
    %740 = arith.addf %739, %738 : vector<2x32xf32>
    %741 = arith.divf %739, %740 : vector<2x32xf32>
    %742 = vector.extract_strided_slice %729 {offsets = [0, 64], sizes = [2, 32], strides = [1, 1]} : vector<2x128xf32> to vector<2x32xf32>
    %743 = math.tanh %742 : vector<2x32xf32>
    %744 = vector.extract_strided_slice %729 {offsets = [0, 96], sizes = [2, 32], strides = [1, 1]} : vector<2x128xf32> to vector<2x32xf32>
    %745 = arith.negf %744 : vector<2x32xf32>
    %746 = math.exp %745 : vector<2x32xf32>
    %cst_209 = arith.constant 1.000000e+00 : f32
    %747 = vector.broadcast %cst_209 : f32 to vector<2x32xf32>
    %748 = arith.addf %747, %746 : vector<2x32xf32>
    %749 = arith.divf %747, %748 : vector<2x32xf32>
    %750 = arith.mulf %741, %719 : vector<2x32xf32>
    %751 = arith.mulf %735, %743 : vector<2x32xf32>
    %752 = arith.addf %750, %751 : vector<2x32xf32>
    %753 = math.tanh %752 : vector<2x32xf32>
    %754 = arith.mulf %749, %753 : vector<2x32xf32>
    %c0_210 = arith.constant 0 : index
    %c4_211 = arith.constant 4 : index
    %c0_212 = arith.constant 0 : index
    %755 = vector.load %arg6[%c0_210, %c4_211, %c0_212] : memref<2x8x32xf32, #tpu.memory_space<vmem>>, vector<2x1x32xf32>
    %756 = vector.shape_cast %755 : vector<2x1x32xf32> to vector<2x32xf32>
    %757 = vector.shape_cast %754 : vector<2x32xf32> to vector<2x1x32xf32>
    tpu.vector_store %arg6[%c0_210, %c4_211, %c0_212], %757 {strides = array<i32>} : memref<2x8x32xf32, #tpu.memory_space<vmem>>, vector<2x1x32xf32>,
    %758 = vector.extract_strided_slice %588 {offsets = [0, 5, 0], sizes = [2, 1, 128], strides = [1, 1, 1]} : vector<2x8x128xf32> to vector<2x1x128xf32>
    %759 = vector.shape_cast %758 : vector<2x1x128xf32> to vector<2x128xf32>
    %760 = arith.truncf %754 : vector<2x32xf32> to vector<2x32xbf16>
    %cst_213 = arith.constant dense<0.000000e+00> : vector<2x128xf32>
    %761 = tpu.matmul %760, %579, %cst_213 {dimension_numbers = #tpu.dot_dimension_numbers<[1], [0], [0], [1], [0, 0, 1, 1], [], []>} : vector<2x32xbf16>, vector<32x128xbf16>, vector<2x128xf32> -> vector<2x128xf32>
    %762 = arith.addf %759, %761 : vector<2x128xf32>
    %763 = vector.extract_strided_slice %762 {offsets = [0, 0], sizes = [2, 32], strides = [1, 1]} : vector<2x128xf32> to vector<2x32xf32>
    %764 = arith.negf %763 : vector<2x32xf32>
    %765 = math.exp %764 : vector<2x32xf32>
    %cst_214 = arith.constant 1.000000e+00 : f32
    %766 = vector.broadcast %cst_214 : f32 to vector<2x32xf32>
    %767 = arith.addf %766, %765 : vector<2x32xf32>
    %768 = arith.divf %766, %767 : vector<2x32xf32>
    %769 = vector.extract_strided_slice %762 {offsets = [0, 32], sizes = [2, 32], strides = [1, 1]} : vector<2x128xf32> to vector<2x32xf32>
    %770 = arith.negf %769 : vector<2x32xf32>
    %771 = math.exp %770 : vector<2x32xf32>
    %cst_215 = arith.constant 1.000000e+00 : f32
    %772 = vector.broadcast %cst_215 : f32 to vector<2x32xf32>
    %773 = arith.addf %772, %771 : vector<2x32xf32>
    %774 = arith.divf %772, %773 : vector<2x32xf32>
    %775 = vector.extract_strided_slice %762 {offsets = [0, 64], sizes = [2, 32], strides = [1, 1]} : vector<2x128xf32> to vector<2x32xf32>
    %776 = math.tanh %775 : vector<2x32xf32>
    %777 = vector.extract_strided_slice %762 {offsets = [0, 96], sizes = [2, 32], strides = [1, 1]} : vector<2x128xf32> to vector<2x32xf32>
    %778 = arith.negf %777 : vector<2x32xf32>
    %779 = math.exp %778 : vector<2x32xf32>
    %cst_216 = arith.constant 1.000000e+00 : f32
    %780 = vector.broadcast %cst_216 : f32 to vector<2x32xf32>
    %781 = arith.addf %780, %779 : vector<2x32xf32>
    %782 = arith.divf %780, %781 : vector<2x32xf32>
    %783 = arith.mulf %774, %752 : vector<2x32xf32>
    %784 = arith.mulf %768, %776 : vector<2x32xf32>
    %785 = arith.addf %783, %784 : vector<2x32xf32>
    %786 = math.tanh %785 : vector<2x32xf32>
    %787 = arith.mulf %782, %786 : vector<2x32xf32>
    %c0_217 = arith.constant 0 : index
    %c5_218 = arith.constant 5 : index
    %c0_219 = arith.constant 0 : index
    %788 = vector.load %arg6[%c0_217, %c5_218, %c0_219] : memref<2x8x32xf32, #tpu.memory_space<vmem>>, vector<2x1x32xf32>
    %789 = vector.shape_cast %788 : vector<2x1x32xf32> to vector<2x32xf32>
    %790 = vector.shape_cast %787 : vector<2x32xf32> to vector<2x1x32xf32>
    tpu.vector_store %arg6[%c0_217, %c5_218, %c0_219], %790 {strides = array<i32>} : memref<2x8x32xf32, #tpu.memory_space<vmem>>, vector<2x1x32xf32>,
    %791 = vector.extract_strided_slice %588 {offsets = [0, 6, 0], sizes = [2, 1, 128], strides = [1, 1, 1]} : vector<2x8x128xf32> to vector<2x1x128xf32>
    %792 = vector.shape_cast %791 : vector<2x1x128xf32> to vector<2x128xf32>
    %793 = arith.truncf %787 : vector<2x32xf32> to vector<2x32xbf16>
    %cst_220 = arith.constant dense<0.000000e+00> : vector<2x128xf32>
    %794 = tpu.matmul %793, %579, %cst_220 {dimension_numbers = #tpu.dot_dimension_numbers<[1], [0], [0], [1], [0, 0, 1, 1], [], []>} : vector<2x32xbf16>, vector<32x128xbf16>, vector<2x128xf32> -> vector<2x128xf32>
    %795 = arith.addf %792, %794 : vector<2x128xf32>
    %796 = vector.extract_strided_slice %795 {offsets = [0, 0], sizes = [2, 32], strides = [1, 1]} : vector<2x128xf32> to vector<2x32xf32>
    %797 = arith.negf %796 : vector<2x32xf32>
    %798 = math.exp %797 : vector<2x32xf32>
    %cst_221 = arith.constant 1.000000e+00 : f32
    %799 = vector.broadcast %cst_221 : f32 to vector<2x32xf32>
    %800 = arith.addf %799, %798 : vector<2x32xf32>
    %801 = arith.divf %799, %800 : vector<2x32xf32>
    %802 = vector.extract_strided_slice %795 {offsets = [0, 32], sizes = [2, 32], strides = [1, 1]} : vector<2x128xf32> to vector<2x32xf32>
    %803 = arith.negf %802 : vector<2x32xf32>
    %804 = math.exp %803 : vector<2x32xf32>
    %cst_222 = arith.constant 1.000000e+00 : f32
    %805 = vector.broadcast %cst_222 : f32 to vector<2x32xf32>
    %806 = arith.addf %805, %804 : vector<2x32xf32>
    %807 = arith.divf %805, %806 : vector<2x32xf32>
    %808 = vector.extract_strided_slice %795 {offsets = [0, 64], sizes = [2, 32], strides = [1, 1]} : vector<2x128xf32> to vector<2x32xf32>
    %809 = math.tanh %808 : vector<2x32xf32>
    %810 = vector.extract_strided_slice %795 {offsets = [0, 96], sizes = [2, 32], strides = [1, 1]} : vector<2x128xf32> to vector<2x32xf32>
    %811 = arith.negf %810 : vector<2x32xf32>
    %812 = math.exp %811 : vector<2x32xf32>
    %cst_223 = arith.constant 1.000000e+00 : f32
    %813 = vector.broadcast %cst_223 : f32 to vector<2x32xf32>
    %814 = arith.addf %813, %812 : vector<2x32xf32>
    %815 = arith.divf %813, %814 : vector<2x32xf32>
    %816 = arith.mulf %807, %785 : vector<2x32xf32>
    %817 = arith.mulf %801, %809 : vector<2x32xf32>
    %818 = arith.addf %816, %817 : vector<2x32xf32>
    %819 = math.tanh %818 : vector<2x32xf32>
    %820 = arith.mulf %815, %819 : vector<2x32xf32>
    %c0_224 = arith.constant 0 : index
    %c6_225 = arith.constant 6 : index
    %c0_226 = arith.constant 0 : index
    %821 = vector.load %arg6[%c0_224, %c6_225, %c0_226] : memref<2x8x32xf32, #tpu.memory_space<vmem>>, vector<2x1x32xf32>
    %822 = vector.shape_cast %821 : vector<2x1x32xf32> to vector<2x32xf32>
    %823 = vector.shape_cast %820 : vector<2x32xf32> to vector<2x1x32xf32>
    tpu.vector_store %arg6[%c0_224, %c6_225, %c0_226], %823 {strides = array<i32>} : memref<2x8x32xf32, #tpu.memory_space<vmem>>, vector<2x1x32xf32>,
    %824 = vector.extract_strided_slice %588 {offsets = [0, 7, 0], sizes = [2, 1, 128], strides = [1, 1, 1]} : vector<2x8x128xf32> to vector<2x1x128xf32>
    %825 = vector.shape_cast %824 : vector<2x1x128xf32> to vector<2x128xf32>
    %826 = arith.truncf %820 : vector<2x32xf32> to vector<2x32xbf16>
    %cst_227 = arith.constant dense<0.000000e+00> : vector<2x128xf32>
    %827 = tpu.matmul %826, %579, %cst_227 {dimension_numbers = #tpu.dot_dimension_numbers<[1], [0], [0], [1], [0, 0, 1, 1], [], []>} : vector<2x32xbf16>, vector<32x128xbf16>, vector<2x128xf32> -> vector<2x128xf32>
    %828 = arith.addf %825, %827 : vector<2x128xf32>
    %829 = vector.extract_strided_slice %828 {offsets = [0, 0], sizes = [2, 32], strides = [1, 1]} : vector<2x128xf32> to vector<2x32xf32>
    %830 = arith.negf %829 : vector<2x32xf32>
    %831 = math.exp %830 : vector<2x32xf32>
    %cst_228 = arith.constant 1.000000e+00 : f32
    %832 = vector.broadcast %cst_228 : f32 to vector<2x32xf32>
    %833 = arith.addf %832, %831 : vector<2x32xf32>
    %834 = arith.divf %832, %833 : vector<2x32xf32>
    %835 = vector.extract_strided_slice %828 {offsets = [0, 32], sizes = [2, 32], strides = [1, 1]} : vector<2x128xf32> to vector<2x32xf32>
    %836 = arith.negf %835 : vector<2x32xf32>
    %837 = math.exp %836 : vector<2x32xf32>
    %cst_229 = arith.constant 1.000000e+00 : f32
    %838 = vector.broadcast %cst_229 : f32 to vector<2x32xf32>
    %839 = arith.addf %838, %837 : vector<2x32xf32>
    %840 = arith.divf %838, %839 : vector<2x32xf32>
    %841 = vector.extract_strided_slice %828 {offsets = [0, 64], sizes = [2, 32], strides = [1, 1]} : vector<2x128xf32> to vector<2x32xf32>
    %842 = math.tanh %841 : vector<2x32xf32>
    %843 = vector.extract_strided_slice %828 {offsets = [0, 96], sizes = [2, 32], strides = [1, 1]} : vector<2x128xf32> to vector<2x32xf32>
    %844 = arith.negf %843 : vector<2x32xf32>
    %845 = math.exp %844 : vector<2x32xf32>
    %cst_230 = arith.constant 1.000000e+00 : f32
    %846 = vector.broadcast %cst_230 : f32 to vector<2x32xf32>
    %847 = arith.addf %846, %845 : vector<2x32xf32>
    %848 = arith.divf %846, %847 : vector<2x32xf32>
    %849 = arith.mulf %840, %818 : vector<2x32xf32>
    %850 = arith.mulf %834, %842 : vector<2x32xf32>
    %851 = arith.addf %849, %850 : vector<2x32xf32>
    %852 = math.tanh %851 : vector<2x32xf32>
    %853 = arith.mulf %848, %852 : vector<2x32xf32>
    %c0_231 = arith.constant 0 : index
    %c7_232 = arith.constant 7 : index
    %c0_233 = arith.constant 0 : index
    %854 = vector.load %arg6[%c0_231, %c7_232, %c0_233] : memref<2x8x32xf32, #tpu.memory_space<vmem>>, vector<2x1x32xf32>
    %855 = vector.shape_cast %854 : vector<2x1x32xf32> to vector<2x32xf32>
    %856 = vector.shape_cast %853 : vector<2x32xf32> to vector<2x1x32xf32>
    tpu.vector_store %arg6[%c0_231, %c7_232, %c0_233], %856 {strides = array<i32>} : memref<2x8x32xf32, #tpu.memory_space<vmem>>, vector<2x1x32xf32>,
    %c2_234 = arith.constant 2 : index
    %c0_235 = arith.constant 0 : index
    %c0_236 = arith.constant 0 : index
    %857 = vector.load %arg7[%c2_234, %c0_235, %c0_236] : memref<5x2x32xf32, #tpu.memory_space<vmem>>, vector<1x2x32xf32>
    %858 = vector.shape_cast %857 : vector<1x2x32xf32> to vector<2x32xf32>
    %859 = vector.shape_cast %853 : vector<2x32xf32> to vector<1x2x32xf32>
    tpu.vector_store %arg7[%c2_234, %c0_235, %c0_236], %859 {strides = array<i32>} : memref<5x2x32xf32, #tpu.memory_space<vmem>>, vector<1x2x32xf32>,
    %c2_237 = arith.constant 2 : index
    %c0_238 = arith.constant 0 : index
    %c0_239 = arith.constant 0 : index
    %860 = vector.load %arg8[%c2_237, %c0_238, %c0_239] : memref<5x2x32xf32, #tpu.memory_space<vmem>>, vector<1x2x32xf32>
    %861 = vector.shape_cast %860 : vector<1x2x32xf32> to vector<2x32xf32>
    %862 = vector.shape_cast %851 : vector<2x32xf32> to vector<1x2x32xf32>
    tpu.vector_store %arg8[%c2_237, %c0_238, %c0_239], %862 {strides = array<i32>} : memref<5x2x32xf32, #tpu.memory_space<vmem>>, vector<1x2x32xf32>,
    %c3_240 = arith.constant 3 : index
    %c0_241 = arith.constant 0 : index
    %c0_242 = arith.constant 0 : index
    %863 = vector.load %arg1[%c3_240, %c0_241, %c0_242] : memref<5x32x128xbf16, #tpu.memory_space<vmem>>, vector<1x32x128xbf16>
    %864 = vector.shape_cast %863 : vector<1x32x128xbf16> to vector<32x128xbf16>
    %c3_243 = arith.constant 3 : index
    %c0_244 = arith.constant 0 : index
    %c0_245 = arith.constant 0 : index
    %865 = vector.load %arg2[%c3_243, %c0_244, %c0_245] : memref<5x32x128xbf16, #tpu.memory_space<vmem>>, vector<1x32x128xbf16>
    %866 = vector.shape_cast %865 : vector<1x32x128xbf16> to vector<32x128xbf16>
    %c3_246 = arith.constant 3 : index
    %c0_247 = arith.constant 0 : index
    %c0_248 = arith.constant 0 : index
    %867 = vector.load %arg3[%c3_246, %c0_247, %c0_248] : memref<5x1x128xf32, #tpu.memory_space<vmem>>, vector<1x1x128xf32>
    %868 = vector.shape_cast %867 : vector<1x1x128xf32> to vector<1x128xf32>
    %c0_249 = arith.constant 0 : index
    %c0_250 = arith.constant 0 : index
    %c0_251 = arith.constant 0 : index
    %869 = vector.load %arg6[%c0_249, %c0_250, %c0_251] : memref<2x8x32xf32, #tpu.memory_space<vmem>>, vector<2x8x32xf32>
    %870 = vector.shape_cast %869 : vector<2x8x32xf32> to vector<16x32xf32>
    %871 = arith.truncf %870 : vector<16x32xf32> to vector<16x32xbf16>
    %cst_252 = arith.constant dense<0.000000e+00> : vector<16x128xf32>
    %872 = tpu.matmul %871, %864, %cst_252 {dimension_numbers = #tpu.dot_dimension_numbers<[1], [0], [0], [1], [0, 0, 1, 1], [], []>} : vector<16x32xbf16>, vector<32x128xbf16>, vector<16x128xf32> -> vector<16x128xf32>
    %873 = vector.broadcast %868 : vector<1x128xf32> to vector<16x128xf32>
    %874 = arith.addf %872, %873 : vector<16x128xf32>
    %875 = vector.shape_cast %874 : vector<16x128xf32> to vector<2x8x128xf32>
    %c3_253 = arith.constant 3 : index
    %c0_254 = arith.constant 0 : index
    %c0_255 = arith.constant 0 : index
    %876 = vector.load %arg4[%c3_253, %c0_254, %c0_255] : memref<5x2x32xf32, #tpu.memory_space<vmem>>, vector<1x2x32xf32>
    %877 = vector.shape_cast %876 : vector<1x2x32xf32> to vector<2x32xf32>
    %c3_256 = arith.constant 3 : index
    %c0_257 = arith.constant 0 : index
    %c0_258 = arith.constant 0 : index
    %878 = vector.load %arg5[%c3_256, %c0_257, %c0_258] : memref<5x2x32xf32, #tpu.memory_space<vmem>>, vector<1x2x32xf32>
    %879 = vector.shape_cast %878 : vector<1x2x32xf32> to vector<2x32xf32>
    %880 = vector.extract_strided_slice %875 {offsets = [0, 0, 0], sizes = [2, 1, 128], strides = [1, 1, 1]} : vector<2x8x128xf32> to vector<2x1x128xf32>
    %881 = vector.shape_cast %880 : vector<2x1x128xf32> to vector<2x128xf32>
    %882 = arith.truncf %877 : vector<2x32xf32> to vector<2x32xbf16>
    %cst_259 = arith.constant dense<0.000000e+00> : vector<2x128xf32>
    %883 = tpu.matmul %882, %866, %cst_259 {dimension_numbers = #tpu.dot_dimension_numbers<[1], [0], [0], [1], [0, 0, 1, 1], [], []>} : vector<2x32xbf16>, vector<32x128xbf16>, vector<2x128xf32> -> vector<2x128xf32>
    %884 = arith.addf %881, %883 : vector<2x128xf32>
    %885 = vector.extract_strided_slice %884 {offsets = [0, 0], sizes = [2, 32], strides = [1, 1]} : vector<2x128xf32> to vector<2x32xf32>
    %886 = arith.negf %885 : vector<2x32xf32>
    %887 = math.exp %886 : vector<2x32xf32>
    %cst_260 = arith.constant 1.000000e+00 : f32
    %888 = vector.broadcast %cst_260 : f32 to vector<2x32xf32>
    %889 = arith.addf %888, %887 : vector<2x32xf32>
    %890 = arith.divf %888, %889 : vector<2x32xf32>
    %891 = vector.extract_strided_slice %884 {offsets = [0, 32], sizes = [2, 32], strides = [1, 1]} : vector<2x128xf32> to vector<2x32xf32>
    %892 = arith.negf %891 : vector<2x32xf32>
    %893 = math.exp %892 : vector<2x32xf32>
    %cst_261 = arith.constant 1.000000e+00 : f32
    %894 = vector.broadcast %cst_261 : f32 to vector<2x32xf32>
    %895 = arith.addf %894, %893 : vector<2x32xf32>
    %896 = arith.divf %894, %895 : vector<2x32xf32>
    %897 = vector.extract_strided_slice %884 {offsets = [0, 64], sizes = [2, 32], strides = [1, 1]} : vector<2x128xf32> to vector<2x32xf32>
    %898 = math.tanh %897 : vector<2x32xf32>
    %899 = vector.extract_strided_slice %884 {offsets = [0, 96], sizes = [2, 32], strides = [1, 1]} : vector<2x128xf32> to vector<2x32xf32>
    %900 = arith.negf %899 : vector<2x32xf32>
    %901 = math.exp %900 : vector<2x32xf32>
    %cst_262 = arith.constant 1.000000e+00 : f32
    %902 = vector.broadcast %cst_262 : f32 to vector<2x32xf32>
    %903 = arith.addf %902, %901 : vector<2x32xf32>
    %904 = arith.divf %902, %903 : vector<2x32xf32>
    %905 = arith.mulf %896, %879 : vector<2x32xf32>
    %906 = arith.mulf %890, %898 : vector<2x32xf32>
    %907 = arith.addf %905, %906 : vector<2x32xf32>
    %908 = math.tanh %907 : vector<2x32xf32>
    %909 = arith.mulf %904, %908 : vector<2x32xf32>
    %c0_263 = arith.constant 0 : index
    %c0_264 = arith.constant 0 : index
    %c0_265 = arith.constant 0 : index
    %910 = vector.load %arg6[%c0_263, %c0_264, %c0_265] : memref<2x8x32xf32, #tpu.memory_space<vmem>>, vector<2x1x32xf32>
    %911 = vector.shape_cast %910 : vector<2x1x32xf32> to vector<2x32xf32>
    %912 = vector.shape_cast %909 : vector<2x32xf32> to vector<2x1x32xf32>
    tpu.vector_store %arg6[%c0_263, %c0_264, %c0_265], %912 {strides = array<i32>} : memref<2x8x32xf32, #tpu.memory_space<vmem>>, vector<2x1x32xf32>,
    %913 = vector.extract_strided_slice %875 {offsets = [0, 1, 0], sizes = [2, 1, 128], strides = [1, 1, 1]} : vector<2x8x128xf32> to vector<2x1x128xf32>
    %914 = vector.shape_cast %913 : vector<2x1x128xf32> to vector<2x128xf32>
    %915 = arith.truncf %909 : vector<2x32xf32> to vector<2x32xbf16>
    %cst_266 = arith.constant dense<0.000000e+00> : vector<2x128xf32>
    %916 = tpu.matmul %915, %866, %cst_266 {dimension_numbers = #tpu.dot_dimension_numbers<[1], [0], [0], [1], [0, 0, 1, 1], [], []>} : vector<2x32xbf16>, vector<32x128xbf16>, vector<2x128xf32> -> vector<2x128xf32>
    %917 = arith.addf %914, %916 : vector<2x128xf32>
    %918 = vector.extract_strided_slice %917 {offsets = [0, 0], sizes = [2, 32], strides = [1, 1]} : vector<2x128xf32> to vector<2x32xf32>
    %919 = arith.negf %918 : vector<2x32xf32>
    %920 = math.exp %919 : vector<2x32xf32>
    %cst_267 = arith.constant 1.000000e+00 : f32
    %921 = vector.broadcast %cst_267 : f32 to vector<2x32xf32>
    %922 = arith.addf %921, %920 : vector<2x32xf32>
    %923 = arith.divf %921, %922 : vector<2x32xf32>
    %924 = vector.extract_strided_slice %917 {offsets = [0, 32], sizes = [2, 32], strides = [1, 1]} : vector<2x128xf32> to vector<2x32xf32>
    %925 = arith.negf %924 : vector<2x32xf32>
    %926 = math.exp %925 : vector<2x32xf32>
    %cst_268 = arith.constant 1.000000e+00 : f32
    %927 = vector.broadcast %cst_268 : f32 to vector<2x32xf32>
    %928 = arith.addf %927, %926 : vector<2x32xf32>
    %929 = arith.divf %927, %928 : vector<2x32xf32>
    %930 = vector.extract_strided_slice %917 {offsets = [0, 64], sizes = [2, 32], strides = [1, 1]} : vector<2x128xf32> to vector<2x32xf32>
    %931 = math.tanh %930 : vector<2x32xf32>
    %932 = vector.extract_strided_slice %917 {offsets = [0, 96], sizes = [2, 32], strides = [1, 1]} : vector<2x128xf32> to vector<2x32xf32>
    %933 = arith.negf %932 : vector<2x32xf32>
    %934 = math.exp %933 : vector<2x32xf32>
    %cst_269 = arith.constant 1.000000e+00 : f32
    %935 = vector.broadcast %cst_269 : f32 to vector<2x32xf32>
    %936 = arith.addf %935, %934 : vector<2x32xf32>
    %937 = arith.divf %935, %936 : vector<2x32xf32>
    %938 = arith.mulf %929, %907 : vector<2x32xf32>
    %939 = arith.mulf %923, %931 : vector<2x32xf32>
    %940 = arith.addf %938, %939 : vector<2x32xf32>
    %941 = math.tanh %940 : vector<2x32xf32>
    %942 = arith.mulf %937, %941 : vector<2x32xf32>
    %c0_270 = arith.constant 0 : index
    %c1_271 = arith.constant 1 : index
    %c0_272 = arith.constant 0 : index
    %943 = vector.load %arg6[%c0_270, %c1_271, %c0_272] : memref<2x8x32xf32, #tpu.memory_space<vmem>>, vector<2x1x32xf32>
    %944 = vector.shape_cast %943 : vector<2x1x32xf32> to vector<2x32xf32>
    %945 = vector.shape_cast %942 : vector<2x32xf32> to vector<2x1x32xf32>
    tpu.vector_store %arg6[%c0_270, %c1_271, %c0_272], %945 {strides = array<i32>} : memref<2x8x32xf32, #tpu.memory_space<vmem>>, vector<2x1x32xf32>,
    %946 = vector.extract_strided_slice %875 {offsets = [0, 2, 0], sizes = [2, 1, 128], strides = [1, 1, 1]} : vector<2x8x128xf32> to vector<2x1x128xf32>
    %947 = vector.shape_cast %946 : vector<2x1x128xf32> to vector<2x128xf32>
    %948 = arith.truncf %942 : vector<2x32xf32> to vector<2x32xbf16>
    %cst_273 = arith.constant dense<0.000000e+00> : vector<2x128xf32>
    %949 = tpu.matmul %948, %866, %cst_273 {dimension_numbers = #tpu.dot_dimension_numbers<[1], [0], [0], [1], [0, 0, 1, 1], [], []>} : vector<2x32xbf16>, vector<32x128xbf16>, vector<2x128xf32> -> vector<2x128xf32>
    %950 = arith.addf %947, %949 : vector<2x128xf32>
    %951 = vector.extract_strided_slice %950 {offsets = [0, 0], sizes = [2, 32], strides = [1, 1]} : vector<2x128xf32> to vector<2x32xf32>
    %952 = arith.negf %951 : vector<2x32xf32>
    %953 = math.exp %952 : vector<2x32xf32>
    %cst_274 = arith.constant 1.000000e+00 : f32
    %954 = vector.broadcast %cst_274 : f32 to vector<2x32xf32>
    %955 = arith.addf %954, %953 : vector<2x32xf32>
    %956 = arith.divf %954, %955 : vector<2x32xf32>
    %957 = vector.extract_strided_slice %950 {offsets = [0, 32], sizes = [2, 32], strides = [1, 1]} : vector<2x128xf32> to vector<2x32xf32>
    %958 = arith.negf %957 : vector<2x32xf32>
    %959 = math.exp %958 : vector<2x32xf32>
    %cst_275 = arith.constant 1.000000e+00 : f32
    %960 = vector.broadcast %cst_275 : f32 to vector<2x32xf32>
    %961 = arith.addf %960, %959 : vector<2x32xf32>
    %962 = arith.divf %960, %961 : vector<2x32xf32>
    %963 = vector.extract_strided_slice %950 {offsets = [0, 64], sizes = [2, 32], strides = [1, 1]} : vector<2x128xf32> to vector<2x32xf32>
    %964 = math.tanh %963 : vector<2x32xf32>
    %965 = vector.extract_strided_slice %950 {offsets = [0, 96], sizes = [2, 32], strides = [1, 1]} : vector<2x128xf32> to vector<2x32xf32>
    %966 = arith.negf %965 : vector<2x32xf32>
    %967 = math.exp %966 : vector<2x32xf32>
    %cst_276 = arith.constant 1.000000e+00 : f32
    %968 = vector.broadcast %cst_276 : f32 to vector<2x32xf32>
    %969 = arith.addf %968, %967 : vector<2x32xf32>
    %970 = arith.divf %968, %969 : vector<2x32xf32>
    %971 = arith.mulf %962, %940 : vector<2x32xf32>
    %972 = arith.mulf %956, %964 : vector<2x32xf32>
    %973 = arith.addf %971, %972 : vector<2x32xf32>
    %974 = math.tanh %973 : vector<2x32xf32>
    %975 = arith.mulf %970, %974 : vector<2x32xf32>
    %c0_277 = arith.constant 0 : index
    %c2_278 = arith.constant 2 : index
    %c0_279 = arith.constant 0 : index
    %976 = vector.load %arg6[%c0_277, %c2_278, %c0_279] : memref<2x8x32xf32, #tpu.memory_space<vmem>>, vector<2x1x32xf32>
    %977 = vector.shape_cast %976 : vector<2x1x32xf32> to vector<2x32xf32>
    %978 = vector.shape_cast %975 : vector<2x32xf32> to vector<2x1x32xf32>
    tpu.vector_store %arg6[%c0_277, %c2_278, %c0_279], %978 {strides = array<i32>} : memref<2x8x32xf32, #tpu.memory_space<vmem>>, vector<2x1x32xf32>,
    %979 = vector.extract_strided_slice %875 {offsets = [0, 3, 0], sizes = [2, 1, 128], strides = [1, 1, 1]} : vector<2x8x128xf32> to vector<2x1x128xf32>
    %980 = vector.shape_cast %979 : vector<2x1x128xf32> to vector<2x128xf32>
    %981 = arith.truncf %975 : vector<2x32xf32> to vector<2x32xbf16>
    %cst_280 = arith.constant dense<0.000000e+00> : vector<2x128xf32>
    %982 = tpu.matmul %981, %866, %cst_280 {dimension_numbers = #tpu.dot_dimension_numbers<[1], [0], [0], [1], [0, 0, 1, 1], [], []>} : vector<2x32xbf16>, vector<32x128xbf16>, vector<2x128xf32> -> vector<2x128xf32>
    %983 = arith.addf %980, %982 : vector<2x128xf32>
    %984 = vector.extract_strided_slice %983 {offsets = [0, 0], sizes = [2, 32], strides = [1, 1]} : vector<2x128xf32> to vector<2x32xf32>
    %985 = arith.negf %984 : vector<2x32xf32>
    %986 = math.exp %985 : vector<2x32xf32>
    %cst_281 = arith.constant 1.000000e+00 : f32
    %987 = vector.broadcast %cst_281 : f32 to vector<2x32xf32>
    %988 = arith.addf %987, %986 : vector<2x32xf32>
    %989 = arith.divf %987, %988 : vector<2x32xf32>
    %990 = vector.extract_strided_slice %983 {offsets = [0, 32], sizes = [2, 32], strides = [1, 1]} : vector<2x128xf32> to vector<2x32xf32>
    %991 = arith.negf %990 : vector<2x32xf32>
    %992 = math.exp %991 : vector<2x32xf32>
    %cst_282 = arith.constant 1.000000e+00 : f32
    %993 = vector.broadcast %cst_282 : f32 to vector<2x32xf32>
    %994 = arith.addf %993, %992 : vector<2x32xf32>
    %995 = arith.divf %993, %994 : vector<2x32xf32>
    %996 = vector.extract_strided_slice %983 {offsets = [0, 64], sizes = [2, 32], strides = [1, 1]} : vector<2x128xf32> to vector<2x32xf32>
    %997 = math.tanh %996 : vector<2x32xf32>
    %998 = vector.extract_strided_slice %983 {offsets = [0, 96], sizes = [2, 32], strides = [1, 1]} : vector<2x128xf32> to vector<2x32xf32>
    %999 = arith.negf %998 : vector<2x32xf32>
    %1000 = math.exp %999 : vector<2x32xf32>
    %cst_283 = arith.constant 1.000000e+00 : f32
    %1001 = vector.broadcast %cst_283 : f32 to vector<2x32xf32>
    %1002 = arith.addf %1001, %1000 : vector<2x32xf32>
    %1003 = arith.divf %1001, %1002 : vector<2x32xf32>
    %1004 = arith.mulf %995, %973 : vector<2x32xf32>
    %1005 = arith.mulf %989, %997 : vector<2x32xf32>
    %1006 = arith.addf %1004, %1005 : vector<2x32xf32>
    %1007 = math.tanh %1006 : vector<2x32xf32>
    %1008 = arith.mulf %1003, %1007 : vector<2x32xf32>
    %c0_284 = arith.constant 0 : index
    %c3_285 = arith.constant 3 : index
    %c0_286 = arith.constant 0 : index
    %1009 = vector.load %arg6[%c0_284, %c3_285, %c0_286] : memref<2x8x32xf32, #tpu.memory_space<vmem>>, vector<2x1x32xf32>
    %1010 = vector.shape_cast %1009 : vector<2x1x32xf32> to vector<2x32xf32>
    %1011 = vector.shape_cast %1008 : vector<2x32xf32> to vector<2x1x32xf32>
    tpu.vector_store %arg6[%c0_284, %c3_285, %c0_286], %1011 {strides = array<i32>} : memref<2x8x32xf32, #tpu.memory_space<vmem>>, vector<2x1x32xf32>,
    %1012 = vector.extract_strided_slice %875 {offsets = [0, 4, 0], sizes = [2, 1, 128], strides = [1, 1, 1]} : vector<2x8x128xf32> to vector<2x1x128xf32>
    %1013 = vector.shape_cast %1012 : vector<2x1x128xf32> to vector<2x128xf32>
    %1014 = arith.truncf %1008 : vector<2x32xf32> to vector<2x32xbf16>
    %cst_287 = arith.constant dense<0.000000e+00> : vector<2x128xf32>
    %1015 = tpu.matmul %1014, %866, %cst_287 {dimension_numbers = #tpu.dot_dimension_numbers<[1], [0], [0], [1], [0, 0, 1, 1], [], []>} : vector<2x32xbf16>, vector<32x128xbf16>, vector<2x128xf32> -> vector<2x128xf32>
    %1016 = arith.addf %1013, %1015 : vector<2x128xf32>
    %1017 = vector.extract_strided_slice %1016 {offsets = [0, 0], sizes = [2, 32], strides = [1, 1]} : vector<2x128xf32> to vector<2x32xf32>
    %1018 = arith.negf %1017 : vector<2x32xf32>
    %1019 = math.exp %1018 : vector<2x32xf32>
    %cst_288 = arith.constant 1.000000e+00 : f32
    %1020 = vector.broadcast %cst_288 : f32 to vector<2x32xf32>
    %1021 = arith.addf %1020, %1019 : vector<2x32xf32>
    %1022 = arith.divf %1020, %1021 : vector<2x32xf32>
    %1023 = vector.extract_strided_slice %1016 {offsets = [0, 32], sizes = [2, 32], strides = [1, 1]} : vector<2x128xf32> to vector<2x32xf32>
    %1024 = arith.negf %1023 : vector<2x32xf32>
    %1025 = math.exp %1024 : vector<2x32xf32>
    %cst_289 = arith.constant 1.000000e+00 : f32
    %1026 = vector.broadcast %cst_289 : f32 to vector<2x32xf32>
    %1027 = arith.addf %1026, %1025 : vector<2x32xf32>
    %1028 = arith.divf %1026, %1027 : vector<2x32xf32>
    %1029 = vector.extract_strided_slice %1016 {offsets = [0, 64], sizes = [2, 32], strides = [1, 1]} : vector<2x128xf32> to vector<2x32xf32>
    %1030 = math.tanh %1029 : vector<2x32xf32>
    %1031 = vector.extract_strided_slice %1016 {offsets = [0, 96], sizes = [2, 32], strides = [1, 1]} : vector<2x128xf32> to vector<2x32xf32>
    %1032 = arith.negf %1031 : vector<2x32xf32>
    %1033 = math.exp %1032 : vector<2x32xf32>
    %cst_290 = arith.constant 1.000000e+00 : f32
    %1034 = vector.broadcast %cst_290 : f32 to vector<2x32xf32>
    %1035 = arith.addf %1034, %1033 : vector<2x32xf32>
    %1036 = arith.divf %1034, %1035 : vector<2x32xf32>
    %1037 = arith.mulf %1028, %1006 : vector<2x32xf32>
    %1038 = arith.mulf %1022, %1030 : vector<2x32xf32>
    %1039 = arith.addf %1037, %1038 : vector<2x32xf32>
    %1040 = math.tanh %1039 : vector<2x32xf32>
    %1041 = arith.mulf %1036, %1040 : vector<2x32xf32>
    %c0_291 = arith.constant 0 : index
    %c4_292 = arith.constant 4 : index
    %c0_293 = arith.constant 0 : index
    %1042 = vector.load %arg6[%c0_291, %c4_292, %c0_293] : memref<2x8x32xf32, #tpu.memory_space<vmem>>, vector<2x1x32xf32>
    %1043 = vector.shape_cast %1042 : vector<2x1x32xf32> to vector<2x32xf32>
    %1044 = vector.shape_cast %1041 : vector<2x32xf32> to vector<2x1x32xf32>
    tpu.vector_store %arg6[%c0_291, %c4_292, %c0_293], %1044 {strides = array<i32>} : memref<2x8x32xf32, #tpu.memory_space<vmem>>, vector<2x1x32xf32>,
    %1045 = vector.extract_strided_slice %875 {offsets = [0, 5, 0], sizes = [2, 1, 128], strides = [1, 1, 1]} : vector<2x8x128xf32> to vector<2x1x128xf32>
    %1046 = vector.shape_cast %1045 : vector<2x1x128xf32> to vector<2x128xf32>
    %1047 = arith.truncf %1041 : vector<2x32xf32> to vector<2x32xbf16>
    %cst_294 = arith.constant dense<0.000000e+00> : vector<2x128xf32>
    %1048 = tpu.matmul %1047, %866, %cst_294 {dimension_numbers = #tpu.dot_dimension_numbers<[1], [0], [0], [1], [0, 0, 1, 1], [], []>} : vector<2x32xbf16>, vector<32x128xbf16>, vector<2x128xf32> -> vector<2x128xf32>
    %1049 = arith.addf %1046, %1048 : vector<2x128xf32>
    %1050 = vector.extract_strided_slice %1049 {offsets = [0, 0], sizes = [2, 32], strides = [1, 1]} : vector<2x128xf32> to vector<2x32xf32>
    %1051 = arith.negf %1050 : vector<2x32xf32>
    %1052 = math.exp %1051 : vector<2x32xf32>
    %cst_295 = arith.constant 1.000000e+00 : f32
    %1053 = vector.broadcast %cst_295 : f32 to vector<2x32xf32>
    %1054 = arith.addf %1053, %1052 : vector<2x32xf32>
    %1055 = arith.divf %1053, %1054 : vector<2x32xf32>
    %1056 = vector.extract_strided_slice %1049 {offsets = [0, 32], sizes = [2, 32], strides = [1, 1]} : vector<2x128xf32> to vector<2x32xf32>
    %1057 = arith.negf %1056 : vector<2x32xf32>
    %1058 = math.exp %1057 : vector<2x32xf32>
    %cst_296 = arith.constant 1.000000e+00 : f32
    %1059 = vector.broadcast %cst_296 : f32 to vector<2x32xf32>
    %1060 = arith.addf %1059, %1058 : vector<2x32xf32>
    %1061 = arith.divf %1059, %1060 : vector<2x32xf32>
    %1062 = vector.extract_strided_slice %1049 {offsets = [0, 64], sizes = [2, 32], strides = [1, 1]} : vector<2x128xf32> to vector<2x32xf32>
    %1063 = math.tanh %1062 : vector<2x32xf32>
    %1064 = vector.extract_strided_slice %1049 {offsets = [0, 96], sizes = [2, 32], strides = [1, 1]} : vector<2x128xf32> to vector<2x32xf32>
    %1065 = arith.negf %1064 : vector<2x32xf32>
    %1066 = math.exp %1065 : vector<2x32xf32>
    %cst_297 = arith.constant 1.000000e+00 : f32
    %1067 = vector.broadcast %cst_297 : f32 to vector<2x32xf32>
    %1068 = arith.addf %1067, %1066 : vector<2x32xf32>
    %1069 = arith.divf %1067, %1068 : vector<2x32xf32>
    %1070 = arith.mulf %1061, %1039 : vector<2x32xf32>
    %1071 = arith.mulf %1055, %1063 : vector<2x32xf32>
    %1072 = arith.addf %1070, %1071 : vector<2x32xf32>
    %1073 = math.tanh %1072 : vector<2x32xf32>
    %1074 = arith.mulf %1069, %1073 : vector<2x32xf32>
    %c0_298 = arith.constant 0 : index
    %c5_299 = arith.constant 5 : index
    %c0_300 = arith.constant 0 : index
    %1075 = vector.load %arg6[%c0_298, %c5_299, %c0_300] : memref<2x8x32xf32, #tpu.memory_space<vmem>>, vector<2x1x32xf32>
    %1076 = vector.shape_cast %1075 : vector<2x1x32xf32> to vector<2x32xf32>
    %1077 = vector.shape_cast %1074 : vector<2x32xf32> to vector<2x1x32xf32>
    tpu.vector_store %arg6[%c0_298, %c5_299, %c0_300], %1077 {strides = array<i32>} : memref<2x8x32xf32, #tpu.memory_space<vmem>>, vector<2x1x32xf32>,
    %1078 = vector.extract_strided_slice %875 {offsets = [0, 6, 0], sizes = [2, 1, 128], strides = [1, 1, 1]} : vector<2x8x128xf32> to vector<2x1x128xf32>
    %1079 = vector.shape_cast %1078 : vector<2x1x128xf32> to vector<2x128xf32>
    %1080 = arith.truncf %1074 : vector<2x32xf32> to vector<2x32xbf16>
    %cst_301 = arith.constant dense<0.000000e+00> : vector<2x128xf32>
    %1081 = tpu.matmul %1080, %866, %cst_301 {dimension_numbers = #tpu.dot_dimension_numbers<[1], [0], [0], [1], [0, 0, 1, 1], [], []>} : vector<2x32xbf16>, vector<32x128xbf16>, vector<2x128xf32> -> vector<2x128xf32>
    %1082 = arith.addf %1079, %1081 : vector<2x128xf32>
    %1083 = vector.extract_strided_slice %1082 {offsets = [0, 0], sizes = [2, 32], strides = [1, 1]} : vector<2x128xf32> to vector<2x32xf32>
    %1084 = arith.negf %1083 : vector<2x32xf32>
    %1085 = math.exp %1084 : vector<2x32xf32>
    %cst_302 = arith.constant 1.000000e+00 : f32
    %1086 = vector.broadcast %cst_302 : f32 to vector<2x32xf32>
    %1087 = arith.addf %1086, %1085 : vector<2x32xf32>
    %1088 = arith.divf %1086, %1087 : vector<2x32xf32>
    %1089 = vector.extract_strided_slice %1082 {offsets = [0, 32], sizes = [2, 32], strides = [1, 1]} : vector<2x128xf32> to vector<2x32xf32>
    %1090 = arith.negf %1089 : vector<2x32xf32>
    %1091 = math.exp %1090 : vector<2x32xf32>
    %cst_303 = arith.constant 1.000000e+00 : f32
    %1092 = vector.broadcast %cst_303 : f32 to vector<2x32xf32>
    %1093 = arith.addf %1092, %1091 : vector<2x32xf32>
    %1094 = arith.divf %1092, %1093 : vector<2x32xf32>
    %1095 = vector.extract_strided_slice %1082 {offsets = [0, 64], sizes = [2, 32], strides = [1, 1]} : vector<2x128xf32> to vector<2x32xf32>
    %1096 = math.tanh %1095 : vector<2x32xf32>
    %1097 = vector.extract_strided_slice %1082 {offsets = [0, 96], sizes = [2, 32], strides = [1, 1]} : vector<2x128xf32> to vector<2x32xf32>
    %1098 = arith.negf %1097 : vector<2x32xf32>
    %1099 = math.exp %1098 : vector<2x32xf32>
    %cst_304 = arith.constant 1.000000e+00 : f32
    %1100 = vector.broadcast %cst_304 : f32 to vector<2x32xf32>
    %1101 = arith.addf %1100, %1099 : vector<2x32xf32>
    %1102 = arith.divf %1100, %1101 : vector<2x32xf32>
    %1103 = arith.mulf %1094, %1072 : vector<2x32xf32>
    %1104 = arith.mulf %1088, %1096 : vector<2x32xf32>
    %1105 = arith.addf %1103, %1104 : vector<2x32xf32>
    %1106 = math.tanh %1105 : vector<2x32xf32>
    %1107 = arith.mulf %1102, %1106 : vector<2x32xf32>
    %c0_305 = arith.constant 0 : index
    %c6_306 = arith.constant 6 : index
    %c0_307 = arith.constant 0 : index
    %1108 = vector.load %arg6[%c0_305, %c6_306, %c0_307] : memref<2x8x32xf32, #tpu.memory_space<vmem>>, vector<2x1x32xf32>
    %1109 = vector.shape_cast %1108 : vector<2x1x32xf32> to vector<2x32xf32>
    %1110 = vector.shape_cast %1107 : vector<2x32xf32> to vector<2x1x32xf32>
    tpu.vector_store %arg6[%c0_305, %c6_306, %c0_307], %1110 {strides = array<i32>} : memref<2x8x32xf32, #tpu.memory_space<vmem>>, vector<2x1x32xf32>,
    %1111 = vector.extract_strided_slice %875 {offsets = [0, 7, 0], sizes = [2, 1, 128], strides = [1, 1, 1]} : vector<2x8x128xf32> to vector<2x1x128xf32>
    %1112 = vector.shape_cast %1111 : vector<2x1x128xf32> to vector<2x128xf32>
    %1113 = arith.truncf %1107 : vector<2x32xf32> to vector<2x32xbf16>
    %cst_308 = arith.constant dense<0.000000e+00> : vector<2x128xf32>
    %1114 = tpu.matmul %1113, %866, %cst_308 {dimension_numbers = #tpu.dot_dimension_numbers<[1], [0], [0], [1], [0, 0, 1, 1], [], []>} : vector<2x32xbf16>, vector<32x128xbf16>, vector<2x128xf32> -> vector<2x128xf32>
    %1115 = arith.addf %1112, %1114 : vector<2x128xf32>
    %1116 = vector.extract_strided_slice %1115 {offsets = [0, 0], sizes = [2, 32], strides = [1, 1]} : vector<2x128xf32> to vector<2x32xf32>
    %1117 = arith.negf %1116 : vector<2x32xf32>
    %1118 = math.exp %1117 : vector<2x32xf32>
    %cst_309 = arith.constant 1.000000e+00 : f32
    %1119 = vector.broadcast %cst_309 : f32 to vector<2x32xf32>
    %1120 = arith.addf %1119, %1118 : vector<2x32xf32>
    %1121 = arith.divf %1119, %1120 : vector<2x32xf32>
    %1122 = vector.extract_strided_slice %1115 {offsets = [0, 32], sizes = [2, 32], strides = [1, 1]} : vector<2x128xf32> to vector<2x32xf32>
    %1123 = arith.negf %1122 : vector<2x32xf32>
    %1124 = math.exp %1123 : vector<2x32xf32>
    %cst_310 = arith.constant 1.000000e+00 : f32
    %1125 = vector.broadcast %cst_310 : f32 to vector<2x32xf32>
    %1126 = arith.addf %1125, %1124 : vector<2x32xf32>
    %1127 = arith.divf %1125, %1126 : vector<2x32xf32>
    %1128 = vector.extract_strided_slice %1115 {offsets = [0, 64], sizes = [2, 32], strides = [1, 1]} : vector<2x128xf32> to vector<2x32xf32>
    %1129 = math.tanh %1128 : vector<2x32xf32>
    %1130 = vector.extract_strided_slice %1115 {offsets = [0, 96], sizes = [2, 32], strides = [1, 1]} : vector<2x128xf32> to vector<2x32xf32>
    %1131 = arith.negf %1130 : vector<2x32xf32>
    %1132 = math.exp %1131 : vector<2x32xf32>
    %cst_311 = arith.constant 1.000000e+00 : f32
    %1133 = vector.broadcast %cst_311 : f32 to vector<2x32xf32>
    %1134 = arith.addf %1133, %1132 : vector<2x32xf32>
    %1135 = arith.divf %1133, %1134 : vector<2x32xf32>
    %1136 = arith.mulf %1127, %1105 : vector<2x32xf32>
    %1137 = arith.mulf %1121, %1129 : vector<2x32xf32>
    %1138 = arith.addf %1136, %1137 : vector<2x32xf32>
    %1139 = math.tanh %1138 : vector<2x32xf32>
    %1140 = arith.mulf %1135, %1139 : vector<2x32xf32>
    %c0_312 = arith.constant 0 : index
    %c7_313 = arith.constant 7 : index
    %c0_314 = arith.constant 0 : index
    %1141 = vector.load %arg6[%c0_312, %c7_313, %c0_314] : memref<2x8x32xf32, #tpu.memory_space<vmem>>, vector<2x1x32xf32>
    %1142 = vector.shape_cast %1141 : vector<2x1x32xf32> to vector<2x32xf32>
    %1143 = vector.shape_cast %1140 : vector<2x32xf32> to vector<2x1x32xf32>
    tpu.vector_store %arg6[%c0_312, %c7_313, %c0_314], %1143 {strides = array<i32>} : memref<2x8x32xf32, #tpu.memory_space<vmem>>, vector<2x1x32xf32>,
    %c3_315 = arith.constant 3 : index
    %c0_316 = arith.constant 0 : index
    %c0_317 = arith.constant 0 : index
    %1144 = vector.load %arg7[%c3_315, %c0_316, %c0_317] : memref<5x2x32xf32, #tpu.memory_space<vmem>>, vector<1x2x32xf32>
    %1145 = vector.shape_cast %1144 : vector<1x2x32xf32> to vector<2x32xf32>
    %1146 = vector.shape_cast %1140 : vector<2x32xf32> to vector<1x2x32xf32>
    tpu.vector_store %arg7[%c3_315, %c0_316, %c0_317], %1146 {strides = array<i32>} : memref<5x2x32xf32, #tpu.memory_space<vmem>>, vector<1x2x32xf32>,
    %c3_318 = arith.constant 3 : index
    %c0_319 = arith.constant 0 : index
    %c0_320 = arith.constant 0 : index
    %1147 = vector.load %arg8[%c3_318, %c0_319, %c0_320] : memref<5x2x32xf32, #tpu.memory_space<vmem>>, vector<1x2x32xf32>
    %1148 = vector.shape_cast %1147 : vector<1x2x32xf32> to vector<2x32xf32>
    %1149 = vector.shape_cast %1138 : vector<2x32xf32> to vector<1x2x32xf32>
    tpu.vector_store %arg8[%c3_318, %c0_319, %c0_320], %1149 {strides = array<i32>} : memref<5x2x32xf32, #tpu.memory_space<vmem>>, vector<1x2x32xf32>,
    %c4_321 = arith.constant 4 : index
    %c0_322 = arith.constant 0 : index
    %c0_323 = arith.constant 0 : index
    %1150 = vector.load %arg1[%c4_321, %c0_322, %c0_323] : memref<5x32x128xbf16, #tpu.memory_space<vmem>>, vector<1x32x128xbf16>
    %1151 = vector.shape_cast %1150 : vector<1x32x128xbf16> to vector<32x128xbf16>
    %c4_324 = arith.constant 4 : index
    %c0_325 = arith.constant 0 : index
    %c0_326 = arith.constant 0 : index
    %1152 = vector.load %arg2[%c4_324, %c0_325, %c0_326] : memref<5x32x128xbf16, #tpu.memory_space<vmem>>, vector<1x32x128xbf16>
    %1153 = vector.shape_cast %1152 : vector<1x32x128xbf16> to vector<32x128xbf16>
    %c4_327 = arith.constant 4 : index
    %c0_328 = arith.constant 0 : index
    %c0_329 = arith.constant 0 : index
    %1154 = vector.load %arg3[%c4_327, %c0_328, %c0_329] : memref<5x1x128xf32, #tpu.memory_space<vmem>>, vector<1x1x128xf32>
    %1155 = vector.shape_cast %1154 : vector<1x1x128xf32> to vector<1x128xf32>
    %c0_330 = arith.constant 0 : index
    %c0_331 = arith.constant 0 : index
    %c0_332 = arith.constant 0 : index
    %1156 = vector.load %arg6[%c0_330, %c0_331, %c0_332] : memref<2x8x32xf32, #tpu.memory_space<vmem>>, vector<2x8x32xf32>
    %1157 = vector.shape_cast %1156 : vector<2x8x32xf32> to vector<16x32xf32>
    %1158 = arith.truncf %1157 : vector<16x32xf32> to vector<16x32xbf16>
    %cst_333 = arith.constant dense<0.000000e+00> : vector<16x128xf32>
    %1159 = tpu.matmul %1158, %1151, %cst_333 {dimension_numbers = #tpu.dot_dimension_numbers<[1], [0], [0], [1], [0, 0, 1, 1], [], []>} : vector<16x32xbf16>, vector<32x128xbf16>, vector<16x128xf32> -> vector<16x128xf32>
    %1160 = vector.broadcast %1155 : vector<1x128xf32> to vector<16x128xf32>
    %1161 = arith.addf %1159, %1160 : vector<16x128xf32>
    %1162 = vector.shape_cast %1161 : vector<16x128xf32> to vector<2x8x128xf32>
    %c4_334 = arith.constant 4 : index
    %c0_335 = arith.constant 0 : index
    %c0_336 = arith.constant 0 : index
    %1163 = vector.load %arg4[%c4_334, %c0_335, %c0_336] : memref<5x2x32xf32, #tpu.memory_space<vmem>>, vector<1x2x32xf32>
    %1164 = vector.shape_cast %1163 : vector<1x2x32xf32> to vector<2x32xf32>
    %c4_337 = arith.constant 4 : index
    %c0_338 = arith.constant 0 : index
    %c0_339 = arith.constant 0 : index
    %1165 = vector.load %arg5[%c4_337, %c0_338, %c0_339] : memref<5x2x32xf32, #tpu.memory_space<vmem>>, vector<1x2x32xf32>
    %1166 = vector.shape_cast %1165 : vector<1x2x32xf32> to vector<2x32xf32>
    %1167 = vector.extract_strided_slice %1162 {offsets = [0, 0, 0], sizes = [2, 1, 128], strides = [1, 1, 1]} : vector<2x8x128xf32> to vector<2x1x128xf32>
    %1168 = vector.shape_cast %1167 : vector<2x1x128xf32> to vector<2x128xf32>
    %1169 = arith.truncf %1164 : vector<2x32xf32> to vector<2x32xbf16>
    %cst_340 = arith.constant dense<0.000000e+00> : vector<2x128xf32>
    %1170 = tpu.matmul %1169, %1153, %cst_340 {dimension_numbers = #tpu.dot_dimension_numbers<[1], [0], [0], [1], [0, 0, 1, 1], [], []>} : vector<2x32xbf16>, vector<32x128xbf16>, vector<2x128xf32> -> vector<2x128xf32>
    %1171 = arith.addf %1168, %1170 : vector<2x128xf32>
    %1172 = vector.extract_strided_slice %1171 {offsets = [0, 0], sizes = [2, 32], strides = [1, 1]} : vector<2x128xf32> to vector<2x32xf32>
    %1173 = arith.negf %1172 : vector<2x32xf32>
    %1174 = math.exp %1173 : vector<2x32xf32>
    %cst_341 = arith.constant 1.000000e+00 : f32
    %1175 = vector.broadcast %cst_341 : f32 to vector<2x32xf32>
    %1176 = arith.addf %1175, %1174 : vector<2x32xf32>
    %1177 = arith.divf %1175, %1176 : vector<2x32xf32>
    %1178 = vector.extract_strided_slice %1171 {offsets = [0, 32], sizes = [2, 32], strides = [1, 1]} : vector<2x128xf32> to vector<2x32xf32>
    %1179 = arith.negf %1178 : vector<2x32xf32>
    %1180 = math.exp %1179 : vector<2x32xf32>
    %cst_342 = arith.constant 1.000000e+00 : f32
    %1181 = vector.broadcast %cst_342 : f32 to vector<2x32xf32>
    %1182 = arith.addf %1181, %1180 : vector<2x32xf32>
    %1183 = arith.divf %1181, %1182 : vector<2x32xf32>
    %1184 = vector.extract_strided_slice %1171 {offsets = [0, 64], sizes = [2, 32], strides = [1, 1]} : vector<2x128xf32> to vector<2x32xf32>
    %1185 = math.tanh %1184 : vector<2x32xf32>
    %1186 = vector.extract_strided_slice %1171 {offsets = [0, 96], sizes = [2, 32], strides = [1, 1]} : vector<2x128xf32> to vector<2x32xf32>
    %1187 = arith.negf %1186 : vector<2x32xf32>
    %1188 = math.exp %1187 : vector<2x32xf32>
    %cst_343 = arith.constant 1.000000e+00 : f32
    %1189 = vector.broadcast %cst_343 : f32 to vector<2x32xf32>
    %1190 = arith.addf %1189, %1188 : vector<2x32xf32>
    %1191 = arith.divf %1189, %1190 : vector<2x32xf32>
    %1192 = arith.mulf %1183, %1166 : vector<2x32xf32>
    %1193 = arith.mulf %1177, %1185 : vector<2x32xf32>
    %1194 = arith.addf %1192, %1193 : vector<2x32xf32>
    %1195 = math.tanh %1194 : vector<2x32xf32>
    %1196 = arith.mulf %1191, %1195 : vector<2x32xf32>
    %c0_344 = arith.constant 0 : index
    %c0_345 = arith.constant 0 : index
    %c0_346 = arith.constant 0 : index
    %1197 = vector.load %arg6[%c0_344, %c0_345, %c0_346] : memref<2x8x32xf32, #tpu.memory_space<vmem>>, vector<2x1x32xf32>
    %1198 = vector.shape_cast %1197 : vector<2x1x32xf32> to vector<2x32xf32>
    %1199 = vector.shape_cast %1196 : vector<2x32xf32> to vector<2x1x32xf32>
    tpu.vector_store %arg6[%c0_344, %c0_345, %c0_346], %1199 {strides = array<i32>} : memref<2x8x32xf32, #tpu.memory_space<vmem>>, vector<2x1x32xf32>,
    %1200 = vector.extract_strided_slice %1162 {offsets = [0, 1, 0], sizes = [2, 1, 128], strides = [1, 1, 1]} : vector<2x8x128xf32> to vector<2x1x128xf32>
    %1201 = vector.shape_cast %1200 : vector<2x1x128xf32> to vector<2x128xf32>
    %1202 = arith.truncf %1196 : vector<2x32xf32> to vector<2x32xbf16>
    %cst_347 = arith.constant dense<0.000000e+00> : vector<2x128xf32>
    %1203 = tpu.matmul %1202, %1153, %cst_347 {dimension_numbers = #tpu.dot_dimension_numbers<[1], [0], [0], [1], [0, 0, 1, 1], [], []>} : vector<2x32xbf16>, vector<32x128xbf16>, vector<2x128xf32> -> vector<2x128xf32>
    %1204 = arith.addf %1201, %1203 : vector<2x128xf32>
    %1205 = vector.extract_strided_slice %1204 {offsets = [0, 0], sizes = [2, 32], strides = [1, 1]} : vector<2x128xf32> to vector<2x32xf32>
    %1206 = arith.negf %1205 : vector<2x32xf32>
    %1207 = math.exp %1206 : vector<2x32xf32>
    %cst_348 = arith.constant 1.000000e+00 : f32
    %1208 = vector.broadcast %cst_348 : f32 to vector<2x32xf32>
    %1209 = arith.addf %1208, %1207 : vector<2x32xf32>
    %1210 = arith.divf %1208, %1209 : vector<2x32xf32>
    %1211 = vector.extract_strided_slice %1204 {offsets = [0, 32], sizes = [2, 32], strides = [1, 1]} : vector<2x128xf32> to vector<2x32xf32>
    %1212 = arith.negf %1211 : vector<2x32xf32>
    %1213 = math.exp %1212 : vector<2x32xf32>
    %cst_349 = arith.constant 1.000000e+00 : f32
    %1214 = vector.broadcast %cst_349 : f32 to vector<2x32xf32>
    %1215 = arith.addf %1214, %1213 : vector<2x32xf32>
    %1216 = arith.divf %1214, %1215 : vector<2x32xf32>
    %1217 = vector.extract_strided_slice %1204 {offsets = [0, 64], sizes = [2, 32], strides = [1, 1]} : vector<2x128xf32> to vector<2x32xf32>
    %1218 = math.tanh %1217 : vector<2x32xf32>
    %1219 = vector.extract_strided_slice %1204 {offsets = [0, 96], sizes = [2, 32], strides = [1, 1]} : vector<2x128xf32> to vector<2x32xf32>
    %1220 = arith.negf %1219 : vector<2x32xf32>
    %1221 = math.exp %1220 : vector<2x32xf32>
    %cst_350 = arith.constant 1.000000e+00 : f32
    %1222 = vector.broadcast %cst_350 : f32 to vector<2x32xf32>
    %1223 = arith.addf %1222, %1221 : vector<2x32xf32>
    %1224 = arith.divf %1222, %1223 : vector<2x32xf32>
    %1225 = arith.mulf %1216, %1194 : vector<2x32xf32>
    %1226 = arith.mulf %1210, %1218 : vector<2x32xf32>
    %1227 = arith.addf %1225, %1226 : vector<2x32xf32>
    %1228 = math.tanh %1227 : vector<2x32xf32>
    %1229 = arith.mulf %1224, %1228 : vector<2x32xf32>
    %c0_351 = arith.constant 0 : index
    %c1_352 = arith.constant 1 : index
    %c0_353 = arith.constant 0 : index
    %1230 = vector.load %arg6[%c0_351, %c1_352, %c0_353] : memref<2x8x32xf32, #tpu.memory_space<vmem>>, vector<2x1x32xf32>
    %1231 = vector.shape_cast %1230 : vector<2x1x32xf32> to vector<2x32xf32>
    %1232 = vector.shape_cast %1229 : vector<2x32xf32> to vector<2x1x32xf32>
    tpu.vector_store %arg6[%c0_351, %c1_352, %c0_353], %1232 {strides = array<i32>} : memref<2x8x32xf32, #tpu.memory_space<vmem>>, vector<2x1x32xf32>,
    %1233 = vector.extract_strided_slice %1162 {offsets = [0, 2, 0], sizes = [2, 1, 128], strides = [1, 1, 1]} : vector<2x8x128xf32> to vector<2x1x128xf32>
    %1234 = vector.shape_cast %1233 : vector<2x1x128xf32> to vector<2x128xf32>
    %1235 = arith.truncf %1229 : vector<2x32xf32> to vector<2x32xbf16>
    %cst_354 = arith.constant dense<0.000000e+00> : vector<2x128xf32>
    %1236 = tpu.matmul %1235, %1153, %cst_354 {dimension_numbers = #tpu.dot_dimension_numbers<[1], [0], [0], [1], [0, 0, 1, 1], [], []>} : vector<2x32xbf16>, vector<32x128xbf16>, vector<2x128xf32> -> vector<2x128xf32>
    %1237 = arith.addf %1234, %1236 : vector<2x128xf32>
    %1238 = vector.extract_strided_slice %1237 {offsets = [0, 0], sizes = [2, 32], strides = [1, 1]} : vector<2x128xf32> to vector<2x32xf32>
    %1239 = arith.negf %1238 : vector<2x32xf32>
    %1240 = math.exp %1239 : vector<2x32xf32>
    %cst_355 = arith.constant 1.000000e+00 : f32
    %1241 = vector.broadcast %cst_355 : f32 to vector<2x32xf32>
    %1242 = arith.addf %1241, %1240 : vector<2x32xf32>
    %1243 = arith.divf %1241, %1242 : vector<2x32xf32>
    %1244 = vector.extract_strided_slice %1237 {offsets = [0, 32], sizes = [2, 32], strides = [1, 1]} : vector<2x128xf32> to vector<2x32xf32>
    %1245 = arith.negf %1244 : vector<2x32xf32>
    %1246 = math.exp %1245 : vector<2x32xf32>
    %cst_356 = arith.constant 1.000000e+00 : f32
    %1247 = vector.broadcast %cst_356 : f32 to vector<2x32xf32>
    %1248 = arith.addf %1247, %1246 : vector<2x32xf32>
    %1249 = arith.divf %1247, %1248 : vector<2x32xf32>
    %1250 = vector.extract_strided_slice %1237 {offsets = [0, 64], sizes = [2, 32], strides = [1, 1]} : vector<2x128xf32> to vector<2x32xf32>
    %1251 = math.tanh %1250 : vector<2x32xf32>
    %1252 = vector.extract_strided_slice %1237 {offsets = [0, 96], sizes = [2, 32], strides = [1, 1]} : vector<2x128xf32> to vector<2x32xf32>
    %1253 = arith.negf %1252 : vector<2x32xf32>
    %1254 = math.exp %1253 : vector<2x32xf32>
    %cst_357 = arith.constant 1.000000e+00 : f32
    %1255 = vector.broadcast %cst_357 : f32 to vector<2x32xf32>
    %1256 = arith.addf %1255, %1254 : vector<2x32xf32>
    %1257 = arith.divf %1255, %1256 : vector<2x32xf32>
    %1258 = arith.mulf %1249, %1227 : vector<2x32xf32>
    %1259 = arith.mulf %1243, %1251 : vector<2x32xf32>
    %1260 = arith.addf %1258, %1259 : vector<2x32xf32>
    %1261 = math.tanh %1260 : vector<2x32xf32>
    %1262 = arith.mulf %1257, %1261 : vector<2x32xf32>
    %c0_358 = arith.constant 0 : index
    %c2_359 = arith.constant 2 : index
    %c0_360 = arith.constant 0 : index
    %1263 = vector.load %arg6[%c0_358, %c2_359, %c0_360] : memref<2x8x32xf32, #tpu.memory_space<vmem>>, vector<2x1x32xf32>
    %1264 = vector.shape_cast %1263 : vector<2x1x32xf32> to vector<2x32xf32>
    %1265 = vector.shape_cast %1262 : vector<2x32xf32> to vector<2x1x32xf32>
    tpu.vector_store %arg6[%c0_358, %c2_359, %c0_360], %1265 {strides = array<i32>} : memref<2x8x32xf32, #tpu.memory_space<vmem>>, vector<2x1x32xf32>,
    %1266 = vector.extract_strided_slice %1162 {offsets = [0, 3, 0], sizes = [2, 1, 128], strides = [1, 1, 1]} : vector<2x8x128xf32> to vector<2x1x128xf32>
    %1267 = vector.shape_cast %1266 : vector<2x1x128xf32> to vector<2x128xf32>
    %1268 = arith.truncf %1262 : vector<2x32xf32> to vector<2x32xbf16>
    %cst_361 = arith.constant dense<0.000000e+00> : vector<2x128xf32>
    %1269 = tpu.matmul %1268, %1153, %cst_361 {dimension_numbers = #tpu.dot_dimension_numbers<[1], [0], [0], [1], [0, 0, 1, 1], [], []>} : vector<2x32xbf16>, vector<32x128xbf16>, vector<2x128xf32> -> vector<2x128xf32>
    %1270 = arith.addf %1267, %1269 : vector<2x128xf32>
    %1271 = vector.extract_strided_slice %1270 {offsets = [0, 0], sizes = [2, 32], strides = [1, 1]} : vector<2x128xf32> to vector<2x32xf32>
    %1272 = arith.negf %1271 : vector<2x32xf32>
    %1273 = math.exp %1272 : vector<2x32xf32>
    %cst_362 = arith.constant 1.000000e+00 : f32
    %1274 = vector.broadcast %cst_362 : f32 to vector<2x32xf32>
    %1275 = arith.addf %1274, %1273 : vector<2x32xf32>
    %1276 = arith.divf %1274, %1275 : vector<2x32xf32>
    %1277 = vector.extract_strided_slice %1270 {offsets = [0, 32], sizes = [2, 32], strides = [1, 1]} : vector<2x128xf32> to vector<2x32xf32>
    %1278 = arith.negf %1277 : vector<2x32xf32>
    %1279 = math.exp %1278 : vector<2x32xf32>
    %cst_363 = arith.constant 1.000000e+00 : f32
    %1280 = vector.broadcast %cst_363 : f32 to vector<2x32xf32>
    %1281 = arith.addf %1280, %1279 : vector<2x32xf32>
    %1282 = arith.divf %1280, %1281 : vector<2x32xf32>
    %1283 = vector.extract_strided_slice %1270 {offsets = [0, 64], sizes = [2, 32], strides = [1, 1]} : vector<2x128xf32> to vector<2x32xf32>
    %1284 = math.tanh %1283 : vector<2x32xf32>
    %1285 = vector.extract_strided_slice %1270 {offsets = [0, 96], sizes = [2, 32], strides = [1, 1]} : vector<2x128xf32> to vector<2x32xf32>
    %1286 = arith.negf %1285 : vector<2x32xf32>
    %1287 = math.exp %1286 : vector<2x32xf32>
    %cst_364 = arith.constant 1.000000e+00 : f32
    %1288 = vector.broadcast %cst_364 : f32 to vector<2x32xf32>
    %1289 = arith.addf %1288, %1287 : vector<2x32xf32>
    %1290 = arith.divf %1288, %1289 : vector<2x32xf32>
    %1291 = arith.mulf %1282, %1260 : vector<2x32xf32>
    %1292 = arith.mulf %1276, %1284 : vector<2x32xf32>
    %1293 = arith.addf %1291, %1292 : vector<2x32xf32>
    %1294 = math.tanh %1293 : vector<2x32xf32>
    %1295 = arith.mulf %1290, %1294 : vector<2x32xf32>
    %c0_365 = arith.constant 0 : index
    %c3_366 = arith.constant 3 : index
    %c0_367 = arith.constant 0 : index
    %1296 = vector.load %arg6[%c0_365, %c3_366, %c0_367] : memref<2x8x32xf32, #tpu.memory_space<vmem>>, vector<2x1x32xf32>
    %1297 = vector.shape_cast %1296 : vector<2x1x32xf32> to vector<2x32xf32>
    %1298 = vector.shape_cast %1295 : vector<2x32xf32> to vector<2x1x32xf32>
    tpu.vector_store %arg6[%c0_365, %c3_366, %c0_367], %1298 {strides = array<i32>} : memref<2x8x32xf32, #tpu.memory_space<vmem>>, vector<2x1x32xf32>,
    %1299 = vector.extract_strided_slice %1162 {offsets = [0, 4, 0], sizes = [2, 1, 128], strides = [1, 1, 1]} : vector<2x8x128xf32> to vector<2x1x128xf32>
    %1300 = vector.shape_cast %1299 : vector<2x1x128xf32> to vector<2x128xf32>
    %1301 = arith.truncf %1295 : vector<2x32xf32> to vector<2x32xbf16>
    %cst_368 = arith.constant dense<0.000000e+00> : vector<2x128xf32>
    %1302 = tpu.matmul %1301, %1153, %cst_368 {dimension_numbers = #tpu.dot_dimension_numbers<[1], [0], [0], [1], [0, 0, 1, 1], [], []>} : vector<2x32xbf16>, vector<32x128xbf16>, vector<2x128xf32> -> vector<2x128xf32>
    %1303 = arith.addf %1300, %1302 : vector<2x128xf32>
    %1304 = vector.extract_strided_slice %1303 {offsets = [0, 0], sizes = [2, 32], strides = [1, 1]} : vector<2x128xf32> to vector<2x32xf32>
    %1305 = arith.negf %1304 : vector<2x32xf32>
    %1306 = math.exp %1305 : vector<2x32xf32>
    %cst_369 = arith.constant 1.000000e+00 : f32
    %1307 = vector.broadcast %cst_369 : f32 to vector<2x32xf32>
    %1308 = arith.addf %1307, %1306 : vector<2x32xf32>
    %1309 = arith.divf %1307, %1308 : vector<2x32xf32>
    %1310 = vector.extract_strided_slice %1303 {offsets = [0, 32], sizes = [2, 32], strides = [1, 1]} : vector<2x128xf32> to vector<2x32xf32>
    %1311 = arith.negf %1310 : vector<2x32xf32>
    %1312 = math.exp %1311 : vector<2x32xf32>
    %cst_370 = arith.constant 1.000000e+00 : f32
    %1313 = vector.broadcast %cst_370 : f32 to vector<2x32xf32>
    %1314 = arith.addf %1313, %1312 : vector<2x32xf32>
    %1315 = arith.divf %1313, %1314 : vector<2x32xf32>
    %1316 = vector.extract_strided_slice %1303 {offsets = [0, 64], sizes = [2, 32], strides = [1, 1]} : vector<2x128xf32> to vector<2x32xf32>
    %1317 = math.tanh %1316 : vector<2x32xf32>
    %1318 = vector.extract_strided_slice %1303 {offsets = [0, 96], sizes = [2, 32], strides = [1, 1]} : vector<2x128xf32> to vector<2x32xf32>
    %1319 = arith.negf %1318 : vector<2x32xf32>
    %1320 = math.exp %1319 : vector<2x32xf32>
    %cst_371 = arith.constant 1.000000e+00 : f32
    %1321 = vector.broadcast %cst_371 : f32 to vector<2x32xf32>
    %1322 = arith.addf %1321, %1320 : vector<2x32xf32>
    %1323 = arith.divf %1321, %1322 : vector<2x32xf32>
    %1324 = arith.mulf %1315, %1293 : vector<2x32xf32>
    %1325 = arith.mulf %1309, %1317 : vector<2x32xf32>
    %1326 = arith.addf %1324, %1325 : vector<2x32xf32>
    %1327 = math.tanh %1326 : vector<2x32xf32>
    %1328 = arith.mulf %1323, %1327 : vector<2x32xf32>
    %c0_372 = arith.constant 0 : index
    %c4_373 = arith.constant 4 : index
    %c0_374 = arith.constant 0 : index
    %1329 = vector.load %arg6[%c0_372, %c4_373, %c0_374] : memref<2x8x32xf32, #tpu.memory_space<vmem>>, vector<2x1x32xf32>
    %1330 = vector.shape_cast %1329 : vector<2x1x32xf32> to vector<2x32xf32>
    %1331 = vector.shape_cast %1328 : vector<2x32xf32> to vector<2x1x32xf32>
    tpu.vector_store %arg6[%c0_372, %c4_373, %c0_374], %1331 {strides = array<i32>} : memref<2x8x32xf32, #tpu.memory_space<vmem>>, vector<2x1x32xf32>,
    %1332 = vector.extract_strided_slice %1162 {offsets = [0, 5, 0], sizes = [2, 1, 128], strides = [1, 1, 1]} : vector<2x8x128xf32> to vector<2x1x128xf32>
    %1333 = vector.shape_cast %1332 : vector<2x1x128xf32> to vector<2x128xf32>
    %1334 = arith.truncf %1328 : vector<2x32xf32> to vector<2x32xbf16>
    %cst_375 = arith.constant dense<0.000000e+00> : vector<2x128xf32>
    %1335 = tpu.matmul %1334, %1153, %cst_375 {dimension_numbers = #tpu.dot_dimension_numbers<[1], [0], [0], [1], [0, 0, 1, 1], [], []>} : vector<2x32xbf16>, vector<32x128xbf16>, vector<2x128xf32> -> vector<2x128xf32>
    %1336 = arith.addf %1333, %1335 : vector<2x128xf32>
    %1337 = vector.extract_strided_slice %1336 {offsets = [0, 0], sizes = [2, 32], strides = [1, 1]} : vector<2x128xf32> to vector<2x32xf32>
    %1338 = arith.negf %1337 : vector<2x32xf32>
    %1339 = math.exp %1338 : vector<2x32xf32>
    %cst_376 = arith.constant 1.000000e+00 : f32
    %1340 = vector.broadcast %cst_376 : f32 to vector<2x32xf32>
    %1341 = arith.addf %1340, %1339 : vector<2x32xf32>
    %1342 = arith.divf %1340, %1341 : vector<2x32xf32>
    %1343 = vector.extract_strided_slice %1336 {offsets = [0, 32], sizes = [2, 32], strides = [1, 1]} : vector<2x128xf32> to vector<2x32xf32>
    %1344 = arith.negf %1343 : vector<2x32xf32>
    %1345 = math.exp %1344 : vector<2x32xf32>
    %cst_377 = arith.constant 1.000000e+00 : f32
    %1346 = vector.broadcast %cst_377 : f32 to vector<2x32xf32>
    %1347 = arith.addf %1346, %1345 : vector<2x32xf32>
    %1348 = arith.divf %1346, %1347 : vector<2x32xf32>
    %1349 = vector.extract_strided_slice %1336 {offsets = [0, 64], sizes = [2, 32], strides = [1, 1]} : vector<2x128xf32> to vector<2x32xf32>
    %1350 = math.tanh %1349 : vector<2x32xf32>
    %1351 = vector.extract_strided_slice %1336 {offsets = [0, 96], sizes = [2, 32], strides = [1, 1]} : vector<2x128xf32> to vector<2x32xf32>
    %1352 = arith.negf %1351 : vector<2x32xf32>
    %1353 = math.exp %1352 : vector<2x32xf32>
    %cst_378 = arith.constant 1.000000e+00 : f32
    %1354 = vector.broadcast %cst_378 : f32 to vector<2x32xf32>
    %1355 = arith.addf %1354, %1353 : vector<2x32xf32>
    %1356 = arith.divf %1354, %1355 : vector<2x32xf32>
    %1357 = arith.mulf %1348, %1326 : vector<2x32xf32>
    %1358 = arith.mulf %1342, %1350 : vector<2x32xf32>
    %1359 = arith.addf %1357, %1358 : vector<2x32xf32>
    %1360 = math.tanh %1359 : vector<2x32xf32>
    %1361 = arith.mulf %1356, %1360 : vector<2x32xf32>
    %c0_379 = arith.constant 0 : index
    %c5_380 = arith.constant 5 : index
    %c0_381 = arith.constant 0 : index
    %1362 = vector.load %arg6[%c0_379, %c5_380, %c0_381] : memref<2x8x32xf32, #tpu.memory_space<vmem>>, vector<2x1x32xf32>
    %1363 = vector.shape_cast %1362 : vector<2x1x32xf32> to vector<2x32xf32>
    %1364 = vector.shape_cast %1361 : vector<2x32xf32> to vector<2x1x32xf32>
    tpu.vector_store %arg6[%c0_379, %c5_380, %c0_381], %1364 {strides = array<i32>} : memref<2x8x32xf32, #tpu.memory_space<vmem>>, vector<2x1x32xf32>,
    %1365 = vector.extract_strided_slice %1162 {offsets = [0, 6, 0], sizes = [2, 1, 128], strides = [1, 1, 1]} : vector<2x8x128xf32> to vector<2x1x128xf32>
    %1366 = vector.shape_cast %1365 : vector<2x1x128xf32> to vector<2x128xf32>
    %1367 = arith.truncf %1361 : vector<2x32xf32> to vector<2x32xbf16>
    %cst_382 = arith.constant dense<0.000000e+00> : vector<2x128xf32>
    %1368 = tpu.matmul %1367, %1153, %cst_382 {dimension_numbers = #tpu.dot_dimension_numbers<[1], [0], [0], [1], [0, 0, 1, 1], [], []>} : vector<2x32xbf16>, vector<32x128xbf16>, vector<2x128xf32> -> vector<2x128xf32>
    %1369 = arith.addf %1366, %1368 : vector<2x128xf32>
    %1370 = vector.extract_strided_slice %1369 {offsets = [0, 0], sizes = [2, 32], strides = [1, 1]} : vector<2x128xf32> to vector<2x32xf32>
    %1371 = arith.negf %1370 : vector<2x32xf32>
    %1372 = math.exp %1371 : vector<2x32xf32>
    %cst_383 = arith.constant 1.000000e+00 : f32
    %1373 = vector.broadcast %cst_383 : f32 to vector<2x32xf32>
    %1374 = arith.addf %1373, %1372 : vector<2x32xf32>
    %1375 = arith.divf %1373, %1374 : vector<2x32xf32>
    %1376 = vector.extract_strided_slice %1369 {offsets = [0, 32], sizes = [2, 32], strides = [1, 1]} : vector<2x128xf32> to vector<2x32xf32>
    %1377 = arith.negf %1376 : vector<2x32xf32>
    %1378 = math.exp %1377 : vector<2x32xf32>
    %cst_384 = arith.constant 1.000000e+00 : f32
    %1379 = vector.broadcast %cst_384 : f32 to vector<2x32xf32>
    %1380 = arith.addf %1379, %1378 : vector<2x32xf32>
    %1381 = arith.divf %1379, %1380 : vector<2x32xf32>
    %1382 = vector.extract_strided_slice %1369 {offsets = [0, 64], sizes = [2, 32], strides = [1, 1]} : vector<2x128xf32> to vector<2x32xf32>
    %1383 = math.tanh %1382 : vector<2x32xf32>
    %1384 = vector.extract_strided_slice %1369 {offsets = [0, 96], sizes = [2, 32], strides = [1, 1]} : vector<2x128xf32> to vector<2x32xf32>
    %1385 = arith.negf %1384 : vector<2x32xf32>
    %1386 = math.exp %1385 : vector<2x32xf32>
    %cst_385 = arith.constant 1.000000e+00 : f32
    %1387 = vector.broadcast %cst_385 : f32 to vector<2x32xf32>
    %1388 = arith.addf %1387, %1386 : vector<2x32xf32>
    %1389 = arith.divf %1387, %1388 : vector<2x32xf32>
    %1390 = arith.mulf %1381, %1359 : vector<2x32xf32>
    %1391 = arith.mulf %1375, %1383 : vector<2x32xf32>
    %1392 = arith.addf %1390, %1391 : vector<2x32xf32>
    %1393 = math.tanh %1392 : vector<2x32xf32>
    %1394 = arith.mulf %1389, %1393 : vector<2x32xf32>
    %c0_386 = arith.constant 0 : index
    %c6_387 = arith.constant 6 : index
    %c0_388 = arith.constant 0 : index
    %1395 = vector.load %arg6[%c0_386, %c6_387, %c0_388] : memref<2x8x32xf32, #tpu.memory_space<vmem>>, vector<2x1x32xf32>
    %1396 = vector.shape_cast %1395 : vector<2x1x32xf32> to vector<2x32xf32>
    %1397 = vector.shape_cast %1394 : vector<2x32xf32> to vector<2x1x32xf32>
    tpu.vector_store %arg6[%c0_386, %c6_387, %c0_388], %1397 {strides = array<i32>} : memref<2x8x32xf32, #tpu.memory_space<vmem>>, vector<2x1x32xf32>,
    %1398 = vector.extract_strided_slice %1162 {offsets = [0, 7, 0], sizes = [2, 1, 128], strides = [1, 1, 1]} : vector<2x8x128xf32> to vector<2x1x128xf32>
    %1399 = vector.shape_cast %1398 : vector<2x1x128xf32> to vector<2x128xf32>
    %1400 = arith.truncf %1394 : vector<2x32xf32> to vector<2x32xbf16>
    %cst_389 = arith.constant dense<0.000000e+00> : vector<2x128xf32>
    %1401 = tpu.matmul %1400, %1153, %cst_389 {dimension_numbers = #tpu.dot_dimension_numbers<[1], [0], [0], [1], [0, 0, 1, 1], [], []>} : vector<2x32xbf16>, vector<32x128xbf16>, vector<2x128xf32> -> vector<2x128xf32>
    %1402 = arith.addf %1399, %1401 : vector<2x128xf32>
    %1403 = vector.extract_strided_slice %1402 {offsets = [0, 0], sizes = [2, 32], strides = [1, 1]} : vector<2x128xf32> to vector<2x32xf32>
    %1404 = arith.negf %1403 : vector<2x32xf32>
    %1405 = math.exp %1404 : vector<2x32xf32>
    %cst_390 = arith.constant 1.000000e+00 : f32
    %1406 = vector.broadcast %cst_390 : f32 to vector<2x32xf32>
    %1407 = arith.addf %1406, %1405 : vector<2x32xf32>
    %1408 = arith.divf %1406, %1407 : vector<2x32xf32>
    %1409 = vector.extract_strided_slice %1402 {offsets = [0, 32], sizes = [2, 32], strides = [1, 1]} : vector<2x128xf32> to vector<2x32xf32>
    %1410 = arith.negf %1409 : vector<2x32xf32>
    %1411 = math.exp %1410 : vector<2x32xf32>
    %cst_391 = arith.constant 1.000000e+00 : f32
    %1412 = vector.broadcast %cst_391 : f32 to vector<2x32xf32>
    %1413 = arith.addf %1412, %1411 : vector<2x32xf32>
    %1414 = arith.divf %1412, %1413 : vector<2x32xf32>
    %1415 = vector.extract_strided_slice %1402 {offsets = [0, 64], sizes = [2, 32], strides = [1, 1]} : vector<2x128xf32> to vector<2x32xf32>
    %1416 = math.tanh %1415 : vector<2x32xf32>
    %1417 = vector.extract_strided_slice %1402 {offsets = [0, 96], sizes = [2, 32], strides = [1, 1]} : vector<2x128xf32> to vector<2x32xf32>
    %1418 = arith.negf %1417 : vector<2x32xf32>
    %1419 = math.exp %1418 : vector<2x32xf32>
    %cst_392 = arith.constant 1.000000e+00 : f32
    %1420 = vector.broadcast %cst_392 : f32 to vector<2x32xf32>
    %1421 = arith.addf %1420, %1419 : vector<2x32xf32>
    %1422 = arith.divf %1420, %1421 : vector<2x32xf32>
    %1423 = arith.mulf %1414, %1392 : vector<2x32xf32>
    %1424 = arith.mulf %1408, %1416 : vector<2x32xf32>
    %1425 = arith.addf %1423, %1424 : vector<2x32xf32>
    %1426 = math.tanh %1425 : vector<2x32xf32>
    %1427 = arith.mulf %1422, %1426 : vector<2x32xf32>
    %c0_393 = arith.constant 0 : index
    %c7_394 = arith.constant 7 : index
    %c0_395 = arith.constant 0 : index
    %1428 = vector.load %arg6[%c0_393, %c7_394, %c0_395] : memref<2x8x32xf32, #tpu.memory_space<vmem>>, vector<2x1x32xf32>
    %1429 = vector.shape_cast %1428 : vector<2x1x32xf32> to vector<2x32xf32>
    %1430 = vector.shape_cast %1427 : vector<2x32xf32> to vector<2x1x32xf32>
    tpu.vector_store %arg6[%c0_393, %c7_394, %c0_395], %1430 {strides = array<i32>} : memref<2x8x32xf32, #tpu.memory_space<vmem>>, vector<2x1x32xf32>,
    %c4_396 = arith.constant 4 : index
    %c0_397 = arith.constant 0 : index
    %c0_398 = arith.constant 0 : index
    %1431 = vector.load %arg7[%c4_396, %c0_397, %c0_398] : memref<5x2x32xf32, #tpu.memory_space<vmem>>, vector<1x2x32xf32>
    %1432 = vector.shape_cast %1431 : vector<1x2x32xf32> to vector<2x32xf32>
    %1433 = vector.shape_cast %1427 : vector<2x32xf32> to vector<1x2x32xf32>
    tpu.vector_store %arg7[%c4_396, %c0_397, %c0_398], %1433 {strides = array<i32>} : memref<5x2x32xf32, #tpu.memory_space<vmem>>, vector<1x2x32xf32>,
    %c4_399 = arith.constant 4 : index
    %c0_400 = arith.constant 0 : index
    %c0_401 = arith.constant 0 : index
    %1434 = vector.load %arg8[%c4_399, %c0_400, %c0_401] : memref<5x2x32xf32, #tpu.memory_space<vmem>>, vector<1x2x32xf32>
    %1435 = vector.shape_cast %1434 : vector<1x2x32xf32> to vector<2x32xf32>
    %1436 = vector.shape_cast %1425 : vector<2x32xf32> to vector<1x2x32xf32>
    tpu.vector_store %arg8[%c4_399, %c0_400, %c0_401], %1436 {strides = array<i32>} : memref<5x2x32xf32, #tpu.memory_space<vmem>>, vector<1x2x32xf32>,
    return
  }
}

</mosaic_0001>

<bundles_post_ra>
// kernel: tpu_custom_call.1
= control target key start
LH: loop header
LB: loop body
LE: loop exit
PB: predicated region body
PF: predicated region fallthrough
CT: control target
= control target key end

     0   :  { %14 = vsyncpa [#allocation3], 0  ;;  %s8798_s0 = inlined_call_operand.hbm [shape: f32[2,8,32], index: 0, kind: input, shape index: {}]   ;;  %s8799_s1 = inlined_call_operand.hbm [shape: bf16[5,32,128], index: 1, kind: input, shape index: {}]   ;;  %s8800_s2 = inlined_call_operand.hbm [shape: bf16[5,32,128], index: 2, kind: input, shape index: {}]   ;;  %s8801_s3 = inlined_call_operand.vmem [shape: f32[5,1,128], index: 3, kind: input, shape index: {}]   ;;  %s8802_s4 = inlined_call_operand.hbm [shape: f32[5,2,32], index: 4, kind: input, shape index: {}]   ;;  %s8803_s5 = inlined_call_operand.hbm [shape: f32[5,2,32], index: 5, kind: input, shape index: {}]   ;;  %s8804_s6 = inlined_call_operand.hbm [shape: f32[2,8,32], index: 6, kind: output, shape index: {0}]   ;;  %s8805_s7 = inlined_call_operand.hbm [shape: f32[5,2,32], index: 7, kind: output, shape index: {1}]   ;;  %s8806_s8 = inlined_call_operand.hbm [shape: f32[5,2,32], index: 8, kind: output, shape index: {2}]  }
   0x1   :  { %15 = vsyncpa [#allocation6], 0 }
   0x2   :  { %16 = vsyncpa [#allocation9], 0 }
   0x3   :  { %17 = vsyncpa [#allocation4], 0 }
   0x4   :  { %18 = vsyncpa [#allocation13], 0  ;;  %s7185_s27 = smov [#allocation5]  }
   0x5   :  { %s36_s28 = sshll.u32 %s7185_s27, 4  ;;  %s37_s28 = int_to_ptr.vmem [resolvable:$true] %s36_s28 }
   0x6   :  { %s7023_s29 = scalar_lea.vmem %s37_s28, 1280  ;;  %p7028_p1 = scmp.lt.s32.totalorder %s37_s28, %s37_s28 }
   0x7   :  { %p7024_p0 = scmp.ne.s32.totalorder %s37_s28, %s7023_s29  ;;  %p7029_p2 = scmp.lt.s32.totalorder %s7023_s29, %s7023_s29 }
   0x9   :  { %p7030_p3 = por %p7029_p2, %p7028_p1 }
   0xb   :  { %p7031_p4 = pnand %p7030_p3, %p7024_p0 }
   0xd   :  { %7034 = shalt.err (!%p7031_p4)
}
   0xe   :  { %s7186_s30 = smov 64   ;;  %s7187_s9 = smov 4  }
   0xf   :  { %42 = dma.hbm_to_vmem [thread:$0]  %s8799_s1, 1280, %s37_s28, [#allocation6], %s7186_s30, %s7186_s30, %s7187_s9  }
  0x10   :  { %s7188_s12 = smov [#allocation8]  }
  0x11   :  { %s62_s13 = sshll.u32 %s7188_s12, 4  ;;  %s63_s13 = int_to_ptr.vmem [resolvable:$true] %s62_s13 }
  0x12   :  { %s7043_s14 = scalar_lea.vmem %s63_s13, 160  ;;  %p7048_p6 = scmp.lt.s32.totalorder %s63_s13, %s63_s13 }
  0x13   :  { %p7044_p5 = scmp.ne.s32.totalorder %s63_s13, %s7043_s14  ;;  %p7049_p7 = scmp.lt.s32.totalorder %s7043_s14, %s7043_s14 }
  0x15   :  { %p7050_p8 = por %p7049_p7, %p7048_p6 }
  0x17   :  { %p7051_p9 = pnand %p7050_p8, %p7044_p5 }
  0x19   :  { %7054 = shalt.err (!%p7051_p9)
}
  0x1a   :  { %s7189_s15 = smov 32   ;;  %s7190_s16 = smov 2  }
  0x1b   :  { %68 = dma.hbm_to_vmem [thread:$0]  %s8802_s4, 160, %s63_s13, [#allocation9], %s7189_s15, %s7189_s15, %s7190_s16  }
  0x1c   :  { %s7191_s1 = smov [#allocation2]  }
  0x1d   :  { %s24_s19 = sshll.u32 %s7191_s1, 4  ;;  %s25_s19 = int_to_ptr.vmem [resolvable:$true] %s24_s19 }
  0x1e   :  { %s7063_s20 = scalar_lea.vmem %s25_s19, 256  ;;  %p7068_p11 = scmp.lt.s32.totalorder %s25_s19, %s25_s19 }
  0x1f   :  { %p7064_p10 = scmp.ne.s32.totalorder %s25_s19, %s7063_s20  ;;  %p7069_p12 = scmp.lt.s32.totalorder %s7063_s20, %s7063_s20 }
  0x21   :  { %p7070_p13 = por %p7069_p12, %p7068_p11 }
  0x23   :  { %p7071_p0 = pnand %p7070_p13, %p7064_p10 }
  0x25   :  { %7074 = shalt.err (!%p7071_p0)
}
  0x26   :  { %s7192_s21 = smov 128   ;;  %s7193_s22 = smov 8  }
  0x27   :  { %30 = dma.hbm_to_vmem [thread:$0]  %s8798_s0, 256, %s25_s19, [#allocation3], %s7192_s21, %s7192_s21, %s7193_s22  }
  0x28   :  { %s7194_s4 = smov [#allocation7]   ;;  %s7195_s26 = smov [#allocation10]  }
  0x29   :  { %s48_s25 = sshll.u32 %s7194_s4, 4  ;;  %s74_s27 = sshll.u32 %s7195_s26, 4  ;;  %s49_s25 = int_to_ptr.vmem [resolvable:$true] %s48_s25  ;;  %s75_s27 = int_to_ptr.vmem [resolvable:$true] %s74_s27 }
  0x2a   :  { %s7083_s28 = scalar_lea.vmem %s49_s25, 1280  ;;  %p7088_p2 = scmp.lt.s32.totalorder %s49_s25, %s49_s25 }
  0x2b   :  { %p7084_p1 = scmp.ne.s32.totalorder %s49_s25, %s7083_s28  ;;  %p7089_p3 = scmp.lt.s32.totalorder %s7083_s28, %s7083_s28 }
  0x2d   :  { %p7090_p4 = por %p7089_p3, %p7088_p2 }
  0x2f   :  { %p7091_p5 = pnand %p7090_p4, %p7084_p1 }
  0x31   :  { %7094 = shalt.err (!%p7091_p5)
}
  0x32   :  { %54 = dma.hbm_to_vmem [thread:$0]  %s8800_s2, 1280, %s49_s25, [#allocation6], %s7186_s30, %s7186_s30, %s7187_s9  }
  0x33   :  { %s7103_s0 = scalar_lea.vmem %s75_s27, 160  ;;  %p7108_p7 = scmp.lt.s32.totalorder %s75_s27, %s75_s27 }
  0x34   :  { %p7104_p6 = scmp.ne.s32.totalorder %s75_s27, %s7103_s0  ;;  %p7109_p8 = scmp.lt.s32.totalorder %s7103_s0, %s7103_s0 }
  0x36   :  { %p7110_p9 = por %p7109_p8, %p7108_p7 }
  0x38   :  { %p7111_p10 = pnand %p7110_p9, %p7104_p6 }
  0x3a   :  { %7114 = shalt.err (!%p7111_p10)
}
  0x3b   :  { %80 = dma.hbm_to_vmem [thread:$0]  %s8803_s5, 160, %s75_s27, [#allocation9], %s7189_s15, %s7189_s15, %s7190_s16  }
  0x3c   :  { %7175 = dma.done.wait [#allocation3], 256  }
  0x3d   :  { %7176 = vsyncadd [#allocation3], 4294967040 }
  0x3e   :  { %7177 = dma.done.wait [#allocation6], 2560  }
  0x3f   :  { %7178 = vsyncadd [#allocation6], 4294964736 }
  0x40   :  { %7179 = dma.done.wait [#allocation9], 320  }
  0x41   :  { %7180 = vsyncadd [#allocation9], 4294966976  ;;  %v7196_v0 = vmov 0.0   ;;  %vm7197_vm0 = vmmov 0   ;;  %v7283_v1 = vld [vmem:[#allocation7 + $0x8] sm:$0xff]   ;;  %v6356_v2 = vld [vmem:[#allocation5 + $0x8] sm:$0xff]  }
  0x42   :  { %5986 = vmatprep.subr.bf16.mxu1 %v7196_v0  ;;  %5978 = vmatprep.subr.bf16.mxu0 %v7196_v0  ;;  %v7286_v3 = vld [vmem:[#allocation7] sm:$0xff]   ;;  %vm99_vm1 = vcmask 261120   ;;  %v6358_v4 = vld [vmem:[#allocation5] sm:$0xff]   ;;  %v98_v7 = vld [vmem:[#allocation2 + $0x8] sm:$0xff]  ;;  %vm314_vm2 = vcmask 1041409   ;;  %vm304_vm3 = vcmask 253952  }
  0x43   :  { %5990 = vmatprep.mubr.msk.bf16.mxu1 %vm7197_vm0, %v7196_v0  ;;  %5982 = vmatprep.mubr.msk.bf16.mxu0 %vm7197_vm0, %v7196_v0  ;;  %v176_v5 = vld [vmem:[#allocation8] sm:$0x3]  ;;  %v97_v6 = vld [vmem:[#allocation2] sm:$0xff]  ;;  %101 = vst.msk [vmem:[#allocation11 + $0x8] sm:$0xff] %vm99_vm1, %v98_v7  ;;  %v177_v9 = vld [vmem:[#allocation10] sm:$0x3] }
  0x44   :  { %5987 = vmatpush3.bf16.msra.mxu1 %v7283_v1  ;;  %5979 = vmatpush3.bf16.msra.mxu0 %v6356_v2  ;;  %v178_v8 = vpack.c.bf16 %v176_v5, %v176_v5  ;;  %100 = vst.msk [vmem:[#allocation11] sm:$0xff] %vm99_vm1, %v97_v6  ;;  %v255_v10 = vrot.slane %v177_v9, 1  ;;  %v5689_v19 = vld [vmem:[%s8801_s3] ss:$0 sm:$0xff]  ;;  %vm430_vm4 = vcmask 254977   ;;  %vm556_vm5 = vcmask 256002  }
  0x45   :  { %5988 = vmatprep.subr.bf16.mxu1 %v7196_v0  ;;  %5980 = vmatprep.subr.bf16.mxu0 %v7196_v0  ;;  %vm683_vm6 = vcmask 257027   ;;  %vm810_vm7 = vcmask 258052   ;;  %vm937_vm8 = vcmask 259077   ;;  %vm1064_vm9 = vcmask 260102   ;;  %s7200_s24 = smov [#allocation11]   ;;  %s7201_s25 = smov [#allocation14]  }
  0x46   :  { %258 = vrot.lane.b32.xlu1 %v255_v10, %s7189_s15  ;;  %vm1191_vm10 = vcmask 261127   ;;  %s5644_s4 = sshll.u32 %s7200_s24, 4  ;;  %s5668_s26 = sshll.u32 %s7201_s25, 4  ;;  %s5645_s4 = int_to_ptr.vmem [resolvable:$true] %s5644_s4  ;;  %s5669_s26 = int_to_ptr.vmem [resolvable:$true] %s5668_s26 }
  0x48   :  { %5989 = vmatpush3.bf16.msra.mxu1 %v7286_v3  ;;  %5981 = vmatpush3.bf16.msra.mxu0 %v6358_v4 }
  0x49   :  { %6002 = vmatprep.subr.bf16.mxu1 %v7196_v0  ;;  %5994 = vmatprep.subr.bf16.mxu0 %v7196_v0 }
  0x4a   :  { %v112_v12 = vld [vmem:[#allocation11 + $0x8] sm:$0xff]  ;;  %256 = vrot.lane.b32.xlu1 %v177_v9, %s7189_s15 }
  0x4b   :  { %5991 = vmatmul.mubr.msk.bf16.vlgmr.msra.gmra.mxu1 %vm99_vm1, %v178_v8  ;;  %v111_v11 = vld [vmem:[#allocation11] sm:$0xff] }
  0x4c   :  { %6003 = vmatpush3.bf16.msra.mxu1 %v7283_v1  ;;  %6006 = vmatprep.mubr.msk.bf16.mxu1 %vm7197_vm0, %v7196_v0  ;;  %v113_v13 = vpack.c.bf16 %v112_v12, %v111_v11 }
  0x4d   :  { %6004 = vmatprep.subr.bf16.mxu1 %v7196_v0 }
  0x4e   :  { %5983 = vmatmul.mubr.msk.bf16.vlgmr.msra.gmra.mxu0 %vm99_vm1, %v113_v13 }
  0x4f   :  { %5995 = vmatpush3.bf16.msra.mxu0 %v7283_v1  ;;  %5998 = vmatprep.mubr.msk.bf16.mxu0 %vm7197_vm0, %v7196_v0 }
  0x50   :  { %6005 = vmatpush3.bf16.msra.mxu1 %v7286_v3  ;;  %5996 = vmatprep.subr.bf16.mxu0 %v7196_v0 }
  0x51   :  { %6018 = vmatprep.subr.bf16.mxu1 %v7196_v0 }
  0x53   :  { %5997 = vmatpush3.bf16.msra.mxu0 %v7286_v3 }
  0x54   :  { %6010 = vmatprep.subr.bf16.mxu0 %v7196_v0 }
  0xb8   :  { %v259_v42 = vpop.permute.xlu1 %258 }
  0xbc   :  { %v257_v44 = vpop.permute.xlu1 %256 }
 0x10b   :  { %v228_v14 = vpop.f32.mrf.mxu1 }
 0x10c   :  { %v235_v21 = vrot.slane %v228_v14, 1 }
 0x10d   :  { %v5992_v15 = vpop.f32.mrf.mxu1 }
 0x10e   :  { %v169_v17 = vpop.f32.mrf.mxu0 }
 0x10f   :  { %v231_v16 = vpop.f32.mrf.mxu1  ;;  %v7314_v23 = vadd.f32 %v5689_v19, %v169_v17 }
 0x110   :  { %v5984_v20 = vpop.f32.mrf.mxu0 }
 0x111   :  { %v5993_v18 = vpop.f32.mrf.mxu1  ;;  %v238_v27 = vadd.f32 %v228_v14, %v7314_v23 }
 0x112   :  { %v172_v22 = vpop.f32.mrf.mxu0 }
 0x113   :  { %v7316_v24 = vadd.f32 %v5689_v19, %v172_v22  ;;  %v5696_v31 = vmul.f32 -1.442695, %v238_v27 }
 0x114   :  { %v5985_v25 = vpop.f32.mrf.mxu0 }
 0x115   :  { %v239_v26 = vadd.f32 %v235_v21, %v7316_v24 }
 0x117   :  { %6375 = vtanh.f32 %v239_v26  ;;  %v5697_v30 = vmul.f32 -1.442695, %v239_v26 }
 0x118   :  { %6377 = vtanh.f32 %v238_v27 }
 0x119   :  { %6379 = vpow2.f32 %v5697_v30 }
 0x11a   :  { %6381 = vpow2.f32 %v5696_v31 }
 0x124   :  { %v6376_v28 = vpop.eup %6375 }
 0x125   :  { %268 = vrot.lane.b32.xlu0 %v6376_v28, %s7186_s30  ;;  %v6378_v29 = vpop.eup %6377 }
 0x126   :  { %v6380_v32 = vpop.eup %6379 }
 0x127   :  { %v247_v33 = vadd.f32 1.0, %v6380_v32  ;;  %v6382_v34 = vpop.eup %6381 }
 0x128   :  { %v246_v35 = vadd.f32 1.0, %v6382_v34 }
 0x129   :  { %266 = vrot.lane.b32.xlu0 %v6378_v29, %s7186_s30  ;;  %6383 = vrcp.f32 %v247_v33 }
 0x12a   :  { %6385 = vrcp.f32 %v246_v35 }
 0x136   :  { %v6384_v36 = vpop.eup %6383 }
 0x137   :  { %v6386_v39 = vpop.eup %6385  ;;  %v263_v43 = vmul.f32 %v6384_v36, %v259_v42 }
 0x138   :  { %v262_v47 = vmul.f32 %v6386_v39, %v257_v44 }
 0x197   :  { %v269_v37 = vpop.permute.xlu0 %268 }
 0x198   :  { %v273_v38 = vmul.f32 %v6384_v36, %v269_v37 }
 0x19a   :  { %278 = vrot.lane.b32.xlu0 %v273_v38, %s7189_s15 }
 0x19b   :  { %v267_v40 = vpop.permute.xlu0 %266 }
 0x19c   :  { %v272_v41 = vmul.f32 %v6386_v39, %v267_v40 }
 0x19e   :  { %276 = vrot.lane.b32.xlu1 %v272_v41, %s7189_s15 }
 0x20c   :  { %v279_v45 = vpop.permute.xlu0 %278 }
 0x20d   :  { %v7324_v46 = vadd.f32 %v279_v45, %v263_v43 }
 0x20f   :  { %6387 = vtanh.f32 %v7324_v46  ;;  %v385_v26 = vrot.slane %v7324_v46, 7 }
 0x210   :  { %v277_v48 = vpop.permute.xlu1 %276 }
 0x211   :  { %v7327_v49 = vadd.f32 %v277_v48, %v262_v47 }
 0x213   :  { %6389 = vtanh.f32 %v7327_v49  ;;  %v384_v28 = vrot.slane %v7327_v49, 7 }
 0x21c   :  { %v6388_v50 = vpop.eup %6387 }
 0x21d   :  { %290 = vrot.lane.b32.xlu0 %v6388_v50, %s7186_s30 }
 0x220   :  { %v6390_v51 = vpop.eup %6389 }
 0x221   :  { %288 = vrot.lane.b32.xlu1 %v6390_v51, %s7186_s30 }
 0x28f   :  { %v291_v52 = vpop.permute.xlu0 %290 }
 0x290   :  { %v7332_v53 = vmul.f32 %v6384_v36, %v291_v52 }
 0x292   :  { %v308_v54 = vpack.c.bf16 %v7332_v53, %v7332_v53 }
 0x293   :  { %v289_v55 = vpop.permute.xlu1 %288 }
 0x294   :  { %v312_v56 = vunpack.c.l.b16 %v308_v54  ;;  %v7336_v57 = vmul.f32 %v6386_v39, %v289_v55 }
 0x296   :  { %v307_v58 = vpack.c.bf16 %v7336_v57, %v7336_v57  ;;  %v313_v59 = vrot.slane %v312_v56, 7 }
 0x298   :  { %v311_v60 = vunpack.c.l.b16 %v307_v58 }
 0x29a   :  { %v315_v61 = vsel %vm314_vm2, %v313_v59, %v311_v60 }
 0x29b   :  { %v316_v62 = vpack.c.b16 %v315_v61, %v315_v61 }
 0x29d   :  { %317 = vrot.lane.b32.xlu0 %v316_v62, %s7189_s15 }
 0x30f   :  { %v318_v63 = vpop.permute.xlu0 %317 }
 0x310   :  { %5999 = vmatmul.mubr.msk.bf16.vlgmr.msra.gmra.mxu0 %vm99_vm1, %v318_v63 }
 0x311   :  { %6011 = vmatpush3.bf16.msra.mxu0 %v7283_v1  ;;  %6014 = vmatprep.mubr.msk.bf16.mxu0 %vm7197_vm0, %v7196_v0 }
 0x312   :  { %6012 = vmatprep.subr.bf16.mxu0 %v7196_v0 }
 0x315   :  { %6013 = vmatpush3.bf16.msra.mxu0 %v7286_v3 }
 0x316   :  { %6026 = vmatprep.subr.bf16.mxu0 %v7196_v0 }
 0x3d0   :  { %v356_v2 = vpop.f32.mrf.mxu0 }
 0x3d1   :  { %v363_v4 = vrot.slane %v356_v2, 7  ;;  %v367_v5 = vadd.f32 %v356_v2, %v7316_v24 }
 0x3d2   :  { %v6000_v6 = vpop.f32.mrf.mxu0 }
 0x3d3   :  { %v366_v7 = vadd.f32 %v363_v4, %v7314_v23  ;;  %6391 = vtanh.f32 %v367_v5  ;;  %v5700_v12 = vmul.f32 -1.442695, %v367_v5 }
 0x3d4   :  { %v359_v8 = vpop.f32.mrf.mxu0 }
 0x3d5   :  { %6393 = vtanh.f32 %v366_v7  ;;  %v5699_v13 = vmul.f32 -1.442695, %v366_v7 }
 0x3d6   :  { %v6001_v9 = vpop.f32.mrf.mxu0  ;;  %6395 = vpow2.f32 %v5700_v12 }
 0x3d7   :  { %6397 = vpow2.f32 %v5699_v13 }
 0x3e0   :  { %v6392_v10 = vpop.eup %6391 }
 0x3e1   :  { %394 = vrot.lane.b32.xlu0 %v6392_v10, %s7186_s30 }
 0x3e2   :  { %v6394_v11 = vpop.eup %6393 }
 0x3e3   :  { %392 = vrot.lane.b32.xlu1 %v6394_v11, %s7186_s30  ;;  %v6396_v14 = vpop.eup %6395 }
 0x3e4   :  { %v6398_v15 = vpop.eup %6397  ;;  %v375_v16 = vadd.f32 1.0, %v6396_v14 }
 0x3e5   :  { %v374_v17 = vadd.f32 1.0, %v6398_v15 }
 0x3e6   :  { %6399 = vrcp.f32 %v375_v16 }
 0x3e7   :  { %6401 = vrcp.f32 %v374_v17 }
 0x3f3   :  { %v6400_v18 = vpop.eup %6399 }
 0x3f4   :  { %v6402_v21 = vpop.eup %6401  ;;  %v389_v27 = vmul.f32 %v6400_v18, %v385_v26 }
 0x3f5   :  { %v388_v31 = vmul.f32 %v6402_v21, %v384_v28 }
 0x453   :  { %v395_v19 = vpop.permute.xlu0 %394 }
 0x454   :  { %v399_v20 = vmul.f32 %v6400_v18, %v395_v19 }
 0x455   :  { %v393_v22 = vpop.permute.xlu1 %392 }
 0x456   :  { %404 = vrot.lane.b32.xlu0 %v399_v20, %s7189_s15  ;;  %v398_v25 = vmul.f32 %v6402_v21, %v393_v22 }
 0x458   :  { %402 = vrot.lane.b32.xlu1 %v398_v25, %s7189_s15 }
 0x4c8   :  { %v405_v29 = vpop.permute.xlu0 %404 }
 0x4c9   :  { %v7357_v30 = vadd.f32 %v405_v29, %v389_v27 }
 0x4ca   :  { %v403_v32 = vpop.permute.xlu1 %402 }
 0x4cb   :  { %6403 = vtanh.f32 %v7357_v30  ;;  %v408_v33 = vadd.f32 %v403_v32, %v388_v31  ;;  %v511_v12 = vrot.slane %v7357_v30, 7 }
 0x4cd   :  { %6405 = vtanh.f32 %v408_v33  ;;  %v510_v11 = vrot.slane %v408_v33, 7 }
 0x4d8   :  { %v6404_v34 = vpop.eup %6403 }
 0x4d9   :  { %416 = vrot.lane.b32.xlu0 %v6404_v34, %s7186_s30 }
 0x4da   :  { %v6406_v35 = vpop.eup %6405 }
 0x4db   :  { %414 = vrot.lane.b32.xlu1 %v6406_v35, %s7186_s30 }
 0x54b   :  { %v417_v36 = vpop.permute.xlu0 %416 }
 0x54c   :  { %v7362_v37 = vmul.f32 %v6400_v18, %v417_v36 }
 0x54d   :  { %v415_v38 = vpop.permute.xlu1 %414 }
 0x54e   :  { %v7364_v39 = vmul.f32 %v6402_v21, %v415_v38  ;;  %v434_v40 = vpack.c.bf16 %v7362_v37, %v7362_v37 }
 0x550   :  { %v433_v41 = vpack.c.bf16 %v7364_v39, %v7364_v39  ;;  %v438_v43 = vunpack.c.l.b16 %v434_v40 }
 0x552   :  { %v437_v42 = vunpack.c.l.b16 %v433_v41 }
 0x554   :  { %v439_v44 = vrot.slane %v437_v42, 1 }
 0x556   :  { %v440_v45 = vsel %vm314_vm2, %v438_v43, %v439_v44 }
 0x557   :  { %v441_v46 = vpack.c.b16 %v440_v45, %v440_v45 }
 0x559   :  { %442 = vrot.lane.b32.xlu1 %v441_v46, %s7189_s15 }
 0x5cb   :  { %v443_v47 = vpop.permute.xlu1 %442 }
 0x5cc   :  { %6007 = vmatmul.mubr.msk.bf16.vlgmr.msra.gmra.mxu1 %vm99_vm1, %v443_v47 }
 0x5cd   :  { %6019 = vmatpush3.bf16.msra.mxu1 %v7283_v1  ;;  %6022 = vmatprep.mubr.msk.bf16.mxu1 %vm7197_vm0, %v7196_v0 }
 0x5ce   :  { %6020 = vmatprep.subr.bf16.mxu1 %v7196_v0 }
 0x5d1   :  { %6021 = vmatpush3.bf16.msra.mxu1 %v7286_v3 }
 0x5d2   :  { %6034 = vmatprep.subr.bf16.mxu1 %v7196_v0 }
 0x68c   :  { %v481_v48 = vpop.f32.mrf.mxu1 }
 0x68d   :  { %v488_v49 = vrot.slane %v481_v48, 6  ;;  %v489_v50 = vrot.slane %v481_v48, 7 }
 0x68e   :  { %v6008_v51 = vpop.f32.mrf.mxu1 }
 0x68f   :  { %v492_v52 = vadd.f32 %v488_v49, %v7314_v23  ;;  %v493_v54 = vadd.f32 %v489_v50, %v7316_v24 }
 0x690   :  { %v484_v55 = vpop.f32.mrf.mxu1 }
 0x691   :  { %6407 = vtanh.f32 %v492_v52  ;;  %v5702_v60 = vmul.f32 -1.442695, %v492_v52  ;;  %v5703_v61 = vmul.f32 -1.442695, %v493_v54 }
 0x692   :  { %6409 = vtanh.f32 %v493_v54  ;;  %v6009_v56 = vpop.f32.mrf.mxu1 }
 0x693   :  { %6411 = vpow2.f32 %v5702_v60 }
 0x694   :  { %6413 = vpow2.f32 %v5703_v61 }
 0x69e   :  { %v6408_v58 = vpop.eup %6407 }
 0x69f   :  { %v6410_v59 = vpop.eup %6409  ;;  %518 = vrot.lane.b32.xlu0 %v6408_v58, %s7186_s30 }
 0x6a0   :  { %520 = vrot.lane.b32.xlu1 %v6410_v59, %s7186_s30  ;;  %v6412_v62 = vpop.eup %6411 }
 0x6a1   :  { %v6414_v63 = vpop.eup %6413  ;;  %v500_v2 = vadd.f32 1.0, %v6412_v62 }
 0x6a2   :  { %v501_v4 = vadd.f32 1.0, %v6414_v63 }
 0x6a3   :  { %6415 = vrcp.f32 %v500_v2 }
 0x6a4   :  { %6417 = vrcp.f32 %v501_v4 }
 0x6b0   :  { %v6416_v5 = vpop.eup %6415 }
 0x6b1   :  { %v6418_v7 = vpop.eup %6417  ;;  %v514_v13 = vmul.f32 %v6416_v5, %v510_v11 }
 0x6b2   :  { %v515_v14 = vmul.f32 %v6418_v7, %v511_v12 }
 0x711   :  { %v519_v6 = vpop.permute.xlu0 %518 }
 0x712   :  { %v521_v8 = vpop.permute.xlu1 %520  ;;  %v524_v9 = vmul.f32 %v6416_v5, %v519_v6 }
 0x713   :  { %v525_v10 = vmul.f32 %v6418_v7, %v521_v8 }
 0x714   :  { %528 = vrot.lane.b32.xlu0 %v524_v9, %s7189_s15 }
 0x715   :  { %530 = vrot.lane.b32.xlu1 %v525_v10, %s7189_s15 }
 0x786   :  { %v529_v15 = vpop.permute.xlu0 %528 }
 0x787   :  { %v531_v16 = vpop.permute.xlu1 %530  ;;  %v7386_v17 = vadd.f32 %v529_v15, %v514_v13 }
 0x788   :  { %v7388_v18 = vadd.f32 %v531_v16, %v515_v14 }
 0x789   :  { %6419 = vtanh.f32 %v7386_v17  ;;  %v637_v62 = vrot.slane %v7386_v17, 7 }
 0x78a   :  { %6421 = vtanh.f32 %v7388_v18  ;;  %v638_v63 = vrot.slane %v7388_v18, 7 }
 0x796   :  { %v6420_v19 = vpop.eup %6419 }
 0x797   :  { %v6422_v20 = vpop.eup %6421  ;;  %540 = vrot.lane.b32.xlu0 %v6420_v19, %s7186_s30 }
 0x798   :  { %542 = vrot.lane.b32.xlu1 %v6422_v20, %s7186_s30 }
 0x809   :  { %v541_v21 = vpop.permute.xlu0 %540 }
 0x80a   :  { %v543_v22 = vpop.permute.xlu1 %542  ;;  %v7394_v25 = vmul.f32 %v6416_v5, %v541_v21 }
 0x80b   :  { %v7396_v26 = vmul.f32 %v6418_v7, %v543_v22 }
 0x80c   :  { %v559_v27 = vpack.c.bf16 %v7394_v25, %v7394_v25 }
 0x80d   :  { %v560_v28 = vpack.c.bf16 %v7396_v26, %v7396_v26 }
 0x80e   :  { %v563_v29 = vunpack.c.l.b16 %v559_v27 }
 0x80f   :  { %v564_v30 = vunpack.c.l.b16 %v560_v28 }
 0x810   :  { %v565_v31 = vrot.slane %v563_v29, 2 }
 0x811   :  { %v566_v32 = vrot.slane %v564_v30, 1 }
 0x813   :  { %v567_v33 = vsel %vm314_vm2, %v566_v32, %v565_v31 }
 0x814   :  { %v568_v34 = vpack.c.b16 %v567_v33, %v567_v33 }
 0x816   :  { %569 = vrot.lane.b32.xlu0 %v568_v34, %s7189_s15 }
 0x888   :  { %v570_v35 = vpop.permute.xlu0 %569 }
 0x889   :  { %6015 = vmatmul.mubr.msk.bf16.vlgmr.msra.gmra.mxu0 %vm99_vm1, %v570_v35 }
 0x88a   :  { %6027 = vmatpush3.bf16.msra.mxu0 %v7283_v1  ;;  %6030 = vmatprep.mubr.msk.bf16.mxu0 %vm7197_vm0, %v7196_v0 }
 0x88b   :  { %6028 = vmatprep.subr.bf16.mxu0 %v7196_v0 }
 0x88e   :  { %6029 = vmatpush3.bf16.msra.mxu0 %v7286_v3 }
 0x88f   :  { %6042 = vmatprep.subr.bf16.mxu0 %v7196_v0 }
 0x949   :  { %v608_v36 = vpop.f32.mrf.mxu0 }
 0x94a   :  { %v615_v38 = vrot.slane %v608_v36, 5  ;;  %v616_v40 = vrot.slane %v608_v36, 6 }
 0x94b   :  { %v6016_v41 = vpop.f32.mrf.mxu0 }
 0x94c   :  { %v619_v42 = vadd.f32 %v615_v38, %v7314_v23  ;;  %v620_v43 = vadd.f32 %v616_v40, %v7316_v24 }
 0x94d   :  { %v611_v44 = vpop.f32.mrf.mxu0 }
 0x94e   :  { %6423 = vtanh.f32 %v619_v42  ;;  %v5705_v48 = vmul.f32 -1.442695, %v619_v42  ;;  %v5706_v49 = vmul.f32 -1.442695, %v620_v43 }
 0x94f   :  { %6425 = vtanh.f32 %v620_v43  ;;  %v6017_v45 = vpop.f32.mrf.mxu0 }
 0x950   :  { %6427 = vpow2.f32 %v5705_v48 }
 0x951   :  { %6429 = vpow2.f32 %v5706_v49 }
 0x95b   :  { %v6424_v46 = vpop.eup %6423 }
 0x95c   :  { %v6426_v47 = vpop.eup %6425  ;;  %645 = vrot.lane.b32.xlu1 %v6424_v46, %s7186_s30 }
 0x95d   :  { %647 = vrot.lane.b32.xlu0 %v6426_v47, %s7186_s30  ;;  %v6428_v50 = vpop.eup %6427 }
 0x95e   :  { %v6430_v51 = vpop.eup %6429  ;;  %v627_v52 = vadd.f32 1.0, %v6428_v50 }
 0x95f   :  { %v628_v54 = vadd.f32 1.0, %v6430_v51 }
 0x960   :  { %6431 = vrcp.f32 %v627_v52 }
 0x961   :  { %6433 = vrcp.f32 %v628_v54 }
 0x96d   :  { %v6432_v55 = vpop.eup %6431 }
 0x96e   :  { %v6434_v58 = vpop.eup %6433  ;;  %v641_v2 = vmul.f32 %v6432_v55, %v637_v62 }
 0x96f   :  { %v642_v4 = vmul.f32 %v6434_v58, %v638_v63 }
 0x9ce   :  { %v646_v56 = vpop.permute.xlu1 %645 }
 0x9cf   :  { %v648_v59 = vpop.permute.xlu0 %647  ;;  %v651_v60 = vmul.f32 %v6432_v55, %v646_v56 }
 0x9d0   :  { %v652_v61 = vmul.f32 %v6434_v58, %v648_v59 }
 0x9d1   :  { %655 = vrot.lane.b32.xlu1 %v651_v60, %s7189_s15 }
 0x9d2   :  { %657 = vrot.lane.b32.xlu0 %v652_v61, %s7189_s15 }
 0xa43   :  { %v656_v5 = vpop.permute.xlu1 %655 }
 0xa44   :  { %v658_v6 = vpop.permute.xlu0 %657  ;;  %v7419_v7 = vadd.f32 %v656_v5, %v641_v2 }
 0xa45   :  { %v7421_v8 = vadd.f32 %v658_v6, %v642_v4 }
 0xa46   :  { %6435 = vtanh.f32 %v7419_v7  ;;  %v764_v52 = vrot.slane %v7419_v7, 7 }
 0xa47   :  { %6437 = vtanh.f32 %v7421_v8  ;;  %v765_v54 = vrot.slane %v7421_v8, 7 }
 0xa53   :  { %v6436_v9 = vpop.eup %6435 }
 0xa54   :  { %v6438_v10 = vpop.eup %6437  ;;  %667 = vrot.lane.b32.xlu1 %v6436_v9, %s7186_s30 }
 0xa55   :  { %669 = vrot.lane.b32.xlu0 %v6438_v10, %s7186_s30 }
 0xac6   :  { %v668_v11 = vpop.permute.xlu1 %667 }
 0xac7   :  { %v670_v12 = vpop.permute.xlu0 %669  ;;  %v7427_v13 = vmul.f32 %v6432_v55, %v668_v11 }
 0xac8   :  { %v7429_v14 = vmul.f32 %v6434_v58, %v670_v12 }
 0xac9   :  { %v686_v15 = vpack.c.bf16 %v7427_v13, %v7427_v13 }
 0xaca   :  { %v687_v16 = vpack.c.bf16 %v7429_v14, %v7429_v14 }
 0xacb   :  { %v690_v17 = vunpack.c.l.b16 %v686_v15 }
 0xacc   :  { %v691_v18 = vunpack.c.l.b16 %v687_v16 }
 0xacd   :  { %v692_v19 = vrot.slane %v690_v17, 3 }
 0xace   :  { %v693_v20 = vrot.slane %v691_v18, 2 }
 0xad0   :  { %v694_v21 = vsel %vm314_vm2, %v693_v20, %v692_v19 }
 0xad1   :  { %v695_v22 = vpack.c.b16 %v694_v21, %v694_v21 }
 0xad3   :  { %696 = vrot.lane.b32.xlu1 %v695_v22, %s7189_s15 }
 0xb45   :  { %v697_v27 = vpop.permute.xlu1 %696 }
 0xb46   :  { %6023 = vmatmul.mubr.msk.bf16.vlgmr.msra.gmra.mxu1 %vm99_vm1, %v697_v27 }
 0xb47   :  { %6035 = vmatpush3.bf16.msra.mxu1 %v7283_v1  ;;  %6038 = vmatprep.mubr.msk.bf16.mxu1 %vm7197_vm0, %v7196_v0 }
 0xb48   :  { %6036 = vmatprep.subr.bf16.mxu1 %v7196_v0 }
 0xb4b   :  { %6037 = vmatpush3.bf16.msra.mxu1 %v7286_v3 }
 0xb4c   :  { %6050 = vmatprep.subr.bf16.mxu1 %v7196_v0 }
 0xc06   :  { %v735_v28 = vpop.f32.mrf.mxu1 }
 0xc07   :  { %v742_v29 = vrot.slane %v735_v28, 4  ;;  %v743_v30 = vrot.slane %v735_v28, 5 }
 0xc08   :  { %v6024_v31 = vpop.f32.mrf.mxu1 }
 0xc09   :  { %v746_v32 = vadd.f32 %v742_v29, %v7314_v23  ;;  %v747_v33 = vadd.f32 %v743_v30, %v7316_v24 }
 0xc0a   :  { %v738_v34 = vpop.f32.mrf.mxu1 }
 0xc0b   :  { %6439 = vtanh.f32 %v746_v32  ;;  %v5708_v40 = vmul.f32 -1.442695, %v746_v32  ;;  %v5709_v41 = vmul.f32 -1.442695, %v747_v33 }
 0xc0c   :  { %6441 = vtanh.f32 %v747_v33  ;;  %v6025_v35 = vpop.f32.mrf.mxu1 }
 0xc0d   :  { %6443 = vpow2.f32 %v5708_v40 }
 0xc0e   :  { %6445 = vpow2.f32 %v5709_v41 }
 0xc18   :  { %v6440_v36 = vpop.eup %6439 }
 0xc19   :  { %v6442_v38 = vpop.eup %6441  ;;  %772 = vrot.lane.b32.xlu0 %v6440_v36, %s7186_s30 }
 0xc1a   :  { %774 = vrot.lane.b32.xlu1 %v6442_v38, %s7186_s30  ;;  %v6444_v42 = vpop.eup %6443 }
 0xc1b   :  { %v6446_v43 = vpop.eup %6445  ;;  %v754_v44 = vadd.f32 1.0, %v6444_v42 }
 0xc1c   :  { %v755_v45 = vadd.f32 1.0, %v6446_v43 }
 0xc1d   :  { %6447 = vrcp.f32 %v754_v44 }
 0xc1e   :  { %6449 = vrcp.f32 %v755_v45 }
 0xc2a   :  { %v6448_v46 = vpop.eup %6447 }
 0xc2b   :  { %v6450_v48 = vpop.eup %6449  ;;  %v768_v55 = vmul.f32 %v6448_v46, %v764_v52 }
 0xc2c   :  { %v769_v56 = vmul.f32 %v6450_v48, %v765_v54 }
 0xc8b   :  { %v773_v47 = vpop.permute.xlu0 %772 }
 0xc8c   :  { %v775_v49 = vpop.permute.xlu1 %774  ;;  %v778_v50 = vmul.f32 %v6448_v46, %v773_v47 }
 0xc8d   :  { %v779_v51 = vmul.f32 %v6450_v48, %v775_v49 }
 0xc8e   :  { %782 = vrot.lane.b32.xlu0 %v778_v50, %s7189_s15 }
 0xc8f   :  { %784 = vrot.lane.b32.xlu1 %v779_v51, %s7189_s15 }
 0xd00   :  { %v783_v58 = vpop.permute.xlu0 %782 }
 0xd01   :  { %v785_v59 = vpop.permute.xlu1 %784  ;;  %v7452_v60 = vadd.f32 %v783_v58, %v768_v55 }
 0xd02   :  { %v7454_v61 = vadd.f32 %v785_v59, %v769_v56 }
 0xd03   :  { %6451 = vtanh.f32 %v7452_v60  ;;  %v891_v44 = vrot.slane %v7452_v60, 7 }
 0xd04   :  { %6453 = vtanh.f32 %v7454_v61  ;;  %v892_v45 = vrot.slane %v7454_v61, 7 }
 0xd10   :  { %v6452_v62 = vpop.eup %6451 }
 0xd11   :  { %v6454_v63 = vpop.eup %6453  ;;  %794 = vrot.lane.b32.xlu0 %v6452_v62, %s7186_s30 }
 0xd12   :  { %796 = vrot.lane.b32.xlu1 %v6454_v63, %s7186_s30 }
 0xd83   :  { %v795_v2 = vpop.permute.xlu0 %794 }
 0xd84   :  { %v797_v4 = vpop.permute.xlu1 %796  ;;  %v7460_v5 = vmul.f32 %v6448_v46, %v795_v2 }
 0xd85   :  { %v7462_v6 = vmul.f32 %v6450_v48, %v797_v4 }
 0xd86   :  { %v813_v7 = vpack.c.bf16 %v7460_v5, %v7460_v5 }
 0xd87   :  { %v814_v8 = vpack.c.bf16 %v7462_v6, %v7462_v6 }
 0xd88   :  { %v817_v9 = vunpack.c.l.b16 %v813_v7 }
 0xd89   :  { %v818_v10 = vunpack.c.l.b16 %v814_v8 }
 0xd8a   :  { %v819_v11 = vrot.slane %v817_v9, 4 }
 0xd8b   :  { %v820_v12 = vrot.slane %v818_v10, 3 }
 0xd8d   :  { %v821_v15 = vsel %vm314_vm2, %v820_v12, %v819_v11 }
 0xd8e   :  { %v822_v16 = vpack.c.b16 %v821_v15, %v821_v15 }
 0xd90   :  { %823 = vrot.lane.b32.xlu0 %v822_v16, %s7189_s15 }
 0xe02   :  { %v824_v17 = vpop.permute.xlu0 %823 }
 0xe03   :  { %6031 = vmatmul.mubr.msk.bf16.vlgmr.msra.gmra.mxu0 %vm99_vm1, %v824_v17 }
 0xe04   :  { %6043 = vmatpush3.bf16.msra.mxu0 %v7283_v1  ;;  %6046 = vmatprep.mubr.msk.bf16.mxu0 %vm7197_vm0, %v7196_v0 }
 0xe05   :  { %6044 = vmatprep.subr.bf16.mxu0 %v7196_v0 }
 0xe08   :  { %6045 = vmatpush3.bf16.msra.mxu0 %v7286_v3 }
 0xe09   :  { %6058 = vmatprep.subr.bf16.mxu0 %v7196_v0 }
 0xec3   :  { %v862_v18 = vpop.f32.mrf.mxu0 }
 0xec4   :  { %v869_v19 = vrot.slane %v862_v18, 3  ;;  %v870_v20 = vrot.slane %v862_v18, 4 }
 0xec5   :  { %v6032_v21 = vpop.f32.mrf.mxu0 }
 0xec6   :  { %v873_v22 = vadd.f32 %v869_v19, %v7314_v23  ;;  %v874_v27 = vadd.f32 %v870_v20, %v7316_v24 }
 0xec7   :  { %v865_v28 = vpop.f32.mrf.mxu0 }
 0xec8   :  { %6455 = vtanh.f32 %v873_v22  ;;  %v5711_v3 = vmul.f32 -1.442695, %v873_v22  ;;  %v5712_v31 = vmul.f32 -1.442695, %v874_v27 }
 0xec9   :  { %6457 = vtanh.f32 %v874_v27  ;;  %v6033_v1 = vpop.f32.mrf.mxu0 }
 0xeca   :  { %6459 = vpow2.f32 %v5711_v3 }
 0xecb   :  { %6461 = vpow2.f32 %v5712_v31 }
 0xed5   :  { %v6456_v29 = vpop.eup %6455 }
 0xed6   :  { %v6458_v30 = vpop.eup %6457  ;;  %899 = vrot.lane.b32.xlu1 %v6456_v29, %s7186_s30 }
 0xed7   :  { %901 = vrot.lane.b32.xlu0 %v6458_v30, %s7186_s30  ;;  %v6460_v32 = vpop.eup %6459 }
 0xed8   :  { %v6462_v33 = vpop.eup %6461  ;;  %v881_v34 = vadd.f32 1.0, %v6460_v32 }
 0xed9   :  { %v882_v35 = vadd.f32 1.0, %v6462_v33 }
 0xeda   :  { %6463 = vrcp.f32 %v881_v34 }
 0xedb   :  { %6465 = vrcp.f32 %v882_v35 }
 0xee7   :  { %v6464_v36 = vpop.eup %6463 }
 0xee8   :  { %v6466_v40 = vpop.eup %6465  ;;  %v895_v46 = vmul.f32 %v6464_v36, %v891_v44 }
 0xee9   :  { %v896_v47 = vmul.f32 %v6466_v40, %v892_v45 }
 0xf48   :  { %v900_v38 = vpop.permute.xlu1 %899 }
 0xf49   :  { %v902_v41 = vpop.permute.xlu0 %901  ;;  %v905_v42 = vmul.f32 %v6464_v36, %v900_v38 }
 0xf4a   :  { %v906_v43 = vmul.f32 %v6466_v40, %v902_v41 }
 0xf4b   :  { %909 = vrot.lane.b32.xlu1 %v905_v42, %s7189_s15 }
 0xf4c   :  { %911 = vrot.lane.b32.xlu0 %v906_v43, %s7189_s15 }
 0xfbd   :  { %v910_v48 = vpop.permute.xlu1 %909 }
 0xfbe   :  { %v912_v49 = vpop.permute.xlu0 %911  ;;  %v915_v50 = vadd.f32 %v910_v48, %v895_v46 }
 0xfbf   :  { %v916_v51 = vadd.f32 %v912_v49, %v896_v47 }
 0xfc0   :  { %6467 = vtanh.f32 %v915_v50 }
 0xfc1   :  { %6469 = vtanh.f32 %v916_v51  ;;  %v1019_v38 = vrot.slane %v916_v51, 7 }
 0xfcd   :  { %v6468_v52 = vpop.eup %6467 }
 0xfce   :  { %v6470_v54 = vpop.eup %6469  ;;  %921 = vrot.lane.b32.xlu1 %v6468_v52, %s7186_s30 }
 0xfcf   :  { %923 = vrot.lane.b32.xlu0 %v6470_v54, %s7186_s30 }
0x1040   :  { %v922_v55 = vpop.permute.xlu1 %921 }
0x1041   :  { %v924_v56 = vpop.permute.xlu0 %923  ;;  %v7487_v58 = vmul.f32 %v6464_v36, %v922_v55  ;;  %v1018_v36 = vrot.slane %v915_v50, 7 }
0x1042   :  { %v7489_v59 = vmul.f32 %v6466_v40, %v924_v56 }
0x1043   :  { %v940_v60 = vpack.c.bf16 %v7487_v58, %v7487_v58 }
0x1044   :  { %v941_v61 = vpack.c.bf16 %v7489_v59, %v7489_v59 }
0x1045   :  { %v944_v62 = vunpack.c.l.b16 %v940_v60 }
0x1046   :  { %v945_v63 = vunpack.c.l.b16 %v941_v61 }
0x1047   :  { %v946_v2 = vrot.slane %v944_v62, 5 }
0x1048   :  { %v947_v4 = vrot.slane %v945_v63, 4 }
0x104a   :  { %v948_v7 = vsel %vm314_vm2, %v947_v4, %v946_v2 }
0x104b   :  { %v949_v8 = vpack.c.b16 %v948_v7, %v948_v7 }
0x104d   :  { %950 = vrot.lane.b32.xlu1 %v949_v8, %s7189_s15 }
0x10bf   :  { %v951_v9 = vpop.permute.xlu1 %950 }
0x10c0   :  { %6039 = vmatmul.mubr.msk.bf16.vlgmr.msra.gmra.mxu1 %vm99_vm1, %v951_v9 }
0x10c1   :  { %6054 = vmatprep.mubr.msk.bf16.mxu1 %vm7197_vm0, %v7196_v0 }
0x1180   :  { %v989_v10 = vpop.f32.mrf.mxu1 }
0x1181   :  { %v996_v11 = vrot.slane %v989_v10, 2  ;;  %v997_v12 = vrot.slane %v989_v10, 3 }
0x1182   :  { %v6040_v15 = vpop.f32.mrf.mxu1 }
0x1183   :  { %v1000_v16 = vadd.f32 %v996_v11, %v7314_v23  ;;  %v1001_v17 = vadd.f32 %v997_v12, %v7316_v24 }
0x1184   :  { %v992_v18 = vpop.f32.mrf.mxu1 }
0x1185   :  { %6471 = vtanh.f32 %v1000_v16  ;;  %v5714_v22 = vmul.f32 -1.442695, %v1000_v16  ;;  %v5715_v27 = vmul.f32 -1.442695, %v1001_v17 }
0x1186   :  { %6473 = vtanh.f32 %v1001_v17  ;;  %v6041_v19 = vpop.f32.mrf.mxu1 }
0x1187   :  { %6475 = vpow2.f32 %v5714_v22 }
0x1188   :  { %6477 = vpow2.f32 %v5715_v27 }
0x1192   :  { %v6472_v20 = vpop.eup %6471 }
0x1193   :  { %v6474_v21 = vpop.eup %6473  ;;  %1026 = vrot.lane.b32.xlu0 %v6472_v20, %s7186_s30 }
0x1194   :  { %1028 = vrot.lane.b32.xlu1 %v6474_v21, %s7186_s30  ;;  %v6476_v28 = vpop.eup %6475 }
0x1195   :  { %v6478_v1 = vpop.eup %6477  ;;  %v1008_v29 = vadd.f32 1.0, %v6476_v28 }
0x1196   :  { %v1009_v30 = vadd.f32 1.0, %v6478_v1 }
0x1197   :  { %6479 = vrcp.f32 %v1008_v29 }
0x1198   :  { %6481 = vrcp.f32 %v1009_v30 }
0x11a4   :  { %v6480_v3 = vpop.eup %6479 }
0x11a5   :  { %v6482_v32 = vpop.eup %6481  ;;  %v1022_v40 = vmul.f32 %v6480_v3, %v1018_v36 }
0x11a6   :  { %v1023_v41 = vmul.f32 %v6482_v32, %v1019_v38 }
0x1205   :  { %v1027_v31 = vpop.permute.xlu0 %1026 }
0x1206   :  { %v1029_v33 = vpop.permute.xlu1 %1028  ;;  %v1032_v34 = vmul.f32 %v6480_v3, %v1027_v31 }
0x1207   :  { %v1033_v35 = vmul.f32 %v6482_v32, %v1029_v33 }
0x1208   :  { %1036 = vrot.lane.b32.xlu0 %v1032_v34, %s7189_s15 }
0x1209   :  { %1038 = vrot.lane.b32.xlu1 %v1033_v35, %s7189_s15 }
0x127a   :  { %v1037_v42 = vpop.permute.xlu0 %1036 }
0x127b   :  { %v1039_v43 = vpop.permute.xlu1 %1038  ;;  %v1042_v44 = vadd.f32 %v1037_v42, %v1022_v40 }
0x127c   :  { %v1043_v45 = vadd.f32 %v1039_v43, %v1023_v41 }
0x127d   :  { %6483 = vtanh.f32 %v1042_v44 }
0x127e   :  { %6485 = vtanh.f32 %v1043_v45  ;;  %v1146_v31 = vrot.slane %v1043_v45, 7 }
0x128a   :  { %v6484_v46 = vpop.eup %6483 }
0x128b   :  { %v6486_v47 = vpop.eup %6485  ;;  %1048 = vrot.lane.b32.xlu0 %v6484_v46, %s7186_s30 }
0x128c   :  { %1050 = vrot.lane.b32.xlu1 %v6486_v47, %s7186_s30 }
0x12fd   :  { %v1049_v48 = vpop.permute.xlu0 %1048 }
0x12fe   :  { %v1051_v49 = vpop.permute.xlu1 %1050  ;;  %v7508_v52 = vmul.f32 %v6480_v3, %v1049_v48  ;;  %v1145_v3 = vrot.slane %v1042_v44, 7 }
0x12ff   :  { %v7510_v50 = vmul.f32 %v6482_v32, %v1051_v49 }
0x1300   :  { %v1067_v51 = vpack.c.bf16 %v7508_v52, %v7508_v52 }
0x1301   :  { %v1068_v54 = vpack.c.bf16 %v7510_v50, %v7510_v50 }
0x1302   :  { %v1071_v55 = vunpack.c.l.b16 %v1067_v51 }
0x1303   :  { %v1072_v56 = vunpack.c.l.b16 %v1068_v54 }
0x1304   :  { %v1073_v60 = vrot.slane %v1071_v55, 6 }
0x1305   :  { %v1074_v61 = vrot.slane %v1072_v56, 5 }
0x1307   :  { %v1075_v62 = vsel %vm314_vm2, %v1074_v61, %v1073_v60 }
0x1308   :  { %v1076_v63 = vpack.c.b16 %v1075_v62, %v1075_v62 }
0x130a   :  { %1077 = vrot.lane.b32.xlu0 %v1076_v63, %s7189_s15 }
0x137c   :  { %v1078_v2 = vpop.permute.xlu0 %1077 }
0x137d   :  { %6047 = vmatmul.mubr.msk.bf16.vlgmr.msra.gmra.mxu0 %vm99_vm1, %v1078_v2 }
0x137e   :  { %6062 = vmatprep.mubr.msk.bf16.mxu0 %vm7197_vm0, %v7196_v0 }
0x143d   :  { %v1116_v4 = vpop.f32.mrf.mxu0 }
0x143e   :  { %v1123_v7 = vrot.slane %v1116_v4, 1  ;;  %v1124_v8 = vrot.slane %v1116_v4, 2 }
0x143f   :  { %v6048_v9 = vpop.f32.mrf.mxu0 }
0x1440   :  { %v1127_v10 = vadd.f32 %v1123_v7, %v7314_v23  ;;  %v1128_v11 = vadd.f32 %v1124_v8, %v7316_v24  ;;  %v5720_v8 = vld [vmem:[%s8801_s3 + $0x1] ss:$0 sm:$0xff] }
0x1441   :  { %v1119_v12 = vpop.f32.mrf.mxu0 }
0x1442   :  { %6487 = vtanh.f32 %v1127_v10  ;;  %v5717_v18 = vmul.f32 -1.442695, %v1127_v10  ;;  %v5718_v19 = vmul.f32 -1.442695, %v1128_v11 }
0x1443   :  { %6489 = vtanh.f32 %v1128_v11  ;;  %v6049_v15 = vpop.f32.mrf.mxu0 }
0x1444   :  { %6491 = vpow2.f32 %v5717_v18 }
0x1445   :  { %6493 = vpow2.f32 %v5718_v19 }
0x144f   :  { %v6488_v16 = vpop.eup %6487 }
0x1450   :  { %v6490_v17 = vpop.eup %6489  ;;  %1153 = vrot.lane.b32.xlu1 %v6488_v16, %s7186_s30 }
0x1451   :  { %1155 = vrot.lane.b32.xlu0 %v6490_v17, %s7186_s30  ;;  %v6492_v20 = vpop.eup %6491 }
0x1452   :  { %v6494_v21 = vpop.eup %6493  ;;  %v1135_v22 = vadd.f32 1.0, %v6492_v20 }
0x1453   :  { %v1136_v23 = vadd.f32 1.0, %v6494_v21  ;;  %v1291_v21 = vld [vmem:[#allocation10 + $0x2] sm:$0x3] }
0x1454   :  { %6495 = vrcp.f32 %v1135_v22 }
0x1455   :  { %6497 = vrcp.f32 %v1136_v23  ;;  %v1369_v23 = vrot.slane %v1291_v21, 1 }
0x1461   :  { %v6496_v24 = vpop.eup %6495 }
0x1462   :  { %v6498_v28 = vpop.eup %6497  ;;  %v1149_v32 = vmul.f32 %v6496_v24, %v1145_v3 }
0x1463   :  { %v1150_v33 = vmul.f32 %v6498_v28, %v1146_v31 }
0x14c2   :  { %v1154_v27 = vpop.permute.xlu1 %1153 }
0x14c3   :  { %v1156_v1 = vpop.permute.xlu0 %1155  ;;  %v1159_v29 = vmul.f32 %v6496_v24, %v1154_v27 }
0x14c4   :  { %v1160_v30 = vmul.f32 %v6498_v28, %v1156_v1 }
0x14c5   :  { %1163 = vrot.lane.b32.xlu1 %v1159_v29, %s7189_s15 }
0x14c6   :  { %1165 = vrot.lane.b32.xlu0 %v1160_v30, %s7189_s15 }
0x1537   :  { %v1164_v34 = vpop.permute.xlu1 %1163 }
0x1538   :  { %v1166_v35 = vpop.permute.xlu0 %1165  ;;  %v7527_v36 = vadd.f32 %v1164_v34, %v1149_v32 }
0x1539   :  { %v7529_v38 = vadd.f32 %v1166_v35, %v1150_v33 }
0x153a   :  { %6499 = vtanh.f32 %v7527_v36 }
0x153b   :  { %6501 = vtanh.f32 %v7529_v38 }
0x1547   :  { %v6500_v40 = vpop.eup %6499 }
0x1548   :  { %v6502_v41 = vpop.eup %6501  ;;  %1175 = vrot.lane.b32.xlu1 %v6500_v40, %s7186_s30 }
0x1549   :  { %1177 = vrot.lane.b32.xlu0 %v6502_v41, %s7186_s30 }
0x154c   :  { %298 = vrot.lane.b32.xlu1 %v7336_v57, %s7189_s15  ;;  %v6360_v57 = vld [vmem:[#allocation5 + $0x18] sm:$0xff]  }
0x154d   :  { %300 = vrot.lane.b32.xlu0 %v7332_v53, %s7189_s15  ;;  %v7563_v53 = vld [vmem:[#allocation7 + $0x18] sm:$0xff]   ;;  %6051 = vmatpush3.bf16.msra.mxu1 %v6360_v57 }
0x154e   :  { %6059 = vmatpush3.bf16.msra.mxu0 %v7563_v53  ;;  %6052 = vmatprep.subr.bf16.mxu1 %v7196_v0 }
0x154f   :  { %6060 = vmatprep.subr.bf16.mxu0 %v7196_v0 }
0x1550   :  { %424 = vrot.lane.b32.xlu1 %v7364_v39, %s7189_s15  ;;  %v6362_v39 = vld [vmem:[#allocation5 + $0x10] sm:$0xff]  }
0x1551   :  { %426 = vrot.lane.b32.xlu0 %v7362_v37, %s7189_s15  ;;  %v7567_v37 = vld [vmem:[#allocation7 + $0x10] sm:$0xff]   ;;  %6053 = vmatpush3.bf16.msra.mxu1 %v6362_v39 }
0x1552   :  { %6061 = vmatpush3.bf16.msra.mxu0 %v7567_v37  ;;  %6066 = vmatprep.subr.bf16.mxu1 %v7196_v0 }
0x1553   :  { %6074 = vmatprep.subr.bf16.mxu0 %v7196_v0 }
0x1554   :  { %550 = vrot.lane.b32.xlu1 %v7394_v25, %s7189_s15  ;;  %v1289_v25 = vld [vmem:[#allocation8 + $0x2] sm:$0x3] }
0x1555   :  { %552 = vrot.lane.b32.xlu0 %v7396_v26, %s7189_s15  ;;  %v1292_v26 = vpack.c.bf16 %v1289_v25, %v1289_v25 }
0x1557   :  { %6063 = vmatmul.mubr.msk.bf16.vlgmr.msra.gmra.mxu0 %vm99_vm1, %v1292_v26 }
0x1558   :  { %677 = vrot.lane.b32.xlu1 %v7427_v13, %s7189_s15  ;;  %6075 = vmatpush3.bf16.msra.mxu0 %v7563_v53 }
0x1559   :  { %679 = vrot.lane.b32.xlu0 %v7429_v14, %s7189_s15  ;;  %6078 = vmatprep.mubr.msk.bf16.mxu0 %vm7197_vm0, %v7196_v0 }
0x155a   :  { %6076 = vmatprep.subr.bf16.mxu0 %v7196_v0 }
0x155c   :  { %804 = vrot.lane.b32.xlu1 %v7460_v5, %s7189_s15  ;;  %6077 = vmatpush3.bf16.msra.mxu0 %v7567_v37 }
0x155d   :  { %806 = vrot.lane.b32.xlu0 %v7462_v6, %s7189_s15  ;;  %6090 = vmatprep.subr.bf16.mxu0 %v7196_v0 }
0x1560   :  { %931 = vrot.lane.b32.xlu1 %v7487_v58, %s7189_s15 }
0x1561   :  { %933 = vrot.lane.b32.xlu0 %v7489_v59, %s7189_s15 }
0x1564   :  { %1058 = vrot.lane.b32.xlu1 %v7508_v52, %s7189_s15 }
0x1565   :  { %1060 = vrot.lane.b32.xlu0 %v7510_v50, %s7189_s15 }
0x15ba   :  { %v1176_v13 = vpop.permute.xlu1 %1175 }
0x15bb   :  { %v1178_v14 = vpop.permute.xlu0 %1177  ;;  %v1181_v5 = vmul.f32 %v6496_v24, %v1176_v13 }
0x15bc   :  { %v7578_v6 = vmul.f32 %v6498_v28, %v1178_v14 }
0x15bd   :  { %1185 = vrot.lane.b32.xlu1 %v1181_v5, %s7189_s15 }
0x15be   :  { %1187 = vrot.lane.b32.xlu0 %v7578_v6, %s7189_s15  ;;  %v299_v58 = vpop.permute.xlu1 %298 }
0x15bf   :  { %v301_v59 = vpop.permute.xlu0 %300  ;;  %305 = vst.msk [vmem:[#allocation11] sm:$0x1] %vm304_vm3, %v299_v58 }
0x15c0   :  { %306 = vst.msk [vmem:[#allocation11 + $0x8] sm:$0x1] %vm304_vm3, %v301_v59 }
0x15c2   :  { %v425_v42 = vpop.permute.xlu1 %424 }
0x15c3   :  { %v427_v43 = vpop.permute.xlu0 %426  ;;  %431 = vst.msk [vmem:[#allocation11] sm:$0x2] %vm430_vm4, %v425_v42 }
0x15c4   :  { %432 = vst.msk [vmem:[#allocation11 + $0x8] sm:$0x2] %vm430_vm4, %v427_v43 }
0x15c6   :  { %v551_v44 = vpop.permute.xlu1 %550 }
0x15c7   :  { %v553_v45 = vpop.permute.xlu0 %552  ;;  %557 = vst.msk [vmem:[#allocation11] sm:$0x4] %vm556_vm5, %v551_v44 }
0x15c8   :  { %558 = vst.msk [vmem:[#allocation11 + $0x8] sm:$0x4] %vm556_vm5, %v553_v45 }
0x15ca   :  { %v678_v46 = vpop.permute.xlu1 %677 }
0x15cb   :  { %v680_v47 = vpop.permute.xlu0 %679  ;;  %684 = vst.msk [vmem:[#allocation11] sm:$0x8] %vm683_vm6, %v678_v46 }
0x15cc   :  { %685 = vst.msk [vmem:[#allocation11 + $0x8] sm:$0x8] %vm683_vm6, %v680_v47 }
0x15ce   :  { %v805_v48 = vpop.permute.xlu1 %804 }
0x15cf   :  { %v807_v49 = vpop.permute.xlu0 %806  ;;  %811 = vst.msk [vmem:[#allocation11] sm:$0x10] %vm810_vm7, %v805_v48 }
0x15d0   :  { %812 = vst.msk [vmem:[#allocation11 + $0x8] sm:$0x10] %vm810_vm7, %v807_v49 }
0x15d2   :  { %v932_v52 = vpop.permute.xlu1 %931 }
0x15d3   :  { %v934_v50 = vpop.permute.xlu0 %933  ;;  %938 = vst.msk [vmem:[#allocation11] sm:$0x20] %vm937_vm8, %v932_v52 }
0x15d4   :  { %939 = vst.msk [vmem:[#allocation11 + $0x8] sm:$0x20] %vm937_vm8, %v934_v50 }
0x15d6   :  { %v1059_v51 = vpop.permute.xlu1 %1058 }
0x15d7   :  { %v1061_v54 = vpop.permute.xlu0 %1060  ;;  %1065 = vst.msk [vmem:[#allocation11] sm:$0x40] %vm1064_vm9, %v1059_v51 }
0x15d8   :  { %1066 = vst.msk [vmem:[#allocation11 + $0x8] sm:$0x40] %vm1064_vm9, %v1061_v54 }
0x1617   :  { %v1342_v63 = vpop.f32.mrf.mxu0 }
0x1618   :  { %v1349_v12 = vrot.slane %v1342_v63, 1 }
0x1619   :  { %v6064_v2 = vpop.f32.mrf.mxu0 }
0x161b   :  { %v1345_v4 = vpop.f32.mrf.mxu0 }
0x161d   :  { %v6065_v7 = vpop.f32.mrf.mxu0 }
0x162f   :  { %v1186_v55 = vpop.permute.xlu1 %1185 }
0x1630   :  { %v1188_v56 = vpop.permute.xlu0 %1187  ;;  %1192 = vst.msk [vmem:[#allocation11] sm:$0x80] %vm1191_vm10, %v1186_v55  ;;  %1198 = vst.msk [vmem:[#allocation12 - $0x7] sm:$0x80] %vm1191_vm10, %v1186_v55 }
0x1631   :  { %1193 = vst.msk [vmem:[#allocation11 + $0x8] sm:$0x80] %vm1191_vm10, %v1188_v56 }
0x1637   :  { %v1223_v60 = vld [vmem:[#allocation11] sm:$0xff] }
0x1638   :  { %v1224_v61 = vld [vmem:[#allocation11 + $0x8] sm:$0xff] }
0x1639   :  { %v1225_v62 = vpack.c.bf16 %v1224_v61, %v1223_v60 }
0x163b   :  { %6055 = vmatmul.mubr.msk.bf16.vlgmr.msra.gmra.mxu1 %vm99_vm1, %v1225_v62 }
0x163c   :  { %6067 = vmatpush3.bf16.msra.mxu1 %v7563_v53  ;;  %6070 = vmatprep.mubr.msk.bf16.mxu1 %vm7197_vm0, %v7196_v0 }
0x163d   :  { %6068 = vmatprep.subr.bf16.mxu1 %v7196_v0 }
0x1640   :  { %6069 = vmatpush3.bf16.msra.mxu1 %v7567_v37 }
0x1641   :  { %6082 = vmatprep.subr.bf16.mxu1 %v7196_v0 }
0x16fb   :  { %v1281_v9 = vpop.f32.mrf.mxu1 }
0x16fc   :  { %v7612_v10 = vadd.f32 %v5720_v8, %v1281_v9 }
0x16fd   :  { %v6056_v11 = vpop.f32.mrf.mxu1 }
0x16fe   :  { %v1352_v15 = vadd.f32 %v1342_v63, %v7612_v10 }
0x16ff   :  { %v1284_v16 = vpop.f32.mrf.mxu1 }
0x1700   :  { %v7615_v17 = vadd.f32 %v5720_v8, %v1284_v16  ;;  %6503 = vtanh.f32 %v1352_v15  ;;  %v5727_v24 = vmul.f32 -1.442695, %v1352_v15 }
0x1701   :  { %v6057_v18 = vpop.f32.mrf.mxu1 }
0x1702   :  { %v1353_v19 = vadd.f32 %v1349_v12, %v7615_v17 }
0x1704   :  { %6505 = vtanh.f32 %v1353_v19  ;;  %v5728_v27 = vmul.f32 -1.442695, %v1353_v19 }
0x1705   :  { %6507 = vpow2.f32 %v5727_v24 }
0x1706   :  { %6509 = vpow2.f32 %v5728_v27 }
0x170d   :  { %v6504_v20 = vpop.eup %6503 }
0x170e   :  { %1380 = vrot.lane.b32.xlu0 %v6504_v20, %s7186_s30 }
0x1711   :  { %v6506_v22 = vpop.eup %6505 }
0x1712   :  { %1370 = vrot.lane.b32.xlu0 %v1291_v21, %s7189_s15  ;;  %1382 = vrot.lane.b32.xlu1 %v6506_v22, %s7186_s30  ;;  %v6508_v28 = vpop.eup %6507 }
0x1713   :  { %v1360_v1 = vadd.f32 1.0, %v6508_v28  ;;  %v6510_v29 = vpop.eup %6509 }
0x1714   :  { %v1361_v30 = vadd.f32 1.0, %v6510_v29 }
0x1715   :  { %6511 = vrcp.f32 %v1360_v1 }
0x1716   :  { %1372 = vrot.lane.b32.xlu1 %v1369_v23, %s7189_s15  ;;  %6513 = vrcp.f32 %v1361_v30 }
0x1722   :  { %v6512_v3 = vpop.eup %6511 }
0x1723   :  { %v6514_v33 = vpop.eup %6513 }
0x1780   :  { %v1381_v31 = vpop.permute.xlu0 %1380 }
0x1781   :  { %v1386_v32 = vmul.f32 %v6512_v3, %v1381_v31 }
0x1783   :  { %1390 = vrot.lane.b32.xlu0 %v1386_v32, %s7189_s15 }
0x1784   :  { %v1383_v34 = vpop.permute.xlu1 %1382  ;;  %v1371_v40 = vpop.permute.xlu0 %1370 }
0x1785   :  { %v1387_v35 = vmul.f32 %v6514_v33, %v1383_v34  ;;  %v1376_v41 = vmul.f32 %v6512_v3, %v1371_v40 }
0x1787   :  { %1392 = vrot.lane.b32.xlu1 %v1387_v35, %s7189_s15 }
0x1788   :  { %v1373_v57 = vpop.permute.xlu1 %1372 }
0x1789   :  { %v1377_v26 = vmul.f32 %v6514_v33, %v1373_v57 }
0x17f5   :  { %v1391_v39 = vpop.permute.xlu0 %1390 }
0x17f6   :  { %v7624_v25 = vadd.f32 %v1391_v39, %v1376_v41 }
0x17f8   :  { %6515 = vtanh.f32 %v7624_v25  ;;  %v1496_v27 = vrot.slane %v7624_v25, 7 }
0x17f9   :  { %v1393_v13 = vpop.permute.xlu1 %1392 }
0x17fa   :  { %v1397_v14 = vadd.f32 %v1393_v13, %v1377_v26 }
0x17fc   :  { %6517 = vtanh.f32 %v1397_v14  ;;  %v1497_v23 = vrot.slane %v1397_v14, 7 }
0x1805   :  { %v6516_v5 = vpop.eup %6515 }
0x1806   :  { %1402 = vrot.lane.b32.xlu0 %v6516_v5, %s7186_s30 }
0x1809   :  { %v6518_v58 = vpop.eup %6517 }
0x180a   :  { %1404 = vrot.lane.b32.xlu1 %v6518_v58, %s7186_s30 }
0x1878   :  { %v1403_v59 = vpop.permute.xlu0 %1402 }
0x1879   :  { %v7629_v42 = vmul.f32 %v6512_v3, %v1403_v59 }
0x187b   :  { %v1420_v45 = vpack.c.bf16 %v7629_v42, %v7629_v42 }
0x187c   :  { %v1405_v43 = vpop.permute.xlu1 %1404 }
0x187d   :  { %v7631_v44 = vmul.f32 %v6514_v33, %v1405_v43  ;;  %v1424_v48 = vunpack.c.l.b16 %v1420_v45 }
0x187f   :  { %v1421_v46 = vpack.c.bf16 %v7631_v44, %v7631_v44 }
0x1881   :  { %v1425_v47 = vunpack.c.l.b16 %v1421_v46 }
0x1883   :  { %v1426_v49 = vrot.slane %v1425_v47, 7 }
0x1885   :  { %v1427_v52 = vsel %vm314_vm2, %v1426_v49, %v1424_v48 }
0x1886   :  { %v1428_v50 = vpack.c.b16 %v1427_v52, %v1427_v52 }
0x1888   :  { %1429 = vrot.lane.b32.xlu1 %v1428_v50, %s7189_s15 }
0x18fa   :  { %v1430_v51 = vpop.permute.xlu1 %1429 }
0x18fb   :  { %6071 = vmatmul.mubr.msk.bf16.vlgmr.msra.gmra.mxu1 %vm99_vm1, %v1430_v51 }
0x18fc   :  { %6083 = vmatpush3.bf16.msra.mxu1 %v7563_v53  ;;  %6086 = vmatprep.mubr.msk.bf16.mxu1 %vm7197_vm0, %v7196_v0 }
0x18fd   :  { %6084 = vmatprep.subr.bf16.mxu1 %v7196_v0 }
0x1900   :  { %6085 = vmatpush3.bf16.msra.mxu1 %v7567_v37 }
0x1901   :  { %6098 = vmatprep.subr.bf16.mxu1 %v7196_v0 }
0x19bb   :  { %v1468_v54 = vpop.f32.mrf.mxu1 }
0x19bc   :  { %v1475_v55 = vrot.slane %v1468_v54, 7  ;;  %v1479_v56 = vadd.f32 %v1468_v54, %v7615_v17 }
0x19bd   :  { %v6072_v60 = vpop.f32.mrf.mxu1 }
0x19be   :  { %v1478_v61 = vadd.f32 %v1475_v55, %v7612_v10  ;;  %6519 = vtanh.f32 %v1479_v56  ;;  %v5731_v7 = vmul.f32 -1.442695, %v1479_v56 }
0x19bf   :  { %v1471_v62 = vpop.f32.mrf.mxu1 }
0x19c0   :  { %6521 = vtanh.f32 %v1478_v61  ;;  %v5730_v8 = vmul.f32 -1.442695, %v1478_v61 }
0x19c1   :  { %v6073_v63 = vpop.f32.mrf.mxu1  ;;  %6523 = vpow2.f32 %v5731_v7 }
0x19c2   :  { %6525 = vpow2.f32 %v5730_v8 }
0x19cb   :  { %v6520_v2 = vpop.eup %6519 }
0x19cc   :  { %1506 = vrot.lane.b32.xlu1 %v6520_v2, %s7186_s30 }
0x19cd   :  { %v6522_v4 = vpop.eup %6521 }
0x19ce   :  { %1504 = vrot.lane.b32.xlu0 %v6522_v4, %s7186_s30  ;;  %v6524_v9 = vpop.eup %6523 }
0x19cf   :  { %v6526_v11 = vpop.eup %6525  ;;  %v1487_v12 = vadd.f32 1.0, %v6524_v9 }
0x19d0   :  { %v1486_v15 = vadd.f32 1.0, %v6526_v11 }
0x19d1   :  { %6527 = vrcp.f32 %v1487_v12 }
0x19d2   :  { %6529 = vrcp.f32 %v1486_v15 }
0x19de   :  { %v6528_v16 = vpop.eup %6527 }
0x19df   :  { %v6530_v20 = vpop.eup %6529  ;;  %v1501_v24 = vmul.f32 %v6528_v16, %v1497_v23 }
0x19e0   :  { %v1500_v29 = vmul.f32 %v6530_v20, %v1496_v27 }
0x1a3e   :  { %v1507_v18 = vpop.permute.xlu1 %1506 }
0x1a3f   :  { %v1511_v19 = vmul.f32 %v6528_v16, %v1507_v18 }
0x1a40   :  { %v1505_v21 = vpop.permute.xlu0 %1504 }
0x1a41   :  { %1516 = vrot.lane.b32.xlu1 %v1511_v19, %s7189_s15  ;;  %v1510_v22 = vmul.f32 %v6530_v20, %v1505_v21 }
0x1a43   :  { %1514 = vrot.lane.b32.xlu0 %v1510_v22, %s7189_s15 }
0x1ab3   :  { %v1517_v28 = vpop.permute.xlu1 %1516 }
0x1ab4   :  { %v7653_v1 = vadd.f32 %v1517_v28, %v1501_v24 }
0x1ab5   :  { %v1515_v30 = vpop.permute.xlu0 %1514 }
0x1ab6   :  { %6531 = vtanh.f32 %v7653_v1  ;;  %v1520_v3 = vadd.f32 %v1515_v30, %v1500_v29  ;;  %v1622_v11 = vrot.slane %v7653_v1, 7 }
0x1ab8   :  { %6533 = vtanh.f32 %v1520_v3  ;;  %v1621_v9 = vrot.slane %v1520_v3, 7 }
0x1ac3   :  { %v6532_v31 = vpop.eup %6531 }
0x1ac4   :  { %1528 = vrot.lane.b32.xlu1 %v6532_v31, %s7186_s30 }
0x1ac5   :  { %v6534_v32 = vpop.eup %6533 }
0x1ac6   :  { %1526 = vrot.lane.b32.xlu0 %v6534_v32, %s7186_s30 }
0x1b36   :  { %v1529_v33 = vpop.permute.xlu1 %1528 }
0x1b37   :  { %v7658_v34 = vmul.f32 %v6528_v16, %v1529_v33 }
0x1b38   :  { %v1527_v35 = vpop.permute.xlu0 %1526 }
0x1b39   :  { %v7660_v40 = vmul.f32 %v6530_v20, %v1527_v35  ;;  %v1545_v41 = vpack.c.bf16 %v7658_v34, %v7658_v34 }
0x1b3b   :  { %v1544_v57 = vpack.c.bf16 %v7660_v40, %v7660_v40  ;;  %v1549_v25 = vunpack.c.l.b16 %v1545_v41 }
0x1b3d   :  { %v1548_v39 = vunpack.c.l.b16 %v1544_v57 }
0x1b3f   :  { %v1550_v26 = vrot.slane %v1548_v39, 1 }
0x1b41   :  { %v1551_v13 = vsel %vm314_vm2, %v1549_v25, %v1550_v26 }
0x1b42   :  { %v1552_v14 = vpack.c.b16 %v1551_v13, %v1551_v13 }
0x1b44   :  { %1553 = vrot.lane.b32.xlu0 %v1552_v14, %s7189_s15 }
0x1bb6   :  { %v1554_v5 = vpop.permute.xlu0 %1553 }
0x1bb7   :  { %6079 = vmatmul.mubr.msk.bf16.vlgmr.msra.gmra.mxu0 %vm99_vm1, %v1554_v5 }
0x1bb8   :  { %6091 = vmatpush3.bf16.msra.mxu0 %v7563_v53  ;;  %6094 = vmatprep.mubr.msk.bf16.mxu0 %vm7197_vm0, %v7196_v0 }
0x1bb9   :  { %6092 = vmatprep.subr.bf16.mxu0 %v7196_v0 }
0x1bbc   :  { %6093 = vmatpush3.bf16.msra.mxu0 %v7567_v37 }
0x1bbd   :  { %6106 = vmatprep.subr.bf16.mxu0 %v7196_v0 }
0x1c77   :  { %v1592_v58 = vpop.f32.mrf.mxu0 }
0x1c78   :  { %v1599_v59 = vrot.slane %v1592_v58, 6  ;;  %v1600_v43 = vrot.slane %v1592_v58, 7 }
0x1c79   :  { %v6080_v45 = vpop.f32.mrf.mxu0 }
0x1c7a   :  { %v1603_v46 = vadd.f32 %v1599_v59, %v7612_v10  ;;  %v1604_v47 = vadd.f32 %v1600_v43, %v7615_v17 }
0x1c7b   :  { %v1595_v48 = vpop.f32.mrf.mxu0 }
0x1c7c   :  { %6535 = vtanh.f32 %v1603_v46  ;;  %v5733_v51 = vmul.f32 -1.442695, %v1603_v46  ;;  %v5734_v54 = vmul.f32 -1.442695, %v1604_v47 }
0x1c7d   :  { %6537 = vtanh.f32 %v1604_v47  ;;  %v6081_v49 = vpop.f32.mrf.mxu0 }
0x1c7e   :  { %6539 = vpow2.f32 %v5733_v51 }
0x1c7f   :  { %6541 = vpow2.f32 %v5734_v54 }
0x1c89   :  { %v6536_v52 = vpop.eup %6535 }
0x1c8a   :  { %v6538_v50 = vpop.eup %6537  ;;  %1629 = vrot.lane.b32.xlu1 %v6536_v52, %s7186_s30 }
0x1c8b   :  { %1631 = vrot.lane.b32.xlu0 %v6538_v50, %s7186_s30  ;;  %v6540_v55 = vpop.eup %6539 }
0x1c8c   :  { %v6542_v56 = vpop.eup %6541  ;;  %v1611_v60 = vadd.f32 1.0, %v6540_v55 }
0x1c8d   :  { %v1612_v61 = vadd.f32 1.0, %v6542_v56 }
0x1c8e   :  { %6543 = vrcp.f32 %v1611_v60 }
0x1c8f   :  { %6545 = vrcp.f32 %v1612_v61 }
0x1c9b   :  { %v6544_v62 = vpop.eup %6543 }
0x1c9c   :  { %v6546_v2 = vpop.eup %6545  ;;  %v1625_v12 = vmul.f32 %v6544_v62, %v1621_v9 }
0x1c9d   :  { %v1626_v15 = vmul.f32 %v6546_v2, %v1622_v11 }
0x1cfc   :  { %v1630_v63 = vpop.permute.xlu1 %1629 }
0x1cfd   :  { %v1632_v4 = vpop.permute.xlu0 %1631  ;;  %v1635_v7 = vmul.f32 %v6544_v62, %v1630_v63 }
0x1cfe   :  { %v1636_v8 = vmul.f32 %v6546_v2, %v1632_v4 }
0x1cff   :  { %1639 = vrot.lane.b32.xlu1 %v1635_v7, %s7189_s15 }
0x1d00   :  { %1641 = vrot.lane.b32.xlu0 %v1636_v8, %s7189_s15 }
0x1d71   :  { %v1640_v16 = vpop.permute.xlu1 %1639 }
0x1d72   :  { %v1642_v18 = vpop.permute.xlu0 %1641  ;;  %v7682_v19 = vadd.f32 %v1640_v16, %v1625_v12 }
0x1d73   :  { %v7684_v20 = vadd.f32 %v1642_v18, %v1626_v15 }
0x1d74   :  { %6547 = vtanh.f32 %v7682_v19  ;;  %v1747_v61 = vrot.slane %v7682_v19, 7 }
0x1d75   :  { %6549 = vtanh.f32 %v7684_v20 }
0x1d81   :  { %v6548_v21 = vpop.eup %6547 }
0x1d82   :  { %v6550_v22 = vpop.eup %6549  ;;  %1651 = vrot.lane.b32.xlu1 %v6548_v21, %s7186_s30 }
0x1d83   :  { %1653 = vrot.lane.b32.xlu0 %v6550_v22, %s7186_s30 }
0x1df4   :  { %v1652_v23 = vpop.permute.xlu1 %1651 }
0x1df5   :  { %v1654_v24 = vpop.permute.xlu0 %1653  ;;  %v7690_v27 = vmul.f32 %v6544_v62, %v1652_v23  ;;  %v1748_v62 = vrot.slane %v7684_v20, 7 }
0x1df6   :  { %v7692_v28 = vmul.f32 %v6546_v2, %v1654_v24 }
0x1df7   :  { %v1669_v1 = vpack.c.bf16 %v7690_v27, %v7690_v27 }
0x1df8   :  { %v1670_v29 = vpack.c.bf16 %v7692_v28, %v7692_v28 }
0x1df9   :  { %v1673_v30 = vunpack.c.l.b16 %v1669_v1 }
0x1dfa   :  { %v1674_v3 = vunpack.c.l.b16 %v1670_v29 }
0x1dfb   :  { %v1675_v31 = vrot.slane %v1673_v30, 2 }
0x1dfc   :  { %v1676_v32 = vrot.slane %v1674_v3, 1 }
0x1dfe   :  { %v1677_v33 = vsel %vm314_vm2, %v1676_v32, %v1675_v31 }
0x1dff   :  { %v1678_v35 = vpack.c.b16 %v1677_v33, %v1677_v33 }
0x1e01   :  { %1679 = vrot.lane.b32.xlu1 %v1678_v35, %s7189_s15 }
0x1e73   :  { %v1680_v41 = vpop.permute.xlu1 %1679 }
0x1e74   :  { %6087 = vmatmul.mubr.msk.bf16.vlgmr.msra.gmra.mxu1 %vm99_vm1, %v1680_v41 }
0x1e75   :  { %6099 = vmatpush3.bf16.msra.mxu1 %v7563_v53  ;;  %6102 = vmatprep.mubr.msk.bf16.mxu1 %vm7197_vm0, %v7196_v0 }
0x1e76   :  { %6100 = vmatprep.subr.bf16.mxu1 %v7196_v0 }
0x1e79   :  { %6101 = vmatpush3.bf16.msra.mxu1 %v7567_v37 }
0x1e7a   :  { %6114 = vmatprep.subr.bf16.mxu1 %v7196_v0 }
0x1f34   :  { %v1718_v57 = vpop.f32.mrf.mxu1 }
0x1f35   :  { %v1725_v39 = vrot.slane %v1718_v57, 5  ;;  %v1726_v25 = vrot.slane %v1718_v57, 6 }
0x1f36   :  { %v6088_v26 = vpop.f32.mrf.mxu1 }
0x1f37   :  { %v1729_v13 = vadd.f32 %v1725_v39, %v7612_v10  ;;  %v1730_v14 = vadd.f32 %v1726_v25, %v7615_v17 }
0x1f38   :  { %v1721_v5 = vpop.f32.mrf.mxu1 }
0x1f39   :  { %6551 = vtanh.f32 %v1729_v13  ;;  %v5736_v45 = vmul.f32 -1.442695, %v1729_v13  ;;  %v5737_v46 = vmul.f32 -1.442695, %v1730_v14 }
0x1f3a   :  { %6553 = vtanh.f32 %v1730_v14  ;;  %v6089_v58 = vpop.f32.mrf.mxu1 }
0x1f3b   :  { %6555 = vpow2.f32 %v5736_v45 }
0x1f3c   :  { %6557 = vpow2.f32 %v5737_v46 }
0x1f46   :  { %v6552_v59 = vpop.eup %6551 }
0x1f47   :  { %v6554_v43 = vpop.eup %6553  ;;  %1755 = vrot.lane.b32.xlu0 %v6552_v59, %s7186_s30 }
0x1f48   :  { %1757 = vrot.lane.b32.xlu1 %v6554_v43, %s7186_s30  ;;  %v6556_v47 = vpop.eup %6555 }
0x1f49   :  { %v6558_v48 = vpop.eup %6557  ;;  %v1737_v49 = vadd.f32 1.0, %v6556_v47 }
0x1f4a   :  { %v1738_v52 = vadd.f32 1.0, %v6558_v48 }
0x1f4b   :  { %6559 = vrcp.f32 %v1737_v49 }
0x1f4c   :  { %6561 = vrcp.f32 %v1738_v52 }
0x1f58   :  { %v6560_v50 = vpop.eup %6559 }
0x1f59   :  { %v6562_v54 = vpop.eup %6561  ;;  %v1751_v63 = vmul.f32 %v6560_v50, %v1747_v61 }
0x1f5a   :  { %v1752_v2 = vmul.f32 %v6562_v54, %v1748_v62 }
0x1fb9   :  { %v1756_v51 = vpop.permute.xlu0 %1755 }
0x1fba   :  { %v1758_v55 = vpop.permute.xlu1 %1757  ;;  %v1761_v56 = vmul.f32 %v6560_v50, %v1756_v51 }
0x1fbb   :  { %v1762_v60 = vmul.f32 %v6562_v54, %v1758_v55 }
0x1fbc   :  { %1765 = vrot.lane.b32.xlu0 %v1761_v56, %s7189_s15 }
0x1fbd   :  { %1767 = vrot.lane.b32.xlu1 %v1762_v60, %s7189_s15 }
0x202e   :  { %v1766_v4 = vpop.permute.xlu0 %1765 }
0x202f   :  { %v1768_v7 = vpop.permute.xlu1 %1767  ;;  %v7715_v8 = vadd.f32 %v1766_v4, %v1751_v63 }
0x2030   :  { %v7717_v9 = vadd.f32 %v1768_v7, %v1752_v2 }
0x2031   :  { %6563 = vtanh.f32 %v7715_v8  ;;  %v1873_v51 = vrot.slane %v7715_v8, 7 }
0x2032   :  { %6565 = vtanh.f32 %v7717_v9 }
0x203e   :  { %v6564_v11 = vpop.eup %6563 }
0x203f   :  { %v6566_v12 = vpop.eup %6565  ;;  %1777 = vrot.lane.b32.xlu0 %v6564_v11, %s7186_s30 }
0x2040   :  { %1779 = vrot.lane.b32.xlu1 %v6566_v12, %s7186_s30 }
0x20b1   :  { %v1778_v15 = vpop.permute.xlu0 %1777 }
0x20b2   :  { %v1780_v16 = vpop.permute.xlu1 %1779  ;;  %v7723_v18 = vmul.f32 %v6560_v50, %v1778_v15 }
0x20b3   :  { %v7725_v19 = vmul.f32 %v6562_v54, %v1780_v16  ;;  %v1874_v54 = vrot.slane %v7717_v9, 7 }
0x20b4   :  { %v1795_v20 = vpack.c.bf16 %v7723_v18, %v7723_v18 }
0x20b5   :  { %v1796_v21 = vpack.c.bf16 %v7725_v19, %v7725_v19 }
0x20b6   :  { %v1799_v22 = vunpack.c.l.b16 %v1795_v20 }
0x20b7   :  { %v1800_v23 = vunpack.c.l.b16 %v1796_v21 }
0x20b8   :  { %v1801_v24 = vrot.slane %v1799_v22, 3 }
0x20b9   :  { %v1802_v1 = vrot.slane %v1800_v23, 2 }
0x20bb   :  { %v1803_v29 = vsel %vm314_vm2, %v1802_v1, %v1801_v24 }
0x20bc   :  { %v1804_v30 = vpack.c.b16 %v1803_v29, %v1803_v29 }
0x20be   :  { %1805 = vrot.lane.b32.xlu0 %v1804_v30, %s7189_s15 }
0x2130   :  { %v1806_v3 = vpop.permute.xlu0 %1805 }
0x2131   :  { %6095 = vmatmul.mubr.msk.bf16.vlgmr.msra.gmra.mxu0 %vm99_vm1, %v1806_v3 }
0x2132   :  { %6107 = vmatpush3.bf16.msra.mxu0 %v7563_v53  ;;  %6110 = vmatprep.mubr.msk.bf16.mxu0 %vm7197_vm0, %v7196_v0 }
0x2133   :  { %6108 = vmatprep.subr.bf16.mxu0 %v7196_v0 }
0x2136   :  { %6109 = vmatpush3.bf16.msra.mxu0 %v7567_v37 }
0x2137   :  { %6122 = vmatprep.subr.bf16.mxu0 %v7196_v0 }
0x21f1   :  { %v1844_v31 = vpop.f32.mrf.mxu0 }
0x21f2   :  { %v1851_v32 = vrot.slane %v1844_v31, 4  ;;  %v1852_v33 = vrot.slane %v1844_v31, 5 }
0x21f3   :  { %v6096_v35 = vpop.f32.mrf.mxu0 }
0x21f4   :  { %v1855_v41 = vadd.f32 %v1851_v32, %v7612_v10  ;;  %v1856_v57 = vadd.f32 %v1852_v33, %v7615_v17 }
0x21f5   :  { %v1847_v39 = vpop.f32.mrf.mxu0 }
0x21f6   :  { %6567 = vtanh.f32 %v1855_v41  ;;  %v5739_v14 = vmul.f32 -1.442695, %v1855_v41  ;;  %v5740_v5 = vmul.f32 -1.442695, %v1856_v57 }
0x21f7   :  { %6569 = vtanh.f32 %v1856_v57  ;;  %v6097_v25 = vpop.f32.mrf.mxu0 }
0x21f8   :  { %6571 = vpow2.f32 %v5739_v14 }
0x21f9   :  { %6573 = vpow2.f32 %v5740_v5 }
0x2203   :  { %v6568_v26 = vpop.eup %6567 }
0x2204   :  { %v6570_v13 = vpop.eup %6569  ;;  %1881 = vrot.lane.b32.xlu1 %v6568_v26, %s7186_s30 }
0x2205   :  { %1883 = vrot.lane.b32.xlu0 %v6570_v13, %s7186_s30  ;;  %v6572_v58 = vpop.eup %6571 }
0x2206   :  { %v6574_v59 = vpop.eup %6573  ;;  %v1863_v43 = vadd.f32 1.0, %v6572_v58 }
0x2207   :  { %v1864_v45 = vadd.f32 1.0, %v6574_v59 }
0x2208   :  { %6575 = vrcp.f32 %v1863_v43 }
0x2209   :  { %6577 = vrcp.f32 %v1864_v45 }
0x2215   :  { %v6576_v46 = vpop.eup %6575 }
0x2216   :  { %v6578_v48 = vpop.eup %6577  ;;  %v1877_v55 = vmul.f32 %v6576_v46, %v1873_v51 }
0x2217   :  { %v1878_v56 = vmul.f32 %v6578_v48, %v1874_v54 }
0x2276   :  { %v1882_v47 = vpop.permute.xlu1 %1881 }
0x2277   :  { %v1884_v49 = vpop.permute.xlu0 %1883  ;;  %v1887_v52 = vmul.f32 %v6576_v46, %v1882_v47 }
0x2278   :  { %v1888_v50 = vmul.f32 %v6578_v48, %v1884_v49 }
0x2279   :  { %1891 = vrot.lane.b32.xlu1 %v1887_v52, %s7189_s15 }
0x227a   :  { %1893 = vrot.lane.b32.xlu0 %v1888_v50, %s7189_s15 }
0x22eb   :  { %v1892_v60 = vpop.permute.xlu1 %1891 }
0x22ec   :  { %v1894_v61 = vpop.permute.xlu0 %1893  ;;  %v7748_v62 = vadd.f32 %v1892_v60, %v1877_v55 }
0x22ed   :  { %v7750_v63 = vadd.f32 %v1894_v61, %v1878_v56 }
0x22ee   :  { %6579 = vtanh.f32 %v7748_v62  ;;  %v1999_v47 = vrot.slane %v7748_v62, 7 }
0x22ef   :  { %6581 = vtanh.f32 %v7750_v63 }
0x22fb   :  { %v6580_v2 = vpop.eup %6579 }
0x22fc   :  { %v6582_v4 = vpop.eup %6581  ;;  %1903 = vrot.lane.b32.xlu1 %v6580_v2, %s7186_s30 }
0x22fd   :  { %1905 = vrot.lane.b32.xlu0 %v6582_v4, %s7186_s30 }
0x236e   :  { %v1904_v7 = vpop.permute.xlu1 %1903 }
0x236f   :  { %v1906_v8 = vpop.permute.xlu0 %1905  ;;  %v7756_v9 = vmul.f32 %v6576_v46, %v1904_v7 }
0x2370   :  { %v7758_v11 = vmul.f32 %v6578_v48, %v1906_v8  ;;  %v2000_v48 = vrot.slane %v7750_v63, 7 }
0x2371   :  { %v1921_v12 = vpack.c.bf16 %v7756_v9, %v7756_v9 }
0x2372   :  { %v1922_v15 = vpack.c.bf16 %v7758_v11, %v7758_v11 }
0x2373   :  { %v1925_v16 = vunpack.c.l.b16 %v1921_v12 }
0x2374   :  { %v1926_v20 = vunpack.c.l.b16 %v1922_v15 }
0x2375   :  { %v1927_v21 = vrot.slane %v1925_v16, 4 }
0x2376   :  { %v1928_v22 = vrot.slane %v1926_v20, 3 }
0x2378   :  { %v1929_v23 = vsel %vm314_vm2, %v1928_v22, %v1927_v21 }
0x2379   :  { %v1930_v24 = vpack.c.b16 %v1929_v23, %v1929_v23 }
0x237b   :  { %1931 = vrot.lane.b32.xlu1 %v1930_v24, %s7189_s15 }
0x23ed   :  { %v1932_v1 = vpop.permute.xlu1 %1931 }
0x23ee   :  { %6103 = vmatmul.mubr.msk.bf16.vlgmr.msra.gmra.mxu1 %vm99_vm1, %v1932_v1 }
0x23ef   :  { %6115 = vmatpush3.bf16.msra.mxu1 %v7563_v53  ;;  %6118 = vmatprep.mubr.msk.bf16.mxu1 %vm7197_vm0, %v7196_v0 }
0x23f0   :  { %6116 = vmatprep.subr.bf16.mxu1 %v7196_v0 }
0x23f3   :  { %6117 = vmatpush3.bf16.msra.mxu1 %v7567_v37 }
0x23f4   :  { %6130 = vmatprep.subr.bf16.mxu1 %v7196_v0 }
0x24ae   :  { %v1970_v29 = vpop.f32.mrf.mxu1 }
0x24af   :  { %v1977_v30 = vrot.slane %v1970_v29, 3  ;;  %v1978_v3 = vrot.slane %v1970_v29, 4 }
0x24b0   :  { %v6104_v31 = vpop.f32.mrf.mxu1 }
0x24b1   :  { %v1981_v32 = vadd.f32 %v1977_v30, %v7612_v10  ;;  %v1982_v33 = vadd.f32 %v1978_v3, %v7615_v17 }
0x24b2   :  { %v1973_v35 = vpop.f32.mrf.mxu1 }
0x24b3   :  { %6583 = vtanh.f32 %v1981_v32  ;;  %v5742_v37 = vmul.f32 -1.442695, %v1981_v32  ;;  %v5743_v39 = vmul.f32 -1.442695, %v1982_v33 }
0x24b4   :  { %6585 = vtanh.f32 %v1982_v33  ;;  %v6105_v53 = vpop.f32.mrf.mxu1 }
0x24b5   :  { %6587 = vpow2.f32 %v5742_v37 }
0x24b6   :  { %6589 = vpow2.f32 %v5743_v39 }
0x24c0   :  { %v6584_v41 = vpop.eup %6583 }
0x24c1   :  { %v6586_v57 = vpop.eup %6585  ;;  %2007 = vrot.lane.b32.xlu0 %v6584_v41, %s7186_s30 }
0x24c2   :  { %2009 = vrot.lane.b32.xlu1 %v6586_v57, %s7186_s30  ;;  %v6588_v25 = vpop.eup %6587 }
0x24c3   :  { %v6590_v26 = vpop.eup %6589  ;;  %v1989_v13 = vadd.f32 1.0, %v6588_v25 }
0x24c4   :  { %v1990_v14 = vadd.f32 1.0, %v6590_v26 }
0x24c5   :  { %6591 = vrcp.f32 %v1989_v13 }
0x24c6   :  { %6593 = vrcp.f32 %v1990_v14 }
0x24d2   :  { %v6592_v5 = vpop.eup %6591 }
0x24d3   :  { %v6594_v59 = vpop.eup %6593  ;;  %v2003_v49 = vmul.f32 %v6592_v5, %v1999_v47 }
0x24d4   :  { %v2004_v52 = vmul.f32 %v6594_v59, %v2000_v48 }
0x2533   :  { %v2008_v58 = vpop.permute.xlu0 %2007 }
0x2534   :  { %v2010_v43 = vpop.permute.xlu1 %2009  ;;  %v2013_v45 = vmul.f32 %v6592_v5, %v2008_v58 }
0x2535   :  { %v2014_v46 = vmul.f32 %v6594_v59, %v2010_v43 }
0x2536   :  { %2017 = vrot.lane.b32.xlu0 %v2013_v45, %s7189_s15 }
0x2537   :  { %2019 = vrot.lane.b32.xlu1 %v2014_v46, %s7189_s15 }
0x25a8   :  { %v2018_v50 = vpop.permute.xlu0 %2017 }
0x25a9   :  { %v2020_v51 = vpop.permute.xlu1 %2019  ;;  %v2023_v54 = vadd.f32 %v2018_v50, %v2003_v49 }
0x25aa   :  { %v2024_v55 = vadd.f32 %v2020_v51, %v2004_v52 }
0x25ab   :  { %6595 = vtanh.f32 %v2023_v54  ;;  %v2125_v43 = vrot.slane %v2023_v54, 7 }
0x25ac   :  { %6597 = vtanh.f32 %v2024_v55  ;;  %v2126_v45 = vrot.slane %v2024_v55, 7 }
0x25b8   :  { %v6596_v56 = vpop.eup %6595 }
0x25b9   :  { %v6598_v60 = vpop.eup %6597  ;;  %2029 = vrot.lane.b32.xlu0 %v6596_v56, %s7186_s30 }
0x25ba   :  { %2031 = vrot.lane.b32.xlu1 %v6598_v60, %s7186_s30 }
0x262b   :  { %v2030_v61 = vpop.permute.xlu0 %2029 }
0x262c   :  { %v2032_v2 = vpop.permute.xlu1 %2031  ;;  %v7783_v4 = vmul.f32 %v6592_v5, %v2030_v61 }
0x262d   :  { %v7785_v62 = vmul.f32 %v6594_v59, %v2032_v2 }
0x262e   :  { %v2047_v63 = vpack.c.bf16 %v7783_v4, %v7783_v4 }
0x262f   :  { %v2048_v7 = vpack.c.bf16 %v7785_v62, %v7785_v62 }
0x2630   :  { %v2051_v8 = vunpack.c.l.b16 %v2047_v63 }
0x2631   :  { %v2052_v12 = vunpack.c.l.b16 %v2048_v7 }
0x2632   :  { %v2053_v15 = vrot.slane %v2051_v8, 5 }
0x2633   :  { %v2054_v16 = vrot.slane %v2052_v12, 4 }
0x2635   :  { %v2055_v20 = vsel %vm314_vm2, %v2054_v16, %v2053_v15 }
0x2636   :  { %v2056_v21 = vpack.c.b16 %v2055_v20, %v2055_v20 }
0x2638   :  { %2057 = vrot.lane.b32.xlu0 %v2056_v21, %s7189_s15 }
0x26aa   :  { %v2058_v22 = vpop.permute.xlu0 %2057 }
0x26ab   :  { %6111 = vmatmul.mubr.msk.bf16.vlgmr.msra.gmra.mxu0 %vm99_vm1, %v2058_v22 }
0x26ac   :  { %6126 = vmatprep.mubr.msk.bf16.mxu0 %vm7197_vm0, %v7196_v0 }
0x276b   :  { %v2096_v23 = vpop.f32.mrf.mxu0 }
0x276c   :  { %v2103_v24 = vrot.slane %v2096_v23, 2  ;;  %v2104_v1 = vrot.slane %v2096_v23, 3 }
0x276d   :  { %v6112_v29 = vpop.f32.mrf.mxu0 }
0x276e   :  { %v2107_v30 = vadd.f32 %v2103_v24, %v7612_v10  ;;  %v2108_v3 = vadd.f32 %v2104_v1, %v7615_v17 }
0x276f   :  { %v2099_v31 = vpop.f32.mrf.mxu0 }
0x2770   :  { %6599 = vtanh.f32 %v2107_v30  ;;  %v5745_v53 = vmul.f32 -1.442695, %v2107_v30  ;;  %v5746_v41 = vmul.f32 -1.442695, %v2108_v3 }
0x2771   :  { %6601 = vtanh.f32 %v2108_v3  ;;  %v6113_v32 = vpop.f32.mrf.mxu0 }
0x2772   :  { %6603 = vpow2.f32 %v5745_v53 }
0x2773   :  { %6605 = vpow2.f32 %v5746_v41 }
0x277d   :  { %v6600_v33 = vpop.eup %6599 }
0x277e   :  { %v6602_v35 = vpop.eup %6601  ;;  %2133 = vrot.lane.b32.xlu1 %v6600_v33, %s7186_s30 }
0x277f   :  { %2135 = vrot.lane.b32.xlu0 %v6602_v35, %s7186_s30  ;;  %v6604_v57 = vpop.eup %6603 }
0x2780   :  { %v6606_v37 = vpop.eup %6605  ;;  %v2115_v39 = vadd.f32 1.0, %v6604_v57 }
0x2781   :  { %v2116_v25 = vadd.f32 1.0, %v6606_v37 }
0x2782   :  { %6607 = vrcp.f32 %v2115_v39 }
0x2783   :  { %6609 = vrcp.f32 %v2116_v25 }
0x278f   :  { %v6608_v26 = vpop.eup %6607 }
0x2790   :  { %v6610_v14 = vpop.eup %6609  ;;  %v2129_v46 = vmul.f32 %v6608_v26, %v2125_v43 }
0x2791   :  { %v2130_v47 = vmul.f32 %v6610_v14, %v2126_v45 }
0x27f0   :  { %v2134_v13 = vpop.permute.xlu1 %2133 }
0x27f1   :  { %v2136_v5 = vpop.permute.xlu0 %2135  ;;  %v2139_v58 = vmul.f32 %v6608_v26, %v2134_v13 }
0x27f2   :  { %v2140_v59 = vmul.f32 %v6610_v14, %v2136_v5 }
0x27f3   :  { %2143 = vrot.lane.b32.xlu1 %v2139_v58, %s7189_s15 }
0x27f4   :  { %2145 = vrot.lane.b32.xlu0 %v2140_v59, %s7189_s15 }
0x2865   :  { %v2144_v48 = vpop.permute.xlu1 %2143 }
0x2866   :  { %v2146_v49 = vpop.permute.xlu0 %2145  ;;  %v2149_v52 = vadd.f32 %v2144_v48, %v2129_v46 }
0x2867   :  { %v2150_v50 = vadd.f32 %v2146_v49, %v2130_v47 }
0x2868   :  { %6611 = vtanh.f32 %v2149_v52  ;;  %v2251_v5 = vrot.slane %v2149_v52, 7 }
0x2869   :  { %6613 = vtanh.f32 %v2150_v50  ;;  %v2252_v58 = vrot.slane %v2150_v50, 7 }
0x2875   :  { %v6612_v51 = vpop.eup %6611 }
0x2876   :  { %v6614_v56 = vpop.eup %6613  ;;  %2155 = vrot.lane.b32.xlu1 %v6612_v51, %s7186_s30 }
0x2877   :  { %2157 = vrot.lane.b32.xlu0 %v6614_v56, %s7186_s30 }
0x28e8   :  { %v2156_v60 = vpop.permute.xlu1 %2155 }
0x28e9   :  { %v2158_v61 = vpop.permute.xlu0 %2157  ;;  %v7804_v2 = vmul.f32 %v6608_v26, %v2156_v60 }
0x28ea   :  { %v7806_v54 = vmul.f32 %v6610_v14, %v2158_v61 }
0x28eb   :  { %v2173_v55 = vpack.c.bf16 %v7804_v2, %v7804_v2 }
0x28ec   :  { %v2174_v63 = vpack.c.bf16 %v7806_v54, %v7806_v54 }
0x28ed   :  { %v2177_v7 = vunpack.c.l.b16 %v2173_v55 }
0x28ee   :  { %v2178_v8 = vunpack.c.l.b16 %v2174_v63 }
0x28ef   :  { %v2179_v12 = vrot.slane %v2177_v7, 6 }
0x28f0   :  { %v2180_v15 = vrot.slane %v2178_v8, 5 }
0x28f2   :  { %v2181_v16 = vsel %vm314_vm2, %v2180_v15, %v2179_v12 }
0x28f3   :  { %v2182_v20 = vpack.c.b16 %v2181_v16, %v2181_v16 }
0x28f5   :  { %2183 = vrot.lane.b32.xlu1 %v2182_v20, %s7189_s15 }
0x2967   :  { %v2184_v21 = vpop.permute.xlu1 %2183 }
0x2968   :  { %6119 = vmatmul.mubr.msk.bf16.vlgmr.msra.gmra.mxu1 %vm99_vm1, %v2184_v21 }
0x2969   :  { %6134 = vmatprep.mubr.msk.bf16.mxu1 %vm7197_vm0, %v7196_v0 }
0x2a28   :  { %v2222_v22 = vpop.f32.mrf.mxu1 }
0x2a29   :  { %v2229_v23 = vrot.slane %v2222_v22, 1  ;;  %v2230_v24 = vrot.slane %v2222_v22, 2 }
0x2a2a   :  { %v6120_v1 = vpop.f32.mrf.mxu1 }
0x2a2b   :  { %v2233_v29 = vadd.f32 %v2229_v23, %v7612_v10  ;;  %v2234_v30 = vadd.f32 %v2230_v24, %v7615_v17 }
0x2a2c   :  { %v2225_v3 = vpop.f32.mrf.mxu1 }
0x2a2d   :  { %6615 = vtanh.f32 %v2233_v29  ;;  %v5748_v35 = vmul.f32 -1.442695, %v2233_v29  ;;  %v5749_v53 = vmul.f32 -1.442695, %v2234_v30 }
0x2a2e   :  { %6617 = vtanh.f32 %v2234_v30  ;;  %v6121_v31 = vpop.f32.mrf.mxu1  ;;  %v5751_v30 = vld [vmem:[%s8801_s3 + $0x2] ss:$0 sm:$0xff] }
0x2a2f   :  { %6619 = vpow2.f32 %v5748_v35 }
0x2a30   :  { %6621 = vpow2.f32 %v5749_v53 }
0x2a3a   :  { %v6616_v32 = vpop.eup %6615 }
0x2a3b   :  { %v6618_v33 = vpop.eup %6617  ;;  %2259 = vrot.lane.b32.xlu0 %v6616_v32, %s7186_s30 }
0x2a3c   :  { %2261 = vrot.lane.b32.xlu1 %v6618_v33, %s7186_s30  ;;  %v6620_v41 = vpop.eup %6619 }
0x2a3d   :  { %v6622_v57 = vpop.eup %6621  ;;  %v2241_v37 = vadd.f32 1.0, %v6620_v41 }
0x2a3e   :  { %v2242_v10 = vadd.f32 1.0, %v6622_v57 }
0x2a3f   :  { %6623 = vrcp.f32 %v2241_v37 }
0x2a40   :  { %6625 = vrcp.f32 %v2242_v10 }
0x2a4c   :  { %v6624_v17 = vpop.eup %6623 }
0x2a4d   :  { %v6626_v25 = vpop.eup %6625  ;;  %v2255_v59 = vmul.f32 %v6624_v17, %v2251_v5 }
0x2a4e   :  { %v2256_v43 = vmul.f32 %v6626_v25, %v2252_v58 }
0x2aad   :  { %v2260_v39 = vpop.permute.xlu0 %2259 }
0x2aae   :  { %v2262_v26 = vpop.permute.xlu1 %2261  ;;  %v2265_v13 = vmul.f32 %v6624_v17, %v2260_v39 }
0x2aaf   :  { %v2266_v14 = vmul.f32 %v6626_v25, %v2262_v26 }
0x2ab0   :  { %2269 = vrot.lane.b32.xlu0 %v2265_v13, %s7189_s15 }
0x2ab1   :  { %2271 = vrot.lane.b32.xlu1 %v2266_v14, %s7189_s15 }
0x2b22   :  { %v2270_v45 = vpop.permute.xlu0 %2269 }
0x2b23   :  { %v2272_v46 = vpop.permute.xlu1 %2271  ;;  %v7823_v47 = vadd.f32 %v2270_v45, %v2255_v59 }
0x2b24   :  { %v7825_v48 = vadd.f32 %v2272_v46, %v2256_v43 }
0x2b25   :  { %6627 = vtanh.f32 %v7823_v47 }
0x2b26   :  { %6629 = vtanh.f32 %v7825_v48 }
0x2b32   :  { %v6628_v49 = vpop.eup %6627 }
0x2b33   :  { %v6630_v51 = vpop.eup %6629  ;;  %2281 = vrot.lane.b32.xlu0 %v6628_v49, %s7186_s30 }
0x2b34   :  { %2283 = vrot.lane.b32.xlu1 %v6630_v51, %s7186_s30 }
0x2b37   :  { %1412 = vrot.lane.b32.xlu0 %v7629_v42, %s7189_s15  ;;  %v7859_v42 = vld [vmem:[#allocation7 + $0x28] sm:$0xff]  }
0x2b38   :  { %1414 = vrot.lane.b32.xlu1 %v7631_v44, %s7189_s15  ;;  %6131 = vmatpush3.bf16.msra.mxu1 %v7859_v42  ;;  %v6364_v44 = vld [vmem:[#allocation5 + $0x28] sm:$0xff]  }
0x2b39   :  { %6132 = vmatprep.subr.bf16.mxu1 %v7196_v0  ;;  %6123 = vmatpush3.bf16.msra.mxu0 %v6364_v44 }
0x2b3a   :  { %6124 = vmatprep.subr.bf16.mxu0 %v7196_v0 }
0x2b3b   :  { %1536 = vrot.lane.b32.xlu0 %v7660_v40, %s7189_s15  ;;  %v6366_v40 = vld [vmem:[#allocation5 + $0x20] sm:$0xff]  }
0x2b3c   :  { %1538 = vrot.lane.b32.xlu1 %v7658_v34, %s7189_s15  ;;  %v7863_v34 = vld [vmem:[#allocation7 + $0x20] sm:$0xff]  }
0x2b3d   :  { %6133 = vmatpush3.bf16.msra.mxu1 %v7863_v34  ;;  %6125 = vmatpush3.bf16.msra.mxu0 %v6366_v40 }
0x2b3e   :  { %6146 = vmatprep.subr.bf16.mxu1 %v7196_v0  ;;  %6138 = vmatprep.subr.bf16.mxu0 %v7196_v0 }
0x2b3f   :  { %1661 = vrot.lane.b32.xlu0 %v7690_v27, %s7189_s15  ;;  %v2396_v27 = vld [vmem:[#allocation8 + $0x4] sm:$0x3] }
0x2b40   :  { %1663 = vrot.lane.b32.xlu1 %v7692_v28, %s7189_s15  ;;  %v2399_v28 = vpack.c.bf16 %v2396_v27, %v2396_v27 }
0x2b42   :  { %6135 = vmatmul.mubr.msk.bf16.vlgmr.msra.gmra.mxu1 %vm99_vm1, %v2399_v28 }
0x2b43   :  { %1787 = vrot.lane.b32.xlu0 %v7723_v18, %s7189_s15  ;;  %6147 = vmatpush3.bf16.msra.mxu1 %v7859_v42 }
0x2b44   :  { %1789 = vrot.lane.b32.xlu1 %v7725_v19, %s7189_s15  ;;  %6150 = vmatprep.mubr.msk.bf16.mxu1 %vm7197_vm0, %v7196_v0 }
0x2b45   :  { %6148 = vmatprep.subr.bf16.mxu1 %v7196_v0 }
0x2b47   :  { %1913 = vrot.lane.b32.xlu0 %v7756_v9, %s7189_s15  ;;  %6149 = vmatpush3.bf16.msra.mxu1 %v7863_v34 }
0x2b48   :  { %1915 = vrot.lane.b32.xlu1 %v7758_v11, %s7189_s15  ;;  %6162 = vmatprep.subr.bf16.mxu1 %v7196_v0 }
0x2b4b   :  { %2039 = vrot.lane.b32.xlu0 %v7783_v4, %s7189_s15 }
0x2b4c   :  { %2041 = vrot.lane.b32.xlu1 %v7785_v62, %s7189_s15 }
0x2b4f   :  { %2165 = vrot.lane.b32.xlu0 %v7804_v2, %s7189_s15 }
0x2b50   :  { %2167 = vrot.lane.b32.xlu1 %v7806_v54, %s7189_s15 }
0x2ba5   :  { %v2282_v18 = vpop.permute.xlu0 %2281 }
0x2ba6   :  { %v2284_v19 = vpop.permute.xlu1 %2283  ;;  %v2287_v9 = vmul.f32 %v6624_v17, %v2282_v18  ;;  %v2398_v17 = vld [vmem:[#allocation10 + $0x4] sm:$0x3] }
0x2ba7   :  { %v7874_v11 = vmul.f32 %v6626_v25, %v2284_v19  ;;  %v2476_v25 = vrot.slane %v2398_v17, 1 }
0x2ba8   :  { %2291 = vrot.lane.b32.xlu0 %v2287_v9, %s7189_s15 }
0x2ba9   :  { %2293 = vrot.lane.b32.xlu1 %v7874_v11, %s7189_s15  ;;  %v1413_v4 = vpop.permute.xlu0 %1412 }
0x2baa   :  { %v1415_v62 = vpop.permute.xlu1 %1414  ;;  %1418 = vst.msk [vmem:[#allocation11] sm:$0x1] %vm304_vm3, %v1413_v4 }
0x2bab   :  { %1419 = vst.msk [vmem:[#allocation11 + $0x8] sm:$0x1] %vm304_vm3, %v1415_v62 }
0x2bad   :  { %v1537_v52 = vpop.permute.xlu0 %1536 }
0x2bae   :  { %v1539_v50 = vpop.permute.xlu1 %1538  ;;  %1542 = vst.msk [vmem:[#allocation11] sm:$0x2] %vm430_vm4, %v1537_v52 }
0x2baf   :  { %1543 = vst.msk [vmem:[#allocation11 + $0x8] sm:$0x2] %vm430_vm4, %v1539_v50 }
0x2bb1   :  { %v1662_v56 = vpop.permute.xlu0 %1661 }
0x2bb2   :  { %v1664_v60 = vpop.permute.xlu1 %1663  ;;  %1667 = vst.msk [vmem:[#allocation11] sm:$0x4] %vm556_vm5, %v1662_v56 }
0x2bb3   :  { %1668 = vst.msk [vmem:[#allocation11 + $0x8] sm:$0x4] %vm556_vm5, %v1664_v60 }
0x2bb5   :  { %v1788_v61 = vpop.permute.xlu0 %1787 }
0x2bb6   :  { %v1790_v2 = vpop.permute.xlu1 %1789  ;;  %1793 = vst.msk [vmem:[#allocation11] sm:$0x8] %vm683_vm6, %v1788_v61 }
0x2bb7   :  { %1794 = vst.msk [vmem:[#allocation11 + $0x8] sm:$0x8] %vm683_vm6, %v1790_v2 }
0x2bb9   :  { %v1914_v54 = vpop.permute.xlu0 %1913 }
0x2bba   :  { %v1916_v55 = vpop.permute.xlu1 %1915  ;;  %1919 = vst.msk [vmem:[#allocation11] sm:$0x10] %vm810_vm7, %v1914_v54 }
0x2bbb   :  { %1920 = vst.msk [vmem:[#allocation11 + $0x8] sm:$0x10] %vm810_vm7, %v1916_v55 }
0x2bbd   :  { %v2040_v63 = vpop.permute.xlu0 %2039 }
0x2bbe   :  { %v2042_v7 = vpop.permute.xlu1 %2041  ;;  %2045 = vst.msk [vmem:[#allocation11] sm:$0x20] %vm937_vm8, %v2040_v63 }
0x2bbf   :  { %2046 = vst.msk [vmem:[#allocation11 + $0x8] sm:$0x20] %vm937_vm8, %v2042_v7 }
0x2bc1   :  { %v2166_v8 = vpop.permute.xlu0 %2165 }
0x2bc2   :  { %v2168_v12 = vpop.permute.xlu1 %2167  ;;  %2171 = vst.msk [vmem:[#allocation11] sm:$0x40] %vm1064_vm9, %v2166_v8 }
0x2bc3   :  { %2172 = vst.msk [vmem:[#allocation11 + $0x8] sm:$0x40] %vm1064_vm9, %v2168_v12 }
0x2c02   :  { %v2449_v23 = vpop.f32.mrf.mxu1 }
0x2c03   :  { %v2456_v33 = vrot.slane %v2449_v23, 1 }
0x2c04   :  { %v6136_v24 = vpop.f32.mrf.mxu1 }
0x2c06   :  { %v2452_v1 = vpop.f32.mrf.mxu1 }
0x2c08   :  { %v6137_v29 = vpop.f32.mrf.mxu1 }
0x2c1a   :  { %v2292_v15 = vpop.permute.xlu0 %2291 }
0x2c1b   :  { %v2294_v16 = vpop.permute.xlu1 %2293  ;;  %2297 = vst.msk [vmem:[#allocation11] sm:$0x80] %vm1191_vm10, %v2292_v15  ;;  %2304 = vst.msk [vmem:[#allocation12 - $0x5] sm:$0x80] %vm1191_vm10, %v2292_v15 }
0x2c1c   :  { %2298 = vst.msk [vmem:[#allocation11 + $0x8] sm:$0x80] %vm1191_vm10, %v2294_v16 }
0x2c22   :  { %v2330_v20 = vld [vmem:[#allocation11] sm:$0xff] }
0x2c23   :  { %v2331_v21 = vld [vmem:[#allocation11 + $0x8] sm:$0xff] }
0x2c24   :  { %v2332_v22 = vpack.c.bf16 %v2331_v21, %v2330_v20 }
0x2c26   :  { %6127 = vmatmul.mubr.msk.bf16.vlgmr.msra.gmra.mxu0 %vm99_vm1, %v2332_v22 }
0x2c27   :  { %6139 = vmatpush3.bf16.msra.mxu0 %v7859_v42  ;;  %6142 = vmatprep.mubr.msk.bf16.mxu0 %vm7197_vm0, %v7196_v0 }
0x2c28   :  { %6140 = vmatprep.subr.bf16.mxu0 %v7196_v0 }
0x2c2b   :  { %6141 = vmatpush3.bf16.msra.mxu0 %v7863_v34 }
0x2c2c   :  { %6154 = vmatprep.subr.bf16.mxu0 %v7196_v0 }
0x2ce6   :  { %v2388_v3 = vpop.f32.mrf.mxu0 }
0x2ce7   :  { %v7908_v31 = vadd.f32 %v5751_v30, %v2388_v3 }
0x2ce8   :  { %v6128_v32 = vpop.f32.mrf.mxu0 }
0x2ce9   :  { %v2459_v35 = vadd.f32 %v2449_v23, %v7908_v31 }
0x2cea   :  { %v2391_v53 = vpop.f32.mrf.mxu0 }
0x2ceb   :  { %v7911_v41 = vadd.f32 %v5751_v30, %v2391_v53  ;;  %6631 = vtanh.f32 %v2459_v35  ;;  %v5758_v26 = vmul.f32 -1.442695, %v2459_v35 }
0x2cec   :  { %v6129_v57 = vpop.f32.mrf.mxu0 }
0x2ced   :  { %v2460_v37 = vadd.f32 %v2456_v33, %v7911_v41 }
0x2cef   :  { %6633 = vtanh.f32 %v2460_v37  ;;  %v5759_v13 = vmul.f32 -1.442695, %v2460_v37 }
0x2cf0   :  { %6635 = vpow2.f32 %v5758_v26 }
0x2cf1   :  { %6637 = vpow2.f32 %v5759_v13 }
0x2cf8   :  { %v6632_v10 = vpop.eup %6631 }
0x2cf9   :  { %2487 = vrot.lane.b32.xlu1 %v6632_v10, %s7186_s30 }
0x2cfc   :  { %v6634_v39 = vpop.eup %6633 }
0x2cfd   :  { %2477 = vrot.lane.b32.xlu1 %v2398_v17, %s7189_s15  ;;  %2489 = vrot.lane.b32.xlu0 %v6634_v39, %s7186_s30  ;;  %v6636_v14 = vpop.eup %6635 }
0x2cfe   :  { %v2467_v5 = vadd.f32 1.0, %v6636_v14  ;;  %v6638_v58 = vpop.eup %6637 }
0x2cff   :  { %v2468_v59 = vadd.f32 1.0, %v6638_v58 }
0x2d00   :  { %6639 = vrcp.f32 %v2467_v5 }
0x2d01   :  { %2479 = vrot.lane.b32.xlu0 %v2476_v25, %s7189_s15  ;;  %6641 = vrcp.f32 %v2468_v59 }
0x2d0d   :  { %v6640_v43 = vpop.eup %6639 }
0x2d0e   :  { %v6642_v49 = vpop.eup %6641 }
0x2d6b   :  { %v2488_v45 = vpop.permute.xlu1 %2487 }
0x2d6c   :  { %v2493_v46 = vmul.f32 %v6640_v43, %v2488_v45 }
0x2d6e   :  { %2497 = vrot.lane.b32.xlu1 %v2493_v46, %s7189_s15 }
0x2d6f   :  { %v2490_v51 = vpop.permute.xlu0 %2489  ;;  %v2478_v40 = vpop.permute.xlu1 %2477 }
0x2d70   :  { %v2494_v44 = vmul.f32 %v6642_v49, %v2490_v51  ;;  %v2483_v27 = vmul.f32 %v6640_v43, %v2478_v40 }
0x2d72   :  { %2499 = vrot.lane.b32.xlu0 %v2494_v44, %s7189_s15 }
0x2d73   :  { %v2480_v28 = vpop.permute.xlu0 %2479 }
0x2d74   :  { %v2484_v9 = vmul.f32 %v6642_v49, %v2480_v28 }
0x2de0   :  { %v2498_v18 = vpop.permute.xlu1 %2497 }
0x2de1   :  { %v7920_v19 = vadd.f32 %v2498_v18, %v2483_v27 }
0x2de3   :  { %6643 = vtanh.f32 %v7920_v19  ;;  %v2603_v58 = vrot.slane %v7920_v19, 7 }
0x2de4   :  { %v2500_v4 = vpop.permute.xlu0 %2499 }
0x2de5   :  { %v2504_v62 = vadd.f32 %v2500_v4, %v2484_v9 }
0x2de7   :  { %6645 = vtanh.f32 %v2504_v62  ;;  %v2604_v14 = vrot.slane %v2504_v62, 7 }
0x2df0   :  { %v6644_v52 = vpop.eup %6643 }
0x2df1   :  { %2509 = vrot.lane.b32.xlu1 %v6644_v52, %s7186_s30 }
0x2df4   :  { %v6646_v50 = vpop.eup %6645 }
0x2df5   :  { %2511 = vrot.lane.b32.xlu0 %v6646_v50, %s7186_s30 }
0x2e63   :  { %v2510_v56 = vpop.permute.xlu1 %2509 }
0x2e64   :  { %v7925_v60 = vmul.f32 %v6640_v43, %v2510_v56 }
0x2e66   :  { %v2527_v54 = vpack.c.bf16 %v7925_v60, %v7925_v60 }
0x2e67   :  { %v2512_v61 = vpop.permute.xlu0 %2511 }
0x2e68   :  { %v7927_v2 = vmul.f32 %v6642_v49, %v2512_v61  ;;  %v2531_v7 = vunpack.c.l.b16 %v2527_v54 }
0x2e6a   :  { %v2528_v55 = vpack.c.bf16 %v7927_v2, %v7927_v2 }
0x2e6c   :  { %v2532_v63 = vunpack.c.l.b16 %v2528_v55 }
0x2e6e   :  { %v2533_v8 = vrot.slane %v2532_v63, 7 }
0x2e70   :  { %v2534_v12 = vsel %vm314_vm2, %v2533_v8, %v2531_v7 }
0x2e71   :  { %v2535_v15 = vpack.c.b16 %v2534_v12, %v2534_v12 }
0x2e73   :  { %2536 = vrot.lane.b32.xlu0 %v2535_v15, %s7189_s15 }
0x2ee5   :  { %v2537_v16 = vpop.permute.xlu0 %2536 }
0x2ee6   :  { %6143 = vmatmul.mubr.msk.bf16.vlgmr.msra.gmra.mxu0 %vm99_vm1, %v2537_v16 }
0x2ee7   :  { %6155 = vmatpush3.bf16.msra.mxu0 %v7859_v42  ;;  %6158 = vmatprep.mubr.msk.bf16.mxu0 %vm7197_vm0, %v7196_v0 }
0x2ee8   :  { %6156 = vmatprep.subr.bf16.mxu0 %v7196_v0 }
0x2eeb   :  { %6157 = vmatpush3.bf16.msra.mxu0 %v7863_v34 }
0x2eec   :  { %6170 = vmatprep.subr.bf16.mxu0 %v7196_v0 }
0x2fa6   :  { %v2575_v20 = vpop.f32.mrf.mxu0 }
0x2fa7   :  { %v2582_v21 = vrot.slane %v2575_v20, 7  ;;  %v2586_v22 = vadd.f32 %v2575_v20, %v7911_v41 }
0x2fa8   :  { %v6144_v23 = vpop.f32.mrf.mxu0 }
0x2fa9   :  { %v2585_v24 = vadd.f32 %v2582_v21, %v7908_v31  ;;  %6647 = vtanh.f32 %v2586_v22  ;;  %v5762_v32 = vmul.f32 -1.442695, %v2586_v22 }
0x2faa   :  { %v2578_v1 = vpop.f32.mrf.mxu0 }
0x2fab   :  { %6649 = vtanh.f32 %v2585_v24  ;;  %v5761_v33 = vmul.f32 -1.442695, %v2585_v24 }
0x2fac   :  { %v6145_v29 = vpop.f32.mrf.mxu0  ;;  %6651 = vpow2.f32 %v5762_v32 }
0x2fad   :  { %6653 = vpow2.f32 %v5761_v33 }
0x2fb6   :  { %v6648_v30 = vpop.eup %6647 }
0x2fb7   :  { %2613 = vrot.lane.b32.xlu0 %v6648_v30, %s7186_s30 }
0x2fb8   :  { %v6650_v3 = vpop.eup %6649 }
0x2fb9   :  { %2611 = vrot.lane.b32.xlu1 %v6650_v3, %s7186_s30  ;;  %v6652_v35 = vpop.eup %6651 }
0x2fba   :  { %v6654_v53 = vpop.eup %6653  ;;  %v2594_v57 = vadd.f32 1.0, %v6652_v35 }
0x2fbb   :  { %v2593_v37 = vadd.f32 1.0, %v6654_v53 }
0x2fbc   :  { %6655 = vrcp.f32 %v2594_v57 }
0x2fbd   :  { %6657 = vrcp.f32 %v2593_v37 }
0x2fc9   :  { %v6656_v10 = vpop.eup %6655 }
0x2fca   :  { %v6658_v25 = vpop.eup %6657  ;;  %v2608_v5 = vmul.f32 %v6656_v10, %v2604_v14 }
0x2fcb   :  { %v2607_v45 = vmul.f32 %v6658_v25, %v2603_v58 }
0x3029   :  { %v2614_v17 = vpop.permute.xlu0 %2613 }
0x302a   :  { %v2618_v39 = vmul.f32 %v6656_v10, %v2614_v17 }
0x302b   :  { %v2612_v26 = vpop.permute.xlu1 %2611 }
0x302c   :  { %2623 = vrot.lane.b32.xlu0 %v2618_v39, %s7189_s15  ;;  %v2617_v13 = vmul.f32 %v6658_v25, %v2612_v26 }
0x302e   :  { %2621 = vrot.lane.b32.xlu1 %v2617_v13, %s7189_s15 }
0x309e   :  { %v2624_v59 = vpop.permute.xlu0 %2623 }
0x309f   :  { %v7949_v43 = vadd.f32 %v2624_v59, %v2608_v5 }
0x30a0   :  { %v2622_v46 = vpop.permute.xlu1 %2621 }
0x30a1   :  { %6659 = vtanh.f32 %v7949_v43  ;;  %v2627_v49 = vadd.f32 %v2622_v46, %v2607_v45 }
0x30a3   :  { %6661 = vtanh.f32 %v2627_v49  ;;  %v2728_v37 = vrot.slane %v2627_v49, 7 }
0x30ae   :  { %v6660_v51 = vpop.eup %6659 }
0x30af   :  { %2635 = vrot.lane.b32.xlu0 %v6660_v51, %s7186_s30 }
0x30b0   :  { %v6662_v44 = vpop.eup %6661 }
0x30b1   :  { %2633 = vrot.lane.b32.xlu1 %v6662_v44, %s7186_s30 }
0x3121   :  { %v2636_v40 = vpop.permute.xlu0 %2635 }
0x3122   :  { %v7954_v27 = vmul.f32 %v6656_v10, %v2636_v40  ;;  %v2729_v10 = vrot.slane %v7949_v43, 7 }
0x3123   :  { %v2634_v28 = vpop.permute.xlu1 %2633 }
0x3124   :  { %v7956_v18 = vmul.f32 %v6658_v25, %v2634_v28  ;;  %v2652_v19 = vpack.c.bf16 %v7954_v27, %v7954_v27 }
0x3126   :  { %v2651_v9 = vpack.c.bf16 %v7956_v18, %v7956_v18  ;;  %v2656_v62 = vunpack.c.l.b16 %v2652_v19 }
0x3128   :  { %v2655_v4 = vunpack.c.l.b16 %v2651_v9 }
0x312a   :  { %v2657_v52 = vrot.slane %v2655_v4, 1 }
0x312c   :  { %v2658_v50 = vsel %vm314_vm2, %v2656_v62, %v2657_v52 }
0x312d   :  { %v2659_v56 = vpack.c.b16 %v2658_v50, %v2658_v50 }
0x312f   :  { %2660 = vrot.lane.b32.xlu1 %v2659_v56, %s7189_s15 }
0x31a1   :  { %v2661_v61 = vpop.permute.xlu1 %2660 }
0x31a2   :  { %6151 = vmatmul.mubr.msk.bf16.vlgmr.msra.gmra.mxu1 %vm99_vm1, %v2661_v61 }
0x31a3   :  { %6163 = vmatpush3.bf16.msra.mxu1 %v7859_v42  ;;  %6166 = vmatprep.mubr.msk.bf16.mxu1 %vm7197_vm0, %v7196_v0 }
0x31a4   :  { %6164 = vmatprep.subr.bf16.mxu1 %v7196_v0 }
0x31a7   :  { %6165 = vmatpush3.bf16.msra.mxu1 %v7863_v34 }
0x31a8   :  { %6178 = vmatprep.subr.bf16.mxu1 %v7196_v0 }
0x3262   :  { %v2699_v54 = vpop.f32.mrf.mxu1 }
0x3263   :  { %v2706_v55 = vrot.slane %v2699_v54, 6  ;;  %v2707_v63 = vrot.slane %v2699_v54, 7 }
0x3264   :  { %v6152_v7 = vpop.f32.mrf.mxu1 }
0x3265   :  { %v2710_v8 = vadd.f32 %v2706_v55, %v7908_v31  ;;  %v2711_v12 = vadd.f32 %v2707_v63, %v7911_v41 }
0x3266   :  { %v2702_v15 = vpop.f32.mrf.mxu1 }
0x3267   :  { %6663 = vtanh.f32 %v2710_v8  ;;  %v5764_v22 = vmul.f32 -1.442695, %v2710_v8  ;;  %v5765_v23 = vmul.f32 -1.442695, %v2711_v12 }
0x3268   :  { %6665 = vtanh.f32 %v2711_v12  ;;  %v6153_v16 = vpop.f32.mrf.mxu1 }
0x3269   :  { %6667 = vpow2.f32 %v5764_v22 }
0x326a   :  { %6669 = vpow2.f32 %v5765_v23 }
0x3274   :  { %v6664_v20 = vpop.eup %6663 }
0x3275   :  { %v6666_v21 = vpop.eup %6665  ;;  %2736 = vrot.lane.b32.xlu0 %v6664_v20, %s7186_s30 }
0x3276   :  { %2738 = vrot.lane.b32.xlu1 %v6666_v21, %s7186_s30  ;;  %v6668_v24 = vpop.eup %6667 }
0x3277   :  { %v6670_v1 = vpop.eup %6669  ;;  %v2718_v29 = vadd.f32 1.0, %v6668_v24 }
0x3278   :  { %v2719_v30 = vadd.f32 1.0, %v6670_v1 }
0x3279   :  { %6671 = vrcp.f32 %v2718_v29 }
0x327a   :  { %6673 = vrcp.f32 %v2719_v30 }
0x3286   :  { %v6672_v3 = vpop.eup %6671 }
0x3287   :  { %v6674_v33 = vpop.eup %6673  ;;  %v2732_v17 = vmul.f32 %v6672_v3, %v2728_v37 }
0x3288   :  { %v2733_v39 = vmul.f32 %v6674_v33, %v2729_v10 }
0x32e7   :  { %v2737_v32 = vpop.permute.xlu0 %2736 }
0x32e8   :  { %v2739_v35 = vpop.permute.xlu1 %2738  ;;  %v2742_v53 = vmul.f32 %v6672_v3, %v2737_v32 }
0x32e9   :  { %v2743_v57 = vmul.f32 %v6674_v33, %v2739_v35 }
0x32ea   :  { %2746 = vrot.lane.b32.xlu0 %v2742_v53, %s7189_s15 }
0x32eb   :  { %2748 = vrot.lane.b32.xlu1 %v2743_v57, %s7189_s15 }
0x335c   :  { %v2747_v25 = vpop.permute.xlu0 %2746 }
0x335d   :  { %v2749_v26 = vpop.permute.xlu1 %2748  ;;  %v7978_v13 = vadd.f32 %v2747_v25, %v2732_v17 }
0x335e   :  { %v7980_v14 = vadd.f32 %v2749_v26, %v2733_v39 }
0x335f   :  { %6675 = vtanh.f32 %v7978_v13 }
0x3360   :  { %6677 = vtanh.f32 %v7980_v14  ;;  %v2855_v35 = vrot.slane %v7980_v14, 7 }
0x336c   :  { %v6676_v5 = vpop.eup %6675 }
0x336d   :  { %v6678_v58 = vpop.eup %6677  ;;  %2758 = vrot.lane.b32.xlu0 %v6676_v5, %s7186_s30 }
0x336e   :  { %2760 = vrot.lane.b32.xlu1 %v6678_v58, %s7186_s30 }
0x33df   :  { %v2759_v59 = vpop.permute.xlu0 %2758 }
0x33e0   :  { %v2761_v43 = vpop.permute.xlu1 %2760  ;;  %v7986_v45 = vmul.f32 %v6672_v3, %v2759_v59 }
0x33e1   :  { %v7988_v46 = vmul.f32 %v6674_v33, %v2761_v43  ;;  %v2854_v33 = vrot.slane %v7978_v13, 7 }
0x33e2   :  { %v2776_v49 = vpack.c.bf16 %v7986_v45, %v7986_v45 }
0x33e3   :  { %v2777_v51 = vpack.c.bf16 %v7988_v46, %v7988_v46 }
0x33e4   :  { %v2780_v44 = vunpack.c.l.b16 %v2776_v49 }
0x33e5   :  { %v2781_v40 = vunpack.c.l.b16 %v2777_v51 }
0x33e6   :  { %v2782_v28 = vrot.slane %v2780_v44, 2 }
0x33e7   :  { %v2783_v19 = vrot.slane %v2781_v40, 1 }
0x33e9   :  { %v2784_v9 = vsel %vm314_vm2, %v2783_v19, %v2782_v28 }
0x33ea   :  { %v2785_v4 = vpack.c.b16 %v2784_v9, %v2784_v9 }
0x33ec   :  { %2786 = vrot.lane.b32.xlu0 %v2785_v4, %s7189_s15 }
0x345e   :  { %v2787_v62 = vpop.permute.xlu0 %2786 }
0x345f   :  { %6159 = vmatmul.mubr.msk.bf16.vlgmr.msra.gmra.mxu0 %vm99_vm1, %v2787_v62 }
0x3460   :  { %6171 = vmatpush3.bf16.msra.mxu0 %v7859_v42  ;;  %6174 = vmatprep.mubr.msk.bf16.mxu0 %vm7197_vm0, %v7196_v0 }
0x3461   :  { %6172 = vmatprep.subr.bf16.mxu0 %v7196_v0 }
0x3464   :  { %6173 = vmatpush3.bf16.msra.mxu0 %v7863_v34 }
0x3465   :  { %6186 = vmatprep.subr.bf16.mxu0 %v7196_v0 }
0x351f   :  { %v2825_v52 = vpop.f32.mrf.mxu0 }
0x3520   :  { %v2832_v50 = vrot.slane %v2825_v52, 5  ;;  %v2833_v56 = vrot.slane %v2825_v52, 6 }
0x3521   :  { %v6160_v61 = vpop.f32.mrf.mxu0 }
0x3522   :  { %v2836_v54 = vadd.f32 %v2832_v50, %v7908_v31  ;;  %v2837_v55 = vadd.f32 %v2833_v56, %v7911_v41 }
0x3523   :  { %v2828_v63 = vpop.f32.mrf.mxu0 }
0x3524   :  { %6679 = vtanh.f32 %v2836_v54  ;;  %v5767_v15 = vmul.f32 -1.442695, %v2836_v54  ;;  %v5768_v16 = vmul.f32 -1.442695, %v2837_v55 }
0x3525   :  { %6681 = vtanh.f32 %v2837_v55  ;;  %v6161_v7 = vpop.f32.mrf.mxu0 }
0x3526   :  { %6683 = vpow2.f32 %v5767_v15 }
0x3527   :  { %6685 = vpow2.f32 %v5768_v16 }
0x3531   :  { %v6680_v8 = vpop.eup %6679 }
0x3532   :  { %v6682_v12 = vpop.eup %6681  ;;  %2862 = vrot.lane.b32.xlu1 %v6680_v8, %s7186_s30 }
0x3533   :  { %2864 = vrot.lane.b32.xlu0 %v6682_v12, %s7186_s30  ;;  %v6684_v20 = vpop.eup %6683 }
0x3534   :  { %v6686_v21 = vpop.eup %6685  ;;  %v2844_v22 = vadd.f32 1.0, %v6684_v20 }
0x3535   :  { %v2845_v23 = vadd.f32 1.0, %v6686_v21 }
0x3536   :  { %6687 = vrcp.f32 %v2844_v22 }
0x3537   :  { %6689 = vrcp.f32 %v2845_v23 }
0x3543   :  { %v6688_v24 = vpop.eup %6687 }
0x3544   :  { %v6690_v29 = vpop.eup %6689  ;;  %v2858_v53 = vmul.f32 %v6688_v24, %v2854_v33 }
0x3545   :  { %v2859_v57 = vmul.f32 %v6690_v29, %v2855_v35 }
0x35a4   :  { %v2863_v1 = vpop.permute.xlu1 %2862 }
0x35a5   :  { %v2865_v30 = vpop.permute.xlu0 %2864  ;;  %v2868_v3 = vmul.f32 %v6688_v24, %v2863_v1 }
0x35a6   :  { %v2869_v32 = vmul.f32 %v6690_v29, %v2865_v30 }
0x35a7   :  { %2872 = vrot.lane.b32.xlu1 %v2868_v3, %s7189_s15 }
0x35a8   :  { %2874 = vrot.lane.b32.xlu0 %v2869_v32, %s7189_s15 }
0x3619   :  { %v2873_v37 = vpop.permute.xlu1 %2872 }
0x361a   :  { %v2875_v10 = vpop.permute.xlu0 %2874  ;;  %v8011_v17 = vadd.f32 %v2873_v37, %v2858_v53 }
0x361b   :  { %v8013_v39 = vadd.f32 %v2875_v10, %v2859_v57 }
0x361c   :  { %6691 = vtanh.f32 %v8011_v17  ;;  %v2980_v3 = vrot.slane %v8011_v17, 7 }
0x361d   :  { %6693 = vtanh.f32 %v8013_v39  ;;  %v2981_v32 = vrot.slane %v8013_v39, 7 }
0x3629   :  { %v6692_v25 = vpop.eup %6691 }
0x362a   :  { %v6694_v26 = vpop.eup %6693  ;;  %2884 = vrot.lane.b32.xlu1 %v6692_v25, %s7186_s30 }
0x362b   :  { %2886 = vrot.lane.b32.xlu0 %v6694_v26, %s7186_s30 }
0x369c   :  { %v2885_v13 = vpop.permute.xlu1 %2884 }
0x369d   :  { %v2887_v14 = vpop.permute.xlu0 %2886  ;;  %v8019_v5 = vmul.f32 %v6688_v24, %v2885_v13 }
0x369e   :  { %v8021_v58 = vmul.f32 %v6690_v29, %v2887_v14 }
0x369f   :  { %v2902_v59 = vpack.c.bf16 %v8019_v5, %v8019_v5 }
0x36a0   :  { %v2903_v43 = vpack.c.bf16 %v8021_v58, %v8021_v58 }
0x36a1   :  { %v2906_v49 = vunpack.c.l.b16 %v2902_v59 }
0x36a2   :  { %v2907_v51 = vunpack.c.l.b16 %v2903_v43 }
0x36a3   :  { %v2908_v44 = vrot.slane %v2906_v49, 3 }
0x36a4   :  { %v2909_v40 = vrot.slane %v2907_v51, 2 }
0x36a6   :  { %v2910_v28 = vsel %vm314_vm2, %v2909_v40, %v2908_v44 }
0x36a7   :  { %v2911_v19 = vpack.c.b16 %v2910_v28, %v2910_v28 }
0x36a9   :  { %2912 = vrot.lane.b32.xlu1 %v2911_v19, %s7189_s15 }
0x371b   :  { %v2913_v9 = vpop.permute.xlu1 %2912 }
0x371c   :  { %6167 = vmatmul.mubr.msk.bf16.vlgmr.msra.gmra.mxu1 %vm99_vm1, %v2913_v9 }
0x371d   :  { %6179 = vmatpush3.bf16.msra.mxu1 %v7859_v42  ;;  %6182 = vmatprep.mubr.msk.bf16.mxu1 %vm7197_vm0, %v7196_v0 }
0x371e   :  { %6180 = vmatprep.subr.bf16.mxu1 %v7196_v0 }
0x3721   :  { %6181 = vmatpush3.bf16.msra.mxu1 %v7863_v34 }
0x3722   :  { %6194 = vmatprep.subr.bf16.mxu1 %v7196_v0 }
0x37dc   :  { %v2951_v4 = vpop.f32.mrf.mxu1 }
0x37dd   :  { %v2958_v62 = vrot.slane %v2951_v4, 4  ;;  %v2959_v52 = vrot.slane %v2951_v4, 5 }
0x37de   :  { %v6168_v50 = vpop.f32.mrf.mxu1 }
0x37df   :  { %v2962_v56 = vadd.f32 %v2958_v62, %v7908_v31  ;;  %v2963_v61 = vadd.f32 %v2959_v52, %v7911_v41 }
0x37e0   :  { %v2954_v54 = vpop.f32.mrf.mxu1 }
0x37e1   :  { %6695 = vtanh.f32 %v2962_v56  ;;  %v5770_v8 = vmul.f32 -1.442695, %v2962_v56  ;;  %v5771_v12 = vmul.f32 -1.442695, %v2963_v61 }
0x37e2   :  { %6697 = vtanh.f32 %v2963_v61  ;;  %v6169_v55 = vpop.f32.mrf.mxu1 }
0x37e3   :  { %6699 = vpow2.f32 %v5770_v8 }
0x37e4   :  { %6701 = vpow2.f32 %v5771_v12 }
0x37ee   :  { %v6696_v63 = vpop.eup %6695 }
0x37ef   :  { %v6698_v7 = vpop.eup %6697  ;;  %2988 = vrot.lane.b32.xlu0 %v6696_v63, %s7186_s30 }
0x37f0   :  { %2990 = vrot.lane.b32.xlu1 %v6698_v7, %s7186_s30  ;;  %v6700_v15 = vpop.eup %6699 }
0x37f1   :  { %v6702_v16 = vpop.eup %6701  ;;  %v2970_v20 = vadd.f32 1.0, %v6700_v15 }
0x37f2   :  { %v2971_v21 = vadd.f32 1.0, %v6702_v16 }
0x37f3   :  { %6703 = vrcp.f32 %v2970_v20 }
0x37f4   :  { %6705 = vrcp.f32 %v2971_v21 }
0x3800   :  { %v6704_v22 = vpop.eup %6703 }
0x3801   :  { %v6706_v24 = vpop.eup %6705  ;;  %v2984_v33 = vmul.f32 %v6704_v22, %v2980_v3 }
0x3802   :  { %v2985_v35 = vmul.f32 %v6706_v24, %v2981_v32 }
0x3861   :  { %v2989_v23 = vpop.permute.xlu0 %2988 }
0x3862   :  { %v2991_v1 = vpop.permute.xlu1 %2990  ;;  %v2994_v29 = vmul.f32 %v6704_v22, %v2989_v23 }
0x3863   :  { %v2995_v30 = vmul.f32 %v6706_v24, %v2991_v1 }
0x3864   :  { %2998 = vrot.lane.b32.xlu0 %v2994_v29, %s7189_s15 }
0x3865   :  { %3000 = vrot.lane.b32.xlu1 %v2995_v30, %s7189_s15 }
0x38d6   :  { %v2999_v53 = vpop.permute.xlu0 %2998 }
0x38d7   :  { %v3001_v57 = vpop.permute.xlu1 %3000  ;;  %v8044_v37 = vadd.f32 %v2999_v53, %v2984_v33 }
0x38d8   :  { %v8046_v10 = vadd.f32 %v3001_v57, %v2985_v35 }
0x38d9   :  { %6707 = vtanh.f32 %v8044_v37  ;;  %v3106_v29 = vrot.slane %v8044_v37, 7 }
0x38da   :  { %6709 = vtanh.f32 %v8046_v10  ;;  %v3107_v30 = vrot.slane %v8046_v10, 7 }
0x38e6   :  { %v6708_v25 = vpop.eup %6707 }
0x38e7   :  { %v6710_v26 = vpop.eup %6709  ;;  %3010 = vrot.lane.b32.xlu0 %v6708_v25, %s7186_s30 }
0x38e8   :  { %3012 = vrot.lane.b32.xlu1 %v6710_v26, %s7186_s30 }
0x3959   :  { %v3011_v17 = vpop.permute.xlu0 %3010 }
0x395a   :  { %v3013_v39 = vpop.permute.xlu1 %3012  ;;  %v8052_v13 = vmul.f32 %v6704_v22, %v3011_v17 }
0x395b   :  { %v8054_v14 = vmul.f32 %v6706_v24, %v3013_v39 }
0x395c   :  { %v3028_v59 = vpack.c.bf16 %v8052_v13, %v8052_v13 }
0x395d   :  { %v3029_v43 = vpack.c.bf16 %v8054_v14, %v8054_v14 }
0x395e   :  { %v3032_v49 = vunpack.c.l.b16 %v3028_v59 }
0x395f   :  { %v3033_v51 = vunpack.c.l.b16 %v3029_v43 }
0x3960   :  { %v3034_v44 = vrot.slane %v3032_v49, 4 }
0x3961   :  { %v3035_v40 = vrot.slane %v3033_v51, 3 }
0x3963   :  { %v3036_v28 = vsel %vm314_vm2, %v3035_v40, %v3034_v44 }
0x3964   :  { %v3037_v19 = vpack.c.b16 %v3036_v28, %v3036_v28 }
0x3966   :  { %3038 = vrot.lane.b32.xlu0 %v3037_v19, %s7189_s15 }
0x39d8   :  { %v3039_v9 = vpop.permute.xlu0 %3038 }
0x39d9   :  { %6175 = vmatmul.mubr.msk.bf16.vlgmr.msra.gmra.mxu0 %vm99_vm1, %v3039_v9 }
0x39da   :  { %6187 = vmatpush3.bf16.msra.mxu0 %v7859_v42  ;;  %6190 = vmatprep.mubr.msk.bf16.mxu0 %vm7197_vm0, %v7196_v0 }
0x39db   :  { %6188 = vmatprep.subr.bf16.mxu0 %v7196_v0 }
0x39de   :  { %6189 = vmatpush3.bf16.msra.mxu0 %v7863_v34 }
0x39df   :  { %6202 = vmatprep.subr.bf16.mxu0 %v7196_v0 }
0x3a99   :  { %v3077_v4 = vpop.f32.mrf.mxu0 }
0x3a9a   :  { %v3084_v62 = vrot.slane %v3077_v4, 3  ;;  %v3085_v52 = vrot.slane %v3077_v4, 4 }
0x3a9b   :  { %v6176_v50 = vpop.f32.mrf.mxu0 }
0x3a9c   :  { %v3088_v56 = vadd.f32 %v3084_v62, %v7908_v31  ;;  %v3089_v61 = vadd.f32 %v3085_v52, %v7911_v41 }
0x3a9d   :  { %v3080_v54 = vpop.f32.mrf.mxu0 }
0x3a9e   :  { %6711 = vtanh.f32 %v3088_v56  ;;  %v5773_v34 = vmul.f32 -1.442695, %v3088_v56  ;;  %v5774_v7 = vmul.f32 -1.442695, %v3089_v61 }
0x3a9f   :  { %6713 = vtanh.f32 %v3089_v61  ;;  %v6177_v42 = vpop.f32.mrf.mxu0 }
0x3aa0   :  { %6715 = vpow2.f32 %v5773_v34 }
0x3aa1   :  { %6717 = vpow2.f32 %v5774_v7 }
0x3aab   :  { %v6712_v55 = vpop.eup %6711 }
0x3aac   :  { %v6714_v63 = vpop.eup %6713  ;;  %3114 = vrot.lane.b32.xlu1 %v6712_v55, %s7186_s30 }
0x3aad   :  { %3116 = vrot.lane.b32.xlu0 %v6714_v63, %s7186_s30  ;;  %v6716_v8 = vpop.eup %6715 }
0x3aae   :  { %v6718_v12 = vpop.eup %6717  ;;  %v3096_v15 = vadd.f32 1.0, %v6716_v8 }
0x3aaf   :  { %v3097_v16 = vadd.f32 1.0, %v6718_v12 }
0x3ab0   :  { %6719 = vrcp.f32 %v3096_v15 }
0x3ab1   :  { %6721 = vrcp.f32 %v3097_v16 }
0x3abd   :  { %v6720_v20 = vpop.eup %6719 }
0x3abe   :  { %v6722_v22 = vpop.eup %6721  ;;  %v3110_v3 = vmul.f32 %v6720_v20, %v3106_v29 }
0x3abf   :  { %v3111_v32 = vmul.f32 %v6722_v22, %v3107_v30 }
0x3b1e   :  { %v3115_v21 = vpop.permute.xlu1 %3114 }
0x3b1f   :  { %v3117_v23 = vpop.permute.xlu0 %3116  ;;  %v3120_v24 = vmul.f32 %v6720_v20, %v3115_v21 }
0x3b20   :  { %v3121_v1 = vmul.f32 %v6722_v22, %v3117_v23 }
0x3b21   :  { %3124 = vrot.lane.b32.xlu1 %v3120_v24, %s7189_s15 }
0x3b22   :  { %3126 = vrot.lane.b32.xlu0 %v3121_v1, %s7189_s15 }
0x3b93   :  { %v3125_v33 = vpop.permute.xlu1 %3124 }
0x3b94   :  { %v3127_v35 = vpop.permute.xlu0 %3126  ;;  %v3130_v53 = vadd.f32 %v3125_v33, %v3110_v3 }
0x3b95   :  { %v3131_v57 = vadd.f32 %v3127_v35, %v3111_v32 }
0x3b96   :  { %6723 = vtanh.f32 %v3130_v53  ;;  %v3232_v29 = vrot.slane %v3130_v53, 7 }
0x3b97   :  { %6725 = vtanh.f32 %v3131_v57  ;;  %v3233_v30 = vrot.slane %v3131_v57, 7 }
0x3ba3   :  { %v6724_v25 = vpop.eup %6723 }
0x3ba4   :  { %v6726_v26 = vpop.eup %6725  ;;  %3136 = vrot.lane.b32.xlu1 %v6724_v25, %s7186_s30 }
0x3ba5   :  { %3138 = vrot.lane.b32.xlu0 %v6726_v26, %s7186_s30 }
0x3c16   :  { %v3137_v17 = vpop.permute.xlu1 %3136 }
0x3c17   :  { %v3139_v39 = vpop.permute.xlu0 %3138  ;;  %v8079_v59 = vmul.f32 %v6720_v20, %v3137_v17 }
0x3c18   :  { %v8081_v37 = vmul.f32 %v6722_v22, %v3139_v39 }
0x3c19   :  { %v3154_v10 = vpack.c.bf16 %v8079_v59, %v8079_v59 }
0x3c1a   :  { %v3155_v43 = vpack.c.bf16 %v8081_v37, %v8081_v37 }
0x3c1b   :  { %v3158_v49 = vunpack.c.l.b16 %v3154_v10 }
0x3c1c   :  { %v3159_v51 = vunpack.c.l.b16 %v3155_v43 }
0x3c1d   :  { %v3160_v44 = vrot.slane %v3158_v49, 5 }
0x3c1e   :  { %v3161_v40 = vrot.slane %v3159_v51, 4 }
0x3c20   :  { %v3162_v28 = vsel %vm314_vm2, %v3161_v40, %v3160_v44 }
0x3c21   :  { %v3163_v19 = vpack.c.b16 %v3162_v28, %v3162_v28 }
0x3c23   :  { %3164 = vrot.lane.b32.xlu1 %v3163_v19, %s7189_s15 }
0x3c95   :  { %v3165_v9 = vpop.permute.xlu1 %3164 }
0x3c96   :  { %6183 = vmatmul.mubr.msk.bf16.vlgmr.msra.gmra.mxu1 %vm99_vm1, %v3165_v9 }
0x3c97   :  { %6198 = vmatprep.mubr.msk.bf16.mxu1 %vm7197_vm0, %v7196_v0 }
0x3d56   :  { %v3203_v4 = vpop.f32.mrf.mxu1 }
0x3d57   :  { %v3210_v62 = vrot.slane %v3203_v4, 2  ;;  %v3211_v52 = vrot.slane %v3203_v4, 3 }
0x3d58   :  { %v6184_v50 = vpop.f32.mrf.mxu1 }
0x3d59   :  { %v3214_v56 = vadd.f32 %v3210_v62, %v7908_v31  ;;  %v3215_v61 = vadd.f32 %v3211_v52, %v7911_v41 }
0x3d5a   :  { %v3206_v54 = vpop.f32.mrf.mxu1 }
0x3d5b   :  { %6727 = vtanh.f32 %v3214_v56  ;;  %v5776_v34 = vmul.f32 -1.442695, %v3214_v56  ;;  %v5777_v7 = vmul.f32 -1.442695, %v3215_v61 }
0x3d5c   :  { %6729 = vtanh.f32 %v3215_v61  ;;  %v6185_v42 = vpop.f32.mrf.mxu1 }
0x3d5d   :  { %6731 = vpow2.f32 %v5776_v34 }
0x3d5e   :  { %6733 = vpow2.f32 %v5777_v7 }
0x3d68   :  { %v6728_v55 = vpop.eup %6727 }
0x3d69   :  { %v6730_v63 = vpop.eup %6729  ;;  %3240 = vrot.lane.b32.xlu0 %v6728_v55, %s7186_s30 }
0x3d6a   :  { %3242 = vrot.lane.b32.xlu1 %v6730_v63, %s7186_s30  ;;  %v6732_v8 = vpop.eup %6731 }
0x3d6b   :  { %v6734_v12 = vpop.eup %6733  ;;  %v3222_v15 = vadd.f32 1.0, %v6732_v8 }
0x3d6c   :  { %v3223_v16 = vadd.f32 1.0, %v6734_v12 }
0x3d6d   :  { %6735 = vrcp.f32 %v3222_v15 }
0x3d6e   :  { %6737 = vrcp.f32 %v3223_v16 }
0x3d7a   :  { %v6736_v20 = vpop.eup %6735 }
0x3d7b   :  { %v6738_v22 = vpop.eup %6737  ;;  %v3236_v3 = vmul.f32 %v6736_v20, %v3232_v29 }
0x3d7c   :  { %v3237_v32 = vmul.f32 %v6738_v22, %v3233_v30 }
0x3ddb   :  { %v3241_v21 = vpop.permute.xlu0 %3240 }
0x3ddc   :  { %v3243_v23 = vpop.permute.xlu1 %3242  ;;  %v3246_v24 = vmul.f32 %v6736_v20, %v3241_v21 }
0x3ddd   :  { %v3247_v1 = vmul.f32 %v6738_v22, %v3243_v23 }
0x3dde   :  { %3250 = vrot.lane.b32.xlu0 %v3246_v24, %s7189_s15 }
0x3ddf   :  { %3252 = vrot.lane.b32.xlu1 %v3247_v1, %s7189_s15 }
0x3e50   :  { %v3251_v33 = vpop.permute.xlu0 %3250 }
0x3e51   :  { %v3253_v35 = vpop.permute.xlu1 %3252  ;;  %v3256_v25 = vadd.f32 %v3251_v33, %v3236_v3 }
0x3e52   :  { %v3257_v26 = vadd.f32 %v3253_v35, %v3237_v32 }
0x3e53   :  { %6739 = vtanh.f32 %v3256_v25  ;;  %v3358_v29 = vrot.slane %v3256_v25, 7 }
0x3e54   :  { %6741 = vtanh.f32 %v3257_v26  ;;  %v3359_v30 = vrot.slane %v3257_v26, 7 }
0x3e60   :  { %v6740_v17 = vpop.eup %6739 }
0x3e61   :  { %v6742_v39 = vpop.eup %6741  ;;  %3262 = vrot.lane.b32.xlu0 %v6740_v17, %s7186_s30 }
0x3e62   :  { %3264 = vrot.lane.b32.xlu1 %v6742_v39, %s7186_s30 }
0x3ed3   :  { %v3263_v10 = vpop.permute.xlu0 %3262 }
0x3ed4   :  { %v3265_v43 = vpop.permute.xlu1 %3264  ;;  %v8100_v49 = vmul.f32 %v6736_v20, %v3263_v10 }
0x3ed5   :  { %v8102_v53 = vmul.f32 %v6738_v22, %v3265_v43 }
0x3ed6   :  { %v3280_v57 = vpack.c.bf16 %v8100_v49, %v8100_v49 }
0x3ed7   :  { %v3281_v51 = vpack.c.bf16 %v8102_v53, %v8102_v53 }
0x3ed8   :  { %v3284_v44 = vunpack.c.l.b16 %v3280_v57 }
0x3ed9   :  { %v3285_v40 = vunpack.c.l.b16 %v3281_v51 }
0x3eda   :  { %v3286_v28 = vrot.slane %v3284_v44, 6 }
0x3edb   :  { %v3287_v19 = vrot.slane %v3285_v40, 5 }
0x3edd   :  { %v3288_v9 = vsel %vm314_vm2, %v3287_v19, %v3286_v28 }
0x3ede   :  { %v3289_v4 = vpack.c.b16 %v3288_v9, %v3288_v9 }
0x3ee0   :  { %3290 = vrot.lane.b32.xlu0 %v3289_v4, %s7189_s15 }
0x3f52   :  { %v3291_v62 = vpop.permute.xlu0 %3290 }
0x3f53   :  { %6191 = vmatmul.mubr.msk.bf16.vlgmr.msra.gmra.mxu0 %vm99_vm1, %v3291_v62 }
0x3f54   :  { %6206 = vmatprep.mubr.msk.bf16.mxu0 %vm7197_vm0, %v7196_v0 }
0x4013   :  { %v3329_v52 = vpop.f32.mrf.mxu0 }
0x4014   :  { %v3336_v50 = vrot.slane %v3329_v52, 1  ;;  %v3337_v56 = vrot.slane %v3329_v52, 2 }
0x4015   :  { %v6192_v61 = vpop.f32.mrf.mxu0 }
0x4016   :  { %v3340_v54 = vadd.f32 %v3336_v50, %v7908_v31  ;;  %v3341_v42 = vadd.f32 %v3337_v56, %v7911_v41 }
0x4017   :  { %v3332_v55 = vpop.f32.mrf.mxu0 }
0x4018   :  { %6743 = vtanh.f32 %v3340_v54  ;;  %v5779_v8 = vmul.f32 -1.442695, %v3340_v54  ;;  %v5780_v12 = vmul.f32 -1.442695, %v3341_v42 }
0x4019   :  { %6745 = vtanh.f32 %v3341_v42  ;;  %v6193_v63 = vpop.f32.mrf.mxu0 }
0x401a   :  { %6747 = vpow2.f32 %v5779_v8 }
0x401b   :  { %6749 = vpow2.f32 %v5780_v12 }
0x4025   :  { %v6744_v34 = vpop.eup %6743 }
0x4026   :  { %v6746_v7 = vpop.eup %6745  ;;  %3366 = vrot.lane.b32.xlu1 %v6744_v34, %s7186_s30  ;;  %v5782_v34 = vld [vmem:[%s8801_s3 + $0x3] ss:$0 sm:$0xff] }
0x4027   :  { %3368 = vrot.lane.b32.xlu0 %v6746_v7, %s7186_s30  ;;  %v6748_v15 = vpop.eup %6747 }
0x4028   :  { %v6750_v16 = vpop.eup %6749  ;;  %v3348_v20 = vadd.f32 1.0, %v6748_v15 }
0x4029   :  { %v3349_v31 = vadd.f32 1.0, %v6750_v16 }
0x402a   :  { %6751 = vrcp.f32 %v3348_v20 }
0x402b   :  { %6753 = vrcp.f32 %v3349_v31 }
0x4037   :  { %v6752_v41 = vpop.eup %6751 }
0x4038   :  { %v6754_v22 = vpop.eup %6753  ;;  %v3362_v3 = vmul.f32 %v6752_v41, %v3358_v29 }
0x4039   :  { %v3363_v32 = vmul.f32 %v6754_v22, %v3359_v30 }
0x4098   :  { %v3367_v21 = vpop.permute.xlu1 %3366 }
0x4099   :  { %v3369_v23 = vpop.permute.xlu0 %3368  ;;  %v3372_v24 = vmul.f32 %v6752_v41, %v3367_v21 }
0x409a   :  { %v3373_v1 = vmul.f32 %v6754_v22, %v3369_v23  ;;  %v3505_v23 = vld [vmem:[#allocation10 + $0x6] sm:$0x3] }
0x409b   :  { %3376 = vrot.lane.b32.xlu1 %v3372_v24, %s7189_s15 }
0x409c   :  { %3378 = vrot.lane.b32.xlu0 %v3373_v1, %s7189_s15  ;;  %v3583_v1 = vrot.slane %v3505_v23, 1 }
0x410d   :  { %v3377_v33 = vpop.permute.xlu1 %3376 }
0x410e   :  { %v3379_v35 = vpop.permute.xlu0 %3378  ;;  %v8119_v17 = vadd.f32 %v3377_v33, %v3362_v3 }
0x410f   :  { %v8121_v39 = vadd.f32 %v3379_v35, %v3363_v32 }
0x4110   :  { %6755 = vtanh.f32 %v8119_v17 }
0x4111   :  { %6757 = vtanh.f32 %v8121_v39 }
0x411d   :  { %v6756_v10 = vpop.eup %6755 }
0x411e   :  { %v6758_v43 = vpop.eup %6757  ;;  %3388 = vrot.lane.b32.xlu1 %v6756_v10, %s7186_s30 }
0x411f   :  { %3390 = vrot.lane.b32.xlu0 %v6758_v43, %s7186_s30 }
0x4122   :  { %2519 = vrot.lane.b32.xlu1 %v7925_v60, %s7189_s15  ;;  %v8155_v60 = vld [vmem:[#allocation7 + $0x38] sm:$0xff]  }
0x4123   :  { %2521 = vrot.lane.b32.xlu0 %v7927_v2, %s7189_s15  ;;  %6203 = vmatpush3.bf16.msra.mxu0 %v8155_v60  ;;  %v6368_v2 = vld [vmem:[#allocation5 + $0x38] sm:$0xff]  }
0x4124   :  { %6204 = vmatprep.subr.bf16.mxu0 %v7196_v0  ;;  %6195 = vmatpush3.bf16.msra.mxu1 %v6368_v2 }
0x4125   :  { %6196 = vmatprep.subr.bf16.mxu1 %v7196_v0 }
0x4126   :  { %2643 = vrot.lane.b32.xlu1 %v7956_v18, %s7189_s15  ;;  %v6370_v18 = vld [vmem:[#allocation5 + $0x30] sm:$0xff]  }
0x4127   :  { %2645 = vrot.lane.b32.xlu0 %v7954_v27, %s7189_s15  ;;  %v8159_v27 = vld [vmem:[#allocation7 + $0x30] sm:$0xff]  }
0x4128   :  { %6205 = vmatpush3.bf16.msra.mxu0 %v8159_v27  ;;  %6197 = vmatpush3.bf16.msra.mxu1 %v6370_v18 }
0x4129   :  { %6218 = vmatprep.subr.bf16.mxu0 %v7196_v0  ;;  %6210 = vmatprep.subr.bf16.mxu1 %v7196_v0 }
0x412a   :  { %2768 = vrot.lane.b32.xlu1 %v7986_v45, %s7189_s15  ;;  %v3503_v45 = vld [vmem:[#allocation8 + $0x6] sm:$0x3] }
0x412b   :  { %2770 = vrot.lane.b32.xlu0 %v7988_v46, %s7189_s15  ;;  %v3506_v46 = vpack.c.bf16 %v3503_v45, %v3503_v45 }
0x412d   :  { %6207 = vmatmul.mubr.msk.bf16.vlgmr.msra.gmra.mxu0 %vm99_vm1, %v3506_v46 }
0x412e   :  { %2894 = vrot.lane.b32.xlu1 %v8019_v5, %s7189_s15  ;;  %6219 = vmatpush3.bf16.msra.mxu0 %v8155_v60 }
0x412f   :  { %2896 = vrot.lane.b32.xlu0 %v8021_v58, %s7189_s15  ;;  %6222 = vmatprep.mubr.msk.bf16.mxu0 %vm7197_vm0, %v7196_v0 }
0x4130   :  { %6220 = vmatprep.subr.bf16.mxu0 %v7196_v0 }
0x4132   :  { %3020 = vrot.lane.b32.xlu1 %v8052_v13, %s7189_s15  ;;  %6221 = vmatpush3.bf16.msra.mxu0 %v8159_v27 }
0x4133   :  { %3022 = vrot.lane.b32.xlu0 %v8054_v14, %s7189_s15  ;;  %6234 = vmatprep.subr.bf16.mxu0 %v7196_v0 }
0x4136   :  { %3146 = vrot.lane.b32.xlu1 %v8079_v59, %s7189_s15 }
0x4137   :  { %3148 = vrot.lane.b32.xlu0 %v8081_v37, %s7189_s15 }
0x413a   :  { %3272 = vrot.lane.b32.xlu1 %v8100_v49, %s7189_s15 }
0x413b   :  { %3274 = vrot.lane.b32.xlu0 %v8102_v53, %s7189_s15 }
0x4190   :  { %v3389_v5 = vpop.permute.xlu1 %3388 }
0x4191   :  { %v3391_v58 = vpop.permute.xlu0 %3390  ;;  %v3394_v13 = vmul.f32 %v6752_v41, %v3389_v5 }
0x4192   :  { %v8170_v14 = vmul.f32 %v6754_v22, %v3391_v58 }
0x4193   :  { %3398 = vrot.lane.b32.xlu1 %v3394_v13, %s7189_s15 }
0x4194   :  { %3400 = vrot.lane.b32.xlu0 %v8170_v14, %s7189_s15  ;;  %v2520_v59 = vpop.permute.xlu1 %2519 }
0x4195   :  { %v2522_v37 = vpop.permute.xlu0 %2521  ;;  %2525 = vst.msk [vmem:[#allocation11] sm:$0x1] %vm304_vm3, %v2520_v59 }
0x4196   :  { %2526 = vst.msk [vmem:[#allocation11 + $0x8] sm:$0x1] %vm304_vm3, %v2522_v37 }
0x4198   :  { %v2644_v25 = vpop.permute.xlu1 %2643 }
0x4199   :  { %v2646_v26 = vpop.permute.xlu0 %2645  ;;  %2649 = vst.msk [vmem:[#allocation11] sm:$0x2] %vm430_vm4, %v2644_v25 }
0x419a   :  { %2650 = vst.msk [vmem:[#allocation11 + $0x8] sm:$0x2] %vm430_vm4, %v2646_v26 }
0x419c   :  { %v2769_v49 = vpop.permute.xlu1 %2768 }
0x419d   :  { %v2771_v53 = vpop.permute.xlu0 %2770  ;;  %2774 = vst.msk [vmem:[#allocation11] sm:$0x4] %vm556_vm5, %v2769_v49 }
0x419e   :  { %2775 = vst.msk [vmem:[#allocation11 + $0x8] sm:$0x4] %vm556_vm5, %v2771_v53 }
0x41a0   :  { %v2895_v57 = vpop.permute.xlu1 %2894 }
0x41a1   :  { %v2897_v51 = vpop.permute.xlu0 %2896  ;;  %2900 = vst.msk [vmem:[#allocation11] sm:$0x8] %vm683_vm6, %v2895_v57 }
0x41a2   :  { %2901 = vst.msk [vmem:[#allocation11 + $0x8] sm:$0x8] %vm683_vm6, %v2897_v51 }
0x41a4   :  { %v3021_v44 = vpop.permute.xlu1 %3020 }
0x41a5   :  { %v3023_v40 = vpop.permute.xlu0 %3022  ;;  %3026 = vst.msk [vmem:[#allocation11] sm:$0x10] %vm810_vm7, %v3021_v44 }
0x41a6   :  { %3027 = vst.msk [vmem:[#allocation11 + $0x8] sm:$0x10] %vm810_vm7, %v3023_v40 }
0x41a8   :  { %v3147_v28 = vpop.permute.xlu1 %3146 }
0x41a9   :  { %v3149_v19 = vpop.permute.xlu0 %3148  ;;  %3152 = vst.msk [vmem:[#allocation11] sm:$0x20] %vm937_vm8, %v3147_v28 }
0x41aa   :  { %3153 = vst.msk [vmem:[#allocation11 + $0x8] sm:$0x20] %vm937_vm8, %v3149_v19 }
0x41ac   :  { %v3273_v9 = vpop.permute.xlu1 %3272 }
0x41ad   :  { %v3275_v4 = vpop.permute.xlu0 %3274  ;;  %3278 = vst.msk [vmem:[#allocation11] sm:$0x40] %vm1064_vm9, %v3273_v9 }
0x41ae   :  { %3279 = vst.msk [vmem:[#allocation11 + $0x8] sm:$0x40] %vm1064_vm9, %v3275_v4 }
0x41ed   :  { %v3556_v54 = vpop.f32.mrf.mxu0 }
0x41ee   :  { %v3563_v15 = vrot.slane %v3556_v54, 1 }
0x41ef   :  { %v6208_v42 = vpop.f32.mrf.mxu0 }
0x41f1   :  { %v3559_v55 = vpop.f32.mrf.mxu0 }
0x41f3   :  { %v6209_v63 = vpop.f32.mrf.mxu0 }
0x4205   :  { %v3399_v62 = vpop.permute.xlu1 %3398 }
0x4206   :  { %v3401_v52 = vpop.permute.xlu0 %3400  ;;  %3404 = vst.msk [vmem:[#allocation11] sm:$0x80] %vm1191_vm10, %v3399_v62  ;;  %3411 = vst.msk [vmem:[#allocation12 - $0x3] sm:$0x80] %vm1191_vm10, %v3399_v62 }
0x4207   :  { %3405 = vst.msk [vmem:[#allocation11 + $0x8] sm:$0x80] %vm1191_vm10, %v3401_v52 }
0x420d   :  { %v3437_v50 = vld [vmem:[#allocation11] sm:$0xff] }
0x420e   :  { %v3438_v56 = vld [vmem:[#allocation11 + $0x8] sm:$0xff] }
0x420f   :  { %v3439_v61 = vpack.c.bf16 %v3438_v56, %v3437_v50 }
0x4211   :  { %6199 = vmatmul.mubr.msk.bf16.vlgmr.msra.gmra.mxu1 %vm99_vm1, %v3439_v61 }
0x4212   :  { %6211 = vmatpush3.bf16.msra.mxu1 %v8155_v60  ;;  %6214 = vmatprep.mubr.msk.bf16.mxu1 %vm7197_vm0, %v7196_v0 }
0x4213   :  { %6212 = vmatprep.subr.bf16.mxu1 %v7196_v0 }
0x4216   :  { %6213 = vmatpush3.bf16.msra.mxu1 %v8159_v27 }
0x4217   :  { %6226 = vmatprep.subr.bf16.mxu1 %v7196_v0 }
0x42d1   :  { %v3495_v7 = vpop.f32.mrf.mxu1 }
0x42d2   :  { %v8204_v8 = vadd.f32 %v5782_v34, %v3495_v7 }
0x42d3   :  { %v6200_v12 = vpop.f32.mrf.mxu1 }
0x42d4   :  { %v3566_v16 = vadd.f32 %v3556_v54, %v8204_v8 }
0x42d5   :  { %v3498_v20 = vpop.f32.mrf.mxu1 }
0x42d6   :  { %v8207_v31 = vadd.f32 %v5782_v34, %v3498_v20  ;;  %6759 = vtanh.f32 %v3566_v16  ;;  %v5789_v29 = vmul.f32 -1.442695, %v3566_v16 }
0x42d7   :  { %v6201_v41 = vpop.f32.mrf.mxu1 }
0x42d8   :  { %v3567_v21 = vadd.f32 %v3563_v15, %v8207_v31 }
0x42da   :  { %6761 = vtanh.f32 %v3567_v21  ;;  %v5790_v30 = vmul.f32 -1.442695, %v3567_v21 }
0x42db   :  { %6763 = vpow2.f32 %v5789_v29 }
0x42dc   :  { %6765 = vpow2.f32 %v5790_v30 }
0x42e3   :  { %v6760_v22 = vpop.eup %6759 }
0x42e4   :  { %3594 = vrot.lane.b32.xlu0 %v6760_v22, %s7186_s30 }
0x42e7   :  { %v6762_v24 = vpop.eup %6761 }
0x42e8   :  { %3584 = vrot.lane.b32.xlu0 %v3505_v23, %s7189_s15  ;;  %3596 = vrot.lane.b32.xlu1 %v6762_v24, %s7186_s30  ;;  %v6764_v3 = vpop.eup %6763 }
0x42e9   :  { %v3574_v32 = vadd.f32 1.0, %v6764_v3  ;;  %v6766_v33 = vpop.eup %6765 }
0x42ea   :  { %v3575_v35 = vadd.f32 1.0, %v6766_v33 }
0x42eb   :  { %6767 = vrcp.f32 %v3574_v32 }
0x42ec   :  { %3586 = vrot.lane.b32.xlu1 %v3583_v1, %s7189_s15  ;;  %6769 = vrcp.f32 %v3575_v35 }
0x42f8   :  { %v6768_v10 = vpop.eup %6767 }
0x42f9   :  { %v6770_v18 = vpop.eup %6769 }
0x4356   :  { %v3595_v43 = vpop.permute.xlu0 %3594 }
0x4357   :  { %v3600_v2 = vmul.f32 %v6768_v10, %v3595_v43 }
0x4359   :  { %3604 = vrot.lane.b32.xlu0 %v3600_v2, %s7189_s15 }
0x435a   :  { %v3597_v45 = vpop.permute.xlu1 %3596  ;;  %v3585_v5 = vpop.permute.xlu0 %3584 }
0x435b   :  { %v3601_v46 = vmul.f32 %v6770_v18, %v3597_v45  ;;  %v3590_v58 = vmul.f32 %v6768_v10, %v3585_v5 }
0x435d   :  { %3606 = vrot.lane.b32.xlu1 %v3601_v46, %s7189_s15 }
0x435e   :  { %v3587_v13 = vpop.permute.xlu1 %3586 }
0x435f   :  { %v3591_v25 = vmul.f32 %v6770_v18, %v3587_v13 }
0x43cb   :  { %v3605_v59 = vpop.permute.xlu0 %3604 }
0x43cc   :  { %v8216_v37 = vadd.f32 %v3605_v59, %v3590_v58 }
0x43ce   :  { %6771 = vtanh.f32 %v8216_v37  ;;  %v3710_v43 = vrot.slane %v8216_v37, 7 }
0x43cf   :  { %v3607_v26 = vpop.permute.xlu1 %3606 }
0x43d0   :  { %v3611_v49 = vadd.f32 %v3607_v26, %v3591_v25 }
0x43d2   :  { %6773 = vtanh.f32 %v3611_v49  ;;  %v3711_v35 = vrot.slane %v3611_v49, 7 }
0x43db   :  { %v6772_v53 = vpop.eup %6771 }
0x43dc   :  { %3616 = vrot.lane.b32.xlu0 %v6772_v53, %s7186_s30 }
0x43df   :  { %v6774_v57 = vpop.eup %6773 }
0x43e0   :  { %3618 = vrot.lane.b32.xlu1 %v6774_v57, %s7186_s30 }
0x444e   :  { %v3617_v51 = vpop.permute.xlu0 %3616 }
0x444f   :  { %v8221_v44 = vmul.f32 %v6768_v10, %v3617_v51 }
0x4451   :  { %v3634_v19 = vpack.c.bf16 %v8221_v44, %v8221_v44 }
0x4452   :  { %v3619_v40 = vpop.permute.xlu1 %3618 }
0x4453   :  { %v8223_v28 = vmul.f32 %v6770_v18, %v3619_v40  ;;  %v3638_v62 = vunpack.c.l.b16 %v3634_v19 }
0x4455   :  { %v3635_v9 = vpack.c.bf16 %v8223_v28, %v8223_v28 }
0x4457   :  { %v3639_v4 = vunpack.c.l.b16 %v3635_v9 }
0x4459   :  { %v3640_v52 = vrot.slane %v3639_v4, 7 }
0x445b   :  { %v3641_v50 = vsel %vm314_vm2, %v3640_v52, %v3638_v62 }
0x445c   :  { %v3642_v56 = vpack.c.b16 %v3641_v50, %v3641_v50 }
0x445e   :  { %3643 = vrot.lane.b32.xlu1 %v3642_v56, %s7189_s15 }
0x44d0   :  { %v3644_v61 = vpop.permute.xlu1 %3643 }
0x44d1   :  { %6215 = vmatmul.mubr.msk.bf16.vlgmr.msra.gmra.mxu1 %vm99_vm1, %v3644_v61 }
0x44d2   :  { %6227 = vmatpush3.bf16.msra.mxu1 %v8155_v60  ;;  %6230 = vmatprep.mubr.msk.bf16.mxu1 %vm7197_vm0, %v7196_v0 }
0x44d3   :  { %6228 = vmatprep.subr.bf16.mxu1 %v7196_v0 }
0x44d6   :  { %6229 = vmatpush3.bf16.msra.mxu1 %v8159_v27 }
0x44d7   :  { %6242 = vmatprep.subr.bf16.mxu1 %v7196_v0 }
0x4591   :  { %v3682_v54 = vpop.f32.mrf.mxu1 }
0x4592   :  { %v3689_v42 = vrot.slane %v3682_v54, 7  ;;  %v3693_v55 = vadd.f32 %v3682_v54, %v8207_v31 }
0x4593   :  { %v6216_v63 = vpop.f32.mrf.mxu1 }
0x4594   :  { %v3692_v34 = vadd.f32 %v3689_v42, %v8204_v8  ;;  %6775 = vtanh.f32 %v3693_v55  ;;  %v5793_v20 = vmul.f32 -1.442695, %v3693_v55 }
0x4595   :  { %v3685_v7 = vpop.f32.mrf.mxu1 }
0x4596   :  { %6777 = vtanh.f32 %v3692_v34  ;;  %v5792_v41 = vmul.f32 -1.442695, %v3692_v34 }
0x4597   :  { %v6217_v12 = vpop.f32.mrf.mxu1  ;;  %6779 = vpow2.f32 %v5793_v20 }
0x4598   :  { %6781 = vpow2.f32 %v5792_v41 }
0x45a1   :  { %v6776_v15 = vpop.eup %6775 }
0x45a2   :  { %3720 = vrot.lane.b32.xlu1 %v6776_v15, %s7186_s30 }
0x45a3   :  { %v6778_v16 = vpop.eup %6777 }
0x45a4   :  { %3718 = vrot.lane.b32.xlu0 %v6778_v16, %s7186_s30  ;;  %v6780_v21 = vpop.eup %6779 }
0x45a5   :  { %v6782_v22 = vpop.eup %6781  ;;  %v3701_v23 = vadd.f32 1.0, %v6780_v21 }
0x45a6   :  { %v3700_v24 = vadd.f32 1.0, %v6782_v22 }
0x45a7   :  { %6783 = vrcp.f32 %v3701_v23 }
0x45a8   :  { %6785 = vrcp.f32 %v3700_v24 }
0x45b4   :  { %v6784_v1 = vpop.eup %6783 }
0x45b5   :  { %v6786_v3 = vpop.eup %6785  ;;  %v3715_v10 = vmul.f32 %v6784_v1, %v3711_v35 }
0x45b6   :  { %v3714_v45 = vmul.f32 %v6786_v3, %v3710_v43 }
0x4614   :  { %v3721_v29 = vpop.permute.xlu1 %3720 }
0x4615   :  { %v3725_v30 = vmul.f32 %v6784_v1, %v3721_v29 }
0x4616   :  { %v3719_v32 = vpop.permute.xlu0 %3718 }
0x4617   :  { %3730 = vrot.lane.b32.xlu1 %v3725_v30, %s7189_s15  ;;  %v3724_v33 = vmul.f32 %v6786_v3, %v3719_v32 }
0x4619   :  { %3728 = vrot.lane.b32.xlu0 %v3724_v33, %s7189_s15 }
0x4689   :  { %v3731_v2 = vpop.permute.xlu1 %3730 }
0x468a   :  { %v8245_v18 = vadd.f32 %v3731_v2, %v3715_v10 }
0x468b   :  { %v3729_v46 = vpop.permute.xlu0 %3728 }
0x468c   :  { %6787 = vtanh.f32 %v8245_v18  ;;  %v3734_v5 = vadd.f32 %v3729_v46, %v3714_v45 }
0x468e   :  { %6789 = vtanh.f32 %v3734_v5  ;;  %v3835_v30 = vrot.slane %v3734_v5, 7 }
0x4699   :  { %v6788_v58 = vpop.eup %6787 }
0x469a   :  { %3742 = vrot.lane.b32.xlu1 %v6788_v58, %s7186_s30 }
0x469b   :  { %v6790_v13 = vpop.eup %6789 }
0x469c   :  { %3740 = vrot.lane.b32.xlu0 %v6790_v13, %s7186_s30 }
0x470c   :  { %v3743_v59 = vpop.permute.xlu1 %3742 }
0x470d   :  { %v8250_v25 = vmul.f32 %v6784_v1, %v3743_v59 }
0x470e   :  { %v3741_v26 = vpop.permute.xlu0 %3740 }
0x470f   :  { %v8252_v37 = vmul.f32 %v6786_v3, %v3741_v26  ;;  %v3759_v49 = vpack.c.bf16 %v8250_v25, %v8250_v25  ;;  %v3836_v3 = vrot.slane %v8245_v18, 7 }
0x4711   :  { %v3758_v53 = vpack.c.bf16 %v8252_v37, %v8252_v37  ;;  %v3763_v51 = vunpack.c.l.b16 %v3759_v49 }
0x4713   :  { %v3762_v57 = vunpack.c.l.b16 %v3758_v53 }
0x4715   :  { %v3764_v40 = vrot.slane %v3762_v57, 1 }
0x4717   :  { %v3765_v19 = vsel %vm314_vm2, %v3763_v51, %v3764_v40 }
0x4718   :  { %v3766_v9 = vpack.c.b16 %v3765_v19, %v3765_v19 }
0x471a   :  { %3767 = vrot.lane.b32.xlu0 %v3766_v9, %s7189_s15 }
0x478c   :  { %v3768_v4 = vpop.permute.xlu0 %3767 }
0x478d   :  { %6223 = vmatmul.mubr.msk.bf16.vlgmr.msra.gmra.mxu0 %vm99_vm1, %v3768_v4 }
0x478e   :  { %6235 = vmatpush3.bf16.msra.mxu0 %v8155_v60  ;;  %6238 = vmatprep.mubr.msk.bf16.mxu0 %vm7197_vm0, %v7196_v0 }
0x478f   :  { %6236 = vmatprep.subr.bf16.mxu0 %v7196_v0 }
0x4792   :  { %6237 = vmatpush3.bf16.msra.mxu0 %v8159_v27 }
0x4793   :  { %6250 = vmatprep.subr.bf16.mxu0 %v7196_v0 }
0x484d   :  { %v3806_v62 = vpop.f32.mrf.mxu0 }
0x484e   :  { %v3813_v52 = vrot.slane %v3806_v62, 6  ;;  %v3814_v50 = vrot.slane %v3806_v62, 7 }
0x484f   :  { %v6224_v56 = vpop.f32.mrf.mxu0 }
0x4850   :  { %v3817_v61 = vadd.f32 %v3813_v52, %v8204_v8  ;;  %v3818_v54 = vadd.f32 %v3814_v50, %v8207_v31 }
0x4851   :  { %v3809_v42 = vpop.f32.mrf.mxu0 }
0x4852   :  { %6791 = vtanh.f32 %v3817_v61  ;;  %v5795_v7 = vmul.f32 -1.442695, %v3817_v61  ;;  %v5796_v12 = vmul.f32 -1.442695, %v3818_v54 }
0x4853   :  { %6793 = vtanh.f32 %v3818_v54  ;;  %v6225_v55 = vpop.f32.mrf.mxu0 }
0x4854   :  { %6795 = vpow2.f32 %v5795_v7 }
0x4855   :  { %6797 = vpow2.f32 %v5796_v12 }
0x485f   :  { %v6792_v63 = vpop.eup %6791 }
0x4860   :  { %v6794_v34 = vpop.eup %6793  ;;  %3843 = vrot.lane.b32.xlu1 %v6792_v63, %s7186_s30 }
0x4861   :  { %3845 = vrot.lane.b32.xlu0 %v6794_v34, %s7186_s30  ;;  %v6796_v15 = vpop.eup %6795 }
0x4862   :  { %v6798_v16 = vpop.eup %6797  ;;  %v3825_v20 = vadd.f32 1.0, %v6796_v15 }
0x4863   :  { %v3826_v41 = vadd.f32 1.0, %v6798_v16 }
0x4864   :  { %6799 = vrcp.f32 %v3825_v20 }
0x4865   :  { %6801 = vrcp.f32 %v3826_v41 }
0x4871   :  { %v6800_v21 = vpop.eup %6799 }
0x4872   :  { %v6802_v23 = vpop.eup %6801  ;;  %v3839_v32 = vmul.f32 %v6800_v21, %v3835_v30 }
0x4873   :  { %v3840_v33 = vmul.f32 %v6802_v23, %v3836_v3 }
0x48d2   :  { %v3844_v22 = vpop.permute.xlu1 %3843 }
0x48d3   :  { %v3846_v24 = vpop.permute.xlu0 %3845  ;;  %v3849_v1 = vmul.f32 %v6800_v21, %v3844_v22 }
0x48d4   :  { %v3850_v29 = vmul.f32 %v6802_v23, %v3846_v24 }
0x48d5   :  { %3853 = vrot.lane.b32.xlu1 %v3849_v1, %s7189_s15 }
0x48d6   :  { %3855 = vrot.lane.b32.xlu0 %v3850_v29, %s7189_s15 }
0x4947   :  { %v3854_v35 = vpop.permute.xlu1 %3853 }
0x4948   :  { %v3856_v10 = vpop.permute.xlu0 %3855  ;;  %v8274_v43 = vadd.f32 %v3854_v35, %v3839_v32 }
0x4949   :  { %v8276_v2 = vadd.f32 %v3856_v10, %v3840_v33 }
0x494a   :  { %6803 = vtanh.f32 %v8274_v43  ;;  %v3961_v29 = vrot.slane %v8274_v43, 7 }
0x494b   :  { %6805 = vtanh.f32 %v8276_v2  ;;  %v3962_v30 = vrot.slane %v8276_v2, 7 }
0x4957   :  { %v6804_v45 = vpop.eup %6803 }
0x4958   :  { %v6806_v46 = vpop.eup %6805  ;;  %3865 = vrot.lane.b32.xlu1 %v6804_v45, %s7186_s30 }
0x4959   :  { %3867 = vrot.lane.b32.xlu0 %v6806_v46, %s7186_s30 }
0x49ca   :  { %v3866_v5 = vpop.permute.xlu1 %3865 }
0x49cb   :  { %v3868_v18 = vpop.permute.xlu0 %3867  ;;  %v8282_v58 = vmul.f32 %v6800_v21, %v3866_v5 }
0x49cc   :  { %v8284_v13 = vmul.f32 %v6802_v23, %v3868_v18 }
0x49cd   :  { %v3883_v59 = vpack.c.bf16 %v8282_v58, %v8282_v58 }
0x49ce   :  { %v3884_v26 = vpack.c.bf16 %v8284_v13, %v8284_v13 }
0x49cf   :  { %v3887_v49 = vunpack.c.l.b16 %v3883_v59 }
0x49d0   :  { %v3888_v53 = vunpack.c.l.b16 %v3884_v26 }
0x49d1   :  { %v3889_v57 = vrot.slane %v3887_v49, 2 }
0x49d2   :  { %v3890_v51 = vrot.slane %v3888_v53, 1 }
0x49d4   :  { %v3891_v40 = vsel %vm314_vm2, %v3890_v51, %v3889_v57 }
0x49d5   :  { %v3892_v19 = vpack.c.b16 %v3891_v40, %v3891_v40 }
0x49d7   :  { %3893 = vrot.lane.b32.xlu1 %v3892_v19, %s7189_s15 }
0x4a49   :  { %v3894_v9 = vpop.permute.xlu1 %3893 }
0x4a4a   :  { %6231 = vmatmul.mubr.msk.bf16.vlgmr.msra.gmra.mxu1 %vm99_vm1, %v3894_v9 }
0x4a4b   :  { %6243 = vmatpush3.bf16.msra.mxu1 %v8155_v60  ;;  %6246 = vmatprep.mubr.msk.bf16.mxu1 %vm7197_vm0, %v7196_v0 }
0x4a4c   :  { %6244 = vmatprep.subr.bf16.mxu1 %v7196_v0 }
0x4a4f   :  { %6245 = vmatpush3.bf16.msra.mxu1 %v8159_v27 }
0x4a50   :  { %6258 = vmatprep.subr.bf16.mxu1 %v7196_v0 }
0x4b0a   :  { %v3932_v4 = vpop.f32.mrf.mxu1 }
0x4b0b   :  { %v3939_v62 = vrot.slane %v3932_v4, 5  ;;  %v3940_v52 = vrot.slane %v3932_v4, 6 }
0x4b0c   :  { %v6232_v50 = vpop.f32.mrf.mxu1 }
0x4b0d   :  { %v3943_v56 = vadd.f32 %v3939_v62, %v8204_v8  ;;  %v3944_v61 = vadd.f32 %v3940_v52, %v8207_v31 }
0x4b0e   :  { %v3935_v54 = vpop.f32.mrf.mxu1 }
0x4b0f   :  { %6807 = vtanh.f32 %v3943_v56  ;;  %v5798_v34 = vmul.f32 -1.442695, %v3943_v56  ;;  %v5799_v7 = vmul.f32 -1.442695, %v3944_v61 }
0x4b10   :  { %6809 = vtanh.f32 %v3944_v61  ;;  %v6233_v42 = vpop.f32.mrf.mxu1 }
0x4b11   :  { %6811 = vpow2.f32 %v5798_v34 }
0x4b12   :  { %6813 = vpow2.f32 %v5799_v7 }
0x4b1c   :  { %v6808_v55 = vpop.eup %6807 }
0x4b1d   :  { %v6810_v63 = vpop.eup %6809  ;;  %3969 = vrot.lane.b32.xlu0 %v6808_v55, %s7186_s30 }
0x4b1e   :  { %3971 = vrot.lane.b32.xlu1 %v6810_v63, %s7186_s30  ;;  %v6812_v12 = vpop.eup %6811 }
0x4b1f   :  { %v6814_v15 = vpop.eup %6813  ;;  %v3951_v16 = vadd.f32 1.0, %v6812_v12 }
0x4b20   :  { %v3952_v20 = vadd.f32 1.0, %v6814_v15 }
0x4b21   :  { %6815 = vrcp.f32 %v3951_v16 }
0x4b22   :  { %6817 = vrcp.f32 %v3952_v20 }
0x4b2e   :  { %v6816_v41 = vpop.eup %6815 }
0x4b2f   :  { %v6818_v22 = vpop.eup %6817  ;;  %v3965_v3 = vmul.f32 %v6816_v41, %v3961_v29 }
0x4b30   :  { %v3966_v32 = vmul.f32 %v6818_v22, %v3962_v30 }
0x4b8f   :  { %v3970_v21 = vpop.permute.xlu0 %3969 }
0x4b90   :  { %v3972_v23 = vpop.permute.xlu1 %3971  ;;  %v3975_v24 = vmul.f32 %v6816_v41, %v3970_v21 }
0x4b91   :  { %v3976_v1 = vmul.f32 %v6818_v22, %v3972_v23 }
0x4b92   :  { %3979 = vrot.lane.b32.xlu0 %v3975_v24, %s7189_s15 }
0x4b93   :  { %3981 = vrot.lane.b32.xlu1 %v3976_v1, %s7189_s15 }
0x4c04   :  { %v3980_v33 = vpop.permute.xlu0 %3979 }
0x4c05   :  { %v3982_v35 = vpop.permute.xlu1 %3981  ;;  %v8307_v10 = vadd.f32 %v3980_v33, %v3965_v3 }
0x4c06   :  { %v8309_v45 = vadd.f32 %v3982_v35, %v3966_v32 }
0x4c07   :  { %6819 = vtanh.f32 %v8307_v10  ;;  %v4087_v30 = vrot.slane %v8307_v10, 7 }
0x4c08   :  { %6821 = vtanh.f32 %v8309_v45  ;;  %v4088_v3 = vrot.slane %v8309_v45, 7 }
0x4c14   :  { %v6820_v46 = vpop.eup %6819 }
0x4c15   :  { %v6822_v5 = vpop.eup %6821  ;;  %3991 = vrot.lane.b32.xlu0 %v6820_v46, %s7186_s30 }
0x4c16   :  { %3993 = vrot.lane.b32.xlu1 %v6822_v5, %s7186_s30 }
0x4c87   :  { %v3992_v43 = vpop.permute.xlu0 %3991 }
0x4c88   :  { %v3994_v2 = vpop.permute.xlu1 %3993  ;;  %v8315_v18 = vmul.f32 %v6816_v41, %v3992_v43 }
0x4c89   :  { %v8317_v59 = vmul.f32 %v6818_v22, %v3994_v2 }
0x4c8a   :  { %v4009_v26 = vpack.c.bf16 %v8315_v18, %v8315_v18 }
0x4c8b   :  { %v4010_v49 = vpack.c.bf16 %v8317_v59, %v8317_v59 }
0x4c8c   :  { %v4013_v53 = vunpack.c.l.b16 %v4009_v26 }
0x4c8d   :  { %v4014_v57 = vunpack.c.l.b16 %v4010_v49 }
0x4c8e   :  { %v4015_v51 = vrot.slane %v4013_v53, 3 }
0x4c8f   :  { %v4016_v40 = vrot.slane %v4014_v57, 2 }
0x4c91   :  { %v4017_v19 = vsel %vm314_vm2, %v4016_v40, %v4015_v51 }
0x4c92   :  { %v4018_v9 = vpack.c.b16 %v4017_v19, %v4017_v19 }
0x4c94   :  { %4019 = vrot.lane.b32.xlu0 %v4018_v9, %s7189_s15 }
0x4d06   :  { %v4020_v4 = vpop.permute.xlu0 %4019 }
0x4d07   :  { %6239 = vmatmul.mubr.msk.bf16.vlgmr.msra.gmra.mxu0 %vm99_vm1, %v4020_v4 }
0x4d08   :  { %6251 = vmatpush3.bf16.msra.mxu0 %v8155_v60  ;;  %6254 = vmatprep.mubr.msk.bf16.mxu0 %vm7197_vm0, %v7196_v0 }
0x4d09   :  { %6252 = vmatprep.subr.bf16.mxu0 %v7196_v0 }
0x4d0c   :  { %6253 = vmatpush3.bf16.msra.mxu0 %v8159_v27 }
0x4d0d   :  { %6266 = vmatprep.subr.bf16.mxu0 %v7196_v0 }
0x4dc7   :  { %v4058_v62 = vpop.f32.mrf.mxu0 }
0x4dc8   :  { %v4065_v52 = vrot.slane %v4058_v62, 4  ;;  %v4066_v50 = vrot.slane %v4058_v62, 5 }
0x4dc9   :  { %v6240_v56 = vpop.f32.mrf.mxu0 }
0x4dca   :  { %v4069_v61 = vadd.f32 %v4065_v52, %v8204_v8  ;;  %v4070_v54 = vadd.f32 %v4066_v50, %v8207_v31 }
0x4dcb   :  { %v4061_v42 = vpop.f32.mrf.mxu0 }
0x4dcc   :  { %6823 = vtanh.f32 %v4069_v61  ;;  %v5801_v7 = vmul.f32 -1.442695, %v4069_v61  ;;  %v5802_v12 = vmul.f32 -1.442695, %v4070_v54 }
0x4dcd   :  { %6825 = vtanh.f32 %v4070_v54  ;;  %v6241_v55 = vpop.f32.mrf.mxu0 }
0x4dce   :  { %6827 = vpow2.f32 %v5801_v7 }
0x4dcf   :  { %6829 = vpow2.f32 %v5802_v12 }
0x4dd9   :  { %v6824_v63 = vpop.eup %6823 }
0x4dda   :  { %v6826_v34 = vpop.eup %6825  ;;  %4095 = vrot.lane.b32.xlu1 %v6824_v63, %s7186_s30 }
0x4ddb   :  { %4097 = vrot.lane.b32.xlu0 %v6826_v34, %s7186_s30  ;;  %v6828_v15 = vpop.eup %6827 }
0x4ddc   :  { %v6830_v16 = vpop.eup %6829  ;;  %v4077_v20 = vadd.f32 1.0, %v6828_v15 }
0x4ddd   :  { %v4078_v41 = vadd.f32 1.0, %v6830_v16 }
0x4dde   :  { %6831 = vrcp.f32 %v4077_v20 }
0x4ddf   :  { %6833 = vrcp.f32 %v4078_v41 }
0x4deb   :  { %v6832_v21 = vpop.eup %6831 }
0x4dec   :  { %v6834_v23 = vpop.eup %6833  ;;  %v4091_v32 = vmul.f32 %v6832_v21, %v4087_v30 }
0x4ded   :  { %v4092_v33 = vmul.f32 %v6834_v23, %v4088_v3 }
0x4e4c   :  { %v4096_v22 = vpop.permute.xlu1 %4095 }
0x4e4d   :  { %v4098_v24 = vpop.permute.xlu0 %4097  ;;  %v4101_v1 = vmul.f32 %v6832_v21, %v4096_v22 }
0x4e4e   :  { %v4102_v29 = vmul.f32 %v6834_v23, %v4098_v24 }
0x4e4f   :  { %4105 = vrot.lane.b32.xlu1 %v4101_v1, %s7189_s15 }
0x4e50   :  { %4107 = vrot.lane.b32.xlu0 %v4102_v29, %s7189_s15 }
0x4ec1   :  { %v4106_v35 = vpop.permute.xlu1 %4105 }
0x4ec2   :  { %v4108_v46 = vpop.permute.xlu0 %4107  ;;  %v8340_v5 = vadd.f32 %v4106_v35, %v4091_v32 }
0x4ec3   :  { %v8342_v43 = vadd.f32 %v4108_v46, %v4092_v33 }
0x4ec4   :  { %6835 = vtanh.f32 %v8340_v5  ;;  %v4213_v3 = vrot.slane %v8340_v5, 7 }
0x4ec5   :  { %6837 = vtanh.f32 %v8342_v43  ;;  %v4214_v32 = vrot.slane %v8342_v43, 7 }
0x4ed1   :  { %v6836_v2 = vpop.eup %6835 }
0x4ed2   :  { %v6838_v26 = vpop.eup %6837  ;;  %4117 = vrot.lane.b32.xlu1 %v6836_v2, %s7186_s30 }
0x4ed3   :  { %4119 = vrot.lane.b32.xlu0 %v6838_v26, %s7186_s30 }
0x4f44   :  { %v4118_v10 = vpop.permute.xlu1 %4117 }
0x4f45   :  { %v4120_v45 = vpop.permute.xlu0 %4119  ;;  %v8348_v49 = vmul.f32 %v6832_v21, %v4118_v10 }
0x4f46   :  { %v8350_v53 = vmul.f32 %v6834_v23, %v4120_v45 }
0x4f47   :  { %v4135_v57 = vpack.c.bf16 %v8348_v49, %v8348_v49 }
0x4f48   :  { %v4136_v51 = vpack.c.bf16 %v8350_v53, %v8350_v53 }
0x4f49   :  { %v4139_v40 = vunpack.c.l.b16 %v4135_v57 }
0x4f4a   :  { %v4140_v19 = vunpack.c.l.b16 %v4136_v51 }
0x4f4b   :  { %v4141_v9 = vrot.slane %v4139_v40, 4 }
0x4f4c   :  { %v4142_v4 = vrot.slane %v4140_v19, 3 }
0x4f4e   :  { %v4143_v62 = vsel %vm314_vm2, %v4142_v4, %v4141_v9 }
0x4f4f   :  { %v4144_v52 = vpack.c.b16 %v4143_v62, %v4143_v62 }
0x4f51   :  { %4145 = vrot.lane.b32.xlu1 %v4144_v52, %s7189_s15 }
0x4fc3   :  { %v4146_v50 = vpop.permute.xlu1 %4145 }
0x4fc4   :  { %6247 = vmatmul.mubr.msk.bf16.vlgmr.msra.gmra.mxu1 %vm99_vm1, %v4146_v50 }
0x4fc5   :  { %6259 = vmatpush3.bf16.msra.mxu1 %v8155_v60  ;;  %6262 = vmatprep.mubr.msk.bf16.mxu1 %vm7197_vm0, %v7196_v0 }
0x4fc6   :  { %6260 = vmatprep.subr.bf16.mxu1 %v7196_v0 }
0x4fc9   :  { %6261 = vmatpush3.bf16.msra.mxu1 %v8159_v27 }
0x4fca   :  { %6274 = vmatprep.subr.bf16.mxu1 %v7196_v0 }
0x5084   :  { %v4184_v56 = vpop.f32.mrf.mxu1 }
0x5085   :  { %v4191_v61 = vrot.slane %v4184_v56, 3  ;;  %v4192_v54 = vrot.slane %v4184_v56, 4 }
0x5086   :  { %v6248_v42 = vpop.f32.mrf.mxu1 }
0x5087   :  { %v4195_v55 = vadd.f32 %v4191_v61, %v8204_v8  ;;  %v4196_v63 = vadd.f32 %v4192_v54, %v8207_v31 }
0x5088   :  { %v4187_v34 = vpop.f32.mrf.mxu1 }
0x5089   :  { %6839 = vtanh.f32 %v4195_v55  ;;  %v5804_v27 = vmul.f32 -1.442695, %v4195_v55  ;;  %v5805_v15 = vmul.f32 -1.442695, %v4196_v63 }
0x508a   :  { %6841 = vtanh.f32 %v4196_v63  ;;  %v6249_v60 = vpop.f32.mrf.mxu1 }
0x508b   :  { %6843 = vpow2.f32 %v5804_v27 }
0x508c   :  { %6845 = vpow2.f32 %v5805_v15 }
0x5096   :  { %v6840_v7 = vpop.eup %6839 }
0x5097   :  { %v6842_v12 = vpop.eup %6841  ;;  %4221 = vrot.lane.b32.xlu0 %v6840_v7, %s7186_s30 }
0x5098   :  { %4223 = vrot.lane.b32.xlu1 %v6842_v12, %s7186_s30  ;;  %v6844_v16 = vpop.eup %6843 }
0x5099   :  { %v6846_v20 = vpop.eup %6845  ;;  %v4203_v41 = vadd.f32 1.0, %v6844_v16 }
0x509a   :  { %v4204_v21 = vadd.f32 1.0, %v6846_v20 }
0x509b   :  { %6847 = vrcp.f32 %v4203_v41 }
0x509c   :  { %6849 = vrcp.f32 %v4204_v21 }
0x50a8   :  { %v6848_v22 = vpop.eup %6847 }
0x50a9   :  { %v6850_v24 = vpop.eup %6849  ;;  %v4217_v33 = vmul.f32 %v6848_v22, %v4213_v3 }
0x50aa   :  { %v4218_v35 = vmul.f32 %v6850_v24, %v4214_v32 }
0x5109   :  { %v4222_v23 = vpop.permute.xlu0 %4221 }
0x510a   :  { %v4224_v1 = vpop.permute.xlu1 %4223  ;;  %v4227_v29 = vmul.f32 %v6848_v22, %v4222_v23 }
0x510b   :  { %v4228_v30 = vmul.f32 %v6850_v24, %v4224_v1 }
0x510c   :  { %4231 = vrot.lane.b32.xlu0 %v4227_v29, %s7189_s15 }
0x510d   :  { %4233 = vrot.lane.b32.xlu1 %v4228_v30, %s7189_s15 }
0x517e   :  { %v4232_v46 = vpop.permute.xlu0 %4231 }
0x517f   :  { %v4234_v2 = vpop.permute.xlu1 %4233  ;;  %v4237_v26 = vadd.f32 %v4232_v46, %v4217_v33 }
0x5180   :  { %v4238_v10 = vadd.f32 %v4234_v2, %v4218_v35 }
0x5181   :  { %6851 = vtanh.f32 %v4237_v26  ;;  %v4339_v35 = vrot.slane %v4237_v26, 7 }
0x5182   :  { %6853 = vtanh.f32 %v4238_v10  ;;  %v4340_v46 = vrot.slane %v4238_v10, 7 }
0x518e   :  { %v6852_v45 = vpop.eup %6851 }
0x518f   :  { %v6854_v57 = vpop.eup %6853  ;;  %4243 = vrot.lane.b32.xlu0 %v6852_v45, %s7186_s30 }
0x5190   :  { %4245 = vrot.lane.b32.xlu1 %v6854_v57, %s7186_s30 }
0x5201   :  { %v4244_v51 = vpop.permute.xlu0 %4243 }
0x5202   :  { %v4246_v40 = vpop.permute.xlu1 %4245  ;;  %v8375_v19 = vmul.f32 %v6848_v22, %v4244_v51 }
0x5203   :  { %v8377_v5 = vmul.f32 %v6850_v24, %v4246_v40 }
0x5204   :  { %v4261_v43 = vpack.c.bf16 %v8375_v19, %v8375_v19 }
0x5205   :  { %v4262_v9 = vpack.c.bf16 %v8377_v5, %v8377_v5 }
0x5206   :  { %v4265_v4 = vunpack.c.l.b16 %v4261_v43 }
0x5207   :  { %v4266_v62 = vunpack.c.l.b16 %v4262_v9 }
0x5208   :  { %v4267_v52 = vrot.slane %v4265_v4, 5 }
0x5209   :  { %v4268_v50 = vrot.slane %v4266_v62, 4 }
0x520b   :  { %v4269_v56 = vsel %vm314_vm2, %v4268_v50, %v4267_v52 }
0x520c   :  { %v4270_v61 = vpack.c.b16 %v4269_v56, %v4269_v56 }
0x520e   :  { %4271 = vrot.lane.b32.xlu0 %v4270_v61, %s7189_s15 }
0x5280   :  { %v4272_v54 = vpop.permute.xlu0 %4271 }
0x5281   :  { %6255 = vmatmul.mubr.msk.bf16.vlgmr.msra.gmra.mxu0 %vm99_vm1, %v4272_v54 }
0x5282   :  { %6270 = vmatprep.mubr.msk.bf16.mxu0 %vm7197_vm0, %v7196_v0 }
0x5341   :  { %v4310_v42 = vpop.f32.mrf.mxu0 }
0x5342   :  { %v4317_v55 = vrot.slane %v4310_v42, 2  ;;  %v4318_v63 = vrot.slane %v4310_v42, 3 }
0x5343   :  { %v6256_v34 = vpop.f32.mrf.mxu0 }
0x5344   :  { %v4321_v60 = vadd.f32 %v4317_v55, %v8204_v8  ;;  %v4322_v7 = vadd.f32 %v4318_v63, %v8207_v31 }
0x5345   :  { %v4313_v12 = vpop.f32.mrf.mxu0 }
0x5346   :  { %6855 = vtanh.f32 %v4321_v60  ;;  %v5807_v20 = vmul.f32 -1.442695, %v4321_v60  ;;  %v5808_v41 = vmul.f32 -1.442695, %v4322_v7 }
0x5347   :  { %6857 = vtanh.f32 %v4322_v7  ;;  %v6257_v27 = vpop.f32.mrf.mxu0 }
0x5348   :  { %6859 = vpow2.f32 %v5807_v20 }
0x5349   :  { %6861 = vpow2.f32 %v5808_v41 }
0x5353   :  { %v6856_v15 = vpop.eup %6855 }
0x5354   :  { %v6858_v16 = vpop.eup %6857  ;;  %4347 = vrot.lane.b32.xlu1 %v6856_v15, %s7186_s30 }
0x5355   :  { %4349 = vrot.lane.b32.xlu0 %v6858_v16, %s7186_s30  ;;  %v6860_v21 = vpop.eup %6859 }
0x5356   :  { %v6862_v22 = vpop.eup %6861  ;;  %v4329_v23 = vadd.f32 1.0, %v6860_v21 }
0x5357   :  { %v4330_v24 = vadd.f32 1.0, %v6862_v22 }
0x5358   :  { %6863 = vrcp.f32 %v4329_v23 }
0x5359   :  { %6865 = vrcp.f32 %v4330_v24 }
0x5365   :  { %v6864_v1 = vpop.eup %6863 }
0x5366   :  { %v6866_v30 = vpop.eup %6865  ;;  %v4343_v2 = vmul.f32 %v6864_v1, %v4339_v35 }
0x5367   :  { %v4344_v45 = vmul.f32 %v6866_v30, %v4340_v46 }
0x53c6   :  { %v4348_v29 = vpop.permute.xlu1 %4347 }
0x53c7   :  { %v4350_v3 = vpop.permute.xlu0 %4349  ;;  %v4353_v32 = vmul.f32 %v6864_v1, %v4348_v29 }
0x53c8   :  { %v4354_v33 = vmul.f32 %v6866_v30, %v4350_v3 }
0x53c9   :  { %4357 = vrot.lane.b32.xlu1 %v4353_v32, %s7189_s15 }
0x53ca   :  { %4359 = vrot.lane.b32.xlu0 %v4354_v33, %s7189_s15 }
0x543b   :  { %v4358_v57 = vpop.permute.xlu1 %4357 }
0x543c   :  { %v4360_v51 = vpop.permute.xlu0 %4359  ;;  %v4363_v40 = vadd.f32 %v4358_v57, %v4343_v2 }
0x543d   :  { %v4364_v43 = vadd.f32 %v4360_v51, %v4344_v45 }
0x543e   :  { %6867 = vtanh.f32 %v4363_v40  ;;  %v4465_v45 = vrot.slane %v4363_v40, 7 }
0x543f   :  { %6869 = vtanh.f32 %v4364_v43  ;;  %v4466_v57 = vrot.slane %v4364_v43, 7 }
0x544b   :  { %v6868_v9 = vpop.eup %6867 }
0x544c   :  { %v6870_v4 = vpop.eup %6869  ;;  %4369 = vrot.lane.b32.xlu1 %v6868_v9, %s7186_s30 }
0x544d   :  { %4371 = vrot.lane.b32.xlu0 %v6870_v4, %s7186_s30 }
0x54be   :  { %v4370_v62 = vpop.permute.xlu1 %4369 }
0x54bf   :  { %v4372_v52 = vpop.permute.xlu0 %4371  ;;  %v8396_v50 = vmul.f32 %v6864_v1, %v4370_v62 }
0x54c0   :  { %v8398_v26 = vmul.f32 %v6866_v30, %v4372_v52 }
0x54c1   :  { %v4387_v10 = vpack.c.bf16 %v8396_v50, %v8396_v50 }
0x54c2   :  { %v4388_v56 = vpack.c.bf16 %v8398_v26, %v8398_v26 }
0x54c3   :  { %v4391_v61 = vunpack.c.l.b16 %v4387_v10 }
0x54c4   :  { %v4392_v54 = vunpack.c.l.b16 %v4388_v56 }
0x54c5   :  { %v4393_v42 = vrot.slane %v4391_v61, 6 }
0x54c6   :  { %v4394_v55 = vrot.slane %v4392_v54, 5 }
0x54c8   :  { %v4395_v63 = vsel %vm314_vm2, %v4394_v55, %v4393_v42 }
0x54c9   :  { %v4396_v34 = vpack.c.b16 %v4395_v63, %v4395_v63 }
0x54cb   :  { %4397 = vrot.lane.b32.xlu1 %v4396_v34, %s7189_s15 }
0x553d   :  { %v4398_v60 = vpop.permute.xlu1 %4397 }
0x553e   :  { %6263 = vmatmul.mubr.msk.bf16.vlgmr.msra.gmra.mxu1 %vm99_vm1, %v4398_v60 }
0x553f   :  { %6278 = vmatprep.mubr.msk.bf16.mxu1 %vm7197_vm0, %v7196_v0 }
0x55fe   :  { %v4436_v7 = vpop.f32.mrf.mxu1 }
0x55ff   :  { %v4443_v12 = vrot.slane %v4436_v7, 1  ;;  %v4444_v27 = vrot.slane %v4436_v7, 2 }
0x5600   :  { %v6264_v15 = vpop.f32.mrf.mxu1 }
0x5601   :  { %v4447_v16 = vadd.f32 %v4443_v12, %v8204_v8  ;;  %v4448_v20 = vadd.f32 %v4444_v27, %v8207_v31 }
0x5602   :  { %v4439_v41 = vpop.f32.mrf.mxu1 }
0x5603   :  { %6871 = vtanh.f32 %v4447_v16  ;;  %v5810_v24 = vmul.f32 -1.442695, %v4447_v16  ;;  %v5811_v1 = vmul.f32 -1.442695, %v4448_v20 }
0x5604   :  { %6873 = vtanh.f32 %v4448_v20  ;;  %v6265_v21 = vpop.f32.mrf.mxu1 }
0x5605   :  { %6875 = vpow2.f32 %v5810_v24 }
0x5606   :  { %6877 = vpow2.f32 %v5811_v1  ;;  %v5813_v1 = vld [vmem:[%s8801_s3 + $0x4] ss:$0 sm:$0xff]  ;;  %s7198_s3 = smov 96  }
0x5610   :  { %v6872_v22 = vpop.eup %6871 }
0x5611   :  { %v6874_v23 = vpop.eup %6873  ;;  %4473 = vrot.lane.b32.xlu0 %v6872_v22, %s7186_s30 }
0x5612   :  { %4475 = vrot.lane.b32.xlu1 %v6874_v23, %s7186_s30  ;;  %v6876_v29 = vpop.eup %6875 }
0x5613   :  { %v6878_v30 = vpop.eup %6877  ;;  %v4455_v3 = vadd.f32 1.0, %v6876_v29 }
0x5614   :  { %v4456_v8 = vadd.f32 1.0, %v6878_v30 }
0x5615   :  { %6879 = vrcp.f32 %v4455_v3 }
0x5616   :  { %6881 = vrcp.f32 %v4456_v8 }
0x5622   :  { %v6880_v31 = vpop.eup %6879 }
0x5623   :  { %v6882_v33 = vpop.eup %6881  ;;  %v4469_v51 = vmul.f32 %v6880_v31, %v4465_v45  ;;  %v4612_v45 = vld [vmem:[#allocation10 + $0x8] sm:$0x3] }
0x5624   :  { %v4470_v9 = vmul.f32 %v6882_v33, %v4466_v57 }
0x5683   :  { %v4474_v32 = vpop.permute.xlu0 %4473 }
0x5684   :  { %v4476_v35 = vpop.permute.xlu1 %4475  ;;  %v4479_v46 = vmul.f32 %v6880_v31, %v4474_v32 }
0x5685   :  { %v4480_v2 = vmul.f32 %v6882_v33, %v4476_v35 }
0x5686   :  { %4483 = vrot.lane.b32.xlu0 %v4479_v46, %s7189_s15 }
0x5687   :  { %4485 = vrot.lane.b32.xlu1 %v4480_v2, %s7189_s15 }
0x56f8   :  { %v4484_v4 = vpop.permute.xlu0 %4483 }
0x56f9   :  { %v4486_v62 = vpop.permute.xlu1 %4485  ;;  %v8415_v52 = vadd.f32 %v4484_v4, %v4469_v51  ;;  %v4690_v51 = vrot.slane %v4612_v45, 1 }
0x56fa   :  { %v8417_v10 = vadd.f32 %v4486_v62, %v4470_v9 }
0x56fb   :  { %6883 = vtanh.f32 %v8415_v52 }
0x56fc   :  { %6885 = vtanh.f32 %v8417_v10 }
0x5708   :  { %v6884_v56 = vpop.eup %6883 }
0x5709   :  { %v6886_v61 = vpop.eup %6885  ;;  %4495 = vrot.lane.b32.xlu0 %v6884_v56, %s7186_s30 }
0x570a   :  { %4497 = vrot.lane.b32.xlu1 %v6886_v61, %s7186_s30 }
0x570d   :  { %3626 = vrot.lane.b32.xlu0 %v8221_v44, %s7189_s15  ;;  %v8451_v44 = vld [vmem:[#allocation7 + $0x48] sm:$0xff]  }
0x570e   :  { %3628 = vrot.lane.b32.xlu1 %v8223_v28, %s7189_s15  ;;  %v6372_v28 = vld [vmem:[#allocation5 + $0x48] sm:$0xff]   ;;  %6275 = vmatpush3.bf16.msra.mxu1 %v8451_v44 }
0x570f   :  { %6267 = vmatpush3.bf16.msra.mxu0 %v6372_v28  ;;  %6276 = vmatprep.subr.bf16.mxu1 %v7196_v0 }
0x5710   :  { %6268 = vmatprep.subr.bf16.mxu0 %v7196_v0 }
0x5711   :  { %3750 = vrot.lane.b32.xlu0 %v8252_v37, %s7189_s15  ;;  %v4610_v37 = vld [vmem:[#allocation8 + $0x8] sm:$0x3] }
0x5712   :  { %3752 = vrot.lane.b32.xlu1 %v8250_v25, %s7189_s15  ;;  %v8454_v25 = vld [vmem:[#allocation7 + $0x40] sm:$0xff]  }
0x5713   :  { %6277 = vmatpush3.bf16.msra.mxu1 %v8454_v25 }
0x5714   :  { %6290 = vmatprep.subr.bf16.mxu1 %v7196_v0 }
0x5715   :  { %3875 = vrot.lane.b32.xlu0 %v8282_v58, %s7189_s15  ;;  %v6374_v58 = vld [vmem:[#allocation5 + $0x40] sm:$0xff]  }
0x5716   :  { %3877 = vrot.lane.b32.xlu1 %v8284_v13, %s7189_s15  ;;  %v4613_v13 = vpack.c.bf16 %v4610_v37, %v4610_v37  ;;  %6269 = vmatpush3.bf16.msra.mxu0 %v6374_v58 }
0x5717   :  { %6282 = vmatprep.subr.bf16.mxu0 %v7196_v0 }
0x5718   :  { %6279 = vmatmul.mubr.msk.bf16.vlgmr.msra.gmra.mxu1 %vm99_vm1, %v4613_v13 }
0x5719   :  { %4001 = vrot.lane.b32.xlu0 %v8315_v18, %s7189_s15  ;;  %6291 = vmatpush3.bf16.msra.mxu1 %v8451_v44 }
0x571a   :  { %4003 = vrot.lane.b32.xlu1 %v8317_v59, %s7189_s15  ;;  %6294 = vmatprep.mubr.msk.bf16.mxu1 %vm7197_vm0, %v7196_v0 }
0x571b   :  { %6292 = vmatprep.subr.bf16.mxu1 %v7196_v0 }
0x571d   :  { %4127 = vrot.lane.b32.xlu0 %v8348_v49, %s7189_s15  ;;  %6293 = vmatpush3.bf16.msra.mxu1 %v8454_v25 }
0x571e   :  { %4129 = vrot.lane.b32.xlu1 %v8350_v53, %s7189_s15  ;;  %6306 = vmatprep.subr.bf16.mxu1 %v7196_v0 }
0x5721   :  { %4253 = vrot.lane.b32.xlu0 %v8375_v19, %s7189_s15 }
0x5722   :  { %4255 = vrot.lane.b32.xlu1 %v8377_v5, %s7189_s15 }
0x5725   :  { %4379 = vrot.lane.b32.xlu0 %v8396_v50, %s7189_s15 }
0x5726   :  { %4381 = vrot.lane.b32.xlu1 %v8398_v26, %s7189_s15 }
0x577b   :  { %v4496_v18 = vpop.permute.xlu0 %4495 }
0x577c   :  { %v4498_v59 = vpop.permute.xlu1 %4497  ;;  %v4501_v49 = vmul.f32 %v6880_v31, %v4496_v18 }
0x577d   :  { %v8466_v53 = vmul.f32 %v6882_v33, %v4498_v59 }
0x577e   :  { %4505 = vrot.lane.b32.xlu0 %v4501_v49, %s7189_s15 }
0x577f   :  { %4507 = vrot.lane.b32.xlu1 %v8466_v53, %s7189_s15  ;;  %v3627_v19 = vpop.permute.xlu0 %3626 }
0x5780   :  { %v3629_v5 = vpop.permute.xlu1 %3628  ;;  %3632 = vst.msk [vmem:[#allocation11] sm:$0x1] %vm304_vm3, %v3627_v19 }
0x5781   :  { %3633 = vst.msk [vmem:[#allocation11 + $0x8] sm:$0x1] %vm304_vm3, %v3629_v5 }
0x5783   :  { %v3751_v40 = vpop.permute.xlu0 %3750 }
0x5784   :  { %v3753_v43 = vpop.permute.xlu1 %3752  ;;  %3756 = vst.msk [vmem:[#allocation11] sm:$0x2] %vm430_vm4, %v3751_v40 }
0x5785   :  { %3757 = vst.msk [vmem:[#allocation11 + $0x8] sm:$0x2] %vm430_vm4, %v3753_v43 }
0x5787   :  { %v3876_v50 = vpop.permute.xlu0 %3875 }
0x5788   :  { %v3878_v26 = vpop.permute.xlu1 %3877  ;;  %3881 = vst.msk [vmem:[#allocation11] sm:$0x4] %vm556_vm5, %v3876_v50 }
0x5789   :  { %3882 = vst.msk [vmem:[#allocation11 + $0x8] sm:$0x4] %vm556_vm5, %v3878_v26 }
0x578b   :  { %v4002_v54 = vpop.permute.xlu0 %4001 }
0x578c   :  { %v4004_v42 = vpop.permute.xlu1 %4003  ;;  %4007 = vst.msk [vmem:[#allocation11] sm:$0x8] %vm683_vm6, %v4002_v54 }
0x578d   :  { %4008 = vst.msk [vmem:[#allocation11 + $0x8] sm:$0x8] %vm683_vm6, %v4004_v42 }
0x578f   :  { %v4128_v55 = vpop.permute.xlu0 %4127 }
0x5790   :  { %v4130_v63 = vpop.permute.xlu1 %4129  ;;  %4133 = vst.msk [vmem:[#allocation11] sm:$0x10] %vm810_vm7, %v4128_v55 }
0x5791   :  { %4134 = vst.msk [vmem:[#allocation11 + $0x8] sm:$0x10] %vm810_vm7, %v4130_v63 }
0x5793   :  { %v4254_v34 = vpop.permute.xlu0 %4253 }
0x5794   :  { %v4256_v60 = vpop.permute.xlu1 %4255  ;;  %4259 = vst.msk [vmem:[#allocation11] sm:$0x20] %vm937_vm8, %v4254_v34 }
0x5795   :  { %4260 = vst.msk [vmem:[#allocation11 + $0x8] sm:$0x20] %vm937_vm8, %v4256_v60 }
0x5797   :  { %v4380_v7 = vpop.permute.xlu0 %4379 }
0x5798   :  { %v4382_v12 = vpop.permute.xlu1 %4381  ;;  %4385 = vst.msk [vmem:[#allocation11] sm:$0x40] %vm1064_vm9, %v4380_v7 }
0x5799   :  { %4386 = vst.msk [vmem:[#allocation11 + $0x8] sm:$0x40] %vm1064_vm9, %v4382_v12 }
0x57d8   :  { %v4663_v21 = vpop.f32.mrf.mxu1 }
0x57d9   :  { %v4670_v8 = vrot.slane %v4663_v21, 1 }
0x57da   :  { %v6280_v22 = vpop.f32.mrf.mxu1 }
0x57dc   :  { %v4666_v23 = vpop.f32.mrf.mxu1 }
0x57de   :  { %v6281_v24 = vpop.f32.mrf.mxu1 }
0x57f0   :  { %v4506_v27 = vpop.permute.xlu0 %4505 }
0x57f1   :  { %v4508_v15 = vpop.permute.xlu1 %4507  ;;  %4511 = vst.msk [vmem:[#allocation11] sm:$0x80] %vm1191_vm10, %v4506_v27  ;;  %4518 = vst.msk [vmem:[#allocation12 - $0x1] sm:$0x80] %vm1191_vm10, %v4506_v27 }
0x57f2   :  { %4512 = vst.msk [vmem:[#allocation11 + $0x8] sm:$0x80] %vm1191_vm10, %v4508_v15 }
0x57f8   :  { %v4544_v16 = vld [vmem:[#allocation11] sm:$0xff] }
0x57f9   :  { %v4545_v20 = vld [vmem:[#allocation11 + $0x8] sm:$0xff] }
0x57fa   :  { %v4546_v41 = vpack.c.bf16 %v4545_v20, %v4544_v16 }
0x57fc   :  { %6271 = vmatmul.mubr.msk.bf16.vlgmr.msra.gmra.mxu0 %vm99_vm1, %v4546_v41 }
0x57fd   :  { %6283 = vmatpush3.bf16.msra.mxu0 %v8451_v44  ;;  %6286 = vmatprep.mubr.msk.bf16.mxu0 %vm7197_vm0, %v7196_v0 }
0x57fe   :  { %6284 = vmatprep.subr.bf16.mxu0 %v7196_v0 }
0x5801   :  { %6285 = vmatpush3.bf16.msra.mxu0 %v8454_v25 }
0x5802   :  { %6298 = vmatprep.subr.bf16.mxu0 %v7196_v0 }
0x58bc   :  { %v4602_v29 = vpop.f32.mrf.mxu0 }
0x58bd   :  { %v8500_v30 = vadd.f32 %v5813_v1, %v4602_v29 }
0x58be   :  { %v6272_v3 = vpop.f32.mrf.mxu0 }
0x58bf   :  { %v4673_v31 = vadd.f32 %v4663_v21, %v8500_v30 }
0x58c0   :  { %v4605_v32 = vpop.f32.mrf.mxu0 }
0x58c1   :  { %v8503_v33 = vadd.f32 %v5813_v1, %v4605_v32  ;;  %6887 = vtanh.f32 %v4673_v31  ;;  %v5820_v9 = vmul.f32 -1.442695, %v4673_v31 }
0x58c2   :  { %v6273_v35 = vpop.f32.mrf.mxu0 }
0x58c3   :  { %v4674_v46 = vadd.f32 %v4670_v8, %v8503_v33 }
0x58c5   :  { %6889 = vtanh.f32 %v4674_v46  ;;  %v5821_v4 = vmul.f32 -1.442695, %v4674_v46 }
0x58c6   :  { %6891 = vpow2.f32 %v5820_v9 }
0x58c7   :  { %6893 = vpow2.f32 %v5821_v4 }
0x58ce   :  { %v6888_v2 = vpop.eup %6887 }
0x58cf   :  { %4701 = vrot.lane.b32.xlu1 %v6888_v2, %s7186_s30 }
0x58d2   :  { %v6890_v57 = vpop.eup %6889 }
0x58d3   :  { %4691 = vrot.lane.b32.xlu1 %v4612_v45, %s7189_s15  ;;  %4703 = vrot.lane.b32.xlu0 %v6890_v57, %s7186_s30  ;;  %v6892_v62 = vpop.eup %6891 }
0x58d4   :  { %v4681_v56 = vadd.f32 1.0, %v6892_v62  ;;  %v6894_v61 = vpop.eup %6893 }
0x58d5   :  { %v4682_v28 = vadd.f32 1.0, %v6894_v61 }
0x58d6   :  { %6895 = vrcp.f32 %v4681_v56 }
0x58d7   :  { %4693 = vrot.lane.b32.xlu0 %v4690_v51, %s7189_s15  ;;  %6897 = vrcp.f32 %v4682_v28 }
0x58e3   :  { %v6896_v37 = vpop.eup %6895 }
0x58e4   :  { %v6898_v18 = vpop.eup %6897 }
0x5941   :  { %v4702_v58 = vpop.permute.xlu1 %4701 }
0x5942   :  { %v4707_v13 = vmul.f32 %v6896_v37, %v4702_v58 }
0x5944   :  { %4711 = vrot.lane.b32.xlu1 %v4707_v13, %s7189_s15 }
0x5945   :  { %v4704_v59 = vpop.permute.xlu0 %4703  ;;  %v4692_v19 = vpop.permute.xlu1 %4691 }
0x5946   :  { %v4708_v49 = vmul.f32 %v6898_v18, %v4704_v59  ;;  %v4697_v5 = vmul.f32 %v6896_v37, %v4692_v19 }
0x5948   :  { %4713 = vrot.lane.b32.xlu0 %v4708_v49, %s7189_s15 }
0x5949   :  { %v4694_v40 = vpop.permute.xlu0 %4693 }
0x594a   :  { %v4698_v26 = vmul.f32 %v6898_v18, %v4694_v40 }
0x59b6   :  { %v4712_v43 = vpop.permute.xlu1 %4711 }
0x59b7   :  { %v8512_v50 = vadd.f32 %v4712_v43, %v4697_v5 }
0x59b9   :  { %6899 = vtanh.f32 %v8512_v50  ;;  %v4817_v59 = vrot.slane %v8512_v50, 7 }
0x59ba   :  { %v4714_v54 = vpop.permute.xlu0 %4713 }
0x59bb   :  { %v4718_v42 = vadd.f32 %v4714_v54, %v4698_v26 }
0x59bd   :  { %6901 = vtanh.f32 %v4718_v42  ;;  %v4818_v13 = vrot.slane %v4718_v42, 7 }
0x59c6   :  { %v6900_v55 = vpop.eup %6899 }
0x59c7   :  { %4723 = vrot.lane.b32.xlu1 %v6900_v55, %s7186_s30 }
0x59ca   :  { %v6902_v63 = vpop.eup %6901 }
0x59cb   :  { %4725 = vrot.lane.b32.xlu0 %v6902_v63, %s7186_s30 }
0x5a39   :  { %v4724_v34 = vpop.permute.xlu1 %4723 }
0x5a3a   :  { %v8517_v60 = vmul.f32 %v6896_v37, %v4724_v34 }
0x5a3c   :  { %v4741_v27 = vpack.c.bf16 %v8517_v60, %v8517_v60 }
0x5a3d   :  { %v4726_v7 = vpop.permute.xlu0 %4725 }
0x5a3e   :  { %v8519_v12 = vmul.f32 %v6898_v18, %v4726_v7  ;;  %v4745_v20 = vunpack.c.l.b16 %v4741_v27 }
0x5a40   :  { %v4742_v15 = vpack.c.bf16 %v8519_v12, %v8519_v12 }
0x5a42   :  { %v4746_v16 = vunpack.c.l.b16 %v4742_v15 }
0x5a44   :  { %v4747_v41 = vrot.slane %v4746_v16, 7 }
0x5a46   :  { %v4748_v21 = vsel %vm314_vm2, %v4747_v41, %v4745_v20 }
0x5a47   :  { %v4749_v22 = vpack.c.b16 %v4748_v21, %v4748_v21 }
0x5a49   :  { %4750 = vrot.lane.b32.xlu0 %v4749_v22, %s7189_s15 }
0x5abb   :  { %v4751_v23 = vpop.permute.xlu0 %4750 }
0x5abc   :  { %6287 = vmatmul.mubr.msk.bf16.vlgmr.msra.gmra.mxu0 %vm99_vm1, %v4751_v23 }
0x5abd   :  { %6299 = vmatpush3.bf16.msra.mxu0 %v8451_v44  ;;  %6302 = vmatprep.mubr.msk.bf16.mxu0 %vm7197_vm0, %v7196_v0 }
0x5abe   :  { %6300 = vmatprep.subr.bf16.mxu0 %v7196_v0 }
0x5ac1   :  { %6301 = vmatpush3.bf16.msra.mxu0 %v8454_v25 }
0x5ac2   :  { %6314 = vmatprep.subr.bf16.mxu0 %v7196_v0 }
0x5b7c   :  { %v4789_v24 = vpop.f32.mrf.mxu0 }
0x5b7d   :  { %v4796_v1 = vrot.slane %v4789_v24, 7  ;;  %v4800_v29 = vadd.f32 %v4789_v24, %v8503_v33 }
0x5b7e   :  { %v6288_v3 = vpop.f32.mrf.mxu0 }
0x5b7f   :  { %v4799_v8 = vadd.f32 %v4796_v1, %v8500_v30  ;;  %6903 = vtanh.f32 %v4800_v29  ;;  %v5824_v2 = vmul.f32 -1.442695, %v4800_v29 }
0x5b80   :  { %v4792_v31 = vpop.f32.mrf.mxu0 }
0x5b81   :  { %6905 = vtanh.f32 %v4799_v8  ;;  %v5823_v45 = vmul.f32 -1.442695, %v4799_v8 }
0x5b82   :  { %v6289_v32 = vpop.f32.mrf.mxu0  ;;  %6907 = vpow2.f32 %v5824_v2 }
0x5b83   :  { %6909 = vpow2.f32 %v5823_v45 }
0x5b8c   :  { %v6904_v35 = vpop.eup %6903 }
0x5b8d   :  { %4827 = vrot.lane.b32.xlu0 %v6904_v35, %s7186_s30 }
0x5b8e   :  { %v6906_v46 = vpop.eup %6905 }
0x5b8f   :  { %4825 = vrot.lane.b32.xlu1 %v6906_v46, %s7186_s30  ;;  %v6908_v57 = vpop.eup %6907 }
0x5b90   :  { %v6910_v51 = vpop.eup %6909  ;;  %v4808_v9 = vadd.f32 1.0, %v6908_v57 }
0x5b91   :  { %v4807_v4 = vadd.f32 1.0, %v6910_v51 }
0x5b92   :  { %6911 = vrcp.f32 %v4808_v9 }
0x5b93   :  { %6913 = vrcp.f32 %v4807_v4 }
0x5b9f   :  { %v6912_v62 = vpop.eup %6911 }
0x5ba0   :  { %v6914_v28 = vpop.eup %6913  ;;  %v4822_v18 = vmul.f32 %v6912_v62, %v4818_v13 }
0x5ba1   :  { %v4821_v5 = vmul.f32 %v6914_v28, %v4817_v59 }
0x5bff   :  { %v4828_v56 = vpop.permute.xlu0 %4827 }
0x5c00   :  { %v4832_v61 = vmul.f32 %v6912_v62, %v4828_v56 }
0x5c01   :  { %v4826_v37 = vpop.permute.xlu1 %4825 }
0x5c02   :  { %4837 = vrot.lane.b32.xlu0 %v4832_v61, %s7189_s15  ;;  %v4831_v58 = vmul.f32 %v6914_v28, %v4826_v37 }
0x5c04   :  { %4835 = vrot.lane.b32.xlu1 %v4831_v58, %s7189_s15 }
0x5c74   :  { %v4838_v49 = vpop.permute.xlu0 %4837 }
0x5c75   :  { %v8541_v19 = vadd.f32 %v4838_v49, %v4822_v18 }
0x5c76   :  { %v4836_v40 = vpop.permute.xlu1 %4835 }
0x5c77   :  { %6915 = vtanh.f32 %v8541_v19  ;;  %v4841_v43 = vadd.f32 %v4836_v40, %v4821_v5  ;;  %v4943_v13 = vrot.slane %v8541_v19, 7 }
0x5c79   :  { %6917 = vtanh.f32 %v4841_v43  ;;  %v4942_v58 = vrot.slane %v4841_v43, 7 }
0x5c84   :  { %v6916_v26 = vpop.eup %6915 }
0x5c85   :  { %4849 = vrot.lane.b32.xlu0 %v6916_v26, %s7186_s30 }
0x5c86   :  { %v6918_v54 = vpop.eup %6917 }
0x5c87   :  { %4847 = vrot.lane.b32.xlu1 %v6918_v54, %s7186_s30 }
0x5cf7   :  { %v4850_v55 = vpop.permute.xlu0 %4849 }
0x5cf8   :  { %v8546_v42 = vmul.f32 %v6912_v62, %v4850_v55 }
0x5cf9   :  { %v4848_v63 = vpop.permute.xlu1 %4847 }
0x5cfa   :  { %v8548_v50 = vmul.f32 %v6914_v28, %v4848_v63  ;;  %v4866_v34 = vpack.c.bf16 %v8546_v42, %v8546_v42 }
0x5cfc   :  { %v4865_v7 = vpack.c.bf16 %v8548_v50, %v8548_v50  ;;  %v4870_v15 = vunpack.c.l.b16 %v4866_v34 }
0x5cfe   :  { %v4869_v27 = vunpack.c.l.b16 %v4865_v7 }
0x5d00   :  { %v4871_v16 = vrot.slane %v4869_v27, 1 }
0x5d02   :  { %v4872_v20 = vsel %vm314_vm2, %v4870_v15, %v4871_v16 }
0x5d03   :  { %v4873_v41 = vpack.c.b16 %v4872_v20, %v4872_v20 }
0x5d05   :  { %4874 = vrot.lane.b32.xlu1 %v4873_v41, %s7189_s15 }
0x5d77   :  { %v4875_v21 = vpop.permute.xlu1 %4874 }
0x5d78   :  { %6295 = vmatmul.mubr.msk.bf16.vlgmr.msra.gmra.mxu1 %vm99_vm1, %v4875_v21 }
0x5d79   :  { %6307 = vmatpush3.bf16.msra.mxu1 %v8451_v44  ;;  %6310 = vmatprep.mubr.msk.bf16.mxu1 %vm7197_vm0, %v7196_v0 }
0x5d7a   :  { %6308 = vmatprep.subr.bf16.mxu1 %v7196_v0 }
0x5d7d   :  { %6309 = vmatpush3.bf16.msra.mxu1 %v8454_v25 }
0x5d7e   :  { %6322 = vmatprep.subr.bf16.mxu1 %v7196_v0 }
0x5e38   :  { %v4913_v22 = vpop.f32.mrf.mxu1 }
0x5e39   :  { %v4920_v23 = vrot.slane %v4913_v22, 6  ;;  %v4921_v24 = vrot.slane %v4913_v22, 7 }
0x5e3a   :  { %v6296_v1 = vpop.f32.mrf.mxu1 }
0x5e3b   :  { %v4924_v29 = vadd.f32 %v4920_v23, %v8500_v30  ;;  %v4925_v3 = vadd.f32 %v4921_v24, %v8503_v33 }
0x5e3c   :  { %v4916_v8 = vpop.f32.mrf.mxu1 }
0x5e3d   :  { %6919 = vtanh.f32 %v4924_v29  ;;  %v5826_v46 = vmul.f32 -1.442695, %v4924_v29  ;;  %v5827_v2 = vmul.f32 -1.442695, %v4925_v3 }
0x5e3e   :  { %6921 = vtanh.f32 %v4925_v3  ;;  %v6297_v31 = vpop.f32.mrf.mxu1 }
0x5e3f   :  { %6923 = vpow2.f32 %v5826_v46 }
0x5e40   :  { %6925 = vpow2.f32 %v5827_v2 }
0x5e4a   :  { %v6920_v32 = vpop.eup %6919 }
0x5e4b   :  { %v6922_v35 = vpop.eup %6921  ;;  %4950 = vrot.lane.b32.xlu0 %v6920_v32, %s7186_s30 }
0x5e4c   :  { %4952 = vrot.lane.b32.xlu1 %v6922_v35, %s7186_s30  ;;  %v6924_v45 = vpop.eup %6923 }
0x5e4d   :  { %v6926_v57 = vpop.eup %6925  ;;  %v4932_v51 = vadd.f32 1.0, %v6924_v45 }
0x5e4e   :  { %v4933_v9 = vadd.f32 1.0, %v6926_v57 }
0x5e4f   :  { %6927 = vrcp.f32 %v4932_v51 }
0x5e50   :  { %6929 = vrcp.f32 %v4933_v9 }
0x5e5c   :  { %v6928_v4 = vpop.eup %6927 }
0x5e5d   :  { %v6930_v56 = vpop.eup %6929  ;;  %v4946_v18 = vmul.f32 %v6928_v4, %v4942_v58 }
0x5e5e   :  { %v4947_v59 = vmul.f32 %v6930_v56, %v4943_v13 }
0x5ebd   :  { %v4951_v62 = vpop.permute.xlu0 %4950 }
0x5ebe   :  { %v4953_v61 = vpop.permute.xlu1 %4952  ;;  %v4956_v28 = vmul.f32 %v6928_v4, %v4951_v62 }
0x5ebf   :  { %v4957_v37 = vmul.f32 %v6930_v56, %v4953_v61 }
0x5ec0   :  { %4960 = vrot.lane.b32.xlu0 %v4956_v28, %s7189_s15 }
0x5ec1   :  { %4962 = vrot.lane.b32.xlu1 %v4957_v37, %s7189_s15 }
0x5f32   :  { %v4961_v49 = vpop.permute.xlu0 %4960 }
0x5f33   :  { %v4963_v5 = vpop.permute.xlu1 %4962  ;;  %v8570_v40 = vadd.f32 %v4961_v49, %v4946_v18 }
0x5f34   :  { %v8572_v26 = vadd.f32 %v4963_v5, %v4947_v59 }
0x5f35   :  { %6931 = vtanh.f32 %v8570_v40  ;;  %v5068_v18 = vrot.slane %v8570_v40, 7 }
0x5f36   :  { %6933 = vtanh.f32 %v8572_v26  ;;  %v5069_v59 = vrot.slane %v8572_v26, 7 }
0x5f42   :  { %v6932_v54 = vpop.eup %6931 }
0x5f43   :  { %v6934_v55 = vpop.eup %6933  ;;  %4972 = vrot.lane.b32.xlu0 %v6932_v54, %s7186_s30 }
0x5f44   :  { %4974 = vrot.lane.b32.xlu1 %v6934_v55, %s7186_s30 }
0x5fb5   :  { %v4973_v43 = vpop.permute.xlu0 %4972 }
0x5fb6   :  { %v4975_v19 = vpop.permute.xlu1 %4974  ;;  %v8578_v63 = vmul.f32 %v6928_v4, %v4973_v43 }
0x5fb7   :  { %v8580_v34 = vmul.f32 %v6930_v56, %v4975_v19 }
0x5fb8   :  { %v4990_v7 = vpack.c.bf16 %v8578_v63, %v8578_v63 }
0x5fb9   :  { %v4991_v27 = vpack.c.bf16 %v8580_v34, %v8580_v34 }
0x5fba   :  { %v4994_v15 = vunpack.c.l.b16 %v4990_v7 }
0x5fbb   :  { %v4995_v16 = vunpack.c.l.b16 %v4991_v27 }
0x5fbc   :  { %v4996_v20 = vrot.slane %v4994_v15, 2 }
0x5fbd   :  { %v4997_v41 = vrot.slane %v4995_v16, 1 }
0x5fbf   :  { %v4998_v21 = vsel %vm314_vm2, %v4997_v41, %v4996_v20 }
0x5fc0   :  { %v4999_v22 = vpack.c.b16 %v4998_v21, %v4998_v21 }
0x5fc2   :  { %5000 = vrot.lane.b32.xlu0 %v4999_v22, %s7189_s15 }
0x6034   :  { %v5001_v23 = vpop.permute.xlu0 %5000 }
0x6035   :  { %6303 = vmatmul.mubr.msk.bf16.vlgmr.msra.gmra.mxu0 %vm99_vm1, %v5001_v23 }
0x6036   :  { %6315 = vmatpush3.bf16.msra.mxu0 %v8451_v44  ;;  %6318 = vmatprep.mubr.msk.bf16.mxu0 %vm7197_vm0, %v7196_v0 }
0x6037   :  { %6316 = vmatprep.subr.bf16.mxu0 %v7196_v0 }
0x603a   :  { %6317 = vmatpush3.bf16.msra.mxu0 %v8454_v25 }
0x603b   :  { %6330 = vmatprep.subr.bf16.mxu0 %v7196_v0 }
0x60f5   :  { %v5039_v24 = vpop.f32.mrf.mxu0 }
0x60f6   :  { %v5046_v1 = vrot.slane %v5039_v24, 5  ;;  %v5047_v29 = vrot.slane %v5039_v24, 6 }
0x60f7   :  { %v6304_v3 = vpop.f32.mrf.mxu0 }
0x60f8   :  { %v5050_v8 = vadd.f32 %v5046_v1, %v8500_v30  ;;  %v5051_v31 = vadd.f32 %v5047_v29, %v8503_v33 }
0x60f9   :  { %v5042_v32 = vpop.f32.mrf.mxu0 }
0x60fa   :  { %6935 = vtanh.f32 %v5050_v8  ;;  %v5829_v45 = vmul.f32 -1.442695, %v5050_v8  ;;  %v5830_v57 = vmul.f32 -1.442695, %v5051_v31 }
0x60fb   :  { %6937 = vtanh.f32 %v5051_v31  ;;  %v6305_v35 = vpop.f32.mrf.mxu0 }
0x60fc   :  { %6939 = vpow2.f32 %v5829_v45 }
0x60fd   :  { %6941 = vpow2.f32 %v5830_v57 }
0x6107   :  { %v6936_v46 = vpop.eup %6935 }
0x6108   :  { %v6938_v2 = vpop.eup %6937  ;;  %5076 = vrot.lane.b32.xlu1 %v6936_v46, %s7186_s30 }
0x6109   :  { %5078 = vrot.lane.b32.xlu0 %v6938_v2, %s7186_s30  ;;  %v6940_v51 = vpop.eup %6939 }
0x610a   :  { %v6942_v9 = vpop.eup %6941  ;;  %v5058_v4 = vadd.f32 1.0, %v6940_v51 }
0x610b   :  { %v5059_v62 = vadd.f32 1.0, %v6942_v9 }
0x610c   :  { %6943 = vrcp.f32 %v5058_v4 }
0x610d   :  { %6945 = vrcp.f32 %v5059_v62 }
0x6119   :  { %v6944_v56 = vpop.eup %6943 }
0x611a   :  { %v6946_v28 = vpop.eup %6945  ;;  %v5072_v49 = vmul.f32 %v6944_v56, %v5068_v18 }
0x611b   :  { %v5073_v5 = vmul.f32 %v6946_v28, %v5069_v59 }
0x617a   :  { %v5077_v61 = vpop.permute.xlu1 %5076 }
0x617b   :  { %v5079_v37 = vpop.permute.xlu0 %5078  ;;  %v5082_v58 = vmul.f32 %v6944_v56, %v5077_v61 }
0x617c   :  { %v5083_v13 = vmul.f32 %v6946_v28, %v5079_v37 }
0x617d   :  { %5086 = vrot.lane.b32.xlu1 %v5082_v58, %s7189_s15 }
0x617e   :  { %5088 = vrot.lane.b32.xlu0 %v5083_v13, %s7189_s15 }
0x61ef   :  { %v5087_v54 = vpop.permute.xlu1 %5086 }
0x61f0   :  { %v5089_v55 = vpop.permute.xlu0 %5088  ;;  %v5092_v43 = vadd.f32 %v5087_v54, %v5072_v49 }
0x61f1   :  { %v5093_v19 = vadd.f32 %v5089_v55, %v5073_v5 }
0x61f2   :  { %6947 = vtanh.f32 %v5092_v43  ;;  %v5194_v54 = vrot.slane %v5092_v43, 7 }
0x61f3   :  { %6949 = vtanh.f32 %v5093_v19  ;;  %v5195_v55 = vrot.slane %v5093_v19, 7 }
0x61ff   :  { %v6948_v7 = vpop.eup %6947 }
0x6200   :  { %v6950_v27 = vpop.eup %6949  ;;  %5098 = vrot.lane.b32.xlu1 %v6948_v7, %s7186_s30 }
0x6201   :  { %5100 = vrot.lane.b32.xlu0 %v6950_v27, %s7186_s30 }
0x6272   :  { %v5099_v15 = vpop.permute.xlu1 %5098 }
0x6273   :  { %v5101_v16 = vpop.permute.xlu0 %5100  ;;  %v8605_v20 = vmul.f32 %v6944_v56, %v5099_v15 }
0x6274   :  { %v8607_v40 = vmul.f32 %v6946_v28, %v5101_v16 }
0x6275   :  { %v5116_v26 = vpack.c.bf16 %v8605_v20, %v8605_v20 }
0x6276   :  { %v5117_v41 = vpack.c.bf16 %v8607_v40, %v8607_v40 }
0x6277   :  { %v5120_v21 = vunpack.c.l.b16 %v5116_v26 }
0x6278   :  { %v5121_v22 = vunpack.c.l.b16 %v5117_v41 }
0x6279   :  { %v5122_v23 = vrot.slane %v5120_v21, 3 }
0x627a   :  { %v5123_v24 = vrot.slane %v5121_v22, 2 }
0x627c   :  { %v5124_v1 = vsel %vm314_vm2, %v5123_v24, %v5122_v23 }
0x627d   :  { %v5125_v29 = vpack.c.b16 %v5124_v1, %v5124_v1 }
0x627f   :  { %5126 = vrot.lane.b32.xlu1 %v5125_v29, %s7189_s15 }
0x62f1   :  { %v5127_v3 = vpop.permute.xlu1 %5126 }
0x62f2   :  { %6311 = vmatmul.mubr.msk.bf16.vlgmr.msra.gmra.mxu1 %vm99_vm1, %v5127_v3 }
0x62f3   :  { %6323 = vmatpush3.bf16.msra.mxu1 %v8451_v44  ;;  %6326 = vmatprep.mubr.msk.bf16.mxu1 %vm7197_vm0, %v7196_v0 }
0x62f4   :  { %6324 = vmatprep.subr.bf16.mxu1 %v7196_v0 }
0x62f7   :  { %6325 = vmatpush3.bf16.msra.mxu1 %v8454_v25 }
0x63b2   :  { %v5165_v8 = vpop.f32.mrf.mxu1 }
0x63b3   :  { %v5172_v31 = vrot.slane %v5165_v8, 4  ;;  %v5173_v32 = vrot.slane %v5165_v8, 5 }
0x63b4   :  { %v6312_v35 = vpop.f32.mrf.mxu1 }
0x63b5   :  { %v5176_v46 = vadd.f32 %v5172_v31, %v8500_v30  ;;  %v5177_v2 = vadd.f32 %v5173_v32, %v8503_v33 }
0x63b6   :  { %v5168_v45 = vpop.f32.mrf.mxu1 }
0x63b7   :  { %6951 = vtanh.f32 %v5176_v46  ;;  %v5832_v4 = vmul.f32 -1.442695, %v5176_v46  ;;  %v5833_v62 = vmul.f32 -1.442695, %v5177_v2 }
0x63b8   :  { %6953 = vtanh.f32 %v5177_v2  ;;  %v6313_v57 = vpop.f32.mrf.mxu1 }
0x63b9   :  { %6955 = vpow2.f32 %v5832_v4 }
0x63ba   :  { %6957 = vpow2.f32 %v5833_v62 }
0x63c4   :  { %v6952_v51 = vpop.eup %6951 }
0x63c5   :  { %v6954_v9 = vpop.eup %6953  ;;  %5202 = vrot.lane.b32.xlu0 %v6952_v51, %s7186_s30 }
0x63c6   :  { %5204 = vrot.lane.b32.xlu1 %v6954_v9, %s7186_s30  ;;  %v6956_v56 = vpop.eup %6955 }
0x63c7   :  { %v6958_v61 = vpop.eup %6957  ;;  %v5184_v28 = vadd.f32 1.0, %v6956_v56 }
0x63c8   :  { %v5185_v37 = vadd.f32 1.0, %v6958_v61 }
0x63c9   :  { %6959 = vrcp.f32 %v5184_v28 }
0x63ca   :  { %6961 = vrcp.f32 %v5185_v37 }
0x63d6   :  { %v6960_v58 = vpop.eup %6959 }
0x63d7   :  { %v6962_v18 = vpop.eup %6961  ;;  %v5198_v7 = vmul.f32 %v6960_v58, %v5194_v54 }
0x63d8   :  { %v5199_v27 = vmul.f32 %v6962_v18, %v5195_v55 }
0x6437   :  { %v5203_v13 = vpop.permute.xlu0 %5202 }
0x6438   :  { %v5205_v59 = vpop.permute.xlu1 %5204  ;;  %v5208_v49 = vmul.f32 %v6960_v58, %v5203_v13 }
0x6439   :  { %v5209_v5 = vmul.f32 %v6962_v18, %v5205_v59 }
0x643a   :  { %5212 = vrot.lane.b32.xlu0 %v5208_v49, %s7189_s15 }
0x643b   :  { %5214 = vrot.lane.b32.xlu1 %v5209_v5, %s7189_s15 }
0x64ac   :  { %v5213_v15 = vpop.permute.xlu0 %5212 }
0x64ad   :  { %v5215_v16 = vpop.permute.xlu1 %5214  ;;  %v5218_v26 = vadd.f32 %v5213_v15, %v5198_v7 }
0x64ae   :  { %v5219_v41 = vadd.f32 %v5215_v16, %v5199_v27 }
0x64af   :  { %6963 = vtanh.f32 %v5218_v26  ;;  %v5320_v27 = vrot.slane %v5218_v26, 7 }
0x64b0   :  { %6965 = vtanh.f32 %v5219_v41  ;;  %v5321_v15 = vrot.slane %v5219_v41, 7 }
0x64bc   :  { %v6964_v21 = vpop.eup %6963 }
0x64bd   :  { %v6966_v22 = vpop.eup %6965  ;;  %5224 = vrot.lane.b32.xlu0 %v6964_v21, %s7186_s30 }
0x64be   :  { %5226 = vrot.lane.b32.xlu1 %v6966_v22, %s7186_s30 }
0x652f   :  { %v5225_v23 = vpop.permute.xlu0 %5224 }
0x6530   :  { %v5227_v24 = vpop.permute.xlu1 %5226  ;;  %v8629_v1 = vmul.f32 %v6960_v58, %v5225_v23 }
0x6531   :  { %v8631_v43 = vmul.f32 %v6962_v18, %v5227_v24 }
0x6532   :  { %v5242_v19 = vpack.c.bf16 %v8629_v1, %v8629_v1 }
0x6533   :  { %v5243_v29 = vpack.c.bf16 %v8631_v43, %v8631_v43 }
0x6534   :  { %v5246_v3 = vunpack.c.l.b16 %v5242_v19 }
0x6535   :  { %v5247_v8 = vunpack.c.l.b16 %v5243_v29 }
0x6536   :  { %v5248_v31 = vrot.slane %v5246_v3, 4 }
0x6537   :  { %v5249_v32 = vrot.slane %v5247_v8, 3 }
0x6539   :  { %v5250_v35 = vsel %vm314_vm2, %v5249_v32, %v5248_v31 }
0x653a   :  { %v5251_v46 = vpack.c.b16 %v5250_v35, %v5250_v35 }
0x653c   :  { %5252 = vrot.lane.b32.xlu0 %v5251_v46, %s7189_s15 }
0x65ae   :  { %v5253_v2 = vpop.permute.xlu0 %5252 }
0x65af   :  { %6319 = vmatmul.mubr.msk.bf16.vlgmr.msra.gmra.mxu0 %vm99_vm1, %v5253_v2 }
0x65b0   :  { %6331 = vmatpush3.bf16.msra.mxu0 %v8451_v44  ;;  %6334 = vmatprep.mubr.msk.bf16.mxu0 %vm7197_vm0, %v7196_v0 }
0x65b1   :  { %6332 = vmatprep.subr.bf16.mxu0 %v7196_v0 }
0x65b4   :  { %6333 = vmatpush3.bf16.msra.mxu0 %v8454_v25 }
0x666f   :  { %v5291_v45 = vpop.f32.mrf.mxu0 }
0x6670   :  { %v5298_v57 = vrot.slane %v5291_v45, 3  ;;  %v5299_v51 = vrot.slane %v5291_v45, 4 }
0x6671   :  { %v6320_v9 = vpop.f32.mrf.mxu0 }
0x6672   :  { %v5302_v4 = vadd.f32 %v5298_v57, %v8500_v30  ;;  %v5303_v62 = vadd.f32 %v5299_v51, %v8503_v33 }
0x6673   :  { %v5294_v56 = vpop.f32.mrf.mxu0 }
0x6674   :  { %6967 = vtanh.f32 %v5302_v4  ;;  %v5835_v0 = vmul.f32 -1.442695, %v5302_v4  ;;  %v5836_v25 = vmul.f32 -1.442695, %v5303_v62 }
0x6675   :  { %6969 = vtanh.f32 %v5303_v62  ;;  %v6321_v61 = vpop.f32.mrf.mxu0 }
0x6676   :  { %6971 = vpow2.f32 %v5835_v0 }
0x6677   :  { %6973 = vpow2.f32 %v5836_v25 }
0x6681   :  { %v6968_v44 = vpop.eup %6967 }
0x6682   :  { %v6970_v28 = vpop.eup %6969  ;;  %5328 = vrot.lane.b32.xlu1 %v6968_v44, %s7186_s30 }
0x6683   :  { %5330 = vrot.lane.b32.xlu0 %v6970_v28, %s7186_s30  ;;  %v6972_v37 = vpop.eup %6971 }
0x6684   :  { %v6974_v58 = vpop.eup %6973  ;;  %v5310_v13 = vadd.f32 1.0, %v6972_v37 }
0x6685   :  { %v5311_v18 = vadd.f32 1.0, %v6974_v58 }
0x6686   :  { %6975 = vrcp.f32 %v5310_v13 }
0x6687   :  { %6977 = vrcp.f32 %v5311_v18 }
0x6693   :  { %v6976_v59 = vpop.eup %6975 }
0x6694   :  { %v6978_v5 = vpop.eup %6977  ;;  %v5324_v16 = vmul.f32 %v6976_v59, %v5320_v27 }
0x6695   :  { %v5325_v21 = vmul.f32 %v6978_v5, %v5321_v15 }
0x66f4   :  { %v5329_v49 = vpop.permute.xlu1 %5328 }
0x66f5   :  { %v5331_v54 = vpop.permute.xlu0 %5330  ;;  %v5334_v55 = vmul.f32 %v6976_v59, %v5329_v49 }
0x66f6   :  { %v5335_v7 = vmul.f32 %v6978_v5, %v5331_v54 }
0x66f7   :  { %5338 = vrot.lane.b32.xlu1 %v5334_v55, %s7189_s15 }
0x66f8   :  { %5340 = vrot.lane.b32.xlu0 %v5335_v7, %s7189_s15 }
0x6769   :  { %v5339_v22 = vpop.permute.xlu1 %5338 }
0x676a   :  { %v5341_v23 = vpop.permute.xlu0 %5340  ;;  %v5344_v24 = vadd.f32 %v5339_v22, %v5324_v16 }
0x676b   :  { %v5345_v19 = vadd.f32 %v5341_v23, %v5325_v21 }
0x676c   :  { %6979 = vtanh.f32 %v5344_v24  ;;  %v5446_v23 = vrot.slane %v5344_v24, 7 }
0x676d   :  { %6981 = vtanh.f32 %v5345_v19 }
0x6779   :  { %v6980_v29 = vpop.eup %6979 }
0x677a   :  { %v6982_v3 = vpop.eup %6981  ;;  %5350 = vrot.lane.b32.xlu1 %v6980_v29, %s7186_s30  ;;  %v5447_v29 = vrot.slane %v5345_v19, 7 }
0x677b   :  { %5352 = vrot.lane.b32.xlu0 %v6982_v3, %s7186_s30 }
0x67ec   :  { %v5351_v8 = vpop.permute.xlu1 %5350 }
0x67ed   :  { %v5353_v31 = vpop.permute.xlu0 %5352  ;;  %v8653_v32 = vmul.f32 %v6976_v59, %v5351_v8 }
0x67ee   :  { %v8655_v26 = vmul.f32 %v6978_v5, %v5353_v31 }
0x67ef   :  { %v5368_v41 = vpack.c.bf16 %v8653_v32, %v8653_v32 }
0x67f0   :  { %v5369_v35 = vpack.c.bf16 %v8655_v26, %v8655_v26 }
0x67f1   :  { %v5372_v46 = vunpack.c.l.b16 %v5368_v41 }
0x67f2   :  { %v5373_v2 = vunpack.c.l.b16 %v5369_v35 }
0x67f3   :  { %v5374_v45 = vrot.slane %v5372_v46, 5 }
0x67f4   :  { %v5375_v57 = vrot.slane %v5373_v2, 4 }
0x67f6   :  { %v5376_v51 = vsel %vm314_vm2, %v5375_v57, %v5374_v45 }
0x67f7   :  { %v5377_v9 = vpack.c.b16 %v5376_v51, %v5376_v51 }
0x67f9   :  { %5378 = vrot.lane.b32.xlu1 %v5377_v9, %s7189_s15 }
0x686b   :  { %v5379_v4 = vpop.permute.xlu1 %5378 }
0x686c   :  { %6327 = vmatmul.mubr.msk.bf16.vlgmr.msra.gmra.mxu1 %vm99_vm1, %v5379_v4 }
0x692c   :  { %v5417_v62 = vpop.f32.mrf.mxu1 }
0x692d   :  { %v5424_v56 = vrot.slane %v5417_v62, 2  ;;  %v5425_v61 = vrot.slane %v5417_v62, 3 }
0x692e   :  { %v6328_v44 = vpop.f32.mrf.mxu1 }
0x692f   :  { %v5428_v28 = vadd.f32 %v5424_v56, %v8500_v30  ;;  %v5429_v0 = vadd.f32 %v5425_v61, %v8503_v33 }
0x6930   :  { %v5420_v25 = vpop.f32.mrf.mxu1 }
0x6931   :  { %6983 = vtanh.f32 %v5428_v28  ;;  %v5838_v18 = vmul.f32 -1.442695, %v5428_v28  ;;  %v5839_v59 = vmul.f32 -1.442695, %v5429_v0 }
0x6932   :  { %6985 = vtanh.f32 %v5429_v0  ;;  %v6329_v37 = vpop.f32.mrf.mxu1 }
0x6933   :  { %6987 = vpow2.f32 %v5838_v18 }
0x6934   :  { %6989 = vpow2.f32 %v5839_v59 }
0x693e   :  { %v6984_v58 = vpop.eup %6983 }
0x693f   :  { %v6986_v13 = vpop.eup %6985  ;;  %5454 = vrot.lane.b32.xlu0 %v6984_v58, %s7186_s30 }
0x6940   :  { %5456 = vrot.lane.b32.xlu1 %v6986_v13, %s7186_s30  ;;  %v6988_v49 = vpop.eup %6987 }
0x6941   :  { %v6990_v5 = vpop.eup %6989  ;;  %v5436_v54 = vadd.f32 1.0, %v6988_v49 }
0x6942   :  { %v5437_v55 = vadd.f32 1.0, %v6990_v5 }
0x6943   :  { %6991 = vrcp.f32 %v5436_v54 }
0x6944   :  { %6993 = vrcp.f32 %v5437_v55 }
0x6950   :  { %v6992_v7 = vpop.eup %6991 }
0x6951   :  { %v6994_v15 = vpop.eup %6993  ;;  %v5450_v3 = vmul.f32 %v6992_v7, %v5446_v23 }
0x6952   :  { %v5451_v8 = vmul.f32 %v6994_v15, %v5447_v29 }
0x69b1   :  { %v5455_v27 = vpop.permute.xlu0 %5454 }
0x69b2   :  { %v5457_v16 = vpop.permute.xlu1 %5456  ;;  %v5460_v21 = vmul.f32 %v6992_v7, %v5455_v27 }
0x69b3   :  { %v5461_v22 = vmul.f32 %v6994_v15, %v5457_v16 }
0x69b4   :  { %5464 = vrot.lane.b32.xlu0 %v5460_v21, %s7189_s15 }
0x69b5   :  { %5466 = vrot.lane.b32.xlu1 %v5461_v22, %s7189_s15 }
0x6a26   :  { %v5465_v31 = vpop.permute.xlu0 %5464 }
0x6a27   :  { %v5467_v41 = vpop.permute.xlu1 %5466  ;;  %v5470_v35 = vadd.f32 %v5465_v31, %v5450_v3 }
0x6a28   :  { %v5471_v46 = vadd.f32 %v5467_v41, %v5451_v8 }
0x6a29   :  { %6995 = vtanh.f32 %v5470_v35  ;;  %v5572_v41 = vrot.slane %v5470_v35, 7  ;;  %v4513_v35 = vrot.slane %v8466_v53, 7 }
0x6a2a   :  { %6997 = vtanh.f32 %v5471_v46 }
0x6a36   :  { %v6996_v2 = vpop.eup %6995 }
0x6a37   :  { %v6998_v45 = vpop.eup %6997  ;;  %5476 = vrot.lane.b32.xlu0 %v6996_v2, %s7186_s30  ;;  %v5573_v2 = vrot.slane %v5471_v46, 7  ;;  %v3406_v46 = vrot.slane %v8170_v14, 7 }
0x6a38   :  { %5478 = vrot.lane.b32.xlu1 %v6998_v45, %s7186_s30 }
0x6aa9   :  { %v5477_v57 = vpop.permute.xlu0 %5476 }
0x6aaa   :  { %v5479_v51 = vpop.permute.xlu1 %5478  ;;  %v8672_v9 = vmul.f32 %v6992_v7, %v5477_v57 }
0x6aab   :  { %v8674_v24 = vmul.f32 %v6994_v15, %v5479_v51 }
0x6aac   :  { %v5494_v19 = vpack.c.bf16 %v8672_v9, %v8672_v9 }
0x6aad   :  { %v5495_v4 = vpack.c.bf16 %v8674_v24, %v8674_v24 }
0x6aae   :  { %v5498_v62 = vunpack.c.l.b16 %v5494_v19 }
0x6aaf   :  { %v5499_v56 = vunpack.c.l.b16 %v5495_v4 }
0x6ab0   :  { %v5500_v61 = vrot.slane %v5498_v62, 6 }
0x6ab1   :  { %v5501_v44 = vrot.slane %v5499_v56, 5 }
0x6ab3   :  { %v5502_v28 = vsel %vm314_vm2, %v5501_v44, %v5500_v61  ;;  %v2299_v44 = vrot.slane %v7874_v11, 7  ;;  %v3415_v11 = vrot.slane %v8121_v39, 7 }
0x6ab4   :  { %v5503_v0 = vpack.c.b16 %v5502_v28, %v5502_v28  ;;  %v1194_v28 = vrot.slane %v7578_v6, 7  ;;  %v2308_v6 = vrot.slane %v7825_v48, 7 }
0x6ab6   :  { %5504 = vrot.lane.b32.xlu0 %v5503_v0, %s7189_s15  ;;  %v1202_v0 = vrot.slane %v7529_v38, 7  ;;  %v4522_v38 = vrot.slane %v8417_v10, 7 }
0x6b28   :  { %v5505_v25 = vpop.permute.xlu0 %5504 }
0x6b29   :  { %6335 = vmatmul.mubr.msk.bf16.vlgmr.msra.gmra.mxu0 %vm99_vm1, %v5505_v25 }
0x6be9   :  { %v5543_v37 = vpop.f32.mrf.mxu0 }
0x6bea   :  { %v5550_v58 = vrot.slane %v5543_v37, 1  ;;  %v5551_v13 = vrot.slane %v5543_v37, 2 }
0x6beb   :  { %v6336_v18 = vpop.f32.mrf.mxu0 }
0x6bec   :  { %v5554_v59 = vadd.f32 %v5550_v58, %v8500_v30  ;;  %v5555_v49 = vadd.f32 %v5551_v13, %v8503_v33 }
0x6bed   :  { %v5546_v5 = vpop.f32.mrf.mxu0 }
0x6bee   :  { %6999 = vtanh.f32 %v5554_v59  ;;  %v5841_v27 = vmul.f32 -1.442695, %v5554_v59  ;;  %v5842_v15 = vmul.f32 -1.442695, %v5555_v49 }
0x6bef   :  { %7001 = vtanh.f32 %v5555_v49  ;;  %v6337_v54 = vpop.f32.mrf.mxu0 }
0x6bf0   :  { %7003 = vpow2.f32 %v5841_v27 }
0x6bf1   :  { %7005 = vpow2.f32 %v5842_v15 }
0x6bfb   :  { %v7000_v55 = vpop.eup %6999 }
0x6bfc   :  { %v7002_v7 = vpop.eup %7001  ;;  %5580 = vrot.lane.b32.xlu0 %v7000_v55, %s7186_s30 }
0x6bfd   :  { %5582 = vrot.lane.b32.xlu1 %v7002_v7, %s7186_s30  ;;  %v7004_v16 = vpop.eup %7003 }
0x6bfe   :  { %v7006_v21 = vpop.eup %7005  ;;  %v5562_v22 = vadd.f32 1.0, %v7004_v16 }
0x6bff   :  { %v5563_v30 = vadd.f32 1.0, %v7006_v21 }
0x6c00   :  { %7007 = vrcp.f32 %v5562_v22 }
0x6c01   :  { %7009 = vrcp.f32 %v5563_v30 }
0x6c0d   :  { %v7008_v33 = vpop.eup %7007 }
0x6c0e   :  { %v7010_v29 = vpop.eup %7009  ;;  %v5576_v45 = vmul.f32 %v7008_v33, %v5572_v41 }
0x6c0f   :  { %v5577_v57 = vmul.f32 %v7010_v29, %v5573_v2 }
0x6c6e   :  { %v5581_v23 = vpop.permute.xlu0 %5580 }
0x6c6f   :  { %v5583_v3 = vpop.permute.xlu1 %5582  ;;  %v5586_v8 = vmul.f32 %v7008_v33, %v5581_v23 }
0x6c70   :  { %v5587_v31 = vmul.f32 %v7010_v29, %v5583_v3 }
0x6c71   :  { %5590 = vrot.lane.b32.xlu0 %v5586_v8, %s7189_s15 }
0x6c72   :  { %5592 = vrot.lane.b32.xlu1 %v5587_v31, %s7189_s15 }
0x6ce3   :  { %v5591_v51 = vpop.permute.xlu0 %5590 }
0x6ce4   :  { %v5593_v19 = vpop.permute.xlu1 %5592  ;;  %v5596_v4 = vadd.f32 %v5591_v51, %v5576_v45 }
0x6ce5   :  { %v5597_v62 = vadd.f32 %v5593_v19, %v5577_v57 }
0x6ce6   :  { %7011 = vtanh.f32 %v5596_v4 }
0x6ce7   :  { %7013 = vtanh.f32 %v5597_v62  ;;  %v5629_v53 = vrot.slane %v5597_v62, 7 }
0x6cf3   :  { %v7012_v56 = vpop.eup %7011 }
0x6cf4   :  { %v7014_v61 = vpop.eup %7013  ;;  %5602 = vrot.lane.b32.xlu0 %v7012_v56, %s7186_s30 }
0x6cf5   :  { %5604 = vrot.lane.b32.xlu1 %v7014_v61, %s7186_s30  ;;  %s7199_s30 = smov [#allocation12]  }
0x6cf6   :  { %s5656_s23 = sshll.u32 %s7199_s30, 4  ;;  %s5657_s23 = int_to_ptr.vmem [resolvable:$true] %s5656_s23 }
0x6cf7   :  { %s7115_s27 = scalar_lea.vmem %s5657_s23, 160  ;;  %p7120_p12 = scmp.lt.s32.totalorder %s5657_s23, %s5657_s23 }
0x6cf8   :  { %2300 = vrot.lane.b32.xlu0 %v2299_v44, %s7189_s15  ;;  %p7116_p11 = scmp.ne.s32.totalorder %s5657_s23, %s7115_s27  ;;  %p7121_p13 = scmp.lt.s32.totalorder %s7115_s27, %s7115_s27 }
0x6cf9   :  { %1195 = vrot.lane.b32.xlu1 %v1194_v28, %s7189_s15 }
0x6cfa   :  { %p7122_p0 = por %p7121_p13, %p7120_p12 }
0x6cfc   :  { %4514 = vrot.lane.b32.xlu0 %v4513_v35, %s7189_s15  ;;  %p7123_p1 = pnand %p7122_p0, %p7116_p11 }
0x6cfd   :  { %3407 = vrot.lane.b32.xlu1 %v3406_v46, %s7189_s15 }
0x6d00   :  { %1205 = vrot.lane.b32.xlu0 %v1202_v0, %s7198_s3 }
0x6d01   :  { %1203 = vrot.lane.b32.xlu1 %v7527_v36, %s7198_s3 }
0x6d04   :  { %2311 = vrot.lane.b32.xlu0 %v2308_v6, %s7198_s3 }
0x6d05   :  { %2309 = vrot.lane.b32.xlu1 %v7823_v47, %s7198_s3 }
0x6d08   :  { %3418 = vrot.lane.b32.xlu0 %v3415_v11, %s7198_s3 }
0x6d09   :  { %3416 = vrot.lane.b32.xlu1 %v8119_v17, %s7198_s3 }
0x6d0c   :  { %4525 = vrot.lane.b32.xlu0 %v4522_v38, %s7198_s3 }
0x6d0d   :  { %4523 = vrot.lane.b32.xlu1 %v8415_v52, %s7198_s3 }
0x6d10   :  { %4735 = vrot.lane.b32.xlu0 %v8519_v12, %s7189_s15 }
0x6d11   :  { %4733 = vrot.lane.b32.xlu1 %v8517_v60, %s7189_s15 }
0x6d14   :  { %4859 = vrot.lane.b32.xlu0 %v8546_v42, %s7189_s15 }
0x6d15   :  { %4857 = vrot.lane.b32.xlu1 %v8548_v50, %s7189_s15 }
0x6d18   :  { %4984 = vrot.lane.b32.xlu0 %v8580_v34, %s7189_s15 }
0x6d19   :  { %4982 = vrot.lane.b32.xlu1 %v8578_v63, %s7189_s15 }
0x6d1c   :  { %5110 = vrot.lane.b32.xlu0 %v8607_v40, %s7189_s15 }
0x6d1d   :  { %5108 = vrot.lane.b32.xlu1 %v8605_v20, %s7189_s15 }
0x6d20   :  { %5236 = vrot.lane.b32.xlu0 %v8631_v43, %s7189_s15 }
0x6d21   :  { %5234 = vrot.lane.b32.xlu1 %v8629_v1, %s7189_s15 }
0x6d24   :  { %5362 = vrot.lane.b32.xlu0 %v8655_v26, %s7189_s15 }
0x6d25   :  { %5360 = vrot.lane.b32.xlu1 %v8653_v32, %s7189_s15 }
0x6d28   :  { %5488 = vrot.lane.b32.xlu0 %v8674_v24, %s7189_s15 }
0x6d29   :  { %5486 = vrot.lane.b32.xlu1 %v8672_v9, %s7189_s15 }
0x6d66   :  { %v5603_v36 = vpop.permute.xlu0 %5602 }
0x6d67   :  { %v5605_v47 = vpop.permute.xlu1 %5604  ;;  %v5608_v48 = vmul.f32 %v7008_v33, %v5603_v36 }
0x6d68   :  { %v5609_v17 = vmul.f32 %v7010_v29, %v5605_v47 }
0x6d69   :  { %5612 = vrot.lane.b32.xlu1 %v5608_v48, %s7189_s15 }
0x6d6a   :  { %v5620_v39 = vrot.slane %v5609_v17, 7  ;;  %v2301_v14 = vpop.permute.xlu0 %2300 }
0x6d6b   :  { %v1196_v52 = vpop.permute.xlu1 %1195  ;;  %2305 = vst.msk [vmem:[#allocation12 + $0x3] sm:$0x1] %vm304_vm3, %v2301_v14 }
0x6d6c   :  { %1199 = vst.msk [vmem:[#allocation12 + $0x1] sm:$0x1] %vm304_vm3, %v1196_v52  ;;  %5621 = vrot.lane.b32.xlu0 %v5620_v39, %s7189_s15 }
0x6d6d   :  { %5614 = vrot.lane.b32.xlu1 %v5609_v17, %s7189_s15 }
0x6d6e   :  { %v4515_v10 = vpop.permute.xlu0 %4514 }
0x6d6f   :  { %v3408_v60 = vpop.permute.xlu1 %3407  ;;  %4519 = vst.msk [vmem:[#allocation12 + $0x7] sm:$0x1] %vm304_vm3, %v4515_v10 }
0x6d70   :  { %3412 = vst.msk [vmem:[#allocation12 + $0x5] sm:$0x1] %vm304_vm3, %v3408_v60  ;;  %5630 = vrot.lane.b32.xlu0 %v5596_v4, %s7198_s3 }
0x6d71   :  { %5632 = vrot.lane.b32.xlu1 %v5629_v53, %s7198_s3 }
0x6d72   :  { %v1206_v12 = vpop.permute.xlu0 %1205 }
0x6d73   :  { %v1204_v42 = vpop.permute.xlu1 %1203  ;;  %1210 = vst.msk [vmem:[#allocation14 + $0x1] sm:$0x1] %vm304_vm3, %v1206_v12 }
0x6d74   :  { %1209 = vst.msk [vmem:[#allocation14 - $0x7] sm:$0x80] %vm1191_vm10, %v1204_v42 }
0x6d76   :  { %v2312_v50 = vpop.permute.xlu0 %2311 }
0x6d77   :  { %v2310_v63 = vpop.permute.xlu1 %2309  ;;  %2317 = vst.msk [vmem:[#allocation14 + $0x3] sm:$0x1] %vm304_vm3, %v2312_v50 }
0x6d78   :  { %2316 = vst.msk [vmem:[#allocation14 - $0x5] sm:$0x80] %vm1191_vm10, %v2310_v63 }
0x6d7a   :  { %v3419_v34 = vpop.permute.xlu0 %3418 }
0x6d7b   :  { %v3417_v20 = vpop.permute.xlu1 %3416  ;;  %3424 = vst.msk [vmem:[#allocation14 + $0x5] sm:$0x1] %vm304_vm3, %v3419_v34 }
0x6d7c   :  { %3423 = vst.msk [vmem:[#allocation14 - $0x3] sm:$0x80] %vm1191_vm10, %v3417_v20 }
0x6d7e   :  { %v4526_v40 = vpop.permute.xlu0 %4525 }
0x6d7f   :  { %v4524_v1 = vpop.permute.xlu1 %4523  ;;  %4531 = vst.msk [vmem:[#allocation14 + $0x7] sm:$0x1] %vm304_vm3, %v4526_v40 }
0x6d80   :  { %4530 = vst.msk [vmem:[#allocation14 - $0x1] sm:$0x80] %vm1191_vm10, %v4524_v1 }
0x6d82   :  { %v4736_v43 = vpop.permute.xlu0 %4735 }
0x6d83   :  { %v4734_v32 = vpop.permute.xlu1 %4733  ;;  %4740 = vst.msk [vmem:[#allocation11 + $0x8] sm:$0x1] %vm304_vm3, %v4736_v43 }
0x6d84   :  { %4739 = vst.msk [vmem:[#allocation11] sm:$0x1] %vm304_vm3, %v4734_v32 }
0x6d86   :  { %v4860_v26 = vpop.permute.xlu0 %4859 }
0x6d87   :  { %v4858_v9 = vpop.permute.xlu1 %4857  ;;  %4864 = vst.msk [vmem:[#allocation11 + $0x8] sm:$0x2] %vm430_vm4, %v4860_v26 }
0x6d88   :  { %4863 = vst.msk [vmem:[#allocation11] sm:$0x2] %vm430_vm4, %v4858_v9 }
0x6d8a   :  { %v4985_v24 = vpop.permute.xlu0 %4984 }
0x6d8b   :  { %v4983_v25 = vpop.permute.xlu1 %4982  ;;  %4989 = vst.msk [vmem:[#allocation11 + $0x8] sm:$0x4] %vm556_vm5, %v4985_v24 }
0x6d8c   :  { %4988 = vst.msk [vmem:[#allocation11] sm:$0x4] %vm556_vm5, %v4983_v25 }
0x6d8e   :  { %v5111_v37 = vpop.permute.xlu0 %5110 }
0x6d8f   :  { %v5109_v58 = vpop.permute.xlu1 %5108  ;;  %5115 = vst.msk [vmem:[#allocation11 + $0x8] sm:$0x8] %vm683_vm6, %v5111_v37 }
0x6d90   :  { %5114 = vst.msk [vmem:[#allocation11] sm:$0x8] %vm683_vm6, %v5109_v58 }
0x6d92   :  { %v5237_v13 = vpop.permute.xlu0 %5236 }
0x6d93   :  { %v5235_v18 = vpop.permute.xlu1 %5234  ;;  %5241 = vst.msk [vmem:[#allocation11 + $0x8] sm:$0x10] %vm810_vm7, %v5237_v13 }
0x6d94   :  { %5240 = vst.msk [vmem:[#allocation11] sm:$0x10] %vm810_vm7, %v5235_v18 }
0x6d96   :  { %v5363_v59 = vpop.permute.xlu0 %5362 }
0x6d97   :  { %v5361_v49 = vpop.permute.xlu1 %5360  ;;  %5367 = vst.msk [vmem:[#allocation11 + $0x8] sm:$0x20] %vm937_vm8, %v5363_v59 }
0x6d98   :  { %5366 = vst.msk [vmem:[#allocation11] sm:$0x20] %vm937_vm8, %v5361_v49 }
0x6d9a   :  { %v5489_v5 = vpop.permute.xlu0 %5488 }
0x6d9b   :  { %v5487_v54 = vpop.permute.xlu1 %5486  ;;  %5493 = vst.msk [vmem:[#allocation11 + $0x8] sm:$0x40] %vm1064_vm9, %v5489_v5 }
0x6d9c   :  { %5492 = vst.msk [vmem:[#allocation11] sm:$0x40] %vm1064_vm9, %v5487_v54 }
0x6ddb   :  { %v5613_v55 = vpop.permute.xlu1 %5612 }
0x6ddc   :  { %5618 = vst.msk [vmem:[#allocation11] sm:$0x80] %vm1191_vm10, %v5613_v55  ;;  %5625 = vst.msk [vmem:[#allocation12 + $0x1] sm:$0x80] %vm1191_vm10, %v5613_v55 }
0x6dde   :  { %v5622_v7 = vpop.permute.xlu0 %5621 }
0x6ddf   :  { %5626 = vst.msk [vmem:[#allocation12 + $0x9] sm:$0x1] %vm304_vm3, %v5622_v7  ;;  %v5615_v27 = vpop.permute.xlu1 %5614 }
0x6de0   :  { %5619 = vst.msk [vmem:[#allocation11 + $0x8] sm:$0x80] %vm1191_vm10, %v5615_v27 }
0x6de1   :  { %7126 = shalt.err (!%p7123_p1)
}
0x6de2   :  { %5662 = dma.vmem_to_hbm [thread:$0]  %s5657_s23, 160, %s8805_s7, [#allocation13], %s7189_s15, %s7189_s15, %s7190_s16  }
0x6de3   :  { %s7135_s10 = scalar_lea.vmem %s5645_s4, 256  ;;  %p7140_p3 = scmp.lt.s32.totalorder %s5645_s4, %s5645_s4 }
0x6de4   :  { %p7136_p2 = scmp.ne.s32.totalorder %s5645_s4, %s7135_s10  ;;  %p7141_p4 = scmp.lt.s32.totalorder %s7135_s10, %s7135_s10 }
0x6de6   :  { %p7142_p5 = por %p7141_p4, %p7140_p3 }
0x6de8   :  { %p7143_p6 = pnand %p7142_p5, %p7136_p2 }
0x6dea   :  { %7146 = shalt.err (!%p7143_p6)
}
0x6deb   :  { %5650 = dma.vmem_to_hbm [thread:$0]  %s5645_s4, 256, %s8804_s6, [#allocation4], %s7192_s21, %s7192_s21, %s7193_s22   ;;  %v5631_v15 = vpop.permute.xlu0 %5630  ;;  %v5633_v16 = vpop.permute.xlu1 %5632 }
0x6dec   :  { %5637 = vst.msk [vmem:[#allocation14 + $0x1] sm:$0x80] %vm1191_vm10, %v5631_v15  ;;  %s7155_s7 = scalar_lea.vmem %s5669_s26, 160  ;;  %p7160_p8 = scmp.lt.s32.totalorder %s5669_s26, %s5669_s26 }
0x6ded   :  { %5638 = vst.msk [vmem:[#allocation14 + $0x9] sm:$0x1] %vm304_vm3, %v5633_v16  ;;  %p7156_p7 = scmp.ne.s32.totalorder %s5669_s26, %s7155_s7  ;;  %p7161_p9 = scmp.lt.s32.totalorder %s7155_s7, %s7155_s7 }
0x6def   :  { %p7162_p10 = por %p7161_p9, %p7160_p8 }
0x6df1   :  { %p7163_p11 = pnand %p7162_p10, %p7156_p7 }
0x6df3   :  { %7166 = shalt.err (!%p7163_p11)
}
0x6df4   :  { %5674 = dma.vmem_to_hbm [thread:$0]  %s5669_s26, 160, %s8806_s8, [#allocation13], %s7189_s15, %s7189_s15, %s7190_s16  }
0x6df5   :  { %7181 = dma.done.wait [#allocation4], 256  }
0x6df6   :  { %7182 = vsyncadd [#allocation4], 4294967040 }
0x6df7   :  { %7183 = dma.done.wait [#allocation13], 320  }
0x6df8   :  { %7184 = vsyncadd [#allocation13], 4294966976 }
0x6df9   :  { %5684 = vsyncpa [#allocation3], 1 }
0x6dfa   :  { %5685 = vsyncpa [#allocation6], 1 }
0x6dfb   :  { %5686 = vsyncpa [#allocation9], 1 }
0x6dfc   :  { %5687 = vsyncpa [#allocation4], 1 }
0x6dfd   :  { %5688 = vsyncpa [#allocation13], 1 }

</bundles_post_ra>
